<compile_context>
chip_gen: v5e
topology: v5e:2x2
jax: 0.10.0
libtpu: 0.0.40
codegen_flags: <defaults>
</compile_context>

<pallas_src>
import jax
import jax.numpy as jnp
from jax import lax
from jax.experimental import pallas as pl
from jax.experimental.pallas import tpu as pltpu

COUT = 2048
NCLS = 80


# ----------------------------------------------------------------- fused kernel
def _fused_kernel(a_ref, w_ref, cb_ref, fcw_ref, o_ref, acc_ref):
    """Grid = (N-half j : parallel, K-chunk k : arbitrary).

    acc (f32, VMEM-resident) accumulates pooled_patches @ wmat over k.
    At the last k step: add conv bias, matmul by the resident fc1 weight
    slice and write the (Mp, 80) partial logits for this N-half.
    (fc1 bias is added once in the wrapper when summing the two halves.)
    """
    k = pl.program_id(1)

    @pl.when(k == 0)
    def _():
        acc_ref[...] = jnp.zeros_like(acc_ref)

    acc_ref[...] += jnp.dot(a_ref[...], w_ref[...],
                            preferred_element_type=jnp.float32)

    @pl.when(k == pl.num_programs(1) - 1)
    def _():
        pooled = acc_ref[...] + cb_ref[...]                      # (Mp, tn) f32
        o_ref[0] = jnp.dot(pooled, fcw_ref[...],
                           preferred_element_type=jnp.float32)   # (Mp, 80)


def fused_conv_gap_fc(a, wmat, conv_b, fc_w, *, tn=1024, tk=2304):
    """a: (Mp, K) bf16 pooled patches; wmat: (K, N) bf16; conv_b: (N,) f32;
    fc_w: (N, NCLS) f32.  Returns per-N-half partial logits (N//tn, Mp, NCLS)."""
    Mp, K = a.shape
    K2, N = wmat.shape
    Nout = fc_w.shape[1]
    assert K == K2 and N % tn == 0 and K % tk == 0
    nj, nk = N // tn, K // tk

    return pl.pallas_call(
        _fused_kernel,
        out_shape=jax.ShapeDtypeStruct((nj, Mp, Nout), jnp.float32),
        grid_spec=pltpu.PrefetchScalarGridSpec(
            num_scalar_prefetch=0,
            grid=(nj, nk),
            in_specs=[
                pl.BlockSpec((Mp, tk), lambda j, k: (0, k)),       # pooled patches
                pl.BlockSpec((tk, tn), lambda j, k: (k, j)),       # conv weight
                pl.BlockSpec((1, tn), lambda j, k: (0, j)),        # conv bias
                pl.BlockSpec((tn, Nout), lambda j, k: (j, 0)),     # fc1 weight
            ],
            out_specs=pl.BlockSpec((1, Mp, Nout), lambda j, k: (j, 0, 0)),
            scratch_shapes=[pltpu.VMEM((Mp, tn), jnp.float32)],
        ),
        compiler_params=pltpu.CompilerParams(
            dimension_semantics=("parallel", "arbitrary"),
            vmem_limit_bytes=32 * 1024 * 1024),
    )(a, wmat, conv_b.reshape(1, N), fc_w)


# ----------------------------------------------------------------- JAX glue
def _pooled_patches(x_nchw):
    """GAP of the im2col patches: (B, 9*Cin), 9-axis ordered (kh, kw)."""
    B, C, H, W = x_nchw.shape
    x = jnp.transpose(x_nchw, (0, 2, 3, 1))                       # NCHW -> NHWC
    xp = jnp.pad(x, ((0, 0), (1, 1), (1, 1), (0, 0)), mode="reflect")
    taps = [xp[:, kh:kh + H, kw:kw + W, :].mean(axis=(1, 2))
            for kh in range(3) for kw in range(3)]                # 9 x (B, C)
    return jnp.stack(taps, axis=1).reshape(B, 9 * C)


def _weight_matrix(conv_w):
    """torch (Cout, Cin, kh, kw) -> (kh, kw, Cin, Cout) -> (9*Cin, Cout)."""
    cout = conv_w.shape[0]
    return jnp.transpose(conv_w, (2, 3, 1, 0)).reshape(-1, cout)


def net_forward(x_nchw, conv_w, conv_b, fc_w, fc_b, *, tn=1024, tk=2304):
    B = x_nchw.shape[0]
    a = _pooled_patches(x_nchw).astype(jnp.bfloat16)              # (B, 9*Cin)
    wmat = _weight_matrix(conv_w).astype(jnp.bfloat16)            # (9*Cin, Cout)

    Mp = 8                                                        # pad rows to a sublane tile
    a = jnp.pad(a, ((0, Mp - B), (0, 0)))

    partials = fused_conv_gap_fc(a, wmat, conv_b, fc_w, tn=tn, tk=tk)  # (2, Mp, 80)
    return partials.sum(axis=0)[:B] + fc_b                        # (B, 80)


# ----------------------------------------------------------------------- main
if __name__ == "__main__":
    B, CIN, H, W = 2, 1024, 8, 8

    key = jax.random.PRNGKey(0)
    kx, kw1, kb1, kw2, kb2 = jax.random.split(key, 5)

    x = jax.random.normal(kx, (B, CIN, H, W), jnp.float32)
    conv_w = jax.random.normal(kw1, (COUT, CIN, 3, 3), jnp.float32) * 0.02
    conv_b = jax.random.normal(kb1, (COUT,), jnp.float32) * 0.02
    # fc weight stored directly as (in_features, out_features)
    fc_w = jax.random.normal(kw2, (COUT, NCLS), jnp.float32) * 0.02
    fc_b = jax.random.normal(kb2, (NCLS,), jnp.float32) * 0.02

    out = jax.jit(net_forward)(x, conv_w, conv_b, fc_w, fc_b)
    out = jax.block_until_ready(out)
    assert out.shape == (B, NCLS) and out.dtype == jnp.float32

    hi = lax.Precision.HIGHEST

    # (1) tight check vs a reference using the same bf16-quantized operands
    a32 = _pooled_patches(x).astype(jnp.bfloat16).astype(jnp.float32)
    w32 = _weight_matrix(conv_w).astype(jnp.bfloat16).astype(jnp.float32)
    ref_pooled = jnp.dot(a32, w32, precision=hi) + conv_b[None, :]
    ref_bf16 = jnp.dot(ref_pooled, fc_w, precision=hi) + fc_b[None, :]
    assert jnp.allclose(out, ref_bf16, rtol=2e-3, atol=2e-4), (
        float(jnp.max(jnp.abs(out - ref_bf16))))

    # (2) looser check vs the full-f32 module semantics (conv -> GAP -> fc1);
    #     slack accounts for the bf16 cast of the conv operands.
    xp = jnp.pad(jnp.transpose(x, (0, 2, 3, 1)),
                 ((0, 0), (1, 1), (1, 1), (0, 0)), mode="reflect")
    ref_conv = lax.conv_general_dilated(
        jnp.transpose(xp, (0, 3, 1, 2)), conv_w, window_strides=(1, 1),
        padding="VALID", dimension_numbers=("NCHW", "OIHW", "NCHW"),
        precision=hi)
    ref_conv = ref_conv + conv_b[None, :, None, None]
    ref_f32 = jnp.dot(ref_conv.mean(axis=(2, 3)), fc_w, precision=hi) + fc_b
    assert jnp.allclose(out, ref_f32, rtol=2e-2, atol=2e-3), (
        float(jnp.max(jnp.abs(out - ref_f32))))

    print("KERNEL_OK")
</pallas_src>

<mosaic_0001>
module attributes {stable_mosaic.version = 11 : i64} {
  func.func @_fused_kernel(%arg0: i32, %arg1: i32, %arg2: memref<8x2304xbf16, #tpu.memory_space<vmem>>, %arg3: memref<2304x1024xbf16, #tpu.memory_space<vmem>>, %arg4: memref<1x1024xf32, #tpu.memory_space<vmem>>, %arg5: memref<1024x80xf32, #tpu.memory_space<vmem>>, %arg6: memref<1x8x80xf32, #tpu.memory_space<vmem>>, %arg7: memref<8x1024xf32, #tpu.memory_space<vmem>>) attributes {dimension_semantics = [#tpu.dimension_semantics<parallel>, #tpu.dimension_semantics<arbitrary>], iteration_bounds = array<i64: 2, 4>, scalar_prefetch = 0 : i64, scratch_operands = 1 : i64, tpu.core_type = #tpu.core_type<tc>, window_params = [{transform_indices = @transform_0, window_bounds = array<i64: 8, 2304>}, {transform_indices = @transform_1, window_bounds = array<i64: 2304, 1024>}, {transform_indices = @transform_2, window_bounds = array<i64: 1, 1024>}, {transform_indices = @transform_3, window_bounds = array<i64: 1024, 80>}, {transform_indices = @transform_4, window_bounds = array<i64: 1, 8, 80>}]} {
    %c0_i32 = arith.constant 0 : i32
    %0 = arith.cmpi eq, %arg1, %c0_i32 : i32
    %1 = arith.extui %0 : i1 to i32
    %c0_i32_0 = arith.constant 0 : i32
    %2 = arith.cmpi ne, %1, %c0_i32_0 : i32
    scf.if %2 {
      %cst_9 = arith.constant 0.000000e+00 : f32
      %12 = vector.broadcast %cst_9 : f32 to vector<8x1024xf32>
      %c0_10 = arith.constant 0 : index
      %c0_11 = arith.constant 0 : index
      %13 = vector.load %arg7[%c0_10, %c0_11] : memref<8x1024xf32, #tpu.memory_space<vmem>>, vector<8x1024xf32>
      tpu.vector_store %arg7[%c0_10, %c0_11], %12 {strides = array<i32>} : memref<8x1024xf32, #tpu.memory_space<vmem>>, vector<8x1024xf32>,
    } else {
    }
    %c0 = arith.constant 0 : index
    %c0_1 = arith.constant 0 : index
    %3 = vector.load %arg7[%c0, %c0_1] : memref<8x1024xf32, #tpu.memory_space<vmem>>, vector<8x1024xf32>
    %c0_2 = arith.constant 0 : index
    %c0_3 = arith.constant 0 : index
    %4 = vector.load %arg2[%c0_2, %c0_3] : memref<8x2304xbf16, #tpu.memory_space<vmem>>, vector<8x2304xbf16>
    %c0_4 = arith.constant 0 : index
    %c0_5 = arith.constant 0 : index
    %5 = vector.load %arg3[%c0_4, %c0_5] : memref<2304x1024xbf16, #tpu.memory_space<vmem>>, vector<2304x1024xbf16>
    %cst = arith.constant dense<0.000000e+00> : vector<8x1024xf32>
    %6 = tpu.matmul %4, %5, %cst {dimension_numbers = #tpu.dot_dimension_numbers<[1], [0], [0], [1], [0, 0, 1, 1], [], []>} : vector<8x2304xbf16>, vector<2304x1024xbf16>, vector<8x1024xf32> -> vector<8x1024xf32>
    %7 = arith.addf %3, %6 : vector<8x1024xf32>
    %c0_6 = arith.constant 0 : index
    %c0_7 = arith.constant 0 : index
    %8 = vector.load %arg7[%c0_6, %c0_7] : memref<8x1024xf32, #tpu.memory_space<vmem>>, vector<8x1024xf32>
    tpu.vector_store %arg7[%c0_6, %c0_7], %7 {strides = array<i32>} : memref<8x1024xf32, #tpu.memory_space<vmem>>, vector<8x1024xf32>,
    %c3_i32 = arith.constant 3 : i32
    %9 = arith.cmpi eq, %arg1, %c3_i32 : i32
    %10 = arith.extui %9 : i1 to i32
    %c0_i32_8 = arith.constant 0 : i32
    %11 = arith.cmpi ne, %10, %c0_i32_8 : i32
    scf.if %11 {
      %c0_9 = arith.constant 0 : index
      %c0_10 = arith.constant 0 : index
      %12 = vector.load %arg7[%c0_9, %c0_10] : memref<8x1024xf32, #tpu.memory_space<vmem>>, vector<8x1024xf32>
      %c0_11 = arith.constant 0 : index
      %c0_12 = arith.constant 0 : index
      %13 = vector.load %arg4[%c0_11, %c0_12] : memref<1x1024xf32, #tpu.memory_space<vmem>>, vector<1x1024xf32>
      %14 = vector.broadcast %13 : vector<1x1024xf32> to vector<8x1024xf32>
      %15 = arith.addf %12, %14 : vector<8x1024xf32>
      %c0_13 = arith.constant 0 : index
      %c0_14 = arith.constant 0 : index
      %16 = vector.load %arg5[%c0_13, %c0_14] : memref<1024x80xf32, #tpu.memory_space<vmem>>, vector<1024x80xf32>
      %cst_15 = arith.constant dense<0.000000e+00> : vector<8x80xf32>
      %17 = tpu.matmul %15, %16, %cst_15 {dimension_numbers = #tpu.dot_dimension_numbers<[1], [0], [0], [1], [0, 0, 1, 1], [], []>} : vector<8x1024xf32>, vector<1024x80xf32>, vector<8x80xf32> -> vector<8x80xf32>
      %c0_16 = arith.constant 0 : index
      %c0_17 = arith.constant 0 : index
      %c0_18 = arith.constant 0 : index
      %18 = vector.load %arg6[%c0_16, %c0_17, %c0_18] : memref<1x8x80xf32, #tpu.memory_space<vmem>>, vector<1x8x80xf32>
      %19 = vector.shape_cast %18 : vector<1x8x80xf32> to vector<8x80xf32>
      %20 = vector.shape_cast %17 : vector<8x80xf32> to vector<1x8x80xf32>
      tpu.vector_store %arg6[%c0_16, %c0_17, %c0_18], %20 {strides = array<i32>} : memref<1x8x80xf32, #tpu.memory_space<vmem>>, vector<1x8x80xf32>,
    } else {
    }
    return
  }
  func.func @transform_0(%arg0: i32, %arg1: i32) -> (i32, i32) {
    %c0_i32 = arith.constant 0 : i32
    %c0_i32_0 = arith.constant 0 : i32
    return %c0_i32, %arg1 : i32, i32
  }
  func.func @transform_1(%arg0: i32, %arg1: i32) -> (i32, i32) {
    %c0_i32 = arith.constant 0 : i32
    return %arg1, %arg0 : i32, i32
  }
  func.func @transform_2(%arg0: i32, %arg1: i32) -> (i32, i32) {
    %c0_i32 = arith.constant 0 : i32
    %c0_i32_0 = arith.constant 0 : i32
    return %c0_i32, %arg0 : i32, i32
  }
  func.func @transform_3(%arg0: i32, %arg1: i32) -> (i32, i32) {
    %c0_i32 = arith.constant 0 : i32
    %c0_i32_0 = arith.constant 0 : i32
    return %arg0, %c0_i32 : i32, i32
  }
  func.func @transform_4(%arg0: i32, %arg1: i32) -> (i32, i32, i32) {
    %c0_i32 = arith.constant 0 : i32
    %c0_i32_0 = arith.constant 0 : i32
    %c0_i32_1 = arith.constant 0 : i32
    return %arg0, %c0_i32, %c0_i32_0 : i32, i32, i32
  }
}

</mosaic_0001>

<bundles_post_ra>
// kernel: net_forward.1
= control target key start
LH: loop header
LB: loop body
LE: loop exit
PB: predicated region body
PF: predicated region fallthrough
CT: control target
= control target key end

     0   :  { %s17389_s15 = smov 0   ;;  %s17391_s16 = smov 0   ;;  %s20971_s0 = inlined_call_operand.vmem [shape: bf16[8,9216], index: 0, kind: input, shape index: {}]   ;;  %s20972_s1 = inlined_call_operand.vmem [shape: bf16[9216,2048], index: 1, kind: input, shape index: {}]   ;;  %s20973_s2 = inlined_call_operand.vmem [shape: f32[1,2048], index: 2, kind: input, shape index: {}]   ;;  %s20974_s3 = inlined_call_operand.vmem [shape: f32[2048,80], index: 3, kind: input, shape index: {}]   ;;  %s20975_s4 = inlined_call_operand.vmem [shape: f32[2,8,80], index: 4, kind: output, shape index: {}]  }
   0x1   :  { %s17393_s17 = smov 0   ;;  %s17395_s18 = smov 0  }
   0x2   :  { %s17397_s19 = smov 0   ;;  %s17399_s20 = smov 0  }
   0x3   :  { %s17401_s21 = smov 0  }
   0x4 LB: > { %s23_s22 = sadd.s32 1, %s17337_s19  ;;  %s26_s23 = sadd.s32 1, %s17341_s20  ;;  %s17345_s21 = sphi %s17401_s21, %s14_s21   ;;  %s17341_s20 = sphi %s17399_s20, %s20986_s20   ;;  %s17337_s19 = sphi %s17397_s19, %s20985_s19   ;;  %s17333_s18 = sphi %s17395_s18, %s20984_s18   ;;  %s17329_s17 = sphi %s17393_s17, %s20983_s17   ;;  %s17325_s16 = sphi %s17391_s16, %s20982_s16   ;;  %s17321_s15 = sphi %s17389_s15, %s20981_s15  }
   0x5   : > { %p24_p0 = scmp.ge.s32.totalorder %s23_s22, 4  ;;  %p68_p1 = scmp.ne.s32.totalorder %s17325_s16, %s17321_s15 }
   0x6   : > { %p69_p2 = scmp.eq.s32.totalorder %s17345_s21, 0  ;;  %s61_s27 = sadd.s32 1, %s17325_s16 }
   0x7   : > { %s20988_s22 = smov (%p24_p0, %s23_s22), 0  ;;  %s20990_s23 = smov (!%p24_p0, %s26_s23), %s17341_s20 }
   0x8   : > { %p70_p3 = por %p69_p2, %p68_p1  ;;  %p28_p4 = scmp.ge.s32.totalorder %s20990_s23, 2 }
   0x9   : > { %s56_s24 = ssub.s32 %s17337_s19, %s20988_s22  ;;  %p11407_p6 = scmp.ge.s32.totalorder %s17345_s21, 8 }
   0xa   : > { %s20992_s23 = smov (%p28_p4, %s20990_s23), 0 }
   0xb   : > { %s57_s25 = ssub.s32 %s17341_s20, %s20992_s23  ;;  %172 = sbr.rel (%p11407_p6) target bundleno = 313 (0x139), region = 16 }
   0xc   : > { %s58_s26 = sor.u32 %s57_s25, %s56_s24 }
   0xd   : > { %p59_p5 = scmp.eq.s32.totalorder %s58_s26, 0 }
   0xf   : > { %s17440_s28 = scalar_select %p59_p5, %s17325_s16, %s61_s27  }
  0x10   : > { %184 = sbr.rel (!%p70_p3) target bundleno = 313 (0x139), region = 24  ;;  %s186_s29 = sand.u32 (%p70_p3), 1, %s17325_s16  }
  0x11   : > { %s17444_s30 = smul.u32 (%p70_p3), 9216, %s186_s29  ;;  %s11408_s5 = sshll.u32 (%p70_p3), %s17341_s20, 3 }
  0x12   : > { %s16031_s6 = smul.u32 (%p70_p3), 4608, %s17337_s19  ;;  %s17461_s24 = smov (%p70_p3), 0  }
  0x13   : > { %s188_s12 = scalar_lea.vmem (%p70_p3), [#allocation3], %s17444_s30   ;;  %s17463_s25 = smov (%p70_p3), 0  }
  0x14   : > { %s192_s7 = sadd.s32 (%p70_p3), %s16031_s6, %s11408_s5  ;;  %s20976_s13 = smov (%p70_p3), %s188_s12 }
  0x15   : > { %s11410_s8 = sshll.u32 %s192_s7, 2 }
  0x16   : > { %s17451_s11 = scalar_lea.vmem %s20972_s1, %s11410_s8  }
  0x17   : > { %s20977_s14 = smov %s17451_s11 }
  0x18 LB: >> { %v208_v0 = vld [vmem:[%s17353_s14] sm:$0xff]  ;;  %s784_s26 = sadd.s32 1, %s17357_s24  ;;  %s204_s25 = sadd.s32 1, %s17361_s25   ;;  %s17361_s25 = sphi %s17463_s25, %s204_s25   ;;  %s17357_s24 = sphi %s17461_s24, %s20980_s24   ;;  %s17353_s14 = sphi %s20977_s14, %s20979_s14   ;;  %s17349_s13 = sphi %s20976_s13, %s20978_s13  }
  0x19   : >> { %v210_v1 = vld [vmem:[%s17353_s14 + $0x40] sm:$0xff]  ;;  %209 = vst [vmem:[%s17349_s13] sm:$0xff] %v208_v0  ;;  %p785_p7 = scmp.ge.s32.totalorder %s784_s26, 4  ;;  %p201_p8 = scmp.ge.s32.totalorder %s204_s25, 4  }
  0x1a   : >> { %v212_v2 = vld [vmem:[%s17353_s14 + $0x80] sm:$0xff]  ;;  %211 = vst [vmem:[%s17349_s13 + $0x20] sm:$0xff] %v210_v1 }
  0x1b   : >> { %v214_v3 = vld [vmem:[%s17353_s14 + $0xc0] sm:$0xff]  ;;  %213 = vst [vmem:[%s17349_s13 + $0x40] sm:$0xff] %v212_v2  ;;  %s20994_s26 = smov (%p785_p7, %s784_s26), 0 }
  0x1c   : >> { %v216_v4 = vld [vmem:[%s17353_s14 + $0x100] sm:$0xff]  ;;  %215 = vst [vmem:[%s17349_s13 + $0x60] sm:$0xff] %v214_v3  ;;  %s11411_s27 = sshll.u32 %s20994_s26, 3  ;;  %s20980_s24 = smov %s20994_s26 }
  0x1d   : >> { %v218_v5 = vld [vmem:[%s17353_s14 + $0x140] sm:$0xff]  ;;  %217 = vst [vmem:[%s17349_s13 + $0x80] sm:$0xff] %v216_v4  ;;  %s17805_s29 = scalar_lea.vmem %s17451_s11, %s11411_s27   ;;  %s17809_s5 = scalar_lea.vmem %s188_s12, %s11411_s27 [#allocation3]  }
  0x1e   : >> { %v220_v6 = vld [vmem:[%s17353_s14 + $0x180] sm:$0xff]  ;;  %219 = vst [vmem:[%s17349_s13 + $0xa0] sm:$0xff] %v218_v5 }
  0x1f   : >> { %v222_v7 = vld [vmem:[%s17353_s14 + $0x1c0] sm:$0xff]  ;;  %221 = vst [vmem:[%s17349_s13 + $0xc0] sm:$0xff] %v220_v6 }
  0x20   : >> { %v224_v8 = vld [vmem:[%s17353_s14 + $0x200] sm:$0xff]  ;;  %223 = vst [vmem:[%s17349_s13 + $0xe0] sm:$0xff] %v222_v7 }
  0x21   : >> { %v226_v9 = vld [vmem:[%s17353_s14 + $0x240] sm:$0xff]  ;;  %225 = vst [vmem:[%s17349_s13 + $0x100] sm:$0xff] %v224_v8 }
  0x22   : >> { %v228_v10 = vld [vmem:[%s17353_s14 + $0x280] sm:$0xff]  ;;  %227 = vst [vmem:[%s17349_s13 + $0x120] sm:$0xff] %v226_v9 }
  0x23   : >> { %v230_v11 = vld [vmem:[%s17353_s14 + $0x2c0] sm:$0xff]  ;;  %229 = vst [vmem:[%s17349_s13 + $0x140] sm:$0xff] %v228_v10 }
  0x24   : >> { %v232_v12 = vld [vmem:[%s17353_s14 + $0x300] sm:$0xff]  ;;  %231 = vst [vmem:[%s17349_s13 + $0x160] sm:$0xff] %v230_v11 }
  0x25   : >> { %v234_v13 = vld [vmem:[%s17353_s14 + $0x340] sm:$0xff]  ;;  %233 = vst [vmem:[%s17349_s13 + $0x180] sm:$0xff] %v232_v12 }
  0x26   : >> { %v236_v14 = vld [vmem:[%s17353_s14 + $0x380] sm:$0xff]  ;;  %235 = vst [vmem:[%s17349_s13 + $0x1a0] sm:$0xff] %v234_v13 }
  0x27   : >> { %v238_v15 = vld [vmem:[%s17353_s14 + $0x3c0] sm:$0xff]  ;;  %237 = vst [vmem:[%s17349_s13 + $0x1c0] sm:$0xff] %v236_v14 }
  0x28   : >> { %v240_v16 = vld [vmem:[%s17353_s14 + $0x400] sm:$0xff]  ;;  %239 = vst [vmem:[%s17349_s13 + $0x1e0] sm:$0xff] %v238_v15 }
  0x29   : >> { %v242_v17 = vld [vmem:[%s17353_s14 + $0x440] sm:$0xff]  ;;  %241 = vst [vmem:[%s17349_s13 + $0x200] sm:$0xff] %v240_v16 }
  0x2a   : >> { %v244_v18 = vld [vmem:[%s17353_s14 + $0x480] sm:$0xff]  ;;  %243 = vst [vmem:[%s17349_s13 + $0x220] sm:$0xff] %v242_v17 }
  0x2b   : >> { %v246_v19 = vld [vmem:[%s17353_s14 + $0x4c0] sm:$0xff]  ;;  %245 = vst [vmem:[%s17349_s13 + $0x240] sm:$0xff] %v244_v18 }
  0x2c   : >> { %v248_v20 = vld [vmem:[%s17353_s14 + $0x500] sm:$0xff]  ;;  %247 = vst [vmem:[%s17349_s13 + $0x260] sm:$0xff] %v246_v19 }
  0x2d   : >> { %v250_v21 = vld [vmem:[%s17353_s14 + $0x540] sm:$0xff]  ;;  %249 = vst [vmem:[%s17349_s13 + $0x280] sm:$0xff] %v248_v20 }
  0x2e   : >> { %v252_v22 = vld [vmem:[%s17353_s14 + $0x580] sm:$0xff]  ;;  %251 = vst [vmem:[%s17349_s13 + $0x2a0] sm:$0xff] %v250_v21 }
  0x2f   : >> { %v254_v23 = vld [vmem:[%s17353_s14 + $0x5c0] sm:$0xff]  ;;  %253 = vst [vmem:[%s17349_s13 + $0x2c0] sm:$0xff] %v252_v22 }
  0x30   : >> { %v256_v24 = vld [vmem:[%s17353_s14 + $0x600] sm:$0xff]  ;;  %255 = vst [vmem:[%s17349_s13 + $0x2e0] sm:$0xff] %v254_v23 }
  0x31   : >> { %v258_v25 = vld [vmem:[%s17353_s14 + $0x640] sm:$0xff]  ;;  %257 = vst [vmem:[%s17349_s13 + $0x300] sm:$0xff] %v256_v24 }
  0x32   : >> { %v260_v26 = vld [vmem:[%s17353_s14 + $0x680] sm:$0xff]  ;;  %259 = vst [vmem:[%s17349_s13 + $0x320] sm:$0xff] %v258_v25 }
  0x33   : >> { %v262_v27 = vld [vmem:[%s17353_s14 + $0x6c0] sm:$0xff]  ;;  %261 = vst [vmem:[%s17349_s13 + $0x340] sm:$0xff] %v260_v26 }
  0x34   : >> { %v264_v28 = vld [vmem:[%s17353_s14 + $0x700] sm:$0xff]  ;;  %263 = vst [vmem:[%s17349_s13 + $0x360] sm:$0xff] %v262_v27 }
  0x35   : >> { %v266_v29 = vld [vmem:[%s17353_s14 + $0x740] sm:$0xff]  ;;  %265 = vst [vmem:[%s17349_s13 + $0x380] sm:$0xff] %v264_v28 }
  0x36   : >> { %v268_v30 = vld [vmem:[%s17353_s14 + $0x780] sm:$0xff]  ;;  %267 = vst [vmem:[%s17349_s13 + $0x3a0] sm:$0xff] %v266_v29 }
  0x37   : >> { %v270_v31 = vld [vmem:[%s17353_s14 + $0x7c0] sm:$0xff]  ;;  %269 = vst [vmem:[%s17349_s13 + $0x3c0] sm:$0xff] %v268_v30 }
  0x38   : >> { %v272_v32 = vld [vmem:[%s17353_s14 + $0x800] sm:$0xff]  ;;  %271 = vst [vmem:[%s17349_s13 + $0x3e0] sm:$0xff] %v270_v31 }
  0x39   : >> { %v274_v33 = vld [vmem:[%s17353_s14 + $0x840] sm:$0xff]  ;;  %273 = vst [vmem:[%s17349_s13 + $0x400] sm:$0xff] %v272_v32 }
  0x3a   : >> { %v276_v34 = vld [vmem:[%s17353_s14 + $0x880] sm:$0xff]  ;;  %275 = vst [vmem:[%s17349_s13 + $0x420] sm:$0xff] %v274_v33 }
  0x3b   : >> { %v278_v35 = vld [vmem:[%s17353_s14 + $0x8c0] sm:$0xff]  ;;  %277 = vst [vmem:[%s17349_s13 + $0x440] sm:$0xff] %v276_v34 }
  0x3c   : >> { %v280_v36 = vld [vmem:[%s17353_s14 + $0x900] sm:$0xff]  ;;  %279 = vst [vmem:[%s17349_s13 + $0x460] sm:$0xff] %v278_v35 }
  0x3d   : >> { %v282_v37 = vld [vmem:[%s17353_s14 + $0x940] sm:$0xff]  ;;  %281 = vst [vmem:[%s17349_s13 + $0x480] sm:$0xff] %v280_v36 }
  0x3e   : >> { %v284_v38 = vld [vmem:[%s17353_s14 + $0x980] sm:$0xff]  ;;  %283 = vst [vmem:[%s17349_s13 + $0x4a0] sm:$0xff] %v282_v37 }
  0x3f   : >> { %v286_v39 = vld [vmem:[%s17353_s14 + $0x9c0] sm:$0xff]  ;;  %285 = vst [vmem:[%s17349_s13 + $0x4c0] sm:$0xff] %v284_v38 }
  0x40   : >> { %v288_v40 = vld [vmem:[%s17353_s14 + $0xa00] sm:$0xff]  ;;  %287 = vst [vmem:[%s17349_s13 + $0x4e0] sm:$0xff] %v286_v39 }
  0x41   : >> { %v290_v41 = vld [vmem:[%s17353_s14 + $0xa40] sm:$0xff]  ;;  %289 = vst [vmem:[%s17349_s13 + $0x500] sm:$0xff] %v288_v40 }
  0x42   : >> { %v292_v42 = vld [vmem:[%s17353_s14 + $0xa80] sm:$0xff]  ;;  %291 = vst [vmem:[%s17349_s13 + $0x520] sm:$0xff] %v290_v41 }
  0x43   : >> { %v294_v43 = vld [vmem:[%s17353_s14 + $0xac0] sm:$0xff]  ;;  %293 = vst [vmem:[%s17349_s13 + $0x540] sm:$0xff] %v292_v42 }
  0x44   : >> { %v296_v44 = vld [vmem:[%s17353_s14 + $0xb00] sm:$0xff]  ;;  %295 = vst [vmem:[%s17349_s13 + $0x560] sm:$0xff] %v294_v43 }
  0x45   : >> { %v298_v45 = vld [vmem:[%s17353_s14 + $0xb40] sm:$0xff]  ;;  %297 = vst [vmem:[%s17349_s13 + $0x580] sm:$0xff] %v296_v44 }
  0x46   : >> { %v300_v46 = vld [vmem:[%s17353_s14 + $0xb80] sm:$0xff]  ;;  %299 = vst [vmem:[%s17349_s13 + $0x5a0] sm:$0xff] %v298_v45 }
  0x47   : >> { %v302_v47 = vld [vmem:[%s17353_s14 + $0xbc0] sm:$0xff]  ;;  %301 = vst [vmem:[%s17349_s13 + $0x5c0] sm:$0xff] %v300_v46 }
  0x48   : >> { %v304_v48 = vld [vmem:[%s17353_s14 + $0xc00] sm:$0xff]  ;;  %303 = vst [vmem:[%s17349_s13 + $0x5e0] sm:$0xff] %v302_v47 }
  0x49   : >> { %v306_v49 = vld [vmem:[%s17353_s14 + $0xc40] sm:$0xff]  ;;  %305 = vst [vmem:[%s17349_s13 + $0x600] sm:$0xff] %v304_v48 }
  0x4a   : >> { %v308_v50 = vld [vmem:[%s17353_s14 + $0xc80] sm:$0xff]  ;;  %307 = vst [vmem:[%s17349_s13 + $0x620] sm:$0xff] %v306_v49 }
  0x4b   : >> { %v310_v51 = vld [vmem:[%s17353_s14 + $0xcc0] sm:$0xff]  ;;  %309 = vst [vmem:[%s17349_s13 + $0x640] sm:$0xff] %v308_v50 }
  0x4c   : >> { %v312_v52 = vld [vmem:[%s17353_s14 + $0xd00] sm:$0xff]  ;;  %311 = vst [vmem:[%s17349_s13 + $0x660] sm:$0xff] %v310_v51 }
  0x4d   : >> { %v314_v53 = vld [vmem:[%s17353_s14 + $0xd40] sm:$0xff]  ;;  %313 = vst [vmem:[%s17349_s13 + $0x680] sm:$0xff] %v312_v52 }
  0x4e   : >> { %v316_v54 = vld [vmem:[%s17353_s14 + $0xd80] sm:$0xff]  ;;  %315 = vst [vmem:[%s17349_s13 + $0x6a0] sm:$0xff] %v314_v53 }
  0x4f   : >> { %v318_v55 = vld [vmem:[%s17353_s14 + $0xdc0] sm:$0xff]  ;;  %317 = vst [vmem:[%s17349_s13 + $0x6c0] sm:$0xff] %v316_v54 }
  0x50   : >> { %v320_v56 = vld [vmem:[%s17353_s14 + $0xe00] sm:$0xff]  ;;  %319 = vst [vmem:[%s17349_s13 + $0x6e0] sm:$0xff] %v318_v55 }
  0x51   : >> { %v322_v57 = vld [vmem:[%s17353_s14 + $0xe40] sm:$0xff]  ;;  %321 = vst [vmem:[%s17349_s13 + $0x700] sm:$0xff] %v320_v56 }
  0x52   : >> { %v324_v58 = vld [vmem:[%s17353_s14 + $0xe80] sm:$0xff]  ;;  %323 = vst [vmem:[%s17349_s13 + $0x720] sm:$0xff] %v322_v57 }
  0x53   : >> { %v326_v59 = vld [vmem:[%s17353_s14 + $0xec0] sm:$0xff]  ;;  %325 = vst [vmem:[%s17349_s13 + $0x740] sm:$0xff] %v324_v58 }
  0x54   : >> { %v328_v60 = vld [vmem:[%s17353_s14 + $0xf00] sm:$0xff]  ;;  %327 = vst [vmem:[%s17349_s13 + $0x760] sm:$0xff] %v326_v59 }
  0x55   : >> { %v330_v61 = vld [vmem:[%s17353_s14 + $0xf40] sm:$0xff]  ;;  %329 = vst [vmem:[%s17349_s13 + $0x780] sm:$0xff] %v328_v60 }
  0x56   : >> { %v332_v62 = vld [vmem:[%s17353_s14 + $0xf80] sm:$0xff]  ;;  %331 = vst [vmem:[%s17349_s13 + $0x7a0] sm:$0xff] %v330_v61 }
  0x57   : >> { %v334_v63 = vld [vmem:[%s17353_s14 + $0xfc0] sm:$0xff]  ;;  %333 = vst [vmem:[%s17349_s13 + $0x7c0] sm:$0xff] %v332_v62 }
  0x58   : >> { %v336_v0 = vld [vmem:[%s17353_s14 + $0x1000] sm:$0xff]  ;;  %335 = vst [vmem:[%s17349_s13 + $0x7e0] sm:$0xff] %v334_v63 }
  0x59   : >> { %v338_v1 = vld [vmem:[%s17353_s14 + $0x1040] sm:$0xff]  ;;  %337 = vst [vmem:[%s17349_s13 + $0x800] sm:$0xff] %v336_v0 }
  0x5a   : >> { %v340_v2 = vld [vmem:[%s17353_s14 + $0x1080] sm:$0xff]  ;;  %339 = vst [vmem:[%s17349_s13 + $0x820] sm:$0xff] %v338_v1 }
  0x5b   : >> { %v342_v3 = vld [vmem:[%s17353_s14 + $0x10c0] sm:$0xff]  ;;  %341 = vst [vmem:[%s17349_s13 + $0x840] sm:$0xff] %v340_v2 }
  0x5c   : >> { %v344_v4 = vld [vmem:[%s17353_s14 + $0x1100] sm:$0xff]  ;;  %343 = vst [vmem:[%s17349_s13 + $0x860] sm:$0xff] %v342_v3 }
  0x5d   : >> { %v346_v5 = vld [vmem:[%s17353_s14 + $0x1140] sm:$0xff]  ;;  %345 = vst [vmem:[%s17349_s13 + $0x880] sm:$0xff] %v344_v4 }
  0x5e   : >> { %v348_v6 = vld [vmem:[%s17353_s14 + $0x1180] sm:$0xff]  ;;  %347 = vst [vmem:[%s17349_s13 + $0x8a0] sm:$0xff] %v346_v5 }
  0x5f   : >> { %v350_v7 = vld [vmem:[%s17353_s14 + $0x11c0] sm:$0xff]  ;;  %349 = vst [vmem:[%s17349_s13 + $0x8c0] sm:$0xff] %v348_v6 }
  0x60   : >> { %v352_v8 = vld [vmem:[%s17353_s14 + $0x1200] sm:$0xff]  ;;  %351 = vst [vmem:[%s17349_s13 + $0x8e0] sm:$0xff] %v350_v7 }
  0x61   : >> { %v354_v9 = vld [vmem:[%s17353_s14 + $0x1240] sm:$0xff]  ;;  %353 = vst [vmem:[%s17349_s13 + $0x900] sm:$0xff] %v352_v8 }
  0x62   : >> { %v356_v10 = vld [vmem:[%s17353_s14 + $0x1280] sm:$0xff]  ;;  %355 = vst [vmem:[%s17349_s13 + $0x920] sm:$0xff] %v354_v9 }
  0x63   : >> { %v358_v11 = vld [vmem:[%s17353_s14 + $0x12c0] sm:$0xff]  ;;  %357 = vst [vmem:[%s17349_s13 + $0x940] sm:$0xff] %v356_v10 }
  0x64   : >> { %v360_v12 = vld [vmem:[%s17353_s14 + $0x1300] sm:$0xff]  ;;  %359 = vst [vmem:[%s17349_s13 + $0x960] sm:$0xff] %v358_v11 }
  0x65   : >> { %v362_v13 = vld [vmem:[%s17353_s14 + $0x1340] sm:$0xff]  ;;  %361 = vst [vmem:[%s17349_s13 + $0x980] sm:$0xff] %v360_v12 }
  0x66   : >> { %v364_v14 = vld [vmem:[%s17353_s14 + $0x1380] sm:$0xff]  ;;  %363 = vst [vmem:[%s17349_s13 + $0x9a0] sm:$0xff] %v362_v13 }
  0x67   : >> { %v366_v15 = vld [vmem:[%s17353_s14 + $0x13c0] sm:$0xff]  ;;  %365 = vst [vmem:[%s17349_s13 + $0x9c0] sm:$0xff] %v364_v14 }
  0x68   : >> { %v368_v16 = vld [vmem:[%s17353_s14 + $0x1400] sm:$0xff]  ;;  %367 = vst [vmem:[%s17349_s13 + $0x9e0] sm:$0xff] %v366_v15 }
  0x69   : >> { %v370_v17 = vld [vmem:[%s17353_s14 + $0x1440] sm:$0xff]  ;;  %369 = vst [vmem:[%s17349_s13 + $0xa00] sm:$0xff] %v368_v16 }
  0x6a   : >> { %v372_v18 = vld [vmem:[%s17353_s14 + $0x1480] sm:$0xff]  ;;  %371 = vst [vmem:[%s17349_s13 + $0xa20] sm:$0xff] %v370_v17 }
  0x6b   : >> { %v374_v19 = vld [vmem:[%s17353_s14 + $0x14c0] sm:$0xff]  ;;  %373 = vst [vmem:[%s17349_s13 + $0xa40] sm:$0xff] %v372_v18 }
  0x6c   : >> { %v376_v20 = vld [vmem:[%s17353_s14 + $0x1500] sm:$0xff]  ;;  %375 = vst [vmem:[%s17349_s13 + $0xa60] sm:$0xff] %v374_v19 }
  0x6d   : >> { %v378_v21 = vld [vmem:[%s17353_s14 + $0x1540] sm:$0xff]  ;;  %377 = vst [vmem:[%s17349_s13 + $0xa80] sm:$0xff] %v376_v20 }
  0x6e   : >> { %v380_v22 = vld [vmem:[%s17353_s14 + $0x1580] sm:$0xff]  ;;  %379 = vst [vmem:[%s17349_s13 + $0xaa0] sm:$0xff] %v378_v21 }
  0x6f   : >> { %v382_v23 = vld [vmem:[%s17353_s14 + $0x15c0] sm:$0xff]  ;;  %381 = vst [vmem:[%s17349_s13 + $0xac0] sm:$0xff] %v380_v22 }
  0x70   : >> { %v384_v24 = vld [vmem:[%s17353_s14 + $0x1600] sm:$0xff]  ;;  %383 = vst [vmem:[%s17349_s13 + $0xae0] sm:$0xff] %v382_v23 }
  0x71   : >> { %v386_v25 = vld [vmem:[%s17353_s14 + $0x1640] sm:$0xff]  ;;  %385 = vst [vmem:[%s17349_s13 + $0xb00] sm:$0xff] %v384_v24 }
  0x72   : >> { %v388_v26 = vld [vmem:[%s17353_s14 + $0x1680] sm:$0xff]  ;;  %387 = vst [vmem:[%s17349_s13 + $0xb20] sm:$0xff] %v386_v25 }
  0x73   : >> { %v390_v27 = vld [vmem:[%s17353_s14 + $0x16c0] sm:$0xff]  ;;  %389 = vst [vmem:[%s17349_s13 + $0xb40] sm:$0xff] %v388_v26 }
  0x74   : >> { %v392_v28 = vld [vmem:[%s17353_s14 + $0x1700] sm:$0xff]  ;;  %391 = vst [vmem:[%s17349_s13 + $0xb60] sm:$0xff] %v390_v27 }
  0x75   : >> { %v394_v29 = vld [vmem:[%s17353_s14 + $0x1740] sm:$0xff]  ;;  %393 = vst [vmem:[%s17349_s13 + $0xb80] sm:$0xff] %v392_v28 }
  0x76   : >> { %v396_v30 = vld [vmem:[%s17353_s14 + $0x1780] sm:$0xff]  ;;  %395 = vst [vmem:[%s17349_s13 + $0xba0] sm:$0xff] %v394_v29 }
  0x77   : >> { %v398_v31 = vld [vmem:[%s17353_s14 + $0x17c0] sm:$0xff]  ;;  %397 = vst [vmem:[%s17349_s13 + $0xbc0] sm:$0xff] %v396_v30 }
  0x78   : >> { %v400_v32 = vld [vmem:[%s17353_s14 + $0x1800] sm:$0xff]  ;;  %399 = vst [vmem:[%s17349_s13 + $0xbe0] sm:$0xff] %v398_v31 }
  0x79   : >> { %v402_v33 = vld [vmem:[%s17353_s14 + $0x1840] sm:$0xff]  ;;  %401 = vst [vmem:[%s17349_s13 + $0xc00] sm:$0xff] %v400_v32 }
  0x7a   : >> { %v404_v34 = vld [vmem:[%s17353_s14 + $0x1880] sm:$0xff]  ;;  %403 = vst [vmem:[%s17349_s13 + $0xc20] sm:$0xff] %v402_v33 }
  0x7b   : >> { %v406_v35 = vld [vmem:[%s17353_s14 + $0x18c0] sm:$0xff]  ;;  %405 = vst [vmem:[%s17349_s13 + $0xc40] sm:$0xff] %v404_v34 }
  0x7c   : >> { %v408_v36 = vld [vmem:[%s17353_s14 + $0x1900] sm:$0xff]  ;;  %407 = vst [vmem:[%s17349_s13 + $0xc60] sm:$0xff] %v406_v35 }
  0x7d   : >> { %v410_v37 = vld [vmem:[%s17353_s14 + $0x1940] sm:$0xff]  ;;  %409 = vst [vmem:[%s17349_s13 + $0xc80] sm:$0xff] %v408_v36 }
  0x7e   : >> { %v412_v38 = vld [vmem:[%s17353_s14 + $0x1980] sm:$0xff]  ;;  %411 = vst [vmem:[%s17349_s13 + $0xca0] sm:$0xff] %v410_v37 }
  0x7f   : >> { %v414_v39 = vld [vmem:[%s17353_s14 + $0x19c0] sm:$0xff]  ;;  %413 = vst [vmem:[%s17349_s13 + $0xcc0] sm:$0xff] %v412_v38 }
  0x80   : >> { %v416_v40 = vld [vmem:[%s17353_s14 + $0x1a00] sm:$0xff]  ;;  %415 = vst [vmem:[%s17349_s13 + $0xce0] sm:$0xff] %v414_v39 }
  0x81   : >> { %v418_v41 = vld [vmem:[%s17353_s14 + $0x1a40] sm:$0xff]  ;;  %417 = vst [vmem:[%s17349_s13 + $0xd00] sm:$0xff] %v416_v40 }
  0x82   : >> { %v420_v42 = vld [vmem:[%s17353_s14 + $0x1a80] sm:$0xff]  ;;  %419 = vst [vmem:[%s17349_s13 + $0xd20] sm:$0xff] %v418_v41 }
  0x83   : >> { %v422_v43 = vld [vmem:[%s17353_s14 + $0x1ac0] sm:$0xff]  ;;  %421 = vst [vmem:[%s17349_s13 + $0xd40] sm:$0xff] %v420_v42 }
  0x84   : >> { %v424_v44 = vld [vmem:[%s17353_s14 + $0x1b00] sm:$0xff]  ;;  %423 = vst [vmem:[%s17349_s13 + $0xd60] sm:$0xff] %v422_v43 }
  0x85   : >> { %v426_v45 = vld [vmem:[%s17353_s14 + $0x1b40] sm:$0xff]  ;;  %425 = vst [vmem:[%s17349_s13 + $0xd80] sm:$0xff] %v424_v44 }
  0x86   : >> { %v428_v46 = vld [vmem:[%s17353_s14 + $0x1b80] sm:$0xff]  ;;  %427 = vst [vmem:[%s17349_s13 + $0xda0] sm:$0xff] %v426_v45 }
  0x87   : >> { %v430_v47 = vld [vmem:[%s17353_s14 + $0x1bc0] sm:$0xff]  ;;  %429 = vst [vmem:[%s17349_s13 + $0xdc0] sm:$0xff] %v428_v46 }
  0x88   : >> { %v432_v48 = vld [vmem:[%s17353_s14 + $0x1c00] sm:$0xff]  ;;  %431 = vst [vmem:[%s17349_s13 + $0xde0] sm:$0xff] %v430_v47 }
  0x89   : >> { %v434_v49 = vld [vmem:[%s17353_s14 + $0x1c40] sm:$0xff]  ;;  %433 = vst [vmem:[%s17349_s13 + $0xe00] sm:$0xff] %v432_v48 }
  0x8a   : >> { %v436_v50 = vld [vmem:[%s17353_s14 + $0x1c80] sm:$0xff]  ;;  %435 = vst [vmem:[%s17349_s13 + $0xe20] sm:$0xff] %v434_v49 }
  0x8b   : >> { %v438_v51 = vld [vmem:[%s17353_s14 + $0x1cc0] sm:$0xff]  ;;  %437 = vst [vmem:[%s17349_s13 + $0xe40] sm:$0xff] %v436_v50 }
  0x8c   : >> { %v440_v52 = vld [vmem:[%s17353_s14 + $0x1d00] sm:$0xff]  ;;  %439 = vst [vmem:[%s17349_s13 + $0xe60] sm:$0xff] %v438_v51 }
  0x8d   : >> { %v442_v53 = vld [vmem:[%s17353_s14 + $0x1d40] sm:$0xff]  ;;  %441 = vst [vmem:[%s17349_s13 + $0xe80] sm:$0xff] %v440_v52 }
  0x8e   : >> { %v444_v54 = vld [vmem:[%s17353_s14 + $0x1d80] sm:$0xff]  ;;  %443 = vst [vmem:[%s17349_s13 + $0xea0] sm:$0xff] %v442_v53 }
  0x8f   : >> { %v446_v55 = vld [vmem:[%s17353_s14 + $0x1dc0] sm:$0xff]  ;;  %445 = vst [vmem:[%s17349_s13 + $0xec0] sm:$0xff] %v444_v54 }
  0x90   : >> { %v448_v56 = vld [vmem:[%s17353_s14 + $0x1e00] sm:$0xff]  ;;  %447 = vst [vmem:[%s17349_s13 + $0xee0] sm:$0xff] %v446_v55 }
  0x91   : >> { %v450_v57 = vld [vmem:[%s17353_s14 + $0x1e40] sm:$0xff]  ;;  %449 = vst [vmem:[%s17349_s13 + $0xf00] sm:$0xff] %v448_v56 }
  0x92   : >> { %v452_v58 = vld [vmem:[%s17353_s14 + $0x1e80] sm:$0xff]  ;;  %451 = vst [vmem:[%s17349_s13 + $0xf20] sm:$0xff] %v450_v57 }
  0x93   : >> { %v454_v59 = vld [vmem:[%s17353_s14 + $0x1ec0] sm:$0xff]  ;;  %453 = vst [vmem:[%s17349_s13 + $0xf40] sm:$0xff] %v452_v58 }
  0x94   : >> { %v456_v60 = vld [vmem:[%s17353_s14 + $0x1f00] sm:$0xff]  ;;  %455 = vst [vmem:[%s17349_s13 + $0xf60] sm:$0xff] %v454_v59 }
  0x95   : >> { %v458_v61 = vld [vmem:[%s17353_s14 + $0x1f40] sm:$0xff]  ;;  %457 = vst [vmem:[%s17349_s13 + $0xf80] sm:$0xff] %v456_v60 }
  0x96   : >> { %v460_v62 = vld [vmem:[%s17353_s14 + $0x1f80] sm:$0xff]  ;;  %459 = vst [vmem:[%s17349_s13 + $0xfa0] sm:$0xff] %v458_v61 }
  0x97   : >> { %v462_v63 = vld [vmem:[%s17353_s14 + $0x1fc0] sm:$0xff]  ;;  %461 = vst [vmem:[%s17349_s13 + $0xfc0] sm:$0xff] %v460_v62 }
  0x98   : >> { %v464_v0 = vld [vmem:[%s17353_s14 + $0x2000] sm:$0xff]  ;;  %463 = vst [vmem:[%s17349_s13 + $0xfe0] sm:$0xff] %v462_v63 }
  0x99   : >> { %v466_v1 = vld [vmem:[%s17353_s14 + $0x2040] sm:$0xff]  ;;  %465 = vst [vmem:[%s17349_s13 + $0x1000] sm:$0xff] %v464_v0 }
  0x9a   : >> { %v468_v2 = vld [vmem:[%s17353_s14 + $0x2080] sm:$0xff]  ;;  %467 = vst [vmem:[%s17349_s13 + $0x1020] sm:$0xff] %v466_v1 }
  0x9b   : >> { %v470_v3 = vld [vmem:[%s17353_s14 + $0x20c0] sm:$0xff]  ;;  %469 = vst [vmem:[%s17349_s13 + $0x1040] sm:$0xff] %v468_v2 }
  0x9c   : >> { %v472_v4 = vld [vmem:[%s17353_s14 + $0x2100] sm:$0xff]  ;;  %471 = vst [vmem:[%s17349_s13 + $0x1060] sm:$0xff] %v470_v3 }
  0x9d   : >> { %v474_v5 = vld [vmem:[%s17353_s14 + $0x2140] sm:$0xff]  ;;  %473 = vst [vmem:[%s17349_s13 + $0x1080] sm:$0xff] %v472_v4 }
  0x9e   : >> { %v476_v6 = vld [vmem:[%s17353_s14 + $0x2180] sm:$0xff]  ;;  %475 = vst [vmem:[%s17349_s13 + $0x10a0] sm:$0xff] %v474_v5 }
  0x9f   : >> { %v478_v7 = vld [vmem:[%s17353_s14 + $0x21c0] sm:$0xff]  ;;  %477 = vst [vmem:[%s17349_s13 + $0x10c0] sm:$0xff] %v476_v6 }
  0xa0   : >> { %v480_v8 = vld [vmem:[%s17353_s14 + $0x2200] sm:$0xff]  ;;  %479 = vst [vmem:[%s17349_s13 + $0x10e0] sm:$0xff] %v478_v7 }
  0xa1   : >> { %v482_v9 = vld [vmem:[%s17353_s14 + $0x2240] sm:$0xff]  ;;  %481 = vst [vmem:[%s17349_s13 + $0x1100] sm:$0xff] %v480_v8 }
  0xa2   : >> { %v484_v10 = vld [vmem:[%s17353_s14 + $0x2280] sm:$0xff]  ;;  %483 = vst [vmem:[%s17349_s13 + $0x1120] sm:$0xff] %v482_v9 }
  0xa3   : >> { %v486_v11 = vld [vmem:[%s17353_s14 + $0x22c0] sm:$0xff]  ;;  %485 = vst [vmem:[%s17349_s13 + $0x1140] sm:$0xff] %v484_v10 }
  0xa4   : >> { %v488_v12 = vld [vmem:[%s17353_s14 + $0x2300] sm:$0xff]  ;;  %487 = vst [vmem:[%s17349_s13 + $0x1160] sm:$0xff] %v486_v11 }
  0xa5   : >> { %v490_v13 = vld [vmem:[%s17353_s14 + $0x2340] sm:$0xff]  ;;  %489 = vst [vmem:[%s17349_s13 + $0x1180] sm:$0xff] %v488_v12 }
  0xa6   : >> { %v492_v14 = vld [vmem:[%s17353_s14 + $0x2380] sm:$0xff]  ;;  %491 = vst [vmem:[%s17349_s13 + $0x11a0] sm:$0xff] %v490_v13 }
  0xa7   : >> { %v494_v15 = vld [vmem:[%s17353_s14 + $0x23c0] sm:$0xff]  ;;  %493 = vst [vmem:[%s17349_s13 + $0x11c0] sm:$0xff] %v492_v14 }
  0xa8   : >> { %v496_v16 = vld [vmem:[%s17353_s14 + $0x2400] sm:$0xff]  ;;  %495 = vst [vmem:[%s17349_s13 + $0x11e0] sm:$0xff] %v494_v15 }
  0xa9   : >> { %v498_v17 = vld [vmem:[%s17353_s14 + $0x2440] sm:$0xff]  ;;  %497 = vst [vmem:[%s17349_s13 + $0x1200] sm:$0xff] %v496_v16 }
  0xaa   : >> { %v500_v18 = vld [vmem:[%s17353_s14 + $0x2480] sm:$0xff]  ;;  %499 = vst [vmem:[%s17349_s13 + $0x1220] sm:$0xff] %v498_v17 }
  0xab   : >> { %v502_v19 = vld [vmem:[%s17353_s14 + $0x24c0] sm:$0xff]  ;;  %501 = vst [vmem:[%s17349_s13 + $0x1240] sm:$0xff] %v500_v18 }
  0xac   : >> { %v504_v20 = vld [vmem:[%s17353_s14 + $0x2500] sm:$0xff]  ;;  %503 = vst [vmem:[%s17349_s13 + $0x1260] sm:$0xff] %v502_v19 }
  0xad   : >> { %v506_v21 = vld [vmem:[%s17353_s14 + $0x2540] sm:$0xff]  ;;  %505 = vst [vmem:[%s17349_s13 + $0x1280] sm:$0xff] %v504_v20 }
  0xae   : >> { %v508_v22 = vld [vmem:[%s17353_s14 + $0x2580] sm:$0xff]  ;;  %507 = vst [vmem:[%s17349_s13 + $0x12a0] sm:$0xff] %v506_v21 }
  0xaf   : >> { %v510_v23 = vld [vmem:[%s17353_s14 + $0x25c0] sm:$0xff]  ;;  %509 = vst [vmem:[%s17349_s13 + $0x12c0] sm:$0xff] %v508_v22 }
  0xb0   : >> { %v512_v24 = vld [vmem:[%s17353_s14 + $0x2600] sm:$0xff]  ;;  %511 = vst [vmem:[%s17349_s13 + $0x12e0] sm:$0xff] %v510_v23 }
  0xb1   : >> { %v514_v25 = vld [vmem:[%s17353_s14 + $0x2640] sm:$0xff]  ;;  %513 = vst [vmem:[%s17349_s13 + $0x1300] sm:$0xff] %v512_v24 }
  0xb2   : >> { %v516_v26 = vld [vmem:[%s17353_s14 + $0x2680] sm:$0xff]  ;;  %515 = vst [vmem:[%s17349_s13 + $0x1320] sm:$0xff] %v514_v25 }
  0xb3   : >> { %v518_v27 = vld [vmem:[%s17353_s14 + $0x26c0] sm:$0xff]  ;;  %517 = vst [vmem:[%s17349_s13 + $0x1340] sm:$0xff] %v516_v26 }
  0xb4   : >> { %v520_v28 = vld [vmem:[%s17353_s14 + $0x2700] sm:$0xff]  ;;  %519 = vst [vmem:[%s17349_s13 + $0x1360] sm:$0xff] %v518_v27 }
  0xb5   : >> { %v522_v29 = vld [vmem:[%s17353_s14 + $0x2740] sm:$0xff]  ;;  %521 = vst [vmem:[%s17349_s13 + $0x1380] sm:$0xff] %v520_v28 }
  0xb6   : >> { %v524_v30 = vld [vmem:[%s17353_s14 + $0x2780] sm:$0xff]  ;;  %523 = vst [vmem:[%s17349_s13 + $0x13a0] sm:$0xff] %v522_v29 }
  0xb7   : >> { %v526_v31 = vld [vmem:[%s17353_s14 + $0x27c0] sm:$0xff]  ;;  %525 = vst [vmem:[%s17349_s13 + $0x13c0] sm:$0xff] %v524_v30 }
  0xb8   : >> { %v528_v32 = vld [vmem:[%s17353_s14 + $0x2800] sm:$0xff]  ;;  %527 = vst [vmem:[%s17349_s13 + $0x13e0] sm:$0xff] %v526_v31 }
  0xb9   : >> { %v530_v33 = vld [vmem:[%s17353_s14 + $0x2840] sm:$0xff]  ;;  %529 = vst [vmem:[%s17349_s13 + $0x1400] sm:$0xff] %v528_v32 }
  0xba   : >> { %v532_v34 = vld [vmem:[%s17353_s14 + $0x2880] sm:$0xff]  ;;  %531 = vst [vmem:[%s17349_s13 + $0x1420] sm:$0xff] %v530_v33 }
  0xbb   : >> { %v534_v35 = vld [vmem:[%s17353_s14 + $0x28c0] sm:$0xff]  ;;  %533 = vst [vmem:[%s17349_s13 + $0x1440] sm:$0xff] %v532_v34 }
  0xbc   : >> { %v536_v36 = vld [vmem:[%s17353_s14 + $0x2900] sm:$0xff]  ;;  %535 = vst [vmem:[%s17349_s13 + $0x1460] sm:$0xff] %v534_v35 }
  0xbd   : >> { %v538_v37 = vld [vmem:[%s17353_s14 + $0x2940] sm:$0xff]  ;;  %537 = vst [vmem:[%s17349_s13 + $0x1480] sm:$0xff] %v536_v36 }
  0xbe   : >> { %v540_v38 = vld [vmem:[%s17353_s14 + $0x2980] sm:$0xff]  ;;  %539 = vst [vmem:[%s17349_s13 + $0x14a0] sm:$0xff] %v538_v37 }
  0xbf   : >> { %v542_v39 = vld [vmem:[%s17353_s14 + $0x29c0] sm:$0xff]  ;;  %541 = vst [vmem:[%s17349_s13 + $0x14c0] sm:$0xff] %v540_v38 }
  0xc0   : >> { %v544_v40 = vld [vmem:[%s17353_s14 + $0x2a00] sm:$0xff]  ;;  %543 = vst [vmem:[%s17349_s13 + $0x14e0] sm:$0xff] %v542_v39 }
  0xc1   : >> { %v546_v41 = vld [vmem:[%s17353_s14 + $0x2a40] sm:$0xff]  ;;  %545 = vst [vmem:[%s17349_s13 + $0x1500] sm:$0xff] %v544_v40 }
  0xc2   : >> { %v548_v42 = vld [vmem:[%s17353_s14 + $0x2a80] sm:$0xff]  ;;  %547 = vst [vmem:[%s17349_s13 + $0x1520] sm:$0xff] %v546_v41 }
  0xc3   : >> { %v550_v43 = vld [vmem:[%s17353_s14 + $0x2ac0] sm:$0xff]  ;;  %549 = vst [vmem:[%s17349_s13 + $0x1540] sm:$0xff] %v548_v42 }
  0xc4   : >> { %v552_v44 = vld [vmem:[%s17353_s14 + $0x2b00] sm:$0xff]  ;;  %551 = vst [vmem:[%s17349_s13 + $0x1560] sm:$0xff] %v550_v43 }
  0xc5   : >> { %v554_v45 = vld [vmem:[%s17353_s14 + $0x2b40] sm:$0xff]  ;;  %553 = vst [vmem:[%s17349_s13 + $0x1580] sm:$0xff] %v552_v44 }
  0xc6   : >> { %v556_v46 = vld [vmem:[%s17353_s14 + $0x2b80] sm:$0xff]  ;;  %555 = vst [vmem:[%s17349_s13 + $0x15a0] sm:$0xff] %v554_v45 }
  0xc7   : >> { %v558_v47 = vld [vmem:[%s17353_s14 + $0x2bc0] sm:$0xff]  ;;  %557 = vst [vmem:[%s17349_s13 + $0x15c0] sm:$0xff] %v556_v46 }
  0xc8   : >> { %v560_v48 = vld [vmem:[%s17353_s14 + $0x2c00] sm:$0xff]  ;;  %559 = vst [vmem:[%s17349_s13 + $0x15e0] sm:$0xff] %v558_v47 }
  0xc9   : >> { %v562_v49 = vld [vmem:[%s17353_s14 + $0x2c40] sm:$0xff]  ;;  %561 = vst [vmem:[%s17349_s13 + $0x1600] sm:$0xff] %v560_v48 }
  0xca   : >> { %v564_v50 = vld [vmem:[%s17353_s14 + $0x2c80] sm:$0xff]  ;;  %563 = vst [vmem:[%s17349_s13 + $0x1620] sm:$0xff] %v562_v49 }
  0xcb   : >> { %v566_v51 = vld [vmem:[%s17353_s14 + $0x2cc0] sm:$0xff]  ;;  %565 = vst [vmem:[%s17349_s13 + $0x1640] sm:$0xff] %v564_v50 }
  0xcc   : >> { %v568_v52 = vld [vmem:[%s17353_s14 + $0x2d00] sm:$0xff]  ;;  %567 = vst [vmem:[%s17349_s13 + $0x1660] sm:$0xff] %v566_v51 }
  0xcd   : >> { %v570_v53 = vld [vmem:[%s17353_s14 + $0x2d40] sm:$0xff]  ;;  %569 = vst [vmem:[%s17349_s13 + $0x1680] sm:$0xff] %v568_v52 }
  0xce   : >> { %v572_v54 = vld [vmem:[%s17353_s14 + $0x2d80] sm:$0xff]  ;;  %571 = vst [vmem:[%s17349_s13 + $0x16a0] sm:$0xff] %v570_v53 }
  0xcf   : >> { %v574_v55 = vld [vmem:[%s17353_s14 + $0x2dc0] sm:$0xff]  ;;  %573 = vst [vmem:[%s17349_s13 + $0x16c0] sm:$0xff] %v572_v54 }
  0xd0   : >> { %v576_v56 = vld [vmem:[%s17353_s14 + $0x2e00] sm:$0xff]  ;;  %575 = vst [vmem:[%s17349_s13 + $0x16e0] sm:$0xff] %v574_v55 }
  0xd1   : >> { %v578_v57 = vld [vmem:[%s17353_s14 + $0x2e40] sm:$0xff]  ;;  %577 = vst [vmem:[%s17349_s13 + $0x1700] sm:$0xff] %v576_v56 }
  0xd2   : >> { %v580_v58 = vld [vmem:[%s17353_s14 + $0x2e80] sm:$0xff]  ;;  %579 = vst [vmem:[%s17349_s13 + $0x1720] sm:$0xff] %v578_v57 }
  0xd3   : >> { %v582_v59 = vld [vmem:[%s17353_s14 + $0x2ec0] sm:$0xff]  ;;  %581 = vst [vmem:[%s17349_s13 + $0x1740] sm:$0xff] %v580_v58 }
  0xd4   : >> { %v584_v60 = vld [vmem:[%s17353_s14 + $0x2f00] sm:$0xff]  ;;  %583 = vst [vmem:[%s17349_s13 + $0x1760] sm:$0xff] %v582_v59 }
  0xd5   : >> { %v586_v61 = vld [vmem:[%s17353_s14 + $0x2f40] sm:$0xff]  ;;  %585 = vst [vmem:[%s17349_s13 + $0x1780] sm:$0xff] %v584_v60 }
  0xd6   : >> { %v588_v62 = vld [vmem:[%s17353_s14 + $0x2f80] sm:$0xff]  ;;  %587 = vst [vmem:[%s17349_s13 + $0x17a0] sm:$0xff] %v586_v61 }
  0xd7   : >> { %v590_v63 = vld [vmem:[%s17353_s14 + $0x2fc0] sm:$0xff]  ;;  %589 = vst [vmem:[%s17349_s13 + $0x17c0] sm:$0xff] %v588_v62 }
  0xd8   : >> { %v592_v0 = vld [vmem:[%s17353_s14 + $0x3000] sm:$0xff]  ;;  %591 = vst [vmem:[%s17349_s13 + $0x17e0] sm:$0xff] %v590_v63 }
  0xd9   : >> { %v594_v1 = vld [vmem:[%s17353_s14 + $0x3040] sm:$0xff]  ;;  %593 = vst [vmem:[%s17349_s13 + $0x1800] sm:$0xff] %v592_v0 }
  0xda   : >> { %v596_v2 = vld [vmem:[%s17353_s14 + $0x3080] sm:$0xff]  ;;  %595 = vst [vmem:[%s17349_s13 + $0x1820] sm:$0xff] %v594_v1 }
  0xdb   : >> { %v598_v3 = vld [vmem:[%s17353_s14 + $0x30c0] sm:$0xff]  ;;  %597 = vst [vmem:[%s17349_s13 + $0x1840] sm:$0xff] %v596_v2 }
  0xdc   : >> { %v600_v4 = vld [vmem:[%s17353_s14 + $0x3100] sm:$0xff]  ;;  %599 = vst [vmem:[%s17349_s13 + $0x1860] sm:$0xff] %v598_v3 }
  0xdd   : >> { %v602_v5 = vld [vmem:[%s17353_s14 + $0x3140] sm:$0xff]  ;;  %601 = vst [vmem:[%s17349_s13 + $0x1880] sm:$0xff] %v600_v4 }
  0xde   : >> { %v604_v6 = vld [vmem:[%s17353_s14 + $0x3180] sm:$0xff]  ;;  %603 = vst [vmem:[%s17349_s13 + $0x18a0] sm:$0xff] %v602_v5 }
  0xdf   : >> { %v606_v7 = vld [vmem:[%s17353_s14 + $0x31c0] sm:$0xff]  ;;  %605 = vst [vmem:[%s17349_s13 + $0x18c0] sm:$0xff] %v604_v6 }
  0xe0   : >> { %v608_v8 = vld [vmem:[%s17353_s14 + $0x3200] sm:$0xff]  ;;  %607 = vst [vmem:[%s17349_s13 + $0x18e0] sm:$0xff] %v606_v7 }
  0xe1   : >> { %v610_v9 = vld [vmem:[%s17353_s14 + $0x3240] sm:$0xff]  ;;  %609 = vst [vmem:[%s17349_s13 + $0x1900] sm:$0xff] %v608_v8 }
  0xe2   : >> { %v612_v10 = vld [vmem:[%s17353_s14 + $0x3280] sm:$0xff]  ;;  %611 = vst [vmem:[%s17349_s13 + $0x1920] sm:$0xff] %v610_v9 }
  0xe3   : >> { %v614_v11 = vld [vmem:[%s17353_s14 + $0x32c0] sm:$0xff]  ;;  %613 = vst [vmem:[%s17349_s13 + $0x1940] sm:$0xff] %v612_v10 }
  0xe4   : >> { %v616_v12 = vld [vmem:[%s17353_s14 + $0x3300] sm:$0xff]  ;;  %615 = vst [vmem:[%s17349_s13 + $0x1960] sm:$0xff] %v614_v11 }
  0xe5   : >> { %v618_v13 = vld [vmem:[%s17353_s14 + $0x3340] sm:$0xff]  ;;  %617 = vst [vmem:[%s17349_s13 + $0x1980] sm:$0xff] %v616_v12 }
  0xe6   : >> { %v620_v14 = vld [vmem:[%s17353_s14 + $0x3380] sm:$0xff]  ;;  %619 = vst [vmem:[%s17349_s13 + $0x19a0] sm:$0xff] %v618_v13 }
  0xe7   : >> { %v622_v15 = vld [vmem:[%s17353_s14 + $0x33c0] sm:$0xff]  ;;  %621 = vst [vmem:[%s17349_s13 + $0x19c0] sm:$0xff] %v620_v14 }
  0xe8   : >> { %v624_v16 = vld [vmem:[%s17353_s14 + $0x3400] sm:$0xff]  ;;  %623 = vst [vmem:[%s17349_s13 + $0x19e0] sm:$0xff] %v622_v15 }
  0xe9   : >> { %v626_v17 = vld [vmem:[%s17353_s14 + $0x3440] sm:$0xff]  ;;  %625 = vst [vmem:[%s17349_s13 + $0x1a00] sm:$0xff] %v624_v16 }
  0xea   : >> { %v628_v18 = vld [vmem:[%s17353_s14 + $0x3480] sm:$0xff]  ;;  %627 = vst [vmem:[%s17349_s13 + $0x1a20] sm:$0xff] %v626_v17 }
  0xeb   : >> { %v630_v19 = vld [vmem:[%s17353_s14 + $0x34c0] sm:$0xff]  ;;  %629 = vst [vmem:[%s17349_s13 + $0x1a40] sm:$0xff] %v628_v18 }
  0xec   : >> { %v632_v20 = vld [vmem:[%s17353_s14 + $0x3500] sm:$0xff]  ;;  %631 = vst [vmem:[%s17349_s13 + $0x1a60] sm:$0xff] %v630_v19 }
  0xed   : >> { %v634_v21 = vld [vmem:[%s17353_s14 + $0x3540] sm:$0xff]  ;;  %633 = vst [vmem:[%s17349_s13 + $0x1a80] sm:$0xff] %v632_v20 }
  0xee   : >> { %v636_v22 = vld [vmem:[%s17353_s14 + $0x3580] sm:$0xff]  ;;  %635 = vst [vmem:[%s17349_s13 + $0x1aa0] sm:$0xff] %v634_v21 }
  0xef   : >> { %v638_v23 = vld [vmem:[%s17353_s14 + $0x35c0] sm:$0xff]  ;;  %637 = vst [vmem:[%s17349_s13 + $0x1ac0] sm:$0xff] %v636_v22 }
  0xf0   : >> { %v640_v24 = vld [vmem:[%s17353_s14 + $0x3600] sm:$0xff]  ;;  %639 = vst [vmem:[%s17349_s13 + $0x1ae0] sm:$0xff] %v638_v23 }
  0xf1   : >> { %v642_v25 = vld [vmem:[%s17353_s14 + $0x3640] sm:$0xff]  ;;  %641 = vst [vmem:[%s17349_s13 + $0x1b00] sm:$0xff] %v640_v24 }
  0xf2   : >> { %v644_v26 = vld [vmem:[%s17353_s14 + $0x3680] sm:$0xff]  ;;  %643 = vst [vmem:[%s17349_s13 + $0x1b20] sm:$0xff] %v642_v25 }
  0xf3   : >> { %v646_v27 = vld [vmem:[%s17353_s14 + $0x36c0] sm:$0xff]  ;;  %645 = vst [vmem:[%s17349_s13 + $0x1b40] sm:$0xff] %v644_v26 }
  0xf4   : >> { %v648_v28 = vld [vmem:[%s17353_s14 + $0x3700] sm:$0xff]  ;;  %647 = vst [vmem:[%s17349_s13 + $0x1b60] sm:$0xff] %v646_v27 }
  0xf5   : >> { %v650_v29 = vld [vmem:[%s17353_s14 + $0x3740] sm:$0xff]  ;;  %649 = vst [vmem:[%s17349_s13 + $0x1b80] sm:$0xff] %v648_v28 }
  0xf6   : >> { %v652_v30 = vld [vmem:[%s17353_s14 + $0x3780] sm:$0xff]  ;;  %651 = vst [vmem:[%s17349_s13 + $0x1ba0] sm:$0xff] %v650_v29 }
  0xf7   : >> { %v654_v31 = vld [vmem:[%s17353_s14 + $0x37c0] sm:$0xff]  ;;  %653 = vst [vmem:[%s17349_s13 + $0x1bc0] sm:$0xff] %v652_v30 }
  0xf8   : >> { %v656_v32 = vld [vmem:[%s17353_s14 + $0x3800] sm:$0xff]  ;;  %655 = vst [vmem:[%s17349_s13 + $0x1be0] sm:$0xff] %v654_v31 }
  0xf9   : >> { %v658_v33 = vld [vmem:[%s17353_s14 + $0x3840] sm:$0xff]  ;;  %657 = vst [vmem:[%s17349_s13 + $0x1c00] sm:$0xff] %v656_v32 }
  0xfa   : >> { %v660_v34 = vld [vmem:[%s17353_s14 + $0x3880] sm:$0xff]  ;;  %659 = vst [vmem:[%s17349_s13 + $0x1c20] sm:$0xff] %v658_v33 }
  0xfb   : >> { %v662_v35 = vld [vmem:[%s17353_s14 + $0x38c0] sm:$0xff]  ;;  %661 = vst [vmem:[%s17349_s13 + $0x1c40] sm:$0xff] %v660_v34 }
  0xfc   : >> { %v664_v36 = vld [vmem:[%s17353_s14 + $0x3900] sm:$0xff]  ;;  %663 = vst [vmem:[%s17349_s13 + $0x1c60] sm:$0xff] %v662_v35 }
  0xfd   : >> { %v666_v37 = vld [vmem:[%s17353_s14 + $0x3940] sm:$0xff]  ;;  %665 = vst [vmem:[%s17349_s13 + $0x1c80] sm:$0xff] %v664_v36 }
  0xfe   : >> { %v668_v38 = vld [vmem:[%s17353_s14 + $0x3980] sm:$0xff]  ;;  %667 = vst [vmem:[%s17349_s13 + $0x1ca0] sm:$0xff] %v666_v37 }
  0xff   : >> { %v670_v39 = vld [vmem:[%s17353_s14 + $0x39c0] sm:$0xff]  ;;  %669 = vst [vmem:[%s17349_s13 + $0x1cc0] sm:$0xff] %v668_v38 }
 0x100   : >> { %v672_v40 = vld [vmem:[%s17353_s14 + $0x3a00] sm:$0xff]  ;;  %671 = vst [vmem:[%s17349_s13 + $0x1ce0] sm:$0xff] %v670_v39 }
 0x101   : >> { %v674_v41 = vld [vmem:[%s17353_s14 + $0x3a40] sm:$0xff]  ;;  %673 = vst [vmem:[%s17349_s13 + $0x1d00] sm:$0xff] %v672_v40 }
 0x102   : >> { %v676_v42 = vld [vmem:[%s17353_s14 + $0x3a80] sm:$0xff]  ;;  %675 = vst [vmem:[%s17349_s13 + $0x1d20] sm:$0xff] %v674_v41 }
 0x103   : >> { %v678_v43 = vld [vmem:[%s17353_s14 + $0x3ac0] sm:$0xff]  ;;  %677 = vst [vmem:[%s17349_s13 + $0x1d40] sm:$0xff] %v676_v42 }
 0x104   : >> { %v680_v44 = vld [vmem:[%s17353_s14 + $0x3b00] sm:$0xff]  ;;  %679 = vst [vmem:[%s17349_s13 + $0x1d60] sm:$0xff] %v678_v43 }
 0x105   : >> { %v682_v45 = vld [vmem:[%s17353_s14 + $0x3b40] sm:$0xff]  ;;  %681 = vst [vmem:[%s17349_s13 + $0x1d80] sm:$0xff] %v680_v44 }
 0x106   : >> { %v684_v46 = vld [vmem:[%s17353_s14 + $0x3b80] sm:$0xff]  ;;  %683 = vst [vmem:[%s17349_s13 + $0x1da0] sm:$0xff] %v682_v45 }
 0x107   : >> { %v686_v47 = vld [vmem:[%s17353_s14 + $0x3bc0] sm:$0xff]  ;;  %685 = vst [vmem:[%s17349_s13 + $0x1dc0] sm:$0xff] %v684_v46 }
 0x108   : >> { %v688_v48 = vld [vmem:[%s17353_s14 + $0x3c00] sm:$0xff]  ;;  %687 = vst [vmem:[%s17349_s13 + $0x1de0] sm:$0xff] %v686_v47 }
 0x109   : >> { %v690_v49 = vld [vmem:[%s17353_s14 + $0x3c40] sm:$0xff]  ;;  %689 = vst [vmem:[%s17349_s13 + $0x1e00] sm:$0xff] %v688_v48 }
 0x10a   : >> { %v692_v50 = vld [vmem:[%s17353_s14 + $0x3c80] sm:$0xff]  ;;  %691 = vst [vmem:[%s17349_s13 + $0x1e20] sm:$0xff] %v690_v49 }
 0x10b   : >> { %v694_v51 = vld [vmem:[%s17353_s14 + $0x3cc0] sm:$0xff]  ;;  %693 = vst [vmem:[%s17349_s13 + $0x1e40] sm:$0xff] %v692_v50 }
 0x10c   : >> { %v696_v52 = vld [vmem:[%s17353_s14 + $0x3d00] sm:$0xff]  ;;  %695 = vst [vmem:[%s17349_s13 + $0x1e60] sm:$0xff] %v694_v51 }
 0x10d   : >> { %v698_v53 = vld [vmem:[%s17353_s14 + $0x3d40] sm:$0xff]  ;;  %697 = vst [vmem:[%s17349_s13 + $0x1e80] sm:$0xff] %v696_v52 }
 0x10e   : >> { %v700_v54 = vld [vmem:[%s17353_s14 + $0x3d80] sm:$0xff]  ;;  %699 = vst [vmem:[%s17349_s13 + $0x1ea0] sm:$0xff] %v698_v53 }
 0x10f   : >> { %v702_v55 = vld [vmem:[%s17353_s14 + $0x3dc0] sm:$0xff]  ;;  %701 = vst [vmem:[%s17349_s13 + $0x1ec0] sm:$0xff] %v700_v54 }
 0x110   : >> { %v704_v56 = vld [vmem:[%s17353_s14 + $0x3e00] sm:$0xff]  ;;  %703 = vst [vmem:[%s17349_s13 + $0x1ee0] sm:$0xff] %v702_v55 }
 0x111   : >> { %v706_v57 = vld [vmem:[%s17353_s14 + $0x3e40] sm:$0xff]  ;;  %705 = vst [vmem:[%s17349_s13 + $0x1f00] sm:$0xff] %v704_v56 }
 0x112   : >> { %v708_v58 = vld [vmem:[%s17353_s14 + $0x3e80] sm:$0xff]  ;;  %707 = vst [vmem:[%s17349_s13 + $0x1f20] sm:$0xff] %v706_v57 }
 0x113   : >> { %v710_v59 = vld [vmem:[%s17353_s14 + $0x3ec0] sm:$0xff]  ;;  %709 = vst [vmem:[%s17349_s13 + $0x1f40] sm:$0xff] %v708_v58 }
 0x114   : >> { %v712_v60 = vld [vmem:[%s17353_s14 + $0x3f00] sm:$0xff]  ;;  %711 = vst [vmem:[%s17349_s13 + $0x1f60] sm:$0xff] %v710_v59 }
 0x115   : >> { %v714_v61 = vld [vmem:[%s17353_s14 + $0x3f40] sm:$0xff]  ;;  %713 = vst [vmem:[%s17349_s13 + $0x1f80] sm:$0xff] %v712_v60 }
 0x116   : >> { %v716_v62 = vld [vmem:[%s17353_s14 + $0x3f80] sm:$0xff]  ;;  %715 = vst [vmem:[%s17349_s13 + $0x1fa0] sm:$0xff] %v714_v61 }
 0x117   : >> { %v718_v63 = vld [vmem:[%s17353_s14 + $0x3fc0] sm:$0xff]  ;;  %717 = vst [vmem:[%s17349_s13 + $0x1fc0] sm:$0xff] %v716_v62 }
 0x118   : >> { %v720_v0 = vld [vmem:[%s17353_s14 + $0x4000] sm:$0xff]  ;;  %719 = vst [vmem:[%s17349_s13 + $0x1fe0] sm:$0xff] %v718_v63 }
 0x119   : >> { %v722_v1 = vld [vmem:[%s17353_s14 + $0x4040] sm:$0xff]  ;;  %721 = vst [vmem:[%s17349_s13 + $0x2000] sm:$0xff] %v720_v0 }
 0x11a   : >> { %v724_v2 = vld [vmem:[%s17353_s14 + $0x4080] sm:$0xff]  ;;  %723 = vst [vmem:[%s17349_s13 + $0x2020] sm:$0xff] %v722_v1 }
 0x11b   : >> { %v726_v3 = vld [vmem:[%s17353_s14 + $0x40c0] sm:$0xff]  ;;  %725 = vst [vmem:[%s17349_s13 + $0x2040] sm:$0xff] %v724_v2 }
 0x11c   : >> { %v728_v4 = vld [vmem:[%s17353_s14 + $0x4100] sm:$0xff]  ;;  %727 = vst [vmem:[%s17349_s13 + $0x2060] sm:$0xff] %v726_v3 }
 0x11d   : >> { %v730_v5 = vld [vmem:[%s17353_s14 + $0x4140] sm:$0xff]  ;;  %729 = vst [vmem:[%s17349_s13 + $0x2080] sm:$0xff] %v728_v4 }
 0x11e   : >> { %v732_v6 = vld [vmem:[%s17353_s14 + $0x4180] sm:$0xff]  ;;  %731 = vst [vmem:[%s17349_s13 + $0x20a0] sm:$0xff] %v730_v5 }
 0x11f   : >> { %v734_v7 = vld [vmem:[%s17353_s14 + $0x41c0] sm:$0xff]  ;;  %733 = vst [vmem:[%s17349_s13 + $0x20c0] sm:$0xff] %v732_v6 }
 0x120   : >> { %v736_v8 = vld [vmem:[%s17353_s14 + $0x4200] sm:$0xff]  ;;  %735 = vst [vmem:[%s17349_s13 + $0x20e0] sm:$0xff] %v734_v7 }
 0x121   : >> { %v738_v9 = vld [vmem:[%s17353_s14 + $0x4240] sm:$0xff]  ;;  %737 = vst [vmem:[%s17349_s13 + $0x2100] sm:$0xff] %v736_v8 }
 0x122   : >> { %v740_v10 = vld [vmem:[%s17353_s14 + $0x4280] sm:$0xff]  ;;  %739 = vst [vmem:[%s17349_s13 + $0x2120] sm:$0xff] %v738_v9 }
 0x123   : >> { %v742_v11 = vld [vmem:[%s17353_s14 + $0x42c0] sm:$0xff]  ;;  %741 = vst [vmem:[%s17349_s13 + $0x2140] sm:$0xff] %v740_v10 }
 0x124   : >> { %v744_v12 = vld [vmem:[%s17353_s14 + $0x4300] sm:$0xff]  ;;  %743 = vst [vmem:[%s17349_s13 + $0x2160] sm:$0xff] %v742_v11 }
 0x125   : >> { %v746_v13 = vld [vmem:[%s17353_s14 + $0x4340] sm:$0xff]  ;;  %745 = vst [vmem:[%s17349_s13 + $0x2180] sm:$0xff] %v744_v12 }
 0x126   : >> { %v748_v14 = vld [vmem:[%s17353_s14 + $0x4380] sm:$0xff]  ;;  %747 = vst [vmem:[%s17349_s13 + $0x21a0] sm:$0xff] %v746_v13 }
 0x127   : >> { %v750_v15 = vld [vmem:[%s17353_s14 + $0x43c0] sm:$0xff]  ;;  %749 = vst [vmem:[%s17349_s13 + $0x21c0] sm:$0xff] %v748_v14 }
 0x128   : >> { %v752_v16 = vld [vmem:[%s17353_s14 + $0x4400] sm:$0xff]  ;;  %751 = vst [vmem:[%s17349_s13 + $0x21e0] sm:$0xff] %v750_v15 }
 0x129   : >> { %v754_v17 = vld [vmem:[%s17353_s14 + $0x4440] sm:$0xff]  ;;  %753 = vst [vmem:[%s17349_s13 + $0x2200] sm:$0xff] %v752_v16 }
 0x12a   : >> { %v756_v18 = vld [vmem:[%s17353_s14 + $0x4480] sm:$0xff]  ;;  %755 = vst [vmem:[%s17349_s13 + $0x2220] sm:$0xff] %v754_v17 }
 0x12b   : >> { %v758_v19 = vld [vmem:[%s17353_s14 + $0x44c0] sm:$0xff]  ;;  %757 = vst [vmem:[%s17349_s13 + $0x2240] sm:$0xff] %v756_v18 }
 0x12c   : >> { %v760_v20 = vld [vmem:[%s17353_s14 + $0x4500] sm:$0xff]  ;;  %759 = vst [vmem:[%s17349_s13 + $0x2260] sm:$0xff] %v758_v19 }
 0x12d   : >> { %v762_v21 = vld [vmem:[%s17353_s14 + $0x4540] sm:$0xff]  ;;  %761 = vst [vmem:[%s17349_s13 + $0x2280] sm:$0xff] %v760_v20 }
 0x12e   : >> { %v764_v22 = vld [vmem:[%s17353_s14 + $0x4580] sm:$0xff]  ;;  %763 = vst [vmem:[%s17349_s13 + $0x22a0] sm:$0xff] %v762_v21 }
 0x12f   : >> { %v766_v23 = vld [vmem:[%s17353_s14 + $0x45c0] sm:$0xff]  ;;  %765 = vst [vmem:[%s17349_s13 + $0x22c0] sm:$0xff] %v764_v22 }
 0x130   : >> { %v768_v24 = vld [vmem:[%s17353_s14 + $0x4600] sm:$0xff]  ;;  %767 = vst [vmem:[%s17349_s13 + $0x22e0] sm:$0xff] %v766_v23 }
 0x131   : >> { %v770_v25 = vld [vmem:[%s17353_s14 + $0x4640] sm:$0xff]  ;;  %769 = vst [vmem:[%s17349_s13 + $0x2300] sm:$0xff] %v768_v24 }
 0x132   : >> { %v772_v26 = vld [vmem:[%s17353_s14 + $0x4680] sm:$0xff]  ;;  %771 = vst [vmem:[%s17349_s13 + $0x2320] sm:$0xff] %v770_v25 }
 0x133   : >> { %v774_v27 = vld [vmem:[%s17353_s14 + $0x46c0] sm:$0xff]  ;;  %773 = vst [vmem:[%s17349_s13 + $0x2340] sm:$0xff] %v772_v26 }
 0x134   : >> { %v776_v28 = vld [vmem:[%s17353_s14 + $0x4700] sm:$0xff]  ;;  %775 = vst [vmem:[%s17349_s13 + $0x2360] sm:$0xff] %v774_v27  ;;  %203 = sbr.rel (!%p201_p8) target bundleno = 24 (0x18), region = 127 }
 0x135   : >> { %v778_v29 = vld [vmem:[%s17353_s14 + $0x4740] sm:$0xff]  ;;  %777 = vst [vmem:[%s17349_s13 + $0x2380] sm:$0xff] %v776_v28 }
 0x136   : >> { %v780_v30 = vld [vmem:[%s17353_s14 + $0x4780] sm:$0xff]  ;;  %779 = vst [vmem:[%s17349_s13 + $0x23a0] sm:$0xff] %v778_v29 }
 0x137   : >> { %v782_v31 = vld [vmem:[%s17353_s14 + $0x47c0] sm:$0xff]  ;;  %781 = vst [vmem:[%s17349_s13 + $0x23c0] sm:$0xff] %v780_v30  ;;  %s20979_s14 = smov %s17805_s29 }
 0x138   : >> { %783 = vst [vmem:[%s17349_s13 + $0x23e0] sm:$0xff] %v782_v31  ;;  %s20978_s13 = smov %s17809_s5 }
 0x139 PF: > { %p11413_p9 = scmp.ge.s32.totalorder %s17345_s21, 1  ;;  %p1992_p10 = scmp.lt.s32.totalorder %s17345_s21, 9 }
 0x13b   : > { %p1993_p11 = pnand %p11413_p9, %p1992_p10 }
 0x13c   : > { %s1999_s6 = sand.u32 (!%p1993_p11), 1, %s17321_s15   ;;  %s2037_s7 = smul.u32 (!%p1993_p11), 18, %s17329_s17 }
 0x13d   : > { %1996 = sbr.rel (%p1993_p11) target bundleno = 2730 (0xaaa), region = 69  ;;  %s11415_s9 = sshll.u32 (!%p1993_p11), %s17333_s18, 3 }
 0x13e   : > { %s17185_s8 = smul.u32 (!%p1993_p11), 9216, %s1999_s6  ;;  %p2038_p12 = scmp.lt.s32.totalorder (!%p1993_p11), %s2037_s7, 71 }
 0x13f   : > { %p2046_p13 = scmp.lt.s32.totalorder (!%p1993_p11), %s11415_s9, 15  ;;  %s11416_s30 = sshll.u32 (!%p1993_p11), %s17333_s18, 7 }
 0x140   : > { %p2051_p0 = scmp.lt.s32.totalorder (!%p1993_p11), %s11416_s30, 255  ;;  %p2056_p1 = scmp.lt.s32.totalorder (!%p1993_p11), %s17333_s18, 1 }
 0x141   : > { %p11419_p2 = scmp.ne.s32.totalorder (!%p1993_p11), %s17329_s17, 0 }
 0x142   : > { %s20996_s7 = smov (!%p2038_p12, %s2037_s7), 71  ;;  %s20998_s9 = smov (!%p2046_p13, %s11415_s9), 15 }
 0x143   : > { %s11414_s10 = sshll.u32 %s20996_s7, 2  ;;  %s2048_s24 = scalar_lea.vmem %s20973_s2, %s20998_s9 }
 0x144   : > { %s18087_s13 = scalar_lea.vmem %s20971_s0, %s11414_s10  ;;  %s21000_s30 = smov (!%p2051_p0, %s11416_s30), 255 }
 0x145   : > { %s11417_s25 = sshll.u32 %s21000_s30, 3  ;;  %s21002_s18 = smov (!%p2056_p1, %s17333_s18), 1 }
 0x146   : > { %s18097_s29 = scalar_lea.vmem %s20974_s3, %s11417_s25  ;;  %s11418_s5 = sshll.u32 %s21002_s18, 3 }
 0x147   : > { %s18103_s11 = scalar_lea.vmem %s20975_s4, %s11418_s5  ;;  %s18105_s10 = scalar_lea.vmem [#allocation3], %s17185_s8 }
 0x148   : > { %2063 = sbr.rel (%p11419_p2) target bundleno = 342 (0x156), region = 77 }
 0x14d   : > { %v17363_v32 = vmov 0.0  }
 0x14e   : > { %2064 = vst [vmem:[#allocation2 + $0x30] sm:$0xff] %v17363_v32 }
 0x14f   : > { %2065 = vst [vmem:[#allocation2] sm:$0xff] %v17363_v32 }
 0x150   : > { %2066 = vst [vmem:[#allocation2 + $0x18] sm:$0xff] %v17363_v32 }
 0x151   : > { %2067 = vst [vmem:[#allocation2 + $0x10] sm:$0xff] %v17363_v32 }
 0x152   : > { %2068 = vst [vmem:[#allocation2 + $0x8] sm:$0xff] %v17363_v32 }
 0x153   : > { %2069 = vst [vmem:[#allocation2 + $0x20] sm:$0xff] %v17363_v32 }
 0x154   : > { %2070 = vst [vmem:[#allocation2 + $0x28] sm:$0xff] %v17363_v32 }
 0x155   : > { %2071 = vst [vmem:[#allocation2 + $0x38] sm:$0xff] %v17363_v32 }
 0x156 PF: > { %v11646_v33 = vld [vmem:[%s18105_s10 + $0x1c0] sm:$0xf]  ;;  %p16028_p3 = scmp.ne.s32.totalorder %s17329_s17, 3 }
 0x157   : > { %v16092_v34 = vld [vmem:[%s18105_s10 + $0x1dc] sm:$0xf0] }
 0x158   : > { %v11902_v35 = vld [vmem:[%s18105_s10 + $0x3c0] sm:$0xf]  ;;  %v11647_v36 = vor.u32 %v16092_v34, %v11646_v33 }
 0x159   : > { %v16156_v37 = vld [vmem:[%s18105_s10 + $0x3dc] sm:$0xf0] }
 0x15a   : > { %v12158_v38 = vld [vmem:[%s18105_s10 + $0x5c0] sm:$0xf]  ;;  %v11903_v40 = vor.u32 %v16156_v37, %v11902_v35  ;;  %9064 = vmatpush.bf16.msra.mxu0 %v11647_v36 }
 0x15b   : > { %v16220_v39 = vld [vmem:[%s18105_s10 + $0x5dc] sm:$0xf0] }
 0x15c   : > { %v12159_v41 = vor.u32 %v16220_v39, %v12158_v38  ;;  %v12414_v42 = vld [vmem:[%s18105_s10 + $0x7c0] sm:$0xf]  ;;  %9077 = vmatpush.bf16.msra.mxu1 %v11903_v40 }
 0x15d   : > { %v16284_v43 = vld [vmem:[%s18105_s10 + $0x7dc] sm:$0xf0] }
 0x15e   : > { %v11614_v44 = vld [vmem:[%s18105_s10 + $0x180] sm:$0xf]  ;;  %v12415_v45 = vor.u32 %v16284_v43, %v12414_v42  ;;  %9090 = vmatpush.bf16.msra.mxu2 %v12159_v41 }
 0x15f   : > { %v16084_v46 = vld [vmem:[%s18105_s10 + $0x19c] sm:$0xf0] }
 0x160   : > { %v11870_v47 = vld [vmem:[%s18105_s10 + $0x380] sm:$0xf]  ;;  %v11615_v49 = vor.u32 %v16084_v46, %v11614_v44  ;;  %9103 = vmatpush.bf16.msra.mxu3 %v12415_v45 }
 0x161   : > { %v16148_v48 = vld [vmem:[%s18105_s10 + $0x39c] sm:$0xf0] }
 0x162   : > { %v11871_v50 = vor.u32 %v16148_v48, %v11870_v47  ;;  %v12126_v51 = vld [vmem:[%s18105_s10 + $0x580] sm:$0xf]  ;;  %9065 = vmatpush.bf16.msra.mxu0 %v11615_v49 }
 0x163   : > { %v16212_v52 = vld [vmem:[%s18105_s10 + $0x59c] sm:$0xf0] }
 0x164   : > { %v12382_v53 = vld [vmem:[%s18105_s10 + $0x780] sm:$0xf]  ;;  %v12127_v54 = vor.u32 %v16212_v52, %v12126_v51  ;;  %9078 = vmatpush.bf16.msra.mxu1 %v11871_v50 }
 0x165   : > { %v16276_v55 = vld [vmem:[%s18105_s10 + $0x79c] sm:$0xf0] }
 0x166   : > { %v11582_v56 = vld [vmem:[%s18105_s10 + $0x140] sm:$0xf]  ;;  %v12383_v58 = vor.u32 %v16276_v55, %v12382_v53  ;;  %9091 = vmatpush.bf16.msra.mxu2 %v12127_v54 }
 0x167   : > { %v16076_v57 = vld [vmem:[%s18105_s10 + $0x15c] sm:$0xf0] }
 0x168   : > { %v11838_v59 = vld [vmem:[%s18105_s10 + $0x340] sm:$0xf]  ;;  %v11583_v62 = vor.u32 %v16076_v57, %v11582_v56  ;;  %9104 = vmatpush.bf16.msra.mxu3 %v12383_v58 }
 0x169   : > { %v16140_v60 = vld [vmem:[%s18105_s10 + $0x35c] sm:$0xf0] }
 0x16a   : > { %v12094_v61 = vld [vmem:[%s18105_s10 + $0x540] sm:$0xf]  ;;  %v11839_v2 = vor.u32 %v16140_v60, %v11838_v59  ;;  %9066 = vmatpush.bf16.msra.mxu0 %v11583_v62 }
 0x16b   : > { %v16204_v63 = vld [vmem:[%s18105_s10 + $0x55c] sm:$0xf0] }
 0x16c   : > { %v12350_v0 = vld [vmem:[%s18105_s10 + $0x740] sm:$0xf]  ;;  %v12095_v3 = vor.u32 %v16204_v63, %v12094_v61  ;;  %9079 = vmatpush.bf16.msra.mxu1 %v11839_v2 }
 0x16d   : > { %v16268_v1 = vld [vmem:[%s18105_s10 + $0x75c] sm:$0xf0] }
 0x16e   : > { %v11550_v4 = vld [vmem:[%s18105_s10 + $0x100] sm:$0xf]  ;;  %v12351_v7 = vor.u32 %v16268_v1, %v12350_v0  ;;  %9092 = vmatpush.bf16.msra.mxu2 %v12095_v3 }
 0x16f   : > { %v16068_v5 = vld [vmem:[%s18105_s10 + $0x11c] sm:$0xf0] }
 0x170   : > { %v11806_v6 = vld [vmem:[%s18105_s10 + $0x300] sm:$0xf]  ;;  %v11551_v13 = vor.u32 %v16068_v5, %v11550_v4  ;;  %9105 = vmatpush.bf16.msra.mxu3 %v12351_v7 }
 0x171   : > { %v16132_v8 = vld [vmem:[%s18105_s10 + $0x31c] sm:$0xf0] }
 0x172   : > { %v12062_v9 = vld [vmem:[%s18105_s10 + $0x500] sm:$0xf]  ;;  %v11807_v14 = vor.u32 %v16132_v8, %v11806_v6  ;;  %9067 = vmatpush.bf16.msra.mxu0 %v11551_v13 }
 0x173   : > { %v16196_v10 = vld [vmem:[%s18105_s10 + $0x51c] sm:$0xf0] }
 0x174   : > { %v12318_v11 = vld [vmem:[%s18105_s10 + $0x700] sm:$0xf]  ;;  %v12063_v15 = vor.u32 %v16196_v10, %v12062_v9  ;;  %9080 = vmatpush.bf16.msra.mxu1 %v11807_v14 }
 0x175   : > { %v16260_v12 = vld [vmem:[%s18105_s10 + $0x71c] sm:$0xf0] }
 0x176   : > { %v11518_v16 = vld [vmem:[%s18105_s10 + $0xc0] sm:$0xf]  ;;  %v12319_v19 = vor.u32 %v16260_v12, %v12318_v11  ;;  %9093 = vmatpush.bf16.msra.mxu2 %v12063_v15 }
 0x177   : > { %v16060_v17 = vld [vmem:[%s18105_s10 + $0xdc] sm:$0xf0] }
 0x178   : > { %v11774_v18 = vld [vmem:[%s18105_s10 + $0x2c0] sm:$0xf]  ;;  %v11519_v25 = vor.u32 %v16060_v17, %v11518_v16  ;;  %9106 = vmatpush.bf16.msra.mxu3 %v12319_v19 }
 0x179   : > { %v16124_v20 = vld [vmem:[%s18105_s10 + $0x2dc] sm:$0xf0] }
 0x17a   : > { %v12030_v21 = vld [vmem:[%s18105_s10 + $0x4c0] sm:$0xf]  ;;  %v11775_v26 = vor.u32 %v16124_v20, %v11774_v18  ;;  %9068 = vmatpush.bf16.msra.mxu0 %v11519_v25 }
 0x17b   : > { %v16188_v22 = vld [vmem:[%s18105_s10 + $0x4dc] sm:$0xf0] }
 0x17c   : > { %v12286_v23 = vld [vmem:[%s18105_s10 + $0x6c0] sm:$0xf]  ;;  %v12031_v27 = vor.u32 %v16188_v22, %v12030_v21  ;;  %9081 = vmatpush.bf16.msra.mxu1 %v11775_v26 }
 0x17d   : > { %v16252_v24 = vld [vmem:[%s18105_s10 + $0x6dc] sm:$0xf0] }
 0x17e   : > { %v11486_v28 = vld [vmem:[%s18105_s10 + $0x80] sm:$0xf]  ;;  %v12287_v31 = vor.u32 %v16252_v24, %v12286_v23  ;;  %9094 = vmatpush.bf16.msra.mxu2 %v12031_v27  ;;  %v2081_v27 = vld [vmem:[%s18087_s13 + $0x8] sm:$0xff] }
 0x17f   : > { %v16052_v29 = vld [vmem:[%s18105_s10 + $0x9c] sm:$0xf0] }
 0x180   : > { %v11742_v30 = vld [vmem:[%s18105_s10 + $0x280] sm:$0xf]  ;;  %v11487_v37 = vor.u32 %v16052_v29, %v11486_v28  ;;  %9107 = vmatpush.bf16.msra.mxu3 %v12287_v31 }
 0x181   : > { %v16116_v32 = vld [vmem:[%s18105_s10 + $0x29c] sm:$0xf0] }
 0x182   : > { %v11998_v33 = vld [vmem:[%s18105_s10 + $0x480] sm:$0xf]  ;;  %v11743_v38 = vor.u32 %v16116_v32, %v11742_v30  ;;  %9069 = vmatpush.bf16.msra.mxu0 %v11487_v37  ;;  %v3252_v32 = vunpack.c.l.b16 %v2081_v27 }
 0x183   : > { %v16180_v34 = vld [vmem:[%s18105_s10 + $0x49c] sm:$0xf0] }
 0x184   : > { %v12254_v35 = vld [vmem:[%s18105_s10 + $0x680] sm:$0xf]  ;;  %v11999_v39 = vor.u32 %v16180_v34, %v11998_v33  ;;  %9082 = vmatpush.bf16.msra.mxu1 %v11743_v38  ;;  %v3253_v33 = vunpack.c.h.b16 %v2081_v27  ;;  %v18197_v37 = vpack.c.b16 %v3252_v32, %v3252_v32 }
 0x185   : > { %v16244_v36 = vld [vmem:[%s18105_s10 + $0x69c] sm:$0xf0] }
 0x186   : > { %v11454_v40 = vld [vmem:[%s18105_s10 + $0x40] sm:$0xf]  ;;  %v12255_v43 = vor.u32 %v16244_v36, %v12254_v35  ;;  %9095 = vmatpush.bf16.msra.mxu2 %v11999_v39  ;;  %v18200_v39 = vpack.c.b16 %v3253_v33, %v3253_v33 }
 0x187   : > { %v16044_v41 = vld [vmem:[%s18105_s10 + $0x5c] sm:$0xf0] }
 0x188   : > { %v11710_v42 = vld [vmem:[%s18105_s10 + $0x240] sm:$0xf]  ;;  %v11455_v49 = vor.u32 %v16044_v41, %v11454_v40  ;;  %9108 = vmatpush.bf16.msra.mxu3 %v12255_v43 }
 0x189   : > { %v16108_v44 = vld [vmem:[%s18105_s10 + $0x25c] sm:$0xf0] }
 0x18a   : > { %v11966_v45 = vld [vmem:[%s18105_s10 + $0x440] sm:$0xf]  ;;  %v11711_v52 = vor.u32 %v16108_v44, %v11710_v42  ;;  %9070 = vmatpush.bf16.msra.mxu0 %v11455_v49 }
 0x18b   : > { %v16172_v46 = vld [vmem:[%s18105_s10 + $0x45c] sm:$0xf0] }
 0x18c   : > { %v12222_v47 = vld [vmem:[%s18105_s10 + $0x640] sm:$0xf]  ;;  %v11967_v53 = vor.u32 %v16172_v46, %v11966_v45  ;;  %9083 = vmatpush.bf16.msra.mxu1 %v11711_v52 }
 0x18d   : > { %v16236_v48 = vld [vmem:[%s18105_s10 + $0x65c] sm:$0xf0] }
 0x18e   : > { %v11422_v50 = vld [vmem:[%s18105_s10] sm:$0xf]  ;;  %v12223_v57 = vor.u32 %v16236_v48, %v12222_v47  ;;  %9096 = vmatpush.bf16.msra.mxu2 %v11967_v53 }
 0x18f   : > { %v16036_v51 = vld [vmem:[%s18105_s10 + $0x1c] sm:$0xf0] }
 0x190   : > { %v11678_v54 = vld [vmem:[%s18105_s10 + $0x200] sm:$0xf]  ;;  %v11423_v0 = vor.u32 %v16036_v51, %v11422_v50  ;;  %9109 = vmatpush.bf16.msra.mxu3 %v12223_v57 }
 0x191   : > { %v16100_v55 = vld [vmem:[%s18105_s10 + $0x21c] sm:$0xf0] }
 0x192   : > { %v11934_v56 = vld [vmem:[%s18105_s10 + $0x400] sm:$0xf]  ;;  %v11679_v4 = vor.u32 %v16100_v55, %v11678_v54  ;;  %9071 = vmatpush.bf16.msra.mxu0 %v11423_v0 }
 0x193   : > { %v16164_v58 = vld [vmem:[%s18105_s10 + $0x41c] sm:$0xf0] }
 0x194   : > { %v12190_v59 = vld [vmem:[%s18105_s10 + $0x600] sm:$0xf]  ;;  %v11935_v5 = vor.u32 %v16164_v58, %v11934_v56  ;;  %9084 = vmatpush.bf16.msra.mxu1 %v11679_v4 }
 0x195   : > { %v16228_v60 = vld [vmem:[%s18105_s10 + $0x61c] sm:$0xf0] }
 0x196   : > { %v12670_v61 = vld [vmem:[%s18105_s10 + $0x9c0] sm:$0xf]  ;;  %v12191_v8 = vor.u32 %v16228_v60, %v12190_v59  ;;  %9097 = vmatpush.bf16.msra.mxu2 %v11935_v5 }
 0x197   : > { %v16348_v62 = vld [vmem:[%s18105_s10 + $0x9dc] sm:$0xf0] }
 0x198   : > { %v12926_v63 = vld [vmem:[%s18105_s10 + $0xbc0] sm:$0xf]  ;;  %v12671_v9 = vor.u32 %v16348_v62, %v12670_v61  ;;  %9110 = vmatpush.bf16.msra.mxu3 %v12191_v8 }
 0x199   : > { %v16412_v1 = vld [vmem:[%s18105_s10 + $0xbdc] sm:$0xf0]  ;;  %9098 = vmatmul.bf16.vlgmr.msra.gmra.mxu2 %v18197_v37 }
 0x19a   : > { %v13182_v2 = vld [vmem:[%s18105_s10 + $0xdc0] sm:$0xf]  ;;  %v12927_v10 = vor.u32 %v16412_v1, %v12926_v63  ;;  %9116 = vmatpush.bf16.msrb.mxu0 %v12671_v9 }
 0x19b   : > { %v16476_v3 = vld [vmem:[%s18105_s10 + $0xddc] sm:$0xf0]  ;;  %9111 = vmatmul.bf16.vlgmr.msra.gmra.mxu3 %v18200_v39 }
 0x19c   : > { %v13438_v6 = vld [vmem:[%s18105_s10 + $0xfc0] sm:$0xf]  ;;  %v13183_v11 = vor.u32 %v16476_v3, %v13182_v2  ;;  %9129 = vmatpush.bf16.msrb.mxu1 %v12927_v10 }
 0x19d   : > { %v16540_v7 = vld [vmem:[%s18105_s10 + $0xfdc] sm:$0xf0] }
 0x19e   : > { %v12638_v12 = vld [vmem:[%s18105_s10 + $0x980] sm:$0xf]  ;;  %v13439_v15 = vor.u32 %v16540_v7, %v13438_v6  ;;  %9142 = vmatpush.bf16.msrb.mxu2 %v13183_v11 }
 0x19f   : > { %v16340_v13 = vld [vmem:[%s18105_s10 + $0x99c] sm:$0xf0] }
 0x1a0   : > { %v12894_v14 = vld [vmem:[%s18105_s10 + $0xb80] sm:$0xf]  ;;  %v12639_v21 = vor.u32 %v16340_v13, %v12638_v12  ;;  %9155 = vmatpush.bf16.msrb.mxu3 %v13439_v15 }
 0x1a1   : > { %v16404_v16 = vld [vmem:[%s18105_s10 + $0xb9c] sm:$0xf0] }
 0x1a2   : > { %v13150_v17 = vld [vmem:[%s18105_s10 + $0xd80] sm:$0xf]  ;;  %v12895_v23 = vor.u32 %v16404_v16, %v12894_v14  ;;  %9117 = vmatpush.bf16.msrb.mxu0 %v12639_v21 }
 0x1a3   : > { %v16468_v18 = vld [vmem:[%s18105_s10 + $0xd9c] sm:$0xf0] }
 0x1a4   : > { %v13406_v19 = vld [vmem:[%s18105_s10 + $0xf80] sm:$0xf]  ;;  %v13151_v24 = vor.u32 %v16468_v18, %v13150_v17  ;;  %9130 = vmatpush.bf16.msrb.mxu1 %v12895_v23 }
 0x1a5   : > { %v16532_v20 = vld [vmem:[%s18105_s10 + $0xf9c] sm:$0xf0] }
 0x1a6   : > { %v12606_v22 = vld [vmem:[%s18105_s10 + $0x940] sm:$0xf]  ;;  %v13407_v28 = vor.u32 %v16532_v20, %v13406_v19  ;;  %9143 = vmatpush.bf16.msrb.mxu2 %v13151_v24 }
 0x1a7   : > { %v16332_v25 = vld [vmem:[%s18105_s10 + $0x95c] sm:$0xf0] }
 0x1a8   : > { %v12862_v26 = vld [vmem:[%s18105_s10 + $0xb40] sm:$0xf]  ;;  %v12607_v36 = vor.u32 %v16332_v25, %v12606_v22  ;;  %9156 = vmatpush.bf16.msrb.mxu3 %v13407_v28 }
 0x1a9   : > { %v16396_v29 = vld [vmem:[%s18105_s10 + $0xb5c] sm:$0xf0] }
 0x1aa   : > { %v13118_v30 = vld [vmem:[%s18105_s10 + $0xd40] sm:$0xf]  ;;  %v12863_v40 = vor.u32 %v16396_v29, %v12862_v26  ;;  %9118 = vmatpush.bf16.msrb.mxu0 %v12607_v36  ;;  %v2083_v36 = vld [vmem:[%s18087_s13 + $0x18] sm:$0xff] }
 0x1ab   : > { %v16460_v31 = vld [vmem:[%s18105_s10 + $0xd5c] sm:$0xf0] }
 0x1ac   : > { %v13374_v34 = vld [vmem:[%s18105_s10 + $0xf40] sm:$0xf]  ;;  %v13119_v41 = vor.u32 %v16460_v31, %v13118_v30  ;;  %9131 = vmatpush.bf16.msrb.mxu1 %v12863_v40 }
 0x1ad   : > { %v16524_v35 = vld [vmem:[%s18105_s10 + $0xf5c] sm:$0xf0] }
 0x1ae   : > { %v2080_v38 = vld [vmem:[%s18087_s13] sm:$0xff]  ;;  %v13375_v47 = vor.u32 %v16524_v35, %v13374_v34  ;;  %9144 = vmatpush.bf16.msrb.mxu2 %v13119_v41 }
 0x1af   : > { %v12574_v42 = vld [vmem:[%s18105_s10 + $0x900] sm:$0xf]  ;;  %v3250_v45 = vunpack.c.l.b16 %v2080_v38  ;;  %v3251_v46 = vunpack.c.h.b16 %v2080_v38 }
 0x1b0   : > { %v16324_v43 = vld [vmem:[%s18105_s10 + $0x91c] sm:$0xf0]  ;;  %9157 = vmatpush.bf16.msrb.mxu3 %v13375_v47 }
 0x1b1   : > { %v12830_v44 = vld [vmem:[%s18105_s10 + $0xb00] sm:$0xf]  ;;  %v18211_v53 = vpack.c.b16 %v3250_v45, %v3250_v45  ;;  %v18214_v54 = vpack.c.b16 %v3251_v46, %v3251_v46  ;;  %v12575_v55 = vor.u32 %v16324_v43, %v12574_v42  ;;  %v2082_v42 = vld [vmem:[%s18087_s13 + $0x10] sm:$0xff] }
 0x1b2   : > { %v16388_v48 = vld [vmem:[%s18105_s10 + $0xb1c] sm:$0xf0] }
 0x1b3   : > { %v13086_v49 = vld [vmem:[%s18105_s10 + $0xd00] sm:$0xf]  ;;  %v12831_v56 = vor.u32 %v16388_v48, %v12830_v44  ;;  %9072 = vmatmul.bf16.vlgmr.msra.gmra.mxu0 %v18211_v53  ;;  %9085 = vmatmul.bf16.vlgmr.msra.gmra.mxu1 %v18214_v54 }
 0x1b4   : > { %v16452_v50 = vld [vmem:[%s18105_s10 + $0xd1c] sm:$0xf0]  ;;  %9119 = vmatpush.bf16.msrb.mxu0 %v12575_v55 }
 0x1b5   : > { %v13342_v51 = vld [vmem:[%s18105_s10 + $0xf00] sm:$0xf]  ;;  %v13087_v57 = vor.u32 %v16452_v50, %v13086_v49  ;;  %9132 = vmatpush.bf16.msrb.mxu1 %v12831_v56  ;;  %v3256_v50 = vunpack.c.l.b16 %v2083_v36 }
 0x1b6   : > { %v16516_v52 = vld [vmem:[%s18105_s10 + $0xf1c] sm:$0xf0] }
 0x1b7   : > { %v12542_v58 = vld [vmem:[%s18105_s10 + $0x8c0] sm:$0xf]  ;;  %v13343_v61 = vor.u32 %v16516_v52, %v13342_v51  ;;  %9145 = vmatpush.bf16.msrb.mxu2 %v13087_v57  ;;  %v3254_v57 = vunpack.c.l.b16 %v2082_v42 }
 0x1b8   : > { %v16316_v59 = vld [vmem:[%s18105_s10 + $0x8dc] sm:$0xf0] }
 0x1b9   : > { %v12798_v60 = vld [vmem:[%s18105_s10 + $0xac0] sm:$0xf]  ;;  %v12543_v3 = vor.u32 %v16316_v59, %v12542_v58  ;;  %9158 = vmatpush.bf16.msrb.mxu3 %v13343_v61  ;;  %v3257_v58 = vunpack.c.h.b16 %v2083_v36  ;;  %v3255_v61 = vunpack.c.h.b16 %v2082_v42 }
 0x1ba   : > { %v16380_v62 = vld [vmem:[%s18105_s10 + $0xadc] sm:$0xf0] }
 0x1bb   : > { %v13054_v63 = vld [vmem:[%s18105_s10 + $0xcc0] sm:$0xf]  ;;  %v12799_v4 = vor.u32 %v16380_v62, %v12798_v60  ;;  %9120 = vmatpush.bf16.msrb.mxu0 %v12543_v3 }
 0x1bc   : > { %v16444_v0 = vld [vmem:[%s18105_s10 + $0xcdc] sm:$0xf0] }
 0x1bd   : > { %v13310_v1 = vld [vmem:[%s18105_s10 + $0xec0] sm:$0xf]  ;;  %v13055_v5 = vor.u32 %v16444_v0, %v13054_v63  ;;  %9133 = vmatpush.bf16.msrb.mxu1 %v12799_v4 }
 0x1be   : > { %v16508_v2 = vld [vmem:[%s18105_s10 + $0xedc] sm:$0xf0] }
 0x1bf   : > { %v12510_v6 = vld [vmem:[%s18105_s10 + $0x880] sm:$0xf]  ;;  %v13311_v9 = vor.u32 %v16508_v2, %v13310_v1  ;;  %9146 = vmatpush.bf16.msrb.mxu2 %v13055_v5 }
 0x1c0   : > { %v16308_v7 = vld [vmem:[%s18105_s10 + $0x89c] sm:$0xf0] }
 0x1c1   : > { %v12766_v8 = vld [vmem:[%s18105_s10 + $0xa80] sm:$0xf]  ;;  %v12511_v15 = vor.u32 %v16308_v7, %v12510_v6  ;;  %9159 = vmatpush.bf16.msrb.mxu3 %v13311_v9  ;;  %v18266_v7 = vpack.c.b16 %v3256_v50, %v3256_v50 }
 0x1c2   : > { %v16372_v10 = vld [vmem:[%s18105_s10 + $0xa9c] sm:$0xf0] }
 0x1c3   : > { %v13022_v11 = vld [vmem:[%s18105_s10 + $0xc80] sm:$0xf]  ;;  %v12767_v16 = vor.u32 %v16372_v10, %v12766_v8  ;;  %9121 = vmatpush.bf16.msrb.mxu0 %v12511_v15  ;;  %v18270_v10 = vpack.c.b16 %v3254_v57, %v3254_v57 }
 0x1c4   : > { %v16436_v12 = vld [vmem:[%s18105_s10 + $0xc9c] sm:$0xf0] }
 0x1c5   : > { %v13278_v13 = vld [vmem:[%s18105_s10 + $0xe80] sm:$0xf]  ;;  %v13023_v17 = vor.u32 %v16436_v12, %v13022_v11  ;;  %9134 = vmatpush.bf16.msrb.mxu1 %v12767_v16  ;;  %v18272_v11 = vpack.c.b16 %v3257_v58, %v3257_v58 }
 0x1c6   : > { %v16500_v14 = vld [vmem:[%s18105_s10 + $0xe9c] sm:$0xf0] }
 0x1c7   : > { %v12478_v18 = vld [vmem:[%s18105_s10 + $0x840] sm:$0xf]  ;;  %v13279_v21 = vor.u32 %v16500_v14, %v13278_v13  ;;  %9147 = vmatpush.bf16.msrb.mxu2 %v13023_v17  ;;  %v18274_v13 = vpack.c.b16 %v3255_v61, %v3255_v61 }
 0x1c8   : > { %v16300_v19 = vld [vmem:[%s18105_s10 + $0x85c] sm:$0xf0] }
 0x1c9   : > { %v12734_v20 = vld [vmem:[%s18105_s10 + $0xa40] sm:$0xf]  ;;  %v12479_v28 = vor.u32 %v16300_v19, %v12478_v18  ;;  %9160 = vmatpush.bf16.msrb.mxu3 %v13279_v21 }
 0x1ca   : > { %v16364_v22 = vld [vmem:[%s18105_s10 + $0xa5c] sm:$0xf0] }
 0x1cb   : > { %v12990_v23 = vld [vmem:[%s18105_s10 + $0xc40] sm:$0xf]  ;;  %v12735_v32 = vor.u32 %v16364_v22, %v12734_v20  ;;  %9122 = vmatpush.bf16.msrb.mxu0 %v12479_v28 }
 0x1cc   : > { %v16428_v24 = vld [vmem:[%s18105_s10 + $0xc5c] sm:$0xf0] }
 0x1cd   : > { %v13246_v25 = vld [vmem:[%s18105_s10 + $0xe40] sm:$0xf]  ;;  %v12991_v33 = vor.u32 %v16428_v24, %v12990_v23  ;;  %9135 = vmatpush.bf16.msrb.mxu1 %v12735_v32 }
 0x1ce   : > { %v16492_v26 = vld [vmem:[%s18105_s10 + $0xe5c] sm:$0xf0] }
 0x1cf   : > { %v12446_v27 = vld [vmem:[%s18105_s10 + $0x800] sm:$0xf]  ;;  %v13247_v38 = vor.u32 %v16492_v26, %v13246_v25  ;;  %9148 = vmatpush.bf16.msrb.mxu2 %v12991_v33 }
 0x1d0   : > { %v16292_v29 = vld [vmem:[%s18105_s10 + $0x81c] sm:$0xf0] }
 0x1d1   : > { %v12702_v30 = vld [vmem:[%s18105_s10 + $0xa00] sm:$0xf]  ;;  %v12447_v46 = vor.u32 %v16292_v29, %v12446_v27  ;;  %9161 = vmatpush.bf16.msrb.mxu3 %v13247_v38 }
 0x1d2   : > { %v16356_v31 = vld [vmem:[%s18105_s10 + $0xa1c] sm:$0xf0] }
 0x1d3   : > { %v12958_v34 = vld [vmem:[%s18105_s10 + $0xc00] sm:$0xf]  ;;  %v12703_v51 = vor.u32 %v16356_v31, %v12702_v30  ;;  %9123 = vmatpush.bf16.msrb.mxu0 %v12447_v46 }
 0x1d4   : > { %v16420_v35 = vld [vmem:[%s18105_s10 + $0xc1c] sm:$0xf0] }
 0x1d5   : > { %v13214_v40 = vld [vmem:[%s18105_s10 + $0xe00] sm:$0xf]  ;;  %v12959_v52 = vor.u32 %v16420_v35, %v12958_v34  ;;  %9136 = vmatpush.bf16.msrb.mxu1 %v12703_v51 }
 0x1d6   : > { %v16484_v41 = vld [vmem:[%s18105_s10 + $0xe1c] sm:$0xf0]  ;;  %9124 = vmatmul.bf16.vlgmr.msrb.gmra.mxu0 %v18270_v10 }
 0x1d7   : > { %v13694_v43 = vld [vmem:[%s18105_s10 + $0x11c0] sm:$0xf]  ;;  %v13215_v59 = vor.u32 %v16484_v41, %v13214_v40  ;;  %9149 = vmatpush.bf16.msrb.mxu2 %v12959_v52 }
 0x1d8   : > { %v16604_v44 = vld [vmem:[%s18105_s10 + $0x11dc] sm:$0xf0]  ;;  %9137 = vmatmul.bf16.vlgmr.msrb.gmra.mxu1 %v18274_v13 }
 0x1d9   : > { %v13950_v45 = vld [vmem:[%s18105_s10 + $0x13c0] sm:$0xf]  ;;  %v13695_v60 = vor.u32 %v16604_v44, %v13694_v43  ;;  %9162 = vmatpush.bf16.msrb.mxu3 %v13215_v59 }
 0x1da   : > { %v16668_v47 = vld [vmem:[%s18105_s10 + $0x13dc] sm:$0xf0]  ;;  %9150 = vmatmul.bf16.vlgmr.msrb.gmra.mxu2 %v18266_v7 }
 0x1db   : > { %v14206_v48 = vld [vmem:[%s18105_s10 + $0x15c0] sm:$0xf]  ;;  %v13951_v62 = vor.u32 %v16668_v47, %v13950_v45  ;;  %9168 = vmatpush.bf16.msra.mxu0 %v13695_v60 }
 0x1dc   : > { %v16732_v49 = vld [vmem:[%s18105_s10 + $0x15dc] sm:$0xf0]  ;;  %9163 = vmatmul.bf16.vlgmr.msrb.gmra.mxu3 %v18272_v11 }
 0x1dd   : > { %v14462_v55 = vld [vmem:[%s18105_s10 + $0x17c0] sm:$0xf]  ;;  %v14207_v63 = vor.u32 %v16732_v49, %v14206_v48  ;;  %9181 = vmatpush.bf16.msra.mxu1 %v13951_v62 }
 0x1de   : > { %v16796_v56 = vld [vmem:[%s18105_s10 + $0x17dc] sm:$0xf0] }
 0x1df   : > { %v13662_v0 = vld [vmem:[%s18105_s10 + $0x1180] sm:$0xf]  ;;  %v14463_v3 = vor.u32 %v16796_v56, %v14462_v55  ;;  %9194 = vmatpush.bf16.msra.mxu2 %v14207_v63 }
 0x1e0   : > { %v16596_v1 = vld [vmem:[%s18105_s10 + $0x119c] sm:$0xf0] }
 0x1e1   : > { %v13918_v2 = vld [vmem:[%s18105_s10 + $0x1380] sm:$0xf]  ;;  %v13663_v12 = vor.u32 %v16596_v1, %v13662_v0  ;;  %9207 = vmatpush.bf16.msra.mxu3 %v14463_v3 }
 0x1e2   : > { %v16660_v4 = vld [vmem:[%s18105_s10 + $0x139c] sm:$0xf0] }
 0x1e3   : > { %v14174_v5 = vld [vmem:[%s18105_s10 + $0x1580] sm:$0xf]  ;;  %v13919_v14 = vor.u32 %v16660_v4, %v13918_v2  ;;  %9169 = vmatpush.bf16.msra.mxu0 %v13663_v12 }
 0x1e4   : > { %v16724_v6 = vld [vmem:[%s18105_s10 + $0x159c] sm:$0xf0] }
 0x1e5   : > { %v14430_v8 = vld [vmem:[%s18105_s10 + $0x1780] sm:$0xf]  ;;  %v14175_v15 = vor.u32 %v16724_v6, %v14174_v5  ;;  %9182 = vmatpush.bf16.msra.mxu1 %v13919_v14 }
 0x1e6   : > { %v16788_v9 = vld [vmem:[%s18105_s10 + $0x179c] sm:$0xf0] }
 0x1e7   : > { %v13630_v16 = vld [vmem:[%s18105_s10 + $0x1140] sm:$0xf]  ;;  %v14431_v19 = vor.u32 %v16788_v9, %v14430_v8  ;;  %9195 = vmatpush.bf16.msra.mxu2 %v14175_v15 }
 0x1e8   : > { %v16588_v17 = vld [vmem:[%s18105_s10 + $0x115c] sm:$0xf0] }
 0x1e9   : > { %v13886_v18 = vld [vmem:[%s18105_s10 + $0x1340] sm:$0xf]  ;;  %v13631_v25 = vor.u32 %v16588_v17, %v13630_v16  ;;  %9208 = vmatpush.bf16.msra.mxu3 %v14431_v19 }
 0x1ea   : > { %v16652_v20 = vld [vmem:[%s18105_s10 + $0x135c] sm:$0xf0] }
 0x1eb   : > { %v14142_v21 = vld [vmem:[%s18105_s10 + $0x1540] sm:$0xf]  ;;  %v13887_v26 = vor.u32 %v16652_v20, %v13886_v18  ;;  %9170 = vmatpush.bf16.msra.mxu0 %v13631_v25 }
 0x1ec   : > { %v16716_v22 = vld [vmem:[%s18105_s10 + $0x155c] sm:$0xf0] }
 0x1ed   : > { %v14398_v23 = vld [vmem:[%s18105_s10 + $0x1740] sm:$0xf]  ;;  %v14143_v27 = vor.u32 %v16716_v22, %v14142_v21  ;;  %9183 = vmatpush.bf16.msra.mxu1 %v13887_v26 }
 0x1ee   : > { %v16780_v24 = vld [vmem:[%s18105_s10 + $0x175c] sm:$0xf0] }
 0x1ef   : > { %v13598_v28 = vld [vmem:[%s18105_s10 + $0x1100] sm:$0xf]  ;;  %v14399_v31 = vor.u32 %v16780_v24, %v14398_v23  ;;  %9196 = vmatpush.bf16.msra.mxu2 %v14143_v27 }
 0x1f0   : > { %v16580_v29 = vld [vmem:[%s18105_s10 + $0x111c] sm:$0xf0] }
 0x1f1   : > { %v13854_v30 = vld [vmem:[%s18105_s10 + $0x1300] sm:$0xf]  ;;  %v13599_v38 = vor.u32 %v16580_v29, %v13598_v28  ;;  %9209 = vmatpush.bf16.msra.mxu3 %v14399_v31 }
 0x1f2   : > { %v16644_v32 = vld [vmem:[%s18105_s10 + $0x131c] sm:$0xf0] }
 0x1f3   : > { %v14110_v33 = vld [vmem:[%s18105_s10 + $0x1500] sm:$0xf]  ;;  %v13855_v40 = vor.u32 %v16644_v32, %v13854_v30  ;;  %9171 = vmatpush.bf16.msra.mxu0 %v13599_v38  ;;  %v2085_v30 = vld [vmem:[%s18087_s13 + $0x28] sm:$0xff] }
 0x1f4   : > { %v16708_v34 = vld [vmem:[%s18105_s10 + $0x151c] sm:$0xf0] }
 0x1f5   : > { %v14366_v35 = vld [vmem:[%s18105_s10 + $0x1700] sm:$0xf]  ;;  %v14111_v41 = vor.u32 %v16708_v34, %v14110_v33  ;;  %9184 = vmatpush.bf16.msra.mxu1 %v13855_v40 }
 0x1f6   : > { %v16772_v36 = vld [vmem:[%s18105_s10 + $0x171c] sm:$0xf0] }
 0x1f7   : > { %v13566_v42 = vld [vmem:[%s18105_s10 + $0x10c0] sm:$0xf]  ;;  %v14367_v45 = vor.u32 %v16772_v36, %v14366_v35  ;;  %9197 = vmatpush.bf16.msra.mxu2 %v14111_v41 }
 0x1f8   : > { %v16572_v43 = vld [vmem:[%s18105_s10 + $0x10dc] sm:$0xf0] }
 0x1f9   : > { %v13822_v44 = vld [vmem:[%s18105_s10 + $0x12c0] sm:$0xf]  ;;  %v13567_v51 = vor.u32 %v16572_v43, %v13566_v42  ;;  %9210 = vmatpush.bf16.msra.mxu3 %v14367_v45  ;;  %v3260_v45 = vunpack.c.l.b16 %v2085_v30 }
 0x1fa   : > { %v16636_v46 = vld [vmem:[%s18105_s10 + $0x12dc] sm:$0xf0] }
 0x1fb   : > { %v14078_v47 = vld [vmem:[%s18105_s10 + $0x14c0] sm:$0xf]  ;;  %v13823_v52 = vor.u32 %v16636_v46, %v13822_v44  ;;  %9172 = vmatpush.bf16.msra.mxu0 %v13567_v51 }
 0x1fc   : > { %v16700_v48 = vld [vmem:[%s18105_s10 + $0x14dc] sm:$0xf0] }
 0x1fd   : > { %v14334_v49 = vld [vmem:[%s18105_s10 + $0x16c0] sm:$0xf]  ;;  %v14079_v55 = vor.u32 %v16700_v48, %v14078_v47  ;;  %9185 = vmatpush.bf16.msra.mxu1 %v13823_v52 }
 0x1fe   : > { %v16764_v50 = vld [vmem:[%s18105_s10 + $0x16dc] sm:$0xf0] }
 0x1ff   : > { %v13534_v56 = vld [vmem:[%s18105_s10 + $0x1080] sm:$0xf]  ;;  %v14335_v59 = vor.u32 %v16764_v50, %v14334_v49  ;;  %9198 = vmatpush.bf16.msra.mxu2 %v14079_v55  ;;  %v3261_v49 = vunpack.c.h.b16 %v2085_v30 }
 0x200   : > { %v16564_v57 = vld [vmem:[%s18105_s10 + $0x109c] sm:$0xf0] }
 0x201   : > { %v13790_v58 = vld [vmem:[%s18105_s10 + $0x1280] sm:$0xf]  ;;  %v13535_v1 = vor.u32 %v16564_v57, %v13534_v56  ;;  %9211 = vmatpush.bf16.msra.mxu3 %v14335_v59 }
 0x202   : > { %v16628_v60 = vld [vmem:[%s18105_s10 + $0x129c] sm:$0xf0] }
 0x203   : > { %v14046_v61 = vld [vmem:[%s18105_s10 + $0x1480] sm:$0xf]  ;;  %v13791_v2 = vor.u32 %v16628_v60, %v13790_v58  ;;  %9173 = vmatpush.bf16.msra.mxu0 %v13535_v1 }
 0x204   : > { %v16692_v62 = vld [vmem:[%s18105_s10 + $0x149c] sm:$0xf0] }
 0x205   : > { %v14302_v63 = vld [vmem:[%s18105_s10 + $0x1680] sm:$0xf]  ;;  %v14047_v3 = vor.u32 %v16692_v62, %v14046_v61  ;;  %9186 = vmatpush.bf16.msra.mxu1 %v13791_v2  ;;  %v18346_v62 = vpack.c.b16 %v3260_v45, %v3260_v45  ;;  %v18352_v2 = vpack.c.b16 %v3261_v49, %v3261_v49 }
 0x206   : > { %v16756_v0 = vld [vmem:[%s18105_s10 + $0x169c] sm:$0xf0] }
 0x207   : > { %v13502_v4 = vld [vmem:[%s18105_s10 + $0x1040] sm:$0xf]  ;;  %v14303_v8 = vor.u32 %v16756_v0, %v14302_v63  ;;  %9199 = vmatpush.bf16.msra.mxu2 %v14047_v3 }
 0x208   : > { %v16556_v5 = vld [vmem:[%s18105_s10 + $0x105c] sm:$0xf0] }
 0x209   : > { %v13758_v6 = vld [vmem:[%s18105_s10 + $0x1240] sm:$0xf]  ;;  %v13503_v18 = vor.u32 %v16556_v5, %v13502_v4  ;;  %9212 = vmatpush.bf16.msra.mxu3 %v14303_v8 }
 0x20a   : > { %v16620_v9 = vld [vmem:[%s18105_s10 + $0x125c] sm:$0xf0] }
 0x20b   : > { %v14014_v12 = vld [vmem:[%s18105_s10 + $0x1440] sm:$0xf]  ;;  %v13759_v22 = vor.u32 %v16620_v9, %v13758_v6  ;;  %9174 = vmatpush.bf16.msra.mxu0 %v13503_v18 }
 0x20c   : > { %v16684_v14 = vld [vmem:[%s18105_s10 + $0x145c] sm:$0xf0] }
 0x20d   : > { %v14270_v15 = vld [vmem:[%s18105_s10 + $0x1640] sm:$0xf]  ;;  %v14015_v23 = vor.u32 %v16684_v14, %v14014_v12  ;;  %9187 = vmatpush.bf16.msra.mxu1 %v13759_v22 }
 0x20e   : > { %v16748_v16 = vld [vmem:[%s18105_s10 + $0x165c] sm:$0xf0] }
 0x20f   : > { %v13470_v17 = vld [vmem:[%s18105_s10 + $0x1000] sm:$0xf]  ;;  %v14271_v27 = vor.u32 %v16748_v16, %v14270_v15  ;;  %9200 = vmatpush.bf16.msra.mxu2 %v14015_v23 }
 0x210   : > { %v16548_v19 = vld [vmem:[%s18105_s10 + $0x101c] sm:$0xf0] }
 0x211   : > { %v13726_v20 = vld [vmem:[%s18105_s10 + $0x1200] sm:$0xf]  ;;  %v13471_v34 = vor.u32 %v16548_v19, %v13470_v17  ;;  %9213 = vmatpush.bf16.msra.mxu3 %v14271_v27 }
 0x212   : > { %v16612_v21 = vld [vmem:[%s18105_s10 + $0x121c] sm:$0xf0] }
 0x213   : > { %v13982_v24 = vld [vmem:[%s18105_s10 + $0x1400] sm:$0xf]  ;;  %v13727_v41 = vor.u32 %v16612_v21, %v13726_v20  ;;  %9175 = vmatpush.bf16.msra.mxu0 %v13471_v34 }
 0x214   : > { %v16676_v25 = vld [vmem:[%s18105_s10 + $0x141c] sm:$0xf0] }
 0x215   : > { %v2084_v26 = vld [vmem:[%s18087_s13 + $0x20] sm:$0xff]  ;;  %v13983_v42 = vor.u32 %v16676_v25, %v13982_v24  ;;  %9188 = vmatpush.bf16.msra.mxu1 %v13727_v41 }
 0x216   : > { %v14238_v28 = vld [vmem:[%s18105_s10 + $0x1600] sm:$0xf]  ;;  %v3258_v40 = vunpack.c.l.b16 %v2084_v26  ;;  %v3259_v46 = vunpack.c.h.b16 %v2084_v26 }
 0x217   : > { %v16740_v29 = vld [vmem:[%s18105_s10 + $0x161c] sm:$0xf0]  ;;  %9201 = vmatpush.bf16.msra.mxu2 %v13983_v42 }
 0x218   : > { %v14718_v31 = vld [vmem:[%s18105_s10 + $0x19c0] sm:$0xf]  ;;  %v14239_v47 = vor.u32 %v16740_v29, %v14238_v28  ;;  %v18341_v58 = vpack.c.b16 %v3258_v40, %v3258_v40  ;;  %v18348_v63 = vpack.c.b16 %v3259_v46, %v3259_v46 }
 0x219   : > { %v16860_v32 = vld [vmem:[%s18105_s10 + $0x19dc] sm:$0xf0] }
 0x21a   : > { %v14974_v33 = vld [vmem:[%s18105_s10 + $0x1bc0] sm:$0xf]  ;;  %v14719_v48 = vor.u32 %v16860_v32, %v14718_v31  ;;  %9214 = vmatpush.bf16.msra.mxu3 %v14239_v47  ;;  %9176 = vmatmul.bf16.vlgmr.msra.gmra.mxu0 %v18341_v58 }
 0x21b   : > { %v16924_v35 = vld [vmem:[%s18105_s10 + $0x1bdc] sm:$0xf0]  ;;  %9202 = vmatmul.bf16.vlgmr.msra.gmra.mxu2 %v18346_v62  ;;  %9189 = vmatmul.bf16.vlgmr.msra.gmra.mxu1 %v18348_v63 }
 0x21c   : > { %v15230_v36 = vld [vmem:[%s18105_s10 + $0x1dc0] sm:$0xf]  ;;  %v14975_v50 = vor.u32 %v16924_v35, %v14974_v33  ;;  %9220 = vmatpush.bf16.msrb.mxu0 %v14719_v48 }
 0x21d   : > { %v16988_v38 = vld [vmem:[%s18105_s10 + $0x1ddc] sm:$0xf0]  ;;  %9215 = vmatmul.bf16.vlgmr.msra.gmra.mxu3 %v18352_v2 }
 0x21e   : > { %v15486_v43 = vld [vmem:[%s18105_s10 + $0x1fc0] sm:$0xf]  ;;  %v15231_v51 = vor.u32 %v16988_v38, %v15230_v36  ;;  %9233 = vmatpush.bf16.msrb.mxu1 %v14975_v50 }
 0x21f   : > { %v17052_v44 = vld [vmem:[%s18105_s10 + $0x1fdc] sm:$0xf0] }
 0x220   : > { %v14686_v52 = vld [vmem:[%s18105_s10 + $0x1980] sm:$0xf]  ;;  %v15487_v57 = vor.u32 %v17052_v44, %v15486_v43  ;;  %9246 = vmatpush.bf16.msrb.mxu2 %v15231_v51 }
 0x221   : > { %v16852_v55 = vld [vmem:[%s18105_s10 + $0x199c] sm:$0xf0] }
 0x222   : > { %v14942_v56 = vld [vmem:[%s18105_s10 + $0x1b80] sm:$0xf]  ;;  %v14687_v3 = vor.u32 %v16852_v55, %v14686_v52  ;;  %9259 = vmatpush.bf16.msrb.mxu3 %v15487_v57 }
 0x223   : > { %v16916_v59 = vld [vmem:[%s18105_s10 + $0x1b9c] sm:$0xf0] }
 0x224   : > { %v15198_v60 = vld [vmem:[%s18105_s10 + $0x1d80] sm:$0xf]  ;;  %v14943_v4 = vor.u32 %v16916_v59, %v14942_v56  ;;  %9221 = vmatpush.bf16.msrb.mxu0 %v14687_v3 }
 0x225   : > { %v16980_v61 = vld [vmem:[%s18105_s10 + $0x1d9c] sm:$0xf0] }
 0x226   : > { %v15454_v0 = vld [vmem:[%s18105_s10 + $0x1f80] sm:$0xf]  ;;  %v15199_v5 = vor.u32 %v16980_v61, %v15198_v60  ;;  %9234 = vmatpush.bf16.msrb.mxu1 %v14943_v4 }
 0x227   : > { %v17044_v1 = vld [vmem:[%s18105_s10 + $0x1f9c] sm:$0xf0] }
 0x228   : > { %v14654_v6 = vld [vmem:[%s18105_s10 + $0x1940] sm:$0xf]  ;;  %v15455_v12 = vor.u32 %v17044_v1, %v15454_v0  ;;  %9247 = vmatpush.bf16.msrb.mxu2 %v15199_v5 }
 0x229   : > { %v16844_v8 = vld [vmem:[%s18105_s10 + $0x195c] sm:$0xf0] }
 0x22a   : > { %v14910_v9 = vld [vmem:[%s18105_s10 + $0x1b40] sm:$0xf]  ;;  %v14655_v19 = vor.u32 %v16844_v8, %v14654_v6  ;;  %9260 = vmatpush.bf16.msrb.mxu3 %v15455_v12 }
 0x22b   : > { %v16908_v14 = vld [vmem:[%s18105_s10 + $0x1b5c] sm:$0xf0] }
 0x22c   : > { %v15166_v15 = vld [vmem:[%s18105_s10 + $0x1d40] sm:$0xf]  ;;  %v14911_v20 = vor.u32 %v16908_v14, %v14910_v9  ;;  %9222 = vmatpush.bf16.msrb.mxu0 %v14655_v19 }
 0x22d   : > { %v16972_v16 = vld [vmem:[%s18105_s10 + $0x1d5c] sm:$0xf0] }
 0x22e   : > { %v15422_v17 = vld [vmem:[%s18105_s10 + $0x1f40] sm:$0xf]  ;;  %v15167_v21 = vor.u32 %v16972_v16, %v15166_v15  ;;  %9235 = vmatpush.bf16.msrb.mxu1 %v14911_v20 }
 0x22f   : > { %v17036_v18 = vld [vmem:[%s18105_s10 + $0x1f5c] sm:$0xf0] }
 0x230   : > { %v14622_v22 = vld [vmem:[%s18105_s10 + $0x1900] sm:$0xf]  ;;  %v15423_v25 = vor.u32 %v17036_v18, %v15422_v17  ;;  %9248 = vmatpush.bf16.msrb.mxu2 %v15167_v21 }
 0x231   : > { %v16836_v23 = vld [vmem:[%s18105_s10 + $0x191c] sm:$0xf0] }
 0x232   : > { %v14878_v24 = vld [vmem:[%s18105_s10 + $0x1b00] sm:$0xf]  ;;  %v14623_v31 = vor.u32 %v16836_v23, %v14622_v22  ;;  %9261 = vmatpush.bf16.msrb.mxu3 %v15423_v25 }
 0x233   : > { %v16900_v26 = vld [vmem:[%s18105_s10 + $0x1b1c] sm:$0xf0] }
 0x234   : > { %v15134_v27 = vld [vmem:[%s18105_s10 + $0x1d00] sm:$0xf]  ;;  %v14879_v32 = vor.u32 %v16900_v26, %v14878_v24  ;;  %9223 = vmatpush.bf16.msrb.mxu0 %v14623_v31  ;;  %v2086_v24 = vld [vmem:[%s18087_s13 + $0x30] sm:$0xff] }
 0x235   : > { %v16964_v28 = vld [vmem:[%s18105_s10 + $0x1d1c] sm:$0xf0] }
 0x236   : > { %v15390_v29 = vld [vmem:[%s18105_s10 + $0x1f00] sm:$0xf]  ;;  %v15135_v33 = vor.u32 %v16964_v28, %v15134_v27  ;;  %9236 = vmatpush.bf16.msrb.mxu1 %v14879_v32  ;;  %v2087_v28 = vld [vmem:[%s18087_s13 + $0x38] sm:$0xff] }
 0x237   : > { %v17028_v30 = vld [vmem:[%s18105_s10 + $0x1f1c] sm:$0xf0] }
 0x238   : > { %v14590_v34 = vld [vmem:[%s18105_s10 + $0x18c0] sm:$0xf]  ;;  %v15391_v38 = vor.u32 %v17028_v30, %v15390_v29  ;;  %9249 = vmatpush.bf16.msrb.mxu2 %v15135_v33 }
 0x239   : > { %v16828_v35 = vld [vmem:[%s18105_s10 + $0x18dc] sm:$0xf0] }
 0x23a   : > { %v14846_v36 = vld [vmem:[%s18105_s10 + $0x1ac0] sm:$0xf]  ;;  %v14591_v45 = vor.u32 %v16828_v35, %v14590_v34  ;;  %9262 = vmatpush.bf16.msrb.mxu3 %v15391_v38  ;;  %v16088_v34 = vld [vmem:[%s18105_s10 + $0x1c4] sm:$0xf] }
 0x23b   : > { %v16892_v40 = vld [vmem:[%s18105_s10 + $0x1adc] sm:$0xf0]  ;;  %v11648_v35 = vld [vmem:[%s18105_s10 + $0x1e0] sm:$0xf0] }
 0x23c   : > { %v15102_v41 = vld [vmem:[%s18105_s10 + $0x1cc0] sm:$0xf]  ;;  %v14847_v46 = vor.u32 %v16892_v40, %v14846_v36  ;;  %9224 = vmatpush.bf16.msrb.mxu0 %v14591_v45  ;;  %v3262_v36 = vunpack.c.l.b16 %v2086_v24 }
 0x23d   : > { %v16956_v42 = vld [vmem:[%s18105_s10 + $0x1cdc] sm:$0xf0] }
 0x23e   : > { %v15358_v43 = vld [vmem:[%s18105_s10 + $0x1ec0] sm:$0xf]  ;;  %v15103_v47 = vor.u32 %v16956_v42, %v15102_v41  ;;  %9237 = vmatpush.bf16.msrb.mxu1 %v14847_v46  ;;  %v16152_v41 = vld [vmem:[%s18105_s10 + $0x3c4] sm:$0xf] }
 0x23f   : > { %v17020_v44 = vld [vmem:[%s18105_s10 + $0x1edc] sm:$0xf0]  ;;  %v11904_v42 = vld [vmem:[%s18105_s10 + $0x3e0] sm:$0xf0] }
 0x240   : > { %v14558_v48 = vld [vmem:[%s18105_s10 + $0x1880] sm:$0xf]  ;;  %v15359_v51 = vor.u32 %v17020_v44, %v15358_v43  ;;  %9250 = vmatpush.bf16.msrb.mxu2 %v15103_v47  ;;  %v3264_v43 = vunpack.c.l.b16 %v2087_v28  ;;  %v3263_v44 = vunpack.c.h.b16 %v2086_v24  ;;  %v3265_v47 = vunpack.c.h.b16 %v2087_v28 }
 0x241   : > { %v16820_v49 = vld [vmem:[%s18105_s10 + $0x189c] sm:$0xf0] }
 0x242   : > { %v14814_v50 = vld [vmem:[%s18105_s10 + $0x1a80] sm:$0xf]  ;;  %v14559_v60 = vor.u32 %v16820_v49, %v14558_v48  ;;  %9263 = vmatpush.bf16.msrb.mxu3 %v15359_v51  ;;  %v11651_v49 = vor.u32 %v16088_v34, %v11648_v35 }
 0x243   : > { %v16884_v52 = vld [vmem:[%s18105_s10 + $0x1a9c] sm:$0xf0] }
 0x244   : > { %v15070_v55 = vld [vmem:[%s18105_s10 + $0x1c80] sm:$0xf]  ;;  %v14815_v61 = vor.u32 %v16884_v52, %v14814_v50  ;;  %9225 = vmatpush.bf16.msrb.mxu0 %v14559_v60  ;;  %v11616_v60 = vld [vmem:[%s18105_s10 + $0x1a0] sm:$0xf0] }
 0x245   : > { %v16948_v56 = vld [vmem:[%s18105_s10 + $0x1c9c] sm:$0xf0] }
 0x246   : > { %v15326_v57 = vld [vmem:[%s18105_s10 + $0x1e80] sm:$0xf]  ;;  %v15071_v0 = vor.u32 %v16948_v56, %v15070_v55  ;;  %9238 = vmatpush.bf16.msrb.mxu1 %v14815_v61  ;;  %v11907_v55 = vor.u32 %v16152_v41, %v11904_v42  ;;  %v18419_v56 = vpack.c.b16 %v3262_v36, %v3262_v36  ;;  %v18424_v61 = vpack.c.b16 %v3264_v43, %v3264_v43  ;;  %v16056_v43 = vld [vmem:[%s18105_s10 + $0xc4] sm:$0xf] }
 0x247   : > { %v17012_v59 = vld [vmem:[%s18105_s10 + $0x1e9c] sm:$0xf0] }
 0x248   : > { %v14526_v1 = vld [vmem:[%s18105_s10 + $0x1840] sm:$0xf]  ;;  %v15327_v5 = vor.u32 %v17012_v59, %v15326_v57  ;;  %9251 = vmatpush.bf16.msrb.mxu2 %v15071_v0  ;;  %v16080_v59 = vld [vmem:[%s18105_s10 + $0x184] sm:$0xf]  ;;  %v18426_v0 = vpack.c.b16 %v3263_v44, %v3263_v44 }
 0x249   : > { %v16812_v3 = vld [vmem:[%s18105_s10 + $0x185c] sm:$0xf0]  ;;  %v11520_v44 = vld [vmem:[%s18105_s10 + $0xe0] sm:$0xf0] }
 0x24a   : > { %v14782_v4 = vld [vmem:[%s18105_s10 + $0x1a40] sm:$0xf]  ;;  %v14527_v16 = vor.u32 %v16812_v3, %v14526_v1  ;;  %9264 = vmatpush.bf16.msrb.mxu3 %v15327_v5  ;;  %v16144_v1 = vld [vmem:[%s18105_s10 + $0x384] sm:$0xf] }
 0x24b   : > { %v16876_v6 = vld [vmem:[%s18105_s10 + $0x1a5c] sm:$0xf0]  ;;  %v11872_v3 = vld [vmem:[%s18105_s10 + $0x3a0] sm:$0xf0] }
 0x24c   : > { %v15038_v8 = vld [vmem:[%s18105_s10 + $0x1c40] sm:$0xf]  ;;  %v14783_v20 = vor.u32 %v16876_v6, %v14782_v4  ;;  %9226 = vmatpush.bf16.msrb.mxu0 %v14527_v16  ;;  %v18430_v4 = vpack.c.b16 %v3265_v47, %v3265_v47 }
 0x24d   : > { %v16940_v9 = vld [vmem:[%s18105_s10 + $0x1c5c] sm:$0xf0] }
 0x24e   : > { %v15294_v12 = vld [vmem:[%s18105_s10 + $0x1e40] sm:$0xf]  ;;  %v15039_v21 = vor.u32 %v16940_v9, %v15038_v8  ;;  %9239 = vmatpush.bf16.msrb.mxu1 %v14783_v20  ;;  %v11619_v8 = vor.u32 %v16080_v59, %v11616_v60  ;;  %v11840_v20 = vld [vmem:[%s18105_s10 + $0x360] sm:$0xf0] }
 0x24f   : > { %v17004_v14 = vld [vmem:[%s18105_s10 + $0x1e5c] sm:$0xf0]  ;;  %v16048_v59 = vld [vmem:[%s18105_s10 + $0x84] sm:$0xf] }
 0x250   : > { %v14494_v15 = vld [vmem:[%s18105_s10 + $0x1800] sm:$0xf]  ;;  %v15295_v25 = vor.u32 %v17004_v14, %v15294_v12  ;;  %9252 = vmatpush.bf16.msrb.mxu2 %v15039_v21  ;;  %v11488_v60 = vld [vmem:[%s18105_s10 + $0xa0] sm:$0xf0] }
 0x251   : > { %v16804_v17 = vld [vmem:[%s18105_s10 + $0x181c] sm:$0xf0] }
 0x252   : > { %v14750_v18 = vld [vmem:[%s18105_s10 + $0x1a00] sm:$0xf]  ;;  %v14495_v32 = vor.u32 %v16804_v17, %v14494_v15  ;;  %9265 = vmatpush.bf16.msrb.mxu3 %v15295_v25  ;;  %v11875_v15 = vor.u32 %v16144_v1, %v11872_v3  ;;  %v16072_v17 = vld [vmem:[%s18105_s10 + $0x144] sm:$0xf] }
 0x253   : > { %v16868_v19 = vld [vmem:[%s18105_s10 + $0x1a1c] sm:$0xf0]  ;;  %v16112_v1 = vld [vmem:[%s18105_s10 + $0x284] sm:$0xf] }
 0x254   : > { %v15006_v22 = vld [vmem:[%s18105_s10 + $0x1c00] sm:$0xf]  ;;  %v14751_v38 = vor.u32 %v16868_v19, %v14750_v18  ;;  %9227 = vmatpush.bf16.msrb.mxu0 %v14495_v32  ;;  %v11584_v18 = vld [vmem:[%s18105_s10 + $0x160] sm:$0xf0] }
 0x255   : > { %v16932_v23 = vld [vmem:[%s18105_s10 + $0x1c1c] sm:$0xf0]  ;;  %v16136_v19 = vld [vmem:[%s18105_s10 + $0x344] sm:$0xf] }
 0x256   : > { %v15262_v26 = vld [vmem:[%s18105_s10 + $0x1e00] sm:$0xf]  ;;  %v15007_v40 = vor.u32 %v16932_v23, %v15006_v22  ;;  %9240 = vmatpush.bf16.msrb.mxu1 %v14751_v38  ;;  %v11587_v23 = vor.u32 %v16072_v17, %v11584_v18  ;;  %v11808_v32 = vld [vmem:[%s18105_s10 + $0x320] sm:$0xf0] }
 0x257   : > { %v16996_v27 = vld [vmem:[%s18105_s10 + $0x1e1c] sm:$0xf0]  ;;  %9228 = vmatmul.bf16.vlgmr.msrb.gmra.mxu0 %v18419_v56  ;;  %v11744_v3 = vld [vmem:[%s18105_s10 + $0x2a0] sm:$0xf0] }
 0x258   : > { %v15742_v29 = vld [vmem:[%s18105_s10 + $0x21c0] sm:$0xf]  ;;  %v15263_v45 = vor.u32 %v16996_v27, %v15262_v26  ;;  %9253 = vmatpush.bf16.msrb.mxu2 %v15007_v40  ;;  %v11843_v27 = vor.u32 %v16136_v19, %v11840_v20  ;;  %v16040_v17 = vld [vmem:[%s18105_s10 + $0x44] sm:$0xf] }
 0x259   : > { %v17116_v30 = vld [vmem:[%s18105_s10 + $0x21dc] sm:$0xf0]  ;;  %9241 = vmatmul.bf16.vlgmr.msrb.gmra.mxu1 %v18426_v0  ;;  %v11456_v18 = vld [vmem:[%s18105_s10 + $0x60] sm:$0xf0] }
 0x25a   : > { %v15998_v31 = vld [vmem:[%s18105_s10 + $0x23c0] sm:$0xf]  ;;  %v15743_v46 = vor.u32 %v17116_v30, %v15742_v29  ;;  %9266 = vmatpush.bf16.msrb.mxu3 %v15263_v45  ;;  %v16064_v29 = vld [vmem:[%s18105_s10 + $0x104] sm:$0xf] }
 0x25b   : > { %v17180_v33 = vld [vmem:[%s18105_s10 + $0x23dc] sm:$0xf0]  ;;  %9254 = vmatmul.bf16.vlgmr.msrb.gmra.mxu2 %v18424_v61  ;;  %v11552_v30 = vld [vmem:[%s18105_s10 + $0x120] sm:$0xf0] }
 0x25c   : > { %v15999_v48 = vor.u32 %v17180_v33, %v15998_v31  ;;  %v15710_v50 = vld [vmem:[%s18105_s10 + $0x2180] sm:$0xf]  ;;  %9272 = vmatpush.bf16.msra.mxu0 %v15743_v46  ;;  %9298 = vmatpush.bf16.msra.mxu2 %v11651_v49  ;;  %v16128_v31 = vld [vmem:[%s18105_s10 + $0x304] sm:$0xf]  ;;  %v11555_v35 = vor.u32 %v16064_v29, %v11552_v30  ;;  %v11523_v49 = vor.u32 %v16056_v43, %v11520_v44 }
 0x25d   : > { %v17108_v51 = vld [vmem:[%s18105_s10 + $0x219c] sm:$0xf0]  ;;  %9267 = vmatmul.bf16.vlgmr.msrb.gmra.mxu3 %v18430_v4  ;;  %v11811_v41 = vor.u32 %v16128_v31, %v11808_v32  ;;  %v16120_v45 = vld [vmem:[%s18105_s10 + $0x2c4] sm:$0xf] }
 0x25e   : > { %v15966_v52 = vld [vmem:[%s18105_s10 + $0x2380] sm:$0xf]  ;;  %v15711_v5 = vor.u32 %v17108_v51, %v15710_v50  ;;  %9285 = vmatpush.bf16.msra.mxu1 %v15999_v48  ;;  %9311 = vmatpush.bf16.msra.mxu3 %v11907_v55  ;;  %v11776_v46 = vld [vmem:[%s18105_s10 + $0x2e0] sm:$0xf0] }
 0x25f   : > { %v17172_v57 = vld [vmem:[%s18105_s10 + $0x239c] sm:$0xf0]  ;;  %v11779_v55 = vor.u32 %v16120_v45, %v11776_v46  ;;  %v16104_v19 = vld [vmem:[%s18105_s10 + $0x244] sm:$0xf] }
 0x260   : > { %v15967_v6 = vor.u32 %v17172_v57, %v15966_v52  ;;  %v15678_v9 = vld [vmem:[%s18105_s10 + $0x2140] sm:$0xf]  ;;  %9273 = vmatpush.bf16.msra.mxu0 %v15711_v5  ;;  %9299 = vmatpush.bf16.msra.mxu2 %v11619_v8  ;;  %v11491_v8 = vor.u32 %v16048_v59, %v11488_v60  ;;  %v11712_v20 = vld [vmem:[%s18105_s10 + $0x260] sm:$0xf0] }
 0x261   : > { %v17100_v12 = vld [vmem:[%s18105_s10 + $0x215c] sm:$0xf0]  ;;  %v11715_v30 = vor.u32 %v16104_v19, %v11712_v20  ;;  %v11424_v31 = vld [vmem:[%s18105_s10 + $0x20] sm:$0xf0] }
 0x262   : > { %v15934_v14 = vld [vmem:[%s18105_s10 + $0x2340] sm:$0xf]  ;;  %v15679_v21 = vor.u32 %v17100_v12, %v15678_v9  ;;  %9286 = vmatpush.bf16.msra.mxu1 %v15967_v6  ;;  %9312 = vmatpush.bf16.msra.mxu3 %v11875_v15  ;;  %v11747_v15 = vor.u32 %v16112_v1, %v11744_v3  ;;  %v16096_v32 = vld [vmem:[%s18105_s10 + $0x204] sm:$0xf] }
 0x263   : > { %v17164_v16 = vld [vmem:[%s18105_s10 + $0x235c] sm:$0xf0]  ;;  %v16408_v46 = vld [vmem:[%s18105_s10 + $0xbc4] sm:$0xf] }
 0x264   : > { %v15935_v22 = vor.u32 %v17164_v16, %v15934_v14  ;;  %v15646_v24 = vld [vmem:[%s18105_s10 + $0x2100] sm:$0xf]  ;;  %9274 = vmatpush.bf16.msra.mxu0 %v15679_v21  ;;  %9300 = vmatpush.bf16.msra.mxu2 %v11587_v23  ;;  %v16272_v59 = vld [vmem:[%s18105_s10 + $0x784] sm:$0xf] }
 0x265   : > { %v17092_v25 = vld [vmem:[%s18105_s10 + $0x211c] sm:$0xf0]  ;;  %v12384_v3 = vld [vmem:[%s18105_s10 + $0x7a0] sm:$0xf0] }
 0x266   : > { %v15902_v26 = vld [vmem:[%s18105_s10 + $0x2300] sm:$0xf]  ;;  %v15647_v33 = vor.u32 %v17092_v25, %v15646_v24  ;;  %9287 = vmatpush.bf16.msra.mxu1 %v15935_v22  ;;  %9313 = vmatpush.bf16.msra.mxu3 %v11843_v27  ;;  %v16264_v19 = vld [vmem:[%s18105_s10 + $0x744] sm:$0xf] }
 0x267   : > { %v17156_v28 = vld [vmem:[%s18105_s10 + $0x231c] sm:$0xf0] }
 0x268   : > { %v15903_v34 = vor.u32 %v17156_v28, %v15902_v26  ;;  %v15614_v36 = vld [vmem:[%s18105_s10 + $0x20c0] sm:$0xf]  ;;  %9275 = vmatpush.bf16.msra.mxu0 %v15647_v33  ;;  %9301 = vmatpush.bf16.msra.mxu2 %v11555_v35  ;;  %v11459_v26 = vor.u32 %v16040_v17, %v11456_v18  ;;  %v16032_v28 = vld [vmem:[%s18105_s10 + $0x4] sm:$0xf] }
 0x269   : > { %v17084_v38 = vld [vmem:[%s18105_s10 + $0x20dc] sm:$0xf0]  ;;  %v11680_v33 = vld [vmem:[%s18105_s10 + $0x220] sm:$0xf0]  ;;  %v11427_v45 = vor.u32 %v16032_v28, %v11424_v31 }
 0x26a   : > { %v15870_v40 = vld [vmem:[%s18105_s10 + $0x22c0] sm:$0xf]  ;;  %v15615_v47 = vor.u32 %v17084_v38, %v15614_v36  ;;  %9288 = vmatpush.bf16.msra.mxu1 %v15903_v34  ;;  %9314 = vmatpush.bf16.msra.mxu3 %v11811_v41  ;;  %v16216_v34 = vld [vmem:[%s18105_s10 + $0x5c4] sm:$0xf] }
 0x26b   : > { %v17148_v42 = vld [vmem:[%s18105_s10 + $0x22dc] sm:$0xf0]  ;;  %v12160_v35 = vld [vmem:[%s18105_s10 + $0x5e0] sm:$0xf0] }
 0x26c   : > { %v15871_v48 = vor.u32 %v17148_v42, %v15870_v40  ;;  %v15582_v50 = vld [vmem:[%s18105_s10 + $0x2080] sm:$0xf]  ;;  %9276 = vmatpush.bf16.msra.mxu0 %v15615_v47  ;;  %9302 = vmatpush.bf16.msra.mxu2 %v11523_v49  ;;  %v16280_v36 = vld [vmem:[%s18105_s10 + $0x7c4] sm:$0xf]  ;;  %v11683_v49 = vor.u32 %v16096_v32, %v11680_v33 }
 0x26d   : > { %v17076_v51 = vld [vmem:[%s18105_s10 + $0x209c] sm:$0xf0]  ;;  %v12416_v40 = vld [vmem:[%s18105_s10 + $0x7e0] sm:$0xf0] }
 0x26e   : > { %v15838_v52 = vld [vmem:[%s18105_s10 + $0x2280] sm:$0xf]  ;;  %v15583_v5 = vor.u32 %v17076_v51, %v15582_v50  ;;  %9289 = vmatpush.bf16.msra.mxu1 %v15871_v48  ;;  %9315 = vmatpush.bf16.msra.mxu3 %v11779_v55  ;;  %v16344_v41 = vld [vmem:[%s18105_s10 + $0x9c4] sm:$0xf]  ;;  %v12163_v50 = vor.u32 %v16216_v34, %v12160_v35  ;;  %v12419_v51 = vor.u32 %v16280_v36, %v12416_v40 }
 0x26f   : > { %v17140_v57 = vld [vmem:[%s18105_s10 + $0x229c] sm:$0xf0]  ;;  %v12672_v42 = vld [vmem:[%s18105_s10 + $0x9e0] sm:$0xf0] }
 0x270   : > { %v15839_v6 = vor.u32 %v17140_v57, %v15838_v52  ;;  %v15550_v9 = vld [vmem:[%s18105_s10 + $0x2040] sm:$0xf]  ;;  %9277 = vmatpush.bf16.msra.mxu0 %v15583_v5  ;;  %9303 = vmatpush.bf16.msra.mxu2 %v11491_v8  ;;  %v12928_v47 = vld [vmem:[%s18105_s10 + $0xbe0] sm:$0xf0]  ;;  %v12675_v52 = vor.u32 %v16344_v41, %v12672_v42 }
 0x271   : > { %v17068_v12 = vld [vmem:[%s18105_s10 + $0x205c] sm:$0xf0]  ;;  %v16208_v55 = vld [vmem:[%s18105_s10 + $0x584] sm:$0xf]  ;;  %v12931_v60 = vor.u32 %v16408_v46, %v12928_v47 }
 0x272   : > { %v15806_v14 = vld [vmem:[%s18105_s10 + $0x2240] sm:$0xf]  ;;  %v15551_v21 = vor.u32 %v17068_v12, %v15550_v9  ;;  %9290 = vmatpush.bf16.msra.mxu1 %v15839_v6  ;;  %9316 = vmatpush.bf16.msra.mxu3 %v11747_v15  ;;  %v12128_v57 = vld [vmem:[%s18105_s10 + $0x5a0] sm:$0xf0]  ;;  %v12387_v15 = vor.u32 %v16272_v59, %v12384_v3 }
 0x273   : > { %v17132_v16 = vld [vmem:[%s18105_s10 + $0x225c] sm:$0xf0]  ;;  %v16336_v5 = vld [vmem:[%s18105_s10 + $0x984] sm:$0xf] }
 0x274   : > { %v15518_v22 = vld [vmem:[%s18105_s10 + $0x2000] sm:$0xf]  ;;  %v15807_v25 = vor.u32 %v17132_v16, %v15806_v14  ;;  %9278 = vmatpush.bf16.msra.mxu0 %v15551_v21  ;;  %9304 = vmatpush.bf16.msra.mxu2 %v11459_v26  ;;  %v12640_v6 = vld [vmem:[%s18105_s10 + $0x9a0] sm:$0xf0]  ;;  %v12131_v14 = vor.u32 %v16208_v55, %v12128_v57 }
 0x275   : > { %v17060_v23 = vld [vmem:[%s18105_s10 + $0x201c] sm:$0xf0]  ;;  %v16400_v9 = vld [vmem:[%s18105_s10 + $0xb84] sm:$0xf]  ;;  %v12643_v16 = vor.u32 %v16336_v5, %v12640_v6 }
 0x276   : > { %v15774_v24 = vld [vmem:[%s18105_s10 + $0x2200] sm:$0xf]  ;;  %v15519_v38 = vor.u32 %v17060_v23, %v15518_v22  ;;  %9291 = vmatpush.bf16.msra.mxu1 %v15807_v25  ;;  %9317 = vmatpush.bf16.msra.mxu3 %v11715_v30  ;;  %v12896_v12 = vld [vmem:[%s18105_s10 + $0xba0] sm:$0xf0] }
 0x277   : > { %v17124_v27 = vld [vmem:[%s18105_s10 + $0x221c] sm:$0xf0]  ;;  %v16200_v17 = vld [vmem:[%s18105_s10 + $0x544] sm:$0xf]  ;;  %v12899_v20 = vor.u32 %v16400_v9, %v12896_v12 }
 0x278   : > { %v2088_v29 = vld [vmem:[%s18087_s13 + $0x40] sm:$0xff]  ;;  %v15775_v44 = vor.u32 %v17124_v27, %v15774_v24  ;;  %9279 = vmatpush.bf16.msra.mxu0 %v15519_v38  ;;  %9305 = vmatpush.bf16.msra.mxu2 %v11427_v45 }
 0x279   : > { %v3266_v43 = vunpack.c.l.b16 %v2088_v29  ;;  %v3267_v48 = vunpack.c.h.b16 %v2088_v29  ;;  %v12096_v18 = vld [vmem:[%s18105_s10 + $0x560] sm:$0xf0] }
 0x27a   : > { %9292 = vmatpush.bf16.msra.mxu1 %v15775_v44  ;;  %9318 = vmatpush.bf16.msra.mxu3 %v11683_v49  ;;  %v12352_v21 = vld [vmem:[%s18105_s10 + $0x760] sm:$0xf0]  ;;  %v12099_v26 = vor.u32 %v16200_v17, %v12096_v18  ;;  %v9086_v18 = vpop.f32.mrf.mxu1 }
 0x27b   : > { %v18496_v1 = vpack.c.b16 %v3266_v43, %v3266_v43  ;;  %v18501_v8 = vpack.c.b16 %v3267_v48, %v3267_v48  ;;  %v16328_v22 = vld [vmem:[%s18105_s10 + $0x944] sm:$0xf]  ;;  %9306 = vmatmul.bf16.vlgmr.msra.gmra.mxu2 %v18211_v53  ;;  %v12355_v27 = vor.u32 %v16264_v19, %v12352_v21 }
 0x27c   : > { %9324 = vmatpush.bf16.msrb.mxu0 %v12163_v50  ;;  %9350 = vmatpush.bf16.msrb.mxu2 %v12675_v52  ;;  %v12608_v23 = vld [vmem:[%s18105_s10 + $0x960] sm:$0xf0] }
 0x27d   : > { %9280 = vmatmul.bf16.vlgmr.msra.gmra.mxu0 %v18496_v1  ;;  %9293 = vmatmul.bf16.vlgmr.msra.gmra.mxu1 %v18501_v8  ;;  %v16392_v24 = vld [vmem:[%s18105_s10 + $0xb44] sm:$0xf]  ;;  %v12611_v28 = vor.u32 %v16328_v22, %v12608_v23 }
 0x27e   : > { %9337 = vmatpush.bf16.msrb.mxu1 %v12419_v51  ;;  %9363 = vmatpush.bf16.msrb.mxu3 %v12931_v60  ;;  %v12864_v25 = vld [vmem:[%s18105_s10 + $0xb60] sm:$0xf0] }
 0x27f   : > { %9319 = vmatmul.bf16.vlgmr.msra.gmra.mxu3 %v18214_v54  ;;  %v16192_v29 = vld [vmem:[%s18105_s10 + $0x504] sm:$0xf]  ;;  %v12867_v32 = vor.u32 %v16392_v24, %v12864_v25  ;;  %v9099_v25 = vpop.f32.mrf.mxu2 }
 0x280   : > { %9325 = vmatpush.bf16.msrb.mxu0 %v12131_v14  ;;  %9351 = vmatpush.bf16.msrb.mxu2 %v12643_v16  ;;  %v12064_v30 = vld [vmem:[%s18105_s10 + $0x520] sm:$0xf0]  ;;  %v9073_v16 = vpop.f32.mrf.mxu0 }
 0x281   : > { %v16256_v31 = vld [vmem:[%s18105_s10 + $0x704] sm:$0xf]  ;;  %v12067_v40 = vor.u32 %v16192_v29, %v12064_v30  ;;  %v9087_v24 = vadd.f32 %v9086_v18, %v9073_v16  ;;  %v9112_v30 = vpop.f32.mrf.mxu3 }
 0x282   : > { %9338 = vmatpush.bf16.msrb.mxu1 %v12387_v15  ;;  %9364 = vmatpush.bf16.msrb.mxu3 %v12899_v20  ;;  %v12320_v33 = vld [vmem:[%s18105_s10 + $0x720] sm:$0xf0] }
 0x283   : > { %v16320_v34 = vld [vmem:[%s18105_s10 + $0x904] sm:$0xf]  ;;  %v12323_v41 = vor.u32 %v16256_v31, %v12320_v33  ;;  %v9100_v33 = vadd.f32 %v9099_v25, %v9087_v24 }
 0x284   : > { %v12576_v35 = vld [vmem:[%s18105_s10 + $0x920] sm:$0xf0]  ;;  %9326 = vmatpush.bf16.msrb.mxu0 %v12099_v26  ;;  %9352 = vmatpush.bf16.msrb.mxu2 %v12611_v28 }
 0x285   : > { %v16384_v36 = vld [vmem:[%s18105_s10 + $0xb04] sm:$0xf]  ;;  %v12579_v42 = vor.u32 %v16320_v34, %v12576_v35 }
 0x286   : > { %v12832_v38 = vld [vmem:[%s18105_s10 + $0xb20] sm:$0xf0]  ;;  %9339 = vmatpush.bf16.msrb.mxu1 %v12355_v27  ;;  %9365 = vmatpush.bf16.msrb.mxu3 %v12867_v32 }
 0x287   : > { %v16184_v43 = vld [vmem:[%s18105_s10 + $0x4c4] sm:$0xf]  ;;  %v12835_v46 = vor.u32 %v16384_v36, %v12832_v38 }
 0x288   : > { %v12032_v44 = vld [vmem:[%s18105_s10 + $0x4e0] sm:$0xf0]  ;;  %9327 = vmatpush.bf16.msrb.mxu0 %v12067_v40  ;;  %9353 = vmatpush.bf16.msrb.mxu2 %v12579_v42 }
 0x289   : > { %v16248_v45 = vld [vmem:[%s18105_s10 + $0x6c4] sm:$0xf]  ;;  %v12035_v52 = vor.u32 %v16184_v43, %v12032_v44  ;;  %v18554_v44 = vadd.f32 %v9112_v30, %v9100_v33 }
 0x28a   : > { %v12288_v47 = vld [vmem:[%s18105_s10 + $0x6e0] sm:$0xf0]  ;;  %9340 = vmatpush.bf16.msrb.mxu1 %v12323_v41  ;;  %9366 = vmatpush.bf16.msrb.mxu3 %v12835_v46 }
 0x28b   : > { %v16312_v48 = vld [vmem:[%s18105_s10 + $0x8c4] sm:$0xf]  ;;  %v12291_v55 = vor.u32 %v16248_v45, %v12288_v47 }
 0x28c   : > { %v12544_v49 = vld [vmem:[%s18105_s10 + $0x8e0] sm:$0xf0]  ;;  %9328 = vmatpush.bf16.msrb.mxu0 %v12035_v52  ;;  %v9075_v52 = vpop.f32.mrf.mxu0 }
 0x28d   : > { %v16376_v50 = vld [vmem:[%s18105_s10 + $0xac4] sm:$0xf]  ;;  %v12547_v57 = vor.u32 %v16312_v48, %v12544_v49 }
 0x28e   : > { %v12800_v51 = vld [vmem:[%s18105_s10 + $0xae0] sm:$0xf0]  ;;  %9341 = vmatpush.bf16.msrb.mxu1 %v12291_v55 }
 0x28f   : > { %v16176_v59 = vld [vmem:[%s18105_s10 + $0x484] sm:$0xf]  ;;  %v12803_v5 = vor.u32 %v16376_v50, %v12800_v51  ;;  %9354 = vmatpush.bf16.msrb.mxu2 %v12547_v57 }
 0x290   : > { %v12000_v60 = vld [vmem:[%s18105_s10 + $0x4a0] sm:$0xf0] }
 0x291   : > { %v16240_v3 = vld [vmem:[%s18105_s10 + $0x684] sm:$0xf]  ;;  %v12003_v17 = vor.u32 %v16176_v59, %v12000_v60  ;;  %9367 = vmatpush.bf16.msrb.mxu3 %v12803_v5 }
 0x292   : > { %v12256_v6 = vld [vmem:[%s18105_s10 + $0x6a0] sm:$0xf0] }
 0x293   : > { %v16304_v9 = vld [vmem:[%s18105_s10 + $0x884] sm:$0xf]  ;;  %v12259_v19 = vor.u32 %v16240_v3, %v12256_v6  ;;  %9329 = vmatpush.bf16.msrb.mxu0 %v12003_v17  ;;  %v9088_v3 = vpop.f32.mrf.mxu1  ;;  %v9114_v17 = vpop.f32.mrf.mxu3 }
 0x294   : > { %v12512_v12 = vld [vmem:[%s18105_s10 + $0x8a0] sm:$0xf0]  ;;  %v9125_v3 = vpop.f32.mrf.mxu0 }
 0x295   : > { %v16368_v14 = vld [vmem:[%s18105_s10 + $0xa84] sm:$0xf]  ;;  %v12515_v20 = vor.u32 %v16304_v9, %v12512_v12  ;;  %9342 = vmatpush.bf16.msrb.mxu1 %v12259_v19 }
 0x296   : > { %v12768_v15 = vld [vmem:[%s18105_s10 + $0xaa0] sm:$0xf0] }
 0x297   : > { %v16168_v21 = vld [vmem:[%s18105_s10 + $0x444] sm:$0xf]  ;;  %v12771_v26 = vor.u32 %v16368_v14, %v12768_v15  ;;  %9355 = vmatpush.bf16.msrb.mxu2 %v12515_v20  ;;  %v9101_v14 = vpop.f32.mrf.mxu2 }
 0x298   : > { %v11968_v22 = vld [vmem:[%s18105_s10 + $0x460] sm:$0xf0] }
 0x299   : > { %v16232_v23 = vld [vmem:[%s18105_s10 + $0x644] sm:$0xf]  ;;  %v11971_v34 = vor.u32 %v16168_v21, %v11968_v22  ;;  %9368 = vmatpush.bf16.msrb.mxu3 %v12771_v26 }
 0x29a   : > { %v12224_v27 = vld [vmem:[%s18105_s10 + $0x660] sm:$0xf0] }
 0x29b   : > { %v16296_v28 = vld [vmem:[%s18105_s10 + $0x844] sm:$0xf]  ;;  %v12227_v38 = vor.u32 %v16232_v23, %v12224_v27  ;;  %9330 = vmatpush.bf16.msrb.mxu0 %v11971_v34 }
 0x29c   : > { %v12480_v29 = vld [vmem:[%s18105_s10 + $0x860] sm:$0xf0] }
 0x29d   : > { %v16360_v31 = vld [vmem:[%s18105_s10 + $0xa44] sm:$0xf]  ;;  %v12483_v40 = vor.u32 %v16296_v28, %v12480_v29  ;;  %9343 = vmatpush.bf16.msrb.mxu1 %v12227_v38 }
 0x29e   : > { %v12736_v32 = vld [vmem:[%s18105_s10 + $0xa60] sm:$0xf0] }
 0x29f   : > { %v16160_v35 = vld [vmem:[%s18105_s10 + $0x404] sm:$0xf]  ;;  %v12739_v45 = vor.u32 %v16360_v31, %v12736_v32  ;;  %9356 = vmatpush.bf16.msrb.mxu2 %v12483_v40 }
 0x2a0   : > { %v11936_v36 = vld [vmem:[%s18105_s10 + $0x420] sm:$0xf0] }
 0x2a1   : > { %v16224_v41 = vld [vmem:[%s18105_s10 + $0x604] sm:$0xf]  ;;  %v11939_v55 = vor.u32 %v16160_v35, %v11936_v36  ;;  %9369 = vmatpush.bf16.msrb.mxu3 %v12739_v45 }
 0x2a2   : > { %v12192_v42 = vld [vmem:[%s18105_s10 + $0x620] sm:$0xf0] }
 0x2a3   : > { %v16288_v43 = vld [vmem:[%s18105_s10 + $0x804] sm:$0xf]  ;;  %v12195_v5 = vor.u32 %v16224_v41, %v12192_v42  ;;  %9331 = vmatpush.bf16.msrb.mxu0 %v11939_v55 }
 0x2a4   : > { %v12448_v46 = vld [vmem:[%s18105_s10 + $0x820] sm:$0xf0] }
 0x2a5   : > { %v16352_v47 = vld [vmem:[%s18105_s10 + $0xa04] sm:$0xf]  ;;  %v12451_v6 = vor.u32 %v16288_v43, %v12448_v46  ;;  %9344 = vmatpush.bf16.msrb.mxu1 %v12195_v5 }
 0x2a6   : > { %v12704_v48 = vld [vmem:[%s18105_s10 + $0xa20] sm:$0xf0]  ;;  %9332 = vmatmul.bf16.vlgmr.msrb.gmra.mxu0 %v18197_v37 }
 0x2a7   : > { %v16472_v49 = vld [vmem:[%s18105_s10 + $0xdc4] sm:$0xf]  ;;  %v12707_v15 = vor.u32 %v16352_v47, %v12704_v48  ;;  %9357 = vmatpush.bf16.msrb.mxu2 %v12451_v6 }
 0x2a8   : > { %v13184_v50 = vld [vmem:[%s18105_s10 + $0xde0] sm:$0xf0]  ;;  %9345 = vmatmul.bf16.vlgmr.msrb.gmra.mxu1 %v18200_v39 }
 0x2a9   : > { %v16536_v51 = vld [vmem:[%s18105_s10 + $0xfc4] sm:$0xf]  ;;  %v13187_v16 = vor.u32 %v16472_v49, %v13184_v50  ;;  %9370 = vmatpush.bf16.msrb.mxu3 %v12707_v15  ;;  %v9126_v15 = vadd.f32 %v9125_v3, %v18554_v44 }
 0x2aa   : > { %v13440_v57 = vld [vmem:[%s18105_s10 + $0xfe0] sm:$0xf0]  ;;  %9358 = vmatmul.bf16.vlgmr.msrb.gmra.mxu2 %v18270_v10 }
 0x2ab   : > { %v16600_v59 = vld [vmem:[%s18105_s10 + $0x11c4] sm:$0xf]  ;;  %v13443_v18 = vor.u32 %v16536_v51, %v13440_v57  ;;  %9376 = vmatpush.bf16.msra.mxu0 %v13187_v16  ;;  %v9138_v16 = vpop.f32.mrf.mxu1 }
 0x2ac   : > { %v13696_v60 = vld [vmem:[%s18105_s10 + $0x11e0] sm:$0xf0]  ;;  %9371 = vmatmul.bf16.vlgmr.msrb.gmra.mxu3 %v18274_v13 }
 0x2ad   : > { %v16664_v9 = vld [vmem:[%s18105_s10 + $0x13c4] sm:$0xf]  ;;  %v13699_v19 = vor.u32 %v16600_v59, %v13696_v60  ;;  %9389 = vmatpush.bf16.msra.mxu1 %v13443_v18 }
 0x2ae   : > { %v13952_v12 = vld [vmem:[%s18105_s10 + $0x13e0] sm:$0xf0] }
 0x2af   : > { %v16464_v20 = vld [vmem:[%s18105_s10 + $0xd84] sm:$0xf]  ;;  %v13955_v23 = vor.u32 %v16664_v9, %v13952_v12  ;;  %9402 = vmatpush.bf16.msra.mxu2 %v13699_v19 }
 0x2b0   : > { %v13152_v21 = vld [vmem:[%s18105_s10 + $0xda0] sm:$0xf0] }
 0x2b1   : > { %v16528_v22 = vld [vmem:[%s18105_s10 + $0xf84] sm:$0xf]  ;;  %v13155_v29 = vor.u32 %v16464_v20, %v13152_v21  ;;  %9415 = vmatpush.bf16.msra.mxu3 %v13955_v23  ;;  %v9139_v23 = vadd.f32 %v9138_v16, %v9126_v15 }
 0x2b2   : > { %v13408_v24 = vld [vmem:[%s18105_s10 + $0xfa0] sm:$0xf0] }
 0x2b3   : > { %v16592_v25 = vld [vmem:[%s18105_s10 + $0x1184] sm:$0xf]  ;;  %v13411_v30 = vor.u32 %v16528_v22, %v13408_v24  ;;  %9377 = vmatpush.bf16.msra.mxu0 %v13155_v29  ;;  %v9151_v29 = vpop.f32.mrf.mxu2 }
 0x2b4   : > { %v13664_v26 = vld [vmem:[%s18105_s10 + $0x11a0] sm:$0xf0] }
 0x2b5   : > { %v16656_v27 = vld [vmem:[%s18105_s10 + $0x1384] sm:$0xf]  ;;  %v13667_v31 = vor.u32 %v16592_v25, %v13664_v26  ;;  %9390 = vmatpush.bf16.msra.mxu1 %v13411_v30 }
 0x2b6   : > { %v13920_v28 = vld [vmem:[%s18105_s10 + $0x13a0] sm:$0xf0] }
 0x2b7   : > { %v16456_v32 = vld [vmem:[%s18105_s10 + $0xd44] sm:$0xf]  ;;  %v13923_v35 = vor.u32 %v16656_v27, %v13920_v28  ;;  %9403 = vmatpush.bf16.msra.mxu2 %v13667_v31 }
 0x2b8   : > { %v13120_v33 = vld [vmem:[%s18105_s10 + $0xd60] sm:$0xf0] }
 0x2b9   : > { %v16520_v34 = vld [vmem:[%s18105_s10 + $0xf44] sm:$0xf]  ;;  %v13123_v43 = vor.u32 %v16456_v32, %v13120_v33  ;;  %9416 = vmatpush.bf16.msra.mxu3 %v13923_v35  ;;  %v9164_v35 = vpop.f32.mrf.mxu3 }
 0x2ba   : > { %v13376_v36 = vld [vmem:[%s18105_s10 + $0xf60] sm:$0xf0] }
 0x2bb   : > { %v16584_v38 = vld [vmem:[%s18105_s10 + $0x1144] sm:$0xf]  ;;  %v13379_v45 = vor.u32 %v16520_v34, %v13376_v36  ;;  %9378 = vmatpush.bf16.msra.mxu0 %v13123_v43  ;;  %v9152_v34 = vadd.f32 %v9151_v29, %v9139_v23  ;;  %v9153_v16 = vpop.f32.mrf.mxu2 }
 0x2bc   : > { %v13632_v40 = vld [vmem:[%s18105_s10 + $0x1160] sm:$0xf0] }
 0x2bd   : > { %v16648_v41 = vld [vmem:[%s18105_s10 + $0x1344] sm:$0xf]  ;;  %v13635_v46 = vor.u32 %v16584_v38, %v13632_v40  ;;  %9391 = vmatpush.bf16.msra.mxu1 %v13379_v45 }
 0x2be   : > { %v13888_v42 = vld [vmem:[%s18105_s10 + $0x1360] sm:$0xf0] }
 0x2bf   : > { %v16448_v47 = vld [vmem:[%s18105_s10 + $0xd04] sm:$0xf]  ;;  %v13891_v50 = vor.u32 %v16648_v41, %v13888_v42  ;;  %9404 = vmatpush.bf16.msra.mxu2 %v13635_v46  ;;  %v18612_v41 = vadd.f32 %v9164_v35, %v9152_v34  ;;  %v9127_v42 = vpop.f32.mrf.mxu0 }
 0x2c0   : > { %v13088_v48 = vld [vmem:[%s18105_s10 + $0xd20] sm:$0xf0] }
 0x2c1   : > { %v16512_v49 = vld [vmem:[%s18105_s10 + $0xf04] sm:$0xf]  ;;  %v13091_v60 = vor.u32 %v16448_v47, %v13088_v48  ;;  %9417 = vmatpush.bf16.msra.mxu3 %v13891_v50 }
 0x2c2   : > { %v13344_v51 = vld [vmem:[%s18105_s10 + $0xf20] sm:$0xf0] }
 0x2c3   : > { %v16576_v52 = vld [vmem:[%s18105_s10 + $0x1104] sm:$0xf]  ;;  %v13347_v5 = vor.u32 %v16512_v49, %v13344_v51  ;;  %9379 = vmatpush.bf16.msra.mxu0 %v13091_v60  ;;  %v9140_v49 = vpop.f32.mrf.mxu1 }
 0x2c4   : > { %v13600_v55 = vld [vmem:[%s18105_s10 + $0x1120] sm:$0xf0] }
 0x2c5   : > { %v16640_v57 = vld [vmem:[%s18105_s10 + $0x1304] sm:$0xf]  ;;  %v13603_v6 = vor.u32 %v16576_v52, %v13600_v55  ;;  %9392 = vmatpush.bf16.msra.mxu1 %v13347_v5 }
 0x2c6   : > { %v13856_v59 = vld [vmem:[%s18105_s10 + $0x1320] sm:$0xf0] }
 0x2c7   : > { %v16440_v9 = vld [vmem:[%s18105_s10 + $0xcc4] sm:$0xf]  ;;  %v13859_v17 = vor.u32 %v16640_v57, %v13856_v59  ;;  %9405 = vmatpush.bf16.msra.mxu2 %v13603_v6 }
 0x2c8   : > { %v13056_v12 = vld [vmem:[%s18105_s10 + $0xce0] sm:$0xf0] }
 0x2c9   : > { %v16504_v14 = vld [vmem:[%s18105_s10 + $0xec4] sm:$0xf]  ;;  %v13059_v24 = vor.u32 %v16440_v9, %v13056_v12  ;;  %9418 = vmatpush.bf16.msra.mxu3 %v13859_v17 }
 0x2ca   : > { %v13312_v18 = vld [vmem:[%s18105_s10 + $0xee0] sm:$0xf0] }
 0x2cb   : > { %v16568_v19 = vld [vmem:[%s18105_s10 + $0x10c4] sm:$0xf]  ;;  %v13315_v44 = vor.u32 %v16504_v14, %v13312_v18  ;;  %9380 = vmatpush.bf16.msra.mxu0 %v13059_v24 }
 0x2cc   : > { %v13568_v20 = vld [vmem:[%s18105_s10 + $0x10e0] sm:$0xf0] }
 0x2cd   : > { %v16632_v21 = vld [vmem:[%s18105_s10 + $0x12c4] sm:$0xf]  ;;  %v13571_v25 = vor.u32 %v16568_v19, %v13568_v20  ;;  %9393 = vmatpush.bf16.msra.mxu1 %v13315_v44 }
 0x2ce   : > { %v13824_v22 = vld [vmem:[%s18105_s10 + $0x12e0] sm:$0xf0] }
 0x2cf   : > { %v16432_v26 = vld [vmem:[%s18105_s10 + $0xc84] sm:$0xf]  ;;  %v13827_v30 = vor.u32 %v16632_v21, %v13824_v22  ;;  %9406 = vmatpush.bf16.msra.mxu2 %v13571_v25  ;;  %v9166_v21 = vpop.f32.mrf.mxu3 }
 0x2d0   : > { %v13024_v27 = vld [vmem:[%s18105_s10 + $0xca0] sm:$0xf0] }
 0x2d1   : > { %v16496_v28 = vld [vmem:[%s18105_s10 + $0xe84] sm:$0xf]  ;;  %v13027_v40 = vor.u32 %v16432_v26, %v13024_v27  ;;  %9419 = vmatpush.bf16.msra.mxu3 %v13827_v30 }
 0x2d2   : > { %v13280_v31 = vld [vmem:[%s18105_s10 + $0xea0] sm:$0xf0] }
 0x2d3   : > { %v16560_v32 = vld [vmem:[%s18105_s10 + $0x1084] sm:$0xf]  ;;  %v13283_v43 = vor.u32 %v16496_v28, %v13280_v31  ;;  %9381 = vmatpush.bf16.msra.mxu0 %v13027_v40 }
 0x2d4   : > { %v13536_v33 = vld [vmem:[%s18105_s10 + $0x10a0] sm:$0xf0] }
 0x2d5   : > { %v16624_v36 = vld [vmem:[%s18105_s10 + $0x1284] sm:$0xf]  ;;  %v13539_v45 = vor.u32 %v16560_v32, %v13536_v33  ;;  %9394 = vmatpush.bf16.msra.mxu1 %v13283_v43 }
 0x2d6   : > { %v13792_v38 = vld [vmem:[%s18105_s10 + $0x12a0] sm:$0xf0] }
 0x2d7   : > { %v16424_v46 = vld [vmem:[%s18105_s10 + $0xc44] sm:$0xf]  ;;  %v13795_v50 = vor.u32 %v16624_v36, %v13792_v38  ;;  %9407 = vmatpush.bf16.msra.mxu2 %v13539_v45 }
 0x2d8   : > { %v12992_v47 = vld [vmem:[%s18105_s10 + $0xc60] sm:$0xf0] }
 0x2d9   : > { %v16488_v48 = vld [vmem:[%s18105_s10 + $0xe44] sm:$0xf]  ;;  %v12995_v60 = vor.u32 %v16424_v46, %v12992_v47  ;;  %9420 = vmatpush.bf16.msra.mxu3 %v13795_v50 }
 0x2da   : > { %v13248_v51 = vld [vmem:[%s18105_s10 + $0xe60] sm:$0xf0] }
 0x2db   : > { %v16552_v52 = vld [vmem:[%s18105_s10 + $0x1044] sm:$0xf]  ;;  %v13251_v6 = vor.u32 %v16488_v48, %v13248_v51  ;;  %9382 = vmatpush.bf16.msra.mxu0 %v12995_v60 }
 0x2dc   : > { %v13504_v55 = vld [vmem:[%s18105_s10 + $0x1060] sm:$0xf0] }
 0x2dd   : > { %v16616_v57 = vld [vmem:[%s18105_s10 + $0x1244] sm:$0xf]  ;;  %v13507_v9 = vor.u32 %v16552_v52, %v13504_v55  ;;  %9395 = vmatpush.bf16.msra.mxu1 %v13251_v6 }
 0x2de   : > { %v13760_v59 = vld [vmem:[%s18105_s10 + $0x1260] sm:$0xf0] }
 0x2df   : > { %v16416_v3 = vld [vmem:[%s18105_s10 + $0xc04] sm:$0xf]  ;;  %v13763_v17 = vor.u32 %v16616_v57, %v13760_v59  ;;  %9408 = vmatpush.bf16.msra.mxu2 %v13507_v9 }
 0x2e0   : > { %v12960_v5 = vld [vmem:[%s18105_s10 + $0xc20] sm:$0xf0] }
 0x2e1   : > { %v16480_v12 = vld [vmem:[%s18105_s10 + $0xe04] sm:$0xf]  ;;  %v12963_v44 = vor.u32 %v16416_v3, %v12960_v5  ;;  %9421 = vmatpush.bf16.msra.mxu3 %v13763_v17 }
 0x2e2   : > { %v13216_v14 = vld [vmem:[%s18105_s10 + $0xe20] sm:$0xf0] }
 0x2e3   : > { %v16544_v15 = vld [vmem:[%s18105_s10 + $0x1004] sm:$0xf]  ;;  %v13219_v28 = vor.u32 %v16480_v12, %v13216_v14  ;;  %9383 = vmatpush.bf16.msra.mxu0 %v12963_v44 }
 0x2e4   : > { %v13472_v18 = vld [vmem:[%s18105_s10 + $0x1020] sm:$0xf0] }
 0x2e5   : > { %v16608_v19 = vld [vmem:[%s18105_s10 + $0x1204] sm:$0xf]  ;;  %v13475_v29 = vor.u32 %v16544_v15, %v13472_v18  ;;  %9396 = vmatpush.bf16.msra.mxu1 %v13219_v28 }
 0x2e6   : > { %v13728_v20 = vld [vmem:[%s18105_s10 + $0x1220] sm:$0xf0]  ;;  %9384 = vmatmul.bf16.vlgmr.msra.gmra.mxu0 %v18266_v7 }
 0x2e7   : > { %v16728_v22 = vld [vmem:[%s18105_s10 + $0x15c4] sm:$0xf]  ;;  %v13731_v32 = vor.u32 %v16608_v19, %v13728_v20  ;;  %9409 = vmatpush.bf16.msra.mxu2 %v13475_v29 }
 0x2e8   : > { %v14208_v23 = vld [vmem:[%s18105_s10 + $0x15e0] sm:$0xf0]  ;;  %9397 = vmatmul.bf16.vlgmr.msra.gmra.mxu1 %v18272_v11 }
 0x2e9   : > { %v16792_v24 = vld [vmem:[%s18105_s10 + $0x17c4] sm:$0xf]  ;;  %v14211_v33 = vor.u32 %v16728_v22, %v14208_v23  ;;  %9422 = vmatpush.bf16.msra.mxu3 %v13731_v32  ;;  %v18664_v23 = vpop.f32.mrf.mxu0 }
 0x2ea   : > { %v14464_v25 = vld [vmem:[%s18105_s10 + $0x17e0] sm:$0xf0]  ;;  %9410 = vmatmul.bf16.vlgmr.msra.gmra.mxu2 %v18341_v58 }
 0x2eb   : > { %v16856_v26 = vld [vmem:[%s18105_s10 + $0x19c4] sm:$0xf]  ;;  %v14467_v34 = vor.u32 %v16792_v24, %v14464_v25  ;;  %9428 = vmatpush.bf16.msrb.mxu0 %v14211_v33 }
 0x2ec   : > { %v14720_v27 = vld [vmem:[%s18105_s10 + $0x19e0] sm:$0xf0]  ;;  %9423 = vmatmul.bf16.vlgmr.msra.gmra.mxu3 %v18348_v63 }
 0x2ed   : > { %v16920_v30 = vld [vmem:[%s18105_s10 + $0x1bc4] sm:$0xf]  ;;  %v14723_v35 = vor.u32 %v16856_v26, %v14720_v27  ;;  %9441 = vmatpush.bf16.msrb.mxu1 %v14467_v34  ;;  %v18668_v26 = vpop.f32.mrf.mxu1 }
 0x2ee   : > { %v14976_v31 = vld [vmem:[%s18105_s10 + $0x1be0] sm:$0xf0] }
 0x2ef   : > { %v16720_v36 = vld [vmem:[%s18105_s10 + $0x1584] sm:$0xf]  ;;  %v14979_v42 = vor.u32 %v16920_v30, %v14976_v31  ;;  %9454 = vmatpush.bf16.msrb.mxu2 %v14723_v35 }
 0x2f0   : > { %v14176_v38 = vld [vmem:[%s18105_s10 + $0x15a0] sm:$0xf0] }
 0x2f1   : > { %v16784_v40 = vld [vmem:[%s18105_s10 + $0x1784] sm:$0xf]  ;;  %v14179_v49 = vor.u32 %v16720_v36, %v14176_v38  ;;  %9467 = vmatpush.bf16.msrb.mxu3 %v14979_v42 }
 0x2f2   : > { %v14432_v43 = vld [vmem:[%s18105_s10 + $0x17a0] sm:$0xf0] }
 0x2f3   : > { %v16848_v45 = vld [vmem:[%s18105_s10 + $0x1984] sm:$0xf]  ;;  %v14435_v50 = vor.u32 %v16784_v40, %v14432_v43  ;;  %9429 = vmatpush.bf16.msrb.mxu0 %v14179_v49  ;;  %v18681_v49 = vpop.f32.mrf.mxu2 }
 0x2f4   : > { %v14688_v46 = vld [vmem:[%s18105_s10 + $0x19a0] sm:$0xf0] }
 0x2f5   : > { %v16912_v47 = vld [vmem:[%s18105_s10 + $0x1b84] sm:$0xf]  ;;  %v14691_v51 = vor.u32 %v16848_v45, %v14688_v46  ;;  %9442 = vmatpush.bf16.msrb.mxu1 %v14435_v50 }
 0x2f6   : > { %v14944_v48 = vld [vmem:[%s18105_s10 + $0x1ba0] sm:$0xf0] }
 0x2f7   : > { %v16712_v52 = vld [vmem:[%s18105_s10 + $0x1544] sm:$0xf]  ;;  %v14947_v59 = vor.u32 %v16912_v47, %v14944_v48  ;;  %9455 = vmatpush.bf16.msrb.mxu2 %v14691_v51 }
 0x2f8   : > { %v14144_v55 = vld [vmem:[%s18105_s10 + $0x1560] sm:$0xf0] }
 0x2f9   : > { %v16776_v57 = vld [vmem:[%s18105_s10 + $0x1744] sm:$0xf]  ;;  %v14147_v12 = vor.u32 %v16712_v52, %v14144_v55  ;;  %9468 = vmatpush.bf16.msrb.mxu3 %v14947_v59  ;;  %v18686_v55 = vpop.f32.mrf.mxu3 }
 0x2fa   : > { %v14400_v60 = vld [vmem:[%s18105_s10 + $0x1760] sm:$0xf0] }
 0x2fb   : > { %v16840_v3 = vld [vmem:[%s18105_s10 + $0x1944] sm:$0xf]  ;;  %v14403_v14 = vor.u32 %v16776_v57, %v14400_v60  ;;  %9430 = vmatpush.bf16.msrb.mxu0 %v14147_v12  ;;  %v9179_v60 = vpop.f32.mrf.mxu0 }
 0x2fc   : > { %v14656_v5 = vld [vmem:[%s18105_s10 + $0x1960] sm:$0xf0] }
 0x2fd   : > { %v16904_v6 = vld [vmem:[%s18105_s10 + $0x1b44] sm:$0xf]  ;;  %v14659_v15 = vor.u32 %v16840_v3, %v14656_v5  ;;  %9443 = vmatpush.bf16.msrb.mxu1 %v14403_v14  ;;  %v9192_v5 = vpop.f32.mrf.mxu1 }
 0x2fe   : > { %v14912_v9 = vld [vmem:[%s18105_s10 + $0x1b60] sm:$0xf0] }
 0x2ff   : > { %v16704_v16 = vld [vmem:[%s18105_s10 + $0x1504] sm:$0xf]  ;;  %v14915_v19 = vor.u32 %v16904_v6, %v14912_v9  ;;  %9456 = vmatpush.bf16.msrb.mxu2 %v14659_v15 }
 0x300   : > { %v14112_v17 = vld [vmem:[%s18105_s10 + $0x1520] sm:$0xf0] }
 0x301   : > { %v16768_v18 = vld [vmem:[%s18105_s10 + $0x1704] sm:$0xf]  ;;  %v14115_v25 = vor.u32 %v16704_v16, %v14112_v17  ;;  %9469 = vmatpush.bf16.msrb.mxu3 %v14915_v19 }
 0x302   : > { %v14368_v20 = vld [vmem:[%s18105_s10 + $0x1720] sm:$0xf0] }
 0x303   : > { %v16832_v21 = vld [vmem:[%s18105_s10 + $0x1904] sm:$0xf]  ;;  %v14371_v27 = vor.u32 %v16768_v18, %v14368_v20  ;;  %9431 = vmatpush.bf16.msrb.mxu0 %v14115_v25 }
 0x304   : > { %v14624_v22 = vld [vmem:[%s18105_s10 + $0x1920] sm:$0xf0] }
 0x305   : > { %v16896_v24 = vld [vmem:[%s18105_s10 + $0x1b04] sm:$0xf]  ;;  %v14627_v28 = vor.u32 %v16832_v21, %v14624_v22  ;;  %9444 = vmatpush.bf16.msrb.mxu1 %v14371_v27 }
 0x306   : > { %v14880_v44 = vld [vmem:[%s18105_s10 + $0x1b20] sm:$0xf0] }
 0x307   : > { %v16696_v29 = vld [vmem:[%s18105_s10 + $0x14c4] sm:$0xf]  ;;  %v14883_v32 = vor.u32 %v16896_v24, %v14880_v44  ;;  %9457 = vmatpush.bf16.msrb.mxu2 %v14627_v28 }
 0x308   : > { %v14080_v30 = vld [vmem:[%s18105_s10 + $0x14e0] sm:$0xf0] }
 0x309   : > { %v16760_v31 = vld [vmem:[%s18105_s10 + $0x16c4] sm:$0xf]  ;;  %v14083_v40 = vor.u32 %v16696_v29, %v14080_v30  ;;  %9470 = vmatpush.bf16.msrb.mxu3 %v14883_v32 }
 0x30a   : > { %v14336_v33 = vld [vmem:[%s18105_s10 + $0x16e0] sm:$0xf0] }
 0x30b   : > { %v16824_v34 = vld [vmem:[%s18105_s10 + $0x18c4] sm:$0xf]  ;;  %v14339_v42 = vor.u32 %v16760_v31, %v14336_v33  ;;  %9432 = vmatpush.bf16.msrb.mxu0 %v14083_v40 }
 0x30c   : > { %v14592_v35 = vld [vmem:[%s18105_s10 + $0x18e0] sm:$0xf0] }
 0x30d   : > { %v16888_v36 = vld [vmem:[%s18105_s10 + $0x1ac4] sm:$0xf]  ;;  %v14595_v43 = vor.u32 %v16824_v34, %v14592_v35  ;;  %9445 = vmatpush.bf16.msrb.mxu1 %v14339_v42  ;;  %v9205_v35 = vpop.f32.mrf.mxu2  ;;  %v9218_v42 = vpop.f32.mrf.mxu3 }
 0x30e   : > { %v14848_v38 = vld [vmem:[%s18105_s10 + $0x1ae0] sm:$0xf0] }
 0x30f   : > { %v16688_v45 = vld [vmem:[%s18105_s10 + $0x1484] sm:$0xf]  ;;  %v14851_v48 = vor.u32 %v16888_v36, %v14848_v38  ;;  %9458 = vmatpush.bf16.msrb.mxu2 %v14595_v43 }
 0x310   : > { %v14048_v46 = vld [vmem:[%s18105_s10 + $0x14a0] sm:$0xf0] }
 0x311   : > { %v16752_v47 = vld [vmem:[%s18105_s10 + $0x1684] sm:$0xf]  ;;  %v14051_v3 = vor.u32 %v16688_v45, %v14048_v46  ;;  %9471 = vmatpush.bf16.msrb.mxu3 %v14851_v48 }
 0x312   : > { %v14304_v50 = vld [vmem:[%s18105_s10 + $0x16a0] sm:$0xf0] }
 0x313   : > { %v16816_v51 = vld [vmem:[%s18105_s10 + $0x1884] sm:$0xf]  ;;  %v14307_v6 = vor.u32 %v16752_v47, %v14304_v50  ;;  %9433 = vmatpush.bf16.msrb.mxu0 %v14051_v3 }
 0x314   : > { %v14560_v52 = vld [vmem:[%s18105_s10 + $0x18a0] sm:$0xf0] }
 0x315   : > { %v16880_v57 = vld [vmem:[%s18105_s10 + $0x1a84] sm:$0xf]  ;;  %v14563_v9 = vor.u32 %v16816_v51, %v14560_v52  ;;  %9446 = vmatpush.bf16.msrb.mxu1 %v14307_v6 }
 0x316   : > { %v14816_v59 = vld [vmem:[%s18105_s10 + $0x1aa0] sm:$0xf0] }
 0x317   : > { %v16680_v12 = vld [vmem:[%s18105_s10 + $0x1444] sm:$0xf]  ;;  %v14819_v16 = vor.u32 %v16880_v57, %v14816_v59  ;;  %9459 = vmatpush.bf16.msrb.mxu2 %v14563_v9 }
 0x318   : > { %v14016_v14 = vld [vmem:[%s18105_s10 + $0x1460] sm:$0xf0] }
 0x319   : > { %v16744_v15 = vld [vmem:[%s18105_s10 + $0x1644] sm:$0xf]  ;;  %v14019_v22 = vor.u32 %v16680_v12, %v14016_v14  ;;  %9472 = vmatpush.bf16.msrb.mxu3 %v14819_v16 }
 0x31a   : > { %v14272_v17 = vld [vmem:[%s18105_s10 + $0x1660] sm:$0xf0] }
 0x31b   : > { %v16808_v18 = vld [vmem:[%s18105_s10 + $0x1844] sm:$0xf]  ;;  %v14275_v25 = vor.u32 %v16744_v15, %v14272_v17  ;;  %9434 = vmatpush.bf16.msrb.mxu0 %v14019_v22 }
 0x31c   : > { %v14528_v19 = vld [vmem:[%s18105_s10 + $0x1860] sm:$0xf0] }
 0x31d   : > { %v16872_v20 = vld [vmem:[%s18105_s10 + $0x1a44] sm:$0xf]  ;;  %v14531_v27 = vor.u32 %v16808_v18, %v14528_v19  ;;  %9447 = vmatpush.bf16.msrb.mxu1 %v14275_v25 }
 0x31e   : > { %v14784_v21 = vld [vmem:[%s18105_s10 + $0x1a60] sm:$0xf0] }
 0x31f   : > { %v16672_v24 = vld [vmem:[%s18105_s10 + $0x1404] sm:$0xf]  ;;  %v14787_v31 = vor.u32 %v16872_v20, %v14784_v21  ;;  %9460 = vmatpush.bf16.msrb.mxu2 %v14531_v27 }
 0x320   : > { %v13984_v44 = vld [vmem:[%s18105_s10 + $0x1420] sm:$0xf0] }
 0x321   : > { %v16736_v28 = vld [vmem:[%s18105_s10 + $0x1604] sm:$0xf]  ;;  %v13987_v43 = vor.u32 %v16672_v24, %v13984_v44  ;;  %9473 = vmatpush.bf16.msrb.mxu3 %v14787_v31 }
 0x322   : > { %v14240_v29 = vld [vmem:[%s18105_s10 + $0x1620] sm:$0xf0] }
 0x323   : > { %v16800_v30 = vld [vmem:[%s18105_s10 + $0x1804] sm:$0xf]  ;;  %v14243_v48 = vor.u32 %v16736_v28, %v14240_v29  ;;  %9435 = vmatpush.bf16.msrb.mxu0 %v13987_v43 }
 0x324   : > { %v14496_v32 = vld [vmem:[%s18105_s10 + $0x1820] sm:$0xf0] }
 0x325   : > { %v16864_v33 = vld [vmem:[%s18105_s10 + $0x1a04] sm:$0xf]  ;;  %v14499_v50 = vor.u32 %v16800_v30, %v14496_v32  ;;  %9448 = vmatpush.bf16.msrb.mxu1 %v14243_v48 }
 0x326   : > { %v14752_v34 = vld [vmem:[%s18105_s10 + $0x1a20] sm:$0xf0]  ;;  %9436 = vmatmul.bf16.vlgmr.msrb.gmra.mxu0 %v18346_v62 }
 0x327   : > { %v16984_v36 = vld [vmem:[%s18105_s10 + $0x1dc4] sm:$0xf]  ;;  %v14755_v57 = vor.u32 %v16864_v33, %v14752_v34  ;;  %9461 = vmatpush.bf16.msrb.mxu2 %v14499_v50 }
 0x328   : > { %v15232_v38 = vld [vmem:[%s18105_s10 + $0x1de0] sm:$0xf0]  ;;  %9449 = vmatmul.bf16.vlgmr.msrb.gmra.mxu1 %v18352_v2 }
 0x329   : > { %v17048_v40 = vld [vmem:[%s18105_s10 + $0x1fc4] sm:$0xf]  ;;  %v15235_v59 = vor.u32 %v16984_v36, %v15232_v38  ;;  %9474 = vmatpush.bf16.msrb.mxu3 %v14755_v57 }
 0x32a   : > { %v15488_v45 = vld [vmem:[%s18105_s10 + $0x1fe0] sm:$0xf0]  ;;  %9462 = vmatmul.bf16.vlgmr.msrb.gmra.mxu2 %v18419_v56 }
 0x32b   : > { %v17112_v46 = vld [vmem:[%s18105_s10 + $0x21c4] sm:$0xf]  ;;  %v15491_v60 = vor.u32 %v17048_v40, %v15488_v45  ;;  %9480 = vmatpush.bf16.msra.mxu0 %v15235_v59 }
 0x32c   : > { %v15744_v47 = vld [vmem:[%s18105_s10 + $0x21e0] sm:$0xf0]  ;;  %9475 = vmatmul.bf16.vlgmr.msrb.gmra.mxu3 %v18426_v0 }
 0x32d   : > { %v17176_v51 = vld [vmem:[%s18105_s10 + $0x23c4] sm:$0xf]  ;;  %v15747_v3 = vor.u32 %v17112_v46, %v15744_v47  ;;  %9493 = vmatpush.bf16.msra.mxu1 %v15491_v60  ;;  %v18740_v46 = vpop.f32.mrf.mxu0 }
 0x32e   : > { %v16000_v52 = vld [vmem:[%s18105_s10 + $0x23e0] sm:$0xf0] }
 0x32f   : > { %v16976_v5 = vld [vmem:[%s18105_s10 + $0x1d84] sm:$0xf]  ;;  %v16003_v12 = vor.u32 %v17176_v51, %v16000_v52  ;;  %9506 = vmatpush.bf16.msra.mxu2 %v15747_v3  ;;  %v18744_v51 = vpop.f32.mrf.mxu1 }
 0x330   : > { %v15200_v6 = vld [vmem:[%s18105_s10 + $0x1da0] sm:$0xf0] }
 0x331   : > { %v17040_v9 = vld [vmem:[%s18105_s10 + $0x1f84] sm:$0xf]  ;;  %v15203_v19 = vor.u32 %v16976_v5, %v15200_v6  ;;  %9519 = vmatpush.bf16.msra.mxu3 %v16003_v12 }
 0x332   : > { %v15456_v14 = vld [vmem:[%s18105_s10 + $0x1fa0] sm:$0xf0] }
 0x333   : > { %v17104_v15 = vld [vmem:[%s18105_s10 + $0x2184] sm:$0xf]  ;;  %v15459_v20 = vor.u32 %v17040_v9, %v15456_v14  ;;  %9481 = vmatpush.bf16.msra.mxu0 %v15203_v19 }
 0x334   : > { %v15712_v16 = vld [vmem:[%s18105_s10 + $0x21a0] sm:$0xf0] }
 0x335   : > { %v17168_v17 = vld [vmem:[%s18105_s10 + $0x2384] sm:$0xf]  ;;  %v15715_v21 = vor.u32 %v17104_v15, %v15712_v16  ;;  %9494 = vmatpush.bf16.msra.mxu1 %v15459_v20 }
 0x336   : > { %v15968_v18 = vld [vmem:[%s18105_s10 + $0x23a0] sm:$0xf0] }
 0x337   : > { %v16968_v22 = vld [vmem:[%s18105_s10 + $0x1d44] sm:$0xf]  ;;  %v15971_v25 = vor.u32 %v17168_v17, %v15968_v18  ;;  %9507 = vmatpush.bf16.msra.mxu2 %v15715_v21 }
 0x338   : > { %v15168_v24 = vld [vmem:[%s18105_s10 + $0x1d60] sm:$0xf0] }
 0x339   : > { %v17032_v44 = vld [vmem:[%s18105_s10 + $0x1f44] sm:$0xf]  ;;  %v15171_v32 = vor.u32 %v16968_v22, %v15168_v24  ;;  %9520 = vmatpush.bf16.msra.mxu3 %v15971_v25  ;;  %v9178_v22 = vadd.f32 %v18664_v23, %v18612_v41  ;;  %v9244_v23 = vpop.f32.mrf.mxu1 }
 0x33a   : > { %v15424_v27 = vld [vmem:[%s18105_s10 + $0x1f60] sm:$0xf0] }
 0x33b   : > { %v17096_v28 = vld [vmem:[%s18105_s10 + $0x2144] sm:$0xf]  ;;  %v15427_v33 = vor.u32 %v17032_v44, %v15424_v27  ;;  %9482 = vmatpush.bf16.msra.mxu0 %v15171_v32  ;;  %v18759_v44 = vpop.f32.mrf.mxu2  ;;  %v9231_v32 = vpop.f32.mrf.mxu0 }
 0x33c   : > { %v15680_v29 = vld [vmem:[%s18105_s10 + $0x2160] sm:$0xf0]  ;;  %v16285_v32 = vld [vmem:[%s18105_s10 + $0x7e4] sm:$0xf0] }
 0x33d   : > { %v17160_v30 = vld [vmem:[%s18105_s10 + $0x2344] sm:$0xf]  ;;  %v15683_v34 = vor.u32 %v17096_v28, %v15680_v29  ;;  %9495 = vmatpush.bf16.msra.mxu1 %v15427_v33  ;;  %v18764_v29 = vpop.f32.mrf.mxu3 }
 0x33e   : > { %v15936_v31 = vld [vmem:[%s18105_s10 + $0x2360] sm:$0xf0] }
 0x33f   : > { %v16960_v35 = vld [vmem:[%s18105_s10 + $0x1d04] sm:$0xf]  ;;  %v15939_v40 = vor.u32 %v17160_v30, %v15936_v31  ;;  %9508 = vmatpush.bf16.msra.mxu2 %v15683_v34 }
 0x340   : > { %v15136_v36 = vld [vmem:[%s18105_s10 + $0x1d20] sm:$0xf0] }
 0x341   : > { %v17024_v38 = vld [vmem:[%s18105_s10 + $0x1f04] sm:$0xf]  ;;  %v15139_v50 = vor.u32 %v16960_v35, %v15136_v36  ;;  %9521 = vmatpush.bf16.msra.mxu3 %v15939_v40  ;;  %v9191_v40 = vadd.f32 %v18668_v26, %v9178_v22 }
 0x342   : > { %v15392_v42 = vld [vmem:[%s18105_s10 + $0x1f20] sm:$0xf0] }
 0x343   : > { %v17088_v43 = vld [vmem:[%s18105_s10 + $0x2104] sm:$0xf]  ;;  %v15395_v52 = vor.u32 %v17024_v38, %v15392_v42  ;;  %9483 = vmatpush.bf16.msra.mxu0 %v15139_v50 }
 0x344   : > { %v15648_v45 = vld [vmem:[%s18105_s10 + $0x2120] sm:$0xf0] }
 0x345   : > { %v17152_v47 = vld [vmem:[%s18105_s10 + $0x2304] sm:$0xf]  ;;  %v15651_v57 = vor.u32 %v17088_v43, %v15648_v45  ;;  %9496 = vmatpush.bf16.msra.mxu1 %v15395_v52  ;;  %v9204_v52 = vadd.f32 %v18681_v49, %v9191_v40 }
 0x346   : > { %v15904_v48 = vld [vmem:[%s18105_s10 + $0x2320] sm:$0xf0] }
 0x347   : > { %v16952_v59 = vld [vmem:[%s18105_s10 + $0x1cc4] sm:$0xf]  ;;  %v15907_v5 = vor.u32 %v17152_v47, %v15904_v48  ;;  %9509 = vmatpush.bf16.msra.mxu2 %v15651_v57 }
 0x348   : > { %v15104_v60 = vld [vmem:[%s18105_s10 + $0x1ce0] sm:$0xf0] }
 0x349   : > { %v17016_v3 = vld [vmem:[%s18105_s10 + $0x1ec4] sm:$0xf]  ;;  %v15107_v16 = vor.u32 %v16952_v59, %v15104_v60  ;;  %9522 = vmatpush.bf16.msra.mxu3 %v15907_v5 }
 0x34a   : > { %v15360_v6 = vld [vmem:[%s18105_s10 + $0x1ee0] sm:$0xf0] }
 0x34b   : > { %v17080_v9 = vld [vmem:[%s18105_s10 + $0x20c4] sm:$0xf]  ;;  %v15363_v17 = vor.u32 %v17016_v3, %v15360_v6  ;;  %9484 = vmatpush.bf16.msra.mxu0 %v15107_v16  ;;  %v9257_v16 = vpop.f32.mrf.mxu2 }
 0x34c   : > { %v15616_v12 = vld [vmem:[%s18105_s10 + $0x20e0] sm:$0xf0]  ;;  %v11558_v16 = vld [vmem:[%s18105_s10 + $0x108] sm:$0xf] }
 0x34d   : > { %v17144_v14 = vld [vmem:[%s18105_s10 + $0x22c4] sm:$0xf]  ;;  %v15619_v18 = vor.u32 %v17080_v9, %v15616_v12  ;;  %9497 = vmatpush.bf16.msra.mxu1 %v15363_v17  ;;  %v11654_v17 = vld [vmem:[%s18105_s10 + $0x1c8] sm:$0xf] }
 0x34e   : > { %v15872_v15 = vld [vmem:[%s18105_s10 + $0x22e0] sm:$0xf0] }
 0x34f   : > { %v16944_v19 = vld [vmem:[%s18105_s10 + $0x1c84] sm:$0xf]  ;;  %v15875_v24 = vor.u32 %v17144_v14, %v15872_v15  ;;  %9510 = vmatpush.bf16.msra.mxu2 %v15619_v18  ;;  %v16093_v18 = vld [vmem:[%s18105_s10 + $0x1e4] sm:$0xf0] }
 0x350   : > { %v15072_v20 = vld [vmem:[%s18105_s10 + $0x1ca0] sm:$0xf0]  ;;  %v11655_v23 = vor.u32 %v16093_v18, %v11654_v17  ;;  %v16069_v17 = vld [vmem:[%s18105_s10 + $0x124] sm:$0xf0] }
 0x351   : > { %v17008_v21 = vld [vmem:[%s18105_s10 + $0x1e84] sm:$0xf]  ;;  %v15075_v41 = vor.u32 %v16944_v19, %v15072_v20  ;;  %9523 = vmatpush.bf16.msra.mxu3 %v15875_v24  ;;  %v11910_v19 = vld [vmem:[%s18105_s10 + $0x3c8] sm:$0xf]  ;;  %v9270_v20 = vpop.f32.mrf.mxu3 }
 0x352   : > { %v15328_v25 = vld [vmem:[%s18105_s10 + $0x1ea0] sm:$0xf0]  ;;  %v16157_v24 = vld [vmem:[%s18105_s10 + $0x3e4] sm:$0xf0] }
 0x353   : > { %v17072_v27 = vld [vmem:[%s18105_s10 + $0x2084] sm:$0xf]  ;;  %v15331_v33 = vor.u32 %v17008_v21, %v15328_v25  ;;  %9485 = vmatpush.bf16.msra.mxu0 %v15075_v41  ;;  %v9217_v21 = vadd.f32 %v18686_v55, %v9204_v52  ;;  %v12166_v25 = vld [vmem:[%s18105_s10 + $0x5c8] sm:$0xf] }
 0x354   : > { %v15584_v28 = vld [vmem:[%s18105_s10 + $0x20a0] sm:$0xf0]  ;;  %v11814_v18 = vld [vmem:[%s18105_s10 + $0x308] sm:$0xf] }
 0x355   : > { %v17136_v30 = vld [vmem:[%s18105_s10 + $0x2284] sm:$0xf]  ;;  %v15587_v34 = vor.u32 %v17072_v27, %v15584_v28  ;;  %9498 = vmatpush.bf16.msra.mxu1 %v15331_v33  ;;  %v16221_v27 = vld [vmem:[%s18105_s10 + $0x5e4] sm:$0xf0]  ;;  %v9230_v41 = vadd.f32 %v18740_v46, %v9217_v21  ;;  %v11911_v33 = vor.u32 %v16157_v24, %v11910_v19 }
 0x356   : > { %v15840_v31 = vld [vmem:[%s18105_s10 + $0x22a0] sm:$0xf0]  ;;  %v12390_v46 = vld [vmem:[%s18105_s10 + $0x788] sm:$0xf] }
 0x357   : > { %v16936_v35 = vld [vmem:[%s18105_s10 + $0x1c44] sm:$0xf]  ;;  %v15843_v42 = vor.u32 %v17136_v30, %v15840_v31  ;;  %9511 = vmatpush.bf16.msra.mxu2 %v15587_v34  ;;  %v12422_v31 = vld [vmem:[%s18105_s10 + $0x7c8] sm:$0xf]  ;;  %v12167_v34 = vor.u32 %v16221_v27, %v12166_v25  ;;  %v9281_v25 = vpop.f32.mrf.mxu0 }
 0x358   : > { %v15040_v36 = vld [vmem:[%s18105_s10 + $0x1c60] sm:$0xf0]  ;;  %v12423_v40 = vor.u32 %v16285_v32, %v12422_v31  ;;  %v16133_v21 = vld [vmem:[%s18105_s10 + $0x324] sm:$0xf0]  ;;  %v11559_v31 = vor.u32 %v16069_v17, %v11558_v16  ;;  %v2072_v32 = vld [vmem:[#allocation2 + $0x30] sm:$0xff] }
 0x359   : > { %v17000_v38 = vld [vmem:[%s18105_s10 + $0x1e44] sm:$0xf]  ;;  %v15043_v57 = vor.u32 %v16936_v35, %v15040_v36  ;;  %9524 = vmatpush.bf16.msra.mxu3 %v15843_v42  ;;  %v11622_v35 = vld [vmem:[%s18105_s10 + $0x188] sm:$0xf] }
 0x35a   : > { %v15296_v43 = vld [vmem:[%s18105_s10 + $0x1e60] sm:$0xf0]  ;;  %v16085_v36 = vld [vmem:[%s18105_s10 + $0x1a4] sm:$0xf0] }
 0x35b   : > { %v17064_v45 = vld [vmem:[%s18105_s10 + $0x2044] sm:$0xf]  ;;  %v15299_v60 = vor.u32 %v17000_v38, %v15296_v43  ;;  %9486 = vmatpush.bf16.msra.mxu0 %v15043_v57  ;;  %v11878_v38 = vld [vmem:[%s18105_s10 + $0x388] sm:$0xf] }
 0x35c   : > { %v15552_v47 = vld [vmem:[%s18105_s10 + $0x2060] sm:$0xf0]  ;;  %v16149_v42 = vld [vmem:[%s18105_s10 + $0x3a4] sm:$0xf0] }
 0x35d   : > { %v17128_v48 = vld [vmem:[%s18105_s10 + $0x2244] sm:$0xf]  ;;  %v15555_v3 = vor.u32 %v17064_v45, %v15552_v47  ;;  %9499 = vmatpush.bf16.msra.mxu1 %v15299_v60  ;;  %v12134_v43 = vld [vmem:[%s18105_s10 + $0x588] sm:$0xf]  ;;  %v11879_v52 = vor.u32 %v16149_v42, %v11878_v38 }
 0x35e   : > { %v15808_v50 = vld [vmem:[%s18105_s10 + $0x2260] sm:$0xf0]  ;;  %v16213_v45 = vld [vmem:[%s18105_s10 + $0x5a4] sm:$0xf0] }
 0x35f   : > { %v16928_v59 = vld [vmem:[%s18105_s10 + $0x1c04] sm:$0xf]  ;;  %v15811_v49 = vor.u32 %v17128_v48, %v15808_v50  ;;  %9512 = vmatpush.bf16.msra.mxu2 %v15555_v3  ;;  %v16277_v47 = vld [vmem:[%s18105_s10 + $0x7a4] sm:$0xf0]  ;;  %v9243_v48 = vadd.f32 %v18744_v51, %v9230_v41  ;;  %v11623_v50 = vor.u32 %v16085_v36, %v11622_v35  ;;  %v12135_v57 = vor.u32 %v16213_v45, %v12134_v43 }
 0x360   : > { %v15008_v26 = vld [vmem:[%s18105_s10 + $0x1c20] sm:$0xf0]  ;;  %v11846_v60 = vld [vmem:[%s18105_s10 + $0x348] sm:$0xf]  ;;  %v12391_v51 = vor.u32 %v16277_v47, %v12390_v46  ;;  %v11815_v41 = vor.u32 %v16133_v21, %v11814_v18 }
 0x361   : > { %v16992_v5 = vld [vmem:[%s18105_s10 + $0x1e04] sm:$0xf]  ;;  %v15011_v22 = vor.u32 %v16928_v59, %v15008_v26  ;;  %9525 = vmatpush.bf16.msra.mxu3 %v15811_v49  ;;  %v11590_v59 = vld [vmem:[%s18105_s10 + $0x148] sm:$0xf]  ;;  %v9256_v3 = vadd.f32 %v18759_v44, %v9243_v48 }
 0x362   : > { %v15264_v6 = vld [vmem:[%s18105_s10 + $0x1e20] sm:$0xf0]  ;;  %v16077_v26 = vld [vmem:[%s18105_s10 + $0x164] sm:$0xf0] }
 0x363   : > { %v17056_v9 = vld [vmem:[%s18105_s10 + $0x2004] sm:$0xf]  ;;  %v15267_v28 = vor.u32 %v16992_v5, %v15264_v6  ;;  %9487 = vmatpush.bf16.msra.mxu0 %v15011_v22  ;;  %v16141_v5 = vld [vmem:[%s18105_s10 + $0x364] sm:$0xf0]  ;;  %v11591_v44 = vor.u32 %v16077_v26, %v11590_v59  ;;  %v9269_v19 = vadd.f32 %v18764_v29, %v9256_v3  ;;  %v9294_v29 = vpop.f32.mrf.mxu1 }
 0x364   : > { %v15520_v12 = vld [vmem:[%s18105_s10 + $0x2020] sm:$0xf0]  ;;  %v12102_v6 = vld [vmem:[%s18105_s10 + $0x548] sm:$0xf] }
 0x365   : > { %v17120_v14 = vld [vmem:[%s18105_s10 + $0x2204] sm:$0xf]  ;;  %v15523_v30 = vor.u32 %v17056_v9, %v15520_v12  ;;  %9500 = vmatpush.bf16.msra.mxu1 %v15267_v28  ;;  %v16205_v9 = vld [vmem:[%s18105_s10 + $0x564] sm:$0xf0] }
 0x366   : > { %v15776_v15 = vld [vmem:[%s18105_s10 + $0x2220] sm:$0xf0]  ;;  %9488 = vmatmul.bf16.vlgmr.msra.gmra.mxu0 %v18424_v61  ;;  %v12358_v49 = vld [vmem:[%s18105_s10 + $0x748] sm:$0xf] }
 0x367   : > { %v15779_v55 = vor.u32 %v17120_v14, %v15776_v15  ;;  %9513 = vmatpush.bf16.msra.mxu2 %v15523_v30  ;;  %9532 = vmatpush.bf16.msrb.mxu0 %v11655_v23  ;;  %v16269_v12 = vld [vmem:[%s18105_s10 + $0x764] sm:$0xf0]  ;;  %v11847_v14 = vor.u32 %v16141_v5, %v11846_v60  ;;  %v12103_v15 = vor.u32 %v16205_v9, %v12102_v6  ;;  %v9307_v5 = vpop.f32.mrf.mxu2 }
 0x368   : > { %9501 = vmatmul.bf16.vlgmr.msra.gmra.mxu1 %v18430_v4  ;;  %v12359_v20 = vor.u32 %v16269_v12, %v12358_v49  ;;  %v12070_v22 = vld [vmem:[%s18105_s10 + $0x508] sm:$0xf]  ;;  %v9282_v30 = vadd.f32 %v9281_v25, %v9269_v19  ;;  %v9320_v49 = vpop.f32.mrf.mxu3  ;;  %v9283_v12 = vpop.f32.mrf.mxu0 }
 0x369   : > { %9526 = vmatpush.bf16.msra.mxu3 %v15779_v55  ;;  %9545 = vmatpush.bf16.msrb.mxu1 %v11911_v33  ;;  %v16197_v24 = vld [vmem:[%s18105_s10 + $0x524] sm:$0xf0] }
 0x36a   : > { %9514 = vmatmul.bf16.vlgmr.msra.gmra.mxu2 %v18496_v1  ;;  %v12326_v27 = vld [vmem:[%s18105_s10 + $0x708] sm:$0xf]  ;;  %v12071_v55 = vor.u32 %v16197_v24, %v12070_v22  ;;  %v9295_v36 = vadd.f32 %v9294_v29, %v9282_v30 }
 0x36b   : > { %9558 = vmatpush.bf16.msrb.mxu2 %v12167_v34  ;;  %9533 = vmatpush.bf16.msrb.mxu0 %v11623_v50  ;;  %v16261_v28 = vld [vmem:[%s18105_s10 + $0x724] sm:$0xf0] }
 0x36c   : > { %9527 = vmatmul.bf16.vlgmr.msra.gmra.mxu3 %v18501_v8  ;;  %v11526_v23 = vld [vmem:[%s18105_s10 + $0xc8] sm:$0xf]  ;;  %v12327_v35 = vor.u32 %v16261_v28, %v12326_v27  ;;  %v10936_v46 = vadd.f32 %v9295_v36, %v2072_v32 }
 0x36d   : > { %9571 = vmatpush.bf16.msrb.mxu3 %v12423_v40  ;;  %9546 = vmatpush.bf16.msrb.mxu1 %v11879_v52  ;;  %v16061_v33 = vld [vmem:[%s18105_s10 + $0xe4] sm:$0xf0] }
 0x36e   : > { %v11782_v34 = vld [vmem:[%s18105_s10 + $0x2c8] sm:$0xf]  ;;  %v11527_v47 = vor.u32 %v16061_v33, %v11526_v23  ;;  %10944 = vst [vmem:[#allocation2 + $0x30] sm:$0xff] %v10936_v46 }
 0x36f   : > { %9559 = vmatpush.bf16.msrb.mxu2 %v12135_v57  ;;  %9534 = vmatpush.bf16.msrb.mxu0 %v11591_v44  ;;  %v16125_v38 = vld [vmem:[%s18105_s10 + $0x2e4] sm:$0xf0] }
 0x370   : > { %v12038_v40 = vld [vmem:[%s18105_s10 + $0x4c8] sm:$0xf]  ;;  %v11783_v50 = vor.u32 %v16125_v38, %v11782_v34  ;;  %v9322_v46 = vpop.f32.mrf.mxu3 }
 0x371   : > { %9572 = vmatpush.bf16.msrb.mxu3 %v12391_v51  ;;  %9547 = vmatpush.bf16.msrb.mxu1 %v11847_v14  ;;  %v16189_v42 = vld [vmem:[%s18105_s10 + $0x4e4] sm:$0xf0]  ;;  %v18843_v14 = vadd.f32 %v9320_v49, %v9307_v5 }
 0x372   : > { %v12294_v43 = vld [vmem:[%s18105_s10 + $0x6c8] sm:$0xf]  ;;  %v12039_v52 = vor.u32 %v16189_v42, %v12038_v40  ;;  %v9309_v40 = vpop.f32.mrf.mxu2 }
 0x373   : > { %9560 = vmatpush.bf16.msrb.mxu2 %v12103_v15  ;;  %v16253_v45 = vld [vmem:[%s18105_s10 + $0x6e4] sm:$0xf0]  ;;  %9535 = vmatpush.bf16.msrb.mxu0 %v11559_v31  ;;  %v9296_v15 = vpop.f32.mrf.mxu1 }
 0x374   : > { %v11494_v48 = vld [vmem:[%s18105_s10 + $0x88] sm:$0xf]  ;;  %v12295_v60 = vor.u32 %v16253_v45, %v12294_v43 }
 0x375   : > { %9573 = vmatpush.bf16.msrb.mxu3 %v12359_v20  ;;  %9548 = vmatpush.bf16.msrb.mxu1 %v11815_v41  ;;  %v16053_v57 = vld [vmem:[%s18105_s10 + $0xa4] sm:$0xf0] }
 0x376   : > { %v11750_v59 = vld [vmem:[%s18105_s10 + $0x288] sm:$0xf]  ;;  %v11495_v44 = vor.u32 %v16053_v57, %v11494_v48 }
 0x377   : > { %9561 = vmatpush.bf16.msrb.mxu2 %v12071_v55  ;;  %v16117_v26 = vld [vmem:[%s18105_s10 + $0x2a4] sm:$0xf0]  ;;  %9536 = vmatpush.bf16.msrb.mxu0 %v11527_v47 }
 0x378   : > { %v12006_v3 = vld [vmem:[%s18105_s10 + $0x488] sm:$0xf]  ;;  %v11751_v16 = vor.u32 %v16117_v26, %v11750_v59 }
 0x379   : > { %9574 = vmatpush.bf16.msrb.mxu3 %v12327_v35  ;;  %v16181_v51 = vld [vmem:[%s18105_s10 + $0x4a4] sm:$0xf0]  ;;  %9549 = vmatpush.bf16.msrb.mxu1 %v11783_v50 }
 0x37a   : > { %v12262_v6 = vld [vmem:[%s18105_s10 + $0x688] sm:$0xf]  ;;  %v12007_v17 = vor.u32 %v16181_v51, %v12006_v3 }
 0x37b   : > { %v16245_v9 = vld [vmem:[%s18105_s10 + $0x6a4] sm:$0xf0]  ;;  %9562 = vmatpush.bf16.msrb.mxu2 %v12039_v52  ;;  %9537 = vmatpush.bf16.msrb.mxu0 %v11495_v44 }
 0x37c   : > { %v11462_v18 = vld [vmem:[%s18105_s10 + $0x48] sm:$0xf]  ;;  %v12263_v21 = vor.u32 %v16245_v9, %v12262_v6 }
 0x37d   : > { %v16045_v19 = vld [vmem:[%s18105_s10 + $0x64] sm:$0xf0]  ;;  %9575 = vmatpush.bf16.msrb.mxu3 %v12295_v60  ;;  %9550 = vmatpush.bf16.msrb.mxu1 %v11751_v16 }
 0x37e   : > { %v11718_v20 = vld [vmem:[%s18105_s10 + $0x248] sm:$0xf]  ;;  %v11463_v30 = vor.u32 %v16045_v19, %v11462_v18 }
 0x37f   : > { %v16109_v22 = vld [vmem:[%s18105_s10 + $0x264] sm:$0xf0]  ;;  %9563 = vmatpush.bf16.msrb.mxu2 %v12007_v17 }
 0x380   : > { %v11974_v24 = vld [vmem:[%s18105_s10 + $0x448] sm:$0xf]  ;;  %v11719_v29 = vor.u32 %v16109_v22, %v11718_v20  ;;  %9538 = vmatpush.bf16.msrb.mxu0 %v11463_v30 }
 0x381   : > { %v16173_v25 = vld [vmem:[%s18105_s10 + $0x464] sm:$0xf0]  ;;  %9576 = vmatpush.bf16.msrb.mxu3 %v12263_v21 }
 0x382   : > { %v12230_v27 = vld [vmem:[%s18105_s10 + $0x648] sm:$0xf]  ;;  %v11975_v41 = vor.u32 %v16173_v25, %v11974_v24  ;;  %9551 = vmatpush.bf16.msrb.mxu1 %v11719_v29 }
 0x383   : > { %v16237_v28 = vld [vmem:[%s18105_s10 + $0x664] sm:$0xf0] }
 0x384   : > { %v11430_v31 = vld [vmem:[%s18105_s10 + $0x8] sm:$0xf]  ;;  %v12231_v34 = vor.u32 %v16237_v28, %v12230_v27  ;;  %9564 = vmatpush.bf16.msrb.mxu2 %v11975_v41 }
 0x385   : > { %v16037_v32 = vld [vmem:[%s18105_s10 + $0x24] sm:$0xf0] }
 0x386   : > { %v11686_v55 = vld [vmem:[%s18105_s10 + $0x208] sm:$0xf]  ;;  %v11431_v47 = vor.u32 %v16037_v32, %v11430_v31  ;;  %9577 = vmatpush.bf16.msrb.mxu3 %v12231_v34 }
 0x387   : > { %v16101_v23 = vld [vmem:[%s18105_s10 + $0x224] sm:$0xf0] }
 0x388   : > { %v11942_v33 = vld [vmem:[%s18105_s10 + $0x408] sm:$0xf]  ;;  %v11687_v57 = vor.u32 %v16101_v23, %v11686_v55  ;;  %9539 = vmatpush.bf16.msrb.mxu0 %v11431_v47 }
 0x389   : > { %v16165_v35 = vld [vmem:[%s18105_s10 + $0x424] sm:$0xf0] }
 0x38a   : > { %v12198_v36 = vld [vmem:[%s18105_s10 + $0x608] sm:$0xf]  ;;  %v11943_v59 = vor.u32 %v16165_v35, %v11942_v33  ;;  %9552 = vmatpush.bf16.msrb.mxu1 %v11687_v57 }
 0x38b   : > { %v16229_v38 = vld [vmem:[%s18105_s10 + $0x624] sm:$0xf0]  ;;  %9540 = vmatmul.bf16.vlgmr.msrb.gmra.mxu0 %v18211_v53 }
 0x38c   : > { %v12678_v42 = vld [vmem:[%s18105_s10 + $0x9c8] sm:$0xf]  ;;  %v12199_v3 = vor.u32 %v16229_v38, %v12198_v36  ;;  %9565 = vmatpush.bf16.msrb.mxu2 %v11943_v59 }
 0x38d   : > { %v16349_v43 = vld [vmem:[%s18105_s10 + $0x9e4] sm:$0xf0]  ;;  %9553 = vmatmul.bf16.vlgmr.msrb.gmra.mxu1 %v18214_v54 }
 0x38e   : > { %v12934_v45 = vld [vmem:[%s18105_s10 + $0xbc8] sm:$0xf]  ;;  %v12679_v51 = vor.u32 %v16349_v43, %v12678_v42  ;;  %9578 = vmatpush.bf16.msrb.mxu3 %v12199_v3  ;;  %v9346_v3 = vpop.f32.mrf.mxu1 }
 0x38f   : > { %v16413_v48 = vld [vmem:[%s18105_s10 + $0xbe4] sm:$0xf0]  ;;  %9566 = vmatmul.bf16.vlgmr.msrb.gmra.mxu2 %v18197_v37 }
 0x390   : > { %v13190_v50 = vld [vmem:[%s18105_s10 + $0xdc8] sm:$0xf]  ;;  %v12935_v5 = vor.u32 %v16413_v48, %v12934_v45  ;;  %9584 = vmatpush.bf16.msra.mxu0 %v12679_v51  ;;  %v9333_v48 = vpop.f32.mrf.mxu0 }
 0x391   : > { %v16477_v52 = vld [vmem:[%s18105_s10 + $0xde4] sm:$0xf0]  ;;  %9579 = vmatmul.bf16.vlgmr.msrb.gmra.mxu3 %v18200_v39 }
 0x392   : > { %v13446_v26 = vld [vmem:[%s18105_s10 + $0xfc8] sm:$0xf]  ;;  %v13191_v6 = vor.u32 %v16477_v52, %v13190_v50  ;;  %9597 = vmatpush.bf16.msra.mxu1 %v12935_v5 }
 0x393   : > { %v16541_v60 = vld [vmem:[%s18105_s10 + $0xfe4] sm:$0xf0] }
 0x394   : > { %v12646_v9 = vld [vmem:[%s18105_s10 + $0x988] sm:$0xf]  ;;  %v13447_v44 = vor.u32 %v16541_v60, %v13446_v26  ;;  %9610 = vmatpush.bf16.msra.mxu2 %v13191_v6  ;;  %v9334_v60 = vadd.f32 %v9333_v48, %v18843_v14 }
 0x395   : > { %v16341_v49 = vld [vmem:[%s18105_s10 + $0x9a4] sm:$0xf0] }
 0x396   : > { %v12902_v12 = vld [vmem:[%s18105_s10 + $0xb88] sm:$0xf]  ;;  %v12647_v20 = vor.u32 %v16341_v49, %v12646_v9  ;;  %9623 = vmatpush.bf16.msra.mxu3 %v13447_v44  ;;  %v9347_v44 = vadd.f32 %v9346_v3, %v9334_v60 }
 0x397   : > { %v16405_v15 = vld [vmem:[%s18105_s10 + $0xba4] sm:$0xf0] }
 0x398   : > { %v13158_v16 = vld [vmem:[%s18105_s10 + $0xd88] sm:$0xf]  ;;  %v12903_v21 = vor.u32 %v16405_v15, %v12902_v12  ;;  %9585 = vmatpush.bf16.msra.mxu0 %v12647_v20  ;;  %v9359_v20 = vpop.f32.mrf.mxu2 }
 0x399   : > { %v16469_v17 = vld [vmem:[%s18105_s10 + $0xda4] sm:$0xf0] }
 0x39a   : > { %v13414_v18 = vld [vmem:[%s18105_s10 + $0xf88] sm:$0xf]  ;;  %v13159_v22 = vor.u32 %v16469_v17, %v13158_v16  ;;  %9598 = vmatpush.bf16.msra.mxu1 %v12903_v21 }
 0x39b   : > { %v16533_v19 = vld [vmem:[%s18105_s10 + $0xfa4] sm:$0xf0] }
 0x39c   : > { %v12614_v24 = vld [vmem:[%s18105_s10 + $0x948] sm:$0xf]  ;;  %v13415_v28 = vor.u32 %v16533_v19, %v13414_v18  ;;  %9611 = vmatpush.bf16.msra.mxu2 %v13159_v22 }
 0x39d   : > { %v16333_v25 = vld [vmem:[%s18105_s10 + $0x964] sm:$0xf0] }
 0x39e   : > { %v12870_v27 = vld [vmem:[%s18105_s10 + $0xb48] sm:$0xf]  ;;  %v12615_v55 = vor.u32 %v16333_v25, %v12614_v24  ;;  %9624 = vmatpush.bf16.msra.mxu3 %v13415_v28  ;;  %v9372_v28 = vpop.f32.mrf.mxu3 }
 0x39f   : > { %v16397_v30 = vld [vmem:[%s18105_s10 + $0xb64] sm:$0xf0] }
 0x3a0   : > { %v13126_v31 = vld [vmem:[%s18105_s10 + $0xd48] sm:$0xf]  ;;  %v12871_v23 = vor.u32 %v16397_v30, %v12870_v27  ;;  %9586 = vmatpush.bf16.msra.mxu0 %v12615_v55  ;;  %v9360_v27 = vadd.f32 %v9359_v20, %v9347_v44  ;;  %v9361_v3 = vpop.f32.mrf.mxu2 }
 0x3a1   : > { %v16461_v32 = vld [vmem:[%s18105_s10 + $0xd64] sm:$0xf0] }
 0x3a2   : > { %v13382_v29 = vld [vmem:[%s18105_s10 + $0xf48] sm:$0xf]  ;;  %v13127_v33 = vor.u32 %v16461_v32, %v13126_v31  ;;  %9599 = vmatpush.bf16.msra.mxu1 %v12871_v23 }
 0x3a3   : > { %v16525_v41 = vld [vmem:[%s18105_s10 + $0xf64] sm:$0xf0] }
 0x3a4   : > { %v12582_v34 = vld [vmem:[%s18105_s10 + $0x908] sm:$0xf]  ;;  %v13383_v38 = vor.u32 %v16525_v41, %v13382_v29  ;;  %9612 = vmatpush.bf16.msra.mxu2 %v13127_v33  ;;  %v18914_v29 = vadd.f32 %v9372_v28, %v9360_v27  ;;  %v9335_v41 = vpop.f32.mrf.mxu0 }
 0x3a5   : > { %v16325_v35 = vld [vmem:[%s18105_s10 + $0x924] sm:$0xf0] }
 0x3a6   : > { %v12838_v36 = vld [vmem:[%s18105_s10 + $0xb08] sm:$0xf]  ;;  %v12583_v47 = vor.u32 %v16325_v35, %v12582_v34  ;;  %9625 = vmatpush.bf16.msra.mxu3 %v13383_v38 }
 0x3a7   : > { %v16389_v40 = vld [vmem:[%s18105_s10 + $0xb24] sm:$0xf0] }
 0x3a8   : > { %v13094_v42 = vld [vmem:[%s18105_s10 + $0xd08] sm:$0xf]  ;;  %v12839_v50 = vor.u32 %v16389_v40, %v12838_v36  ;;  %9587 = vmatpush.bf16.msra.mxu0 %v12583_v47  ;;  %v9348_v36 = vpop.f32.mrf.mxu1 }
 0x3a9   : > { %v16453_v43 = vld [vmem:[%s18105_s10 + $0xd24] sm:$0xf0] }
 0x3aa   : > { %v13350_v45 = vld [vmem:[%s18105_s10 + $0xf08] sm:$0xf]  ;;  %v13095_v52 = vor.u32 %v16453_v43, %v13094_v42  ;;  %9600 = vmatpush.bf16.msra.mxu1 %v12839_v50 }
 0x3ab   : > { %v16517_v46 = vld [vmem:[%s18105_s10 + $0xf24] sm:$0xf0] }
 0x3ac   : > { %v12550_v57 = vld [vmem:[%s18105_s10 + $0x8c8] sm:$0xf]  ;;  %v13351_v51 = vor.u32 %v16517_v46, %v13350_v45  ;;  %9613 = vmatpush.bf16.msra.mxu2 %v13095_v52 }
 0x3ad   : > { %v16317_v59 = vld [vmem:[%s18105_s10 + $0x8e4] sm:$0xf0] }
 0x3ae   : > { %v12806_v26 = vld [vmem:[%s18105_s10 + $0xac8] sm:$0xf]  ;;  %v12551_v15 = vor.u32 %v16317_v59, %v12550_v57  ;;  %9626 = vmatpush.bf16.msra.mxu3 %v13351_v51 }
 0x3af   : > { %v16381_v5 = vld [vmem:[%s18105_s10 + $0xae4] sm:$0xf0] }
 0x3b0   : > { %v13062_v6 = vld [vmem:[%s18105_s10 + $0xcc8] sm:$0xf]  ;;  %v12807_v14 = vor.u32 %v16381_v5, %v12806_v26  ;;  %9588 = vmatpush.bf16.msra.mxu0 %v12551_v15 }
 0x3b1   : > { %v16445_v9 = vld [vmem:[%s18105_s10 + $0xce4] sm:$0xf0] }
 0x3b2   : > { %v13318_v49 = vld [vmem:[%s18105_s10 + $0xec8] sm:$0xf]  ;;  %v13063_v16 = vor.u32 %v16445_v9, %v13062_v6  ;;  %9601 = vmatpush.bf16.msra.mxu1 %v12807_v14 }
 0x3b3   : > { %v16509_v12 = vld [vmem:[%s18105_s10 + $0xee4] sm:$0xf0] }
 0x3b4   : > { %v12518_v17 = vld [vmem:[%s18105_s10 + $0x888] sm:$0xf]  ;;  %v13319_v21 = vor.u32 %v16509_v12, %v13318_v49  ;;  %9614 = vmatpush.bf16.msra.mxu2 %v13063_v16  ;;  %v9374_v49 = vpop.f32.mrf.mxu3 }
 0x3b5   : > { %v16309_v18 = vld [vmem:[%s18105_s10 + $0x8a4] sm:$0xf0] }
 0x3b6   : > { %v12774_v19 = vld [vmem:[%s18105_s10 + $0xa88] sm:$0xf]  ;;  %v12519_v32 = vor.u32 %v16309_v18, %v12518_v17  ;;  %9627 = vmatpush.bf16.msra.mxu3 %v13319_v21 }
 0x3b7   : > { %v16373_v22 = vld [vmem:[%s18105_s10 + $0xaa4] sm:$0xf0] }
 0x3b8   : > { %v13030_v24 = vld [vmem:[%s18105_s10 + $0xc88] sm:$0xf]  ;;  %v12775_v55 = vor.u32 %v16373_v22, %v12774_v19  ;;  %9589 = vmatpush.bf16.msra.mxu0 %v12519_v32 }
 0x3b9   : > { %v16437_v25 = vld [vmem:[%s18105_s10 + $0xca4] sm:$0xf0] }
 0x3ba   : > { %v13286_v30 = vld [vmem:[%s18105_s10 + $0xe88] sm:$0xf]  ;;  %v13031_v23 = vor.u32 %v16437_v25, %v13030_v24  ;;  %9602 = vmatpush.bf16.msra.mxu1 %v12775_v55 }
 0x3bb   : > { %v16501_v31 = vld [vmem:[%s18105_s10 + $0xea4] sm:$0xf0] }
 0x3bc   : > { %v12486_v33 = vld [vmem:[%s18105_s10 + $0x848] sm:$0xf]  ;;  %v13287_v38 = vor.u32 %v16501_v31, %v13286_v30  ;;  %9615 = vmatpush.bf16.msra.mxu2 %v13031_v23 }
 0x3bd   : > { %v16301_v34 = vld [vmem:[%s18105_s10 + $0x864] sm:$0xf0] }
 0x3be   : > { %v12742_v35 = vld [vmem:[%s18105_s10 + $0xa48] sm:$0xf]  ;;  %v12487_v47 = vor.u32 %v16301_v34, %v12486_v33  ;;  %9628 = vmatpush.bf16.msra.mxu3 %v13287_v38 }
 0x3bf   : > { %v16365_v40 = vld [vmem:[%s18105_s10 + $0xa64] sm:$0xf0] }
 0x3c0   : > { %v12998_v42 = vld [vmem:[%s18105_s10 + $0xc48] sm:$0xf]  ;;  %v12743_v52 = vor.u32 %v16365_v40, %v12742_v35  ;;  %9590 = vmatpush.bf16.msra.mxu0 %v12487_v47 }
 0x3c1   : > { %v16429_v43 = vld [vmem:[%s18105_s10 + $0xc64] sm:$0xf0] }
 0x3c2   : > { %v13254_v45 = vld [vmem:[%s18105_s10 + $0xe48] sm:$0xf]  ;;  %v12999_v57 = vor.u32 %v16429_v43, %v12998_v42  ;;  %9603 = vmatpush.bf16.msra.mxu1 %v12743_v52 }
 0x3c3   : > { %v16493_v46 = vld [vmem:[%s18105_s10 + $0xe64] sm:$0xf0] }
 0x3c4   : > { %v12454_v48 = vld [vmem:[%s18105_s10 + $0x808] sm:$0xf]  ;;  %v13255_v51 = vor.u32 %v16493_v46, %v13254_v45  ;;  %9616 = vmatpush.bf16.msra.mxu2 %v12999_v57 }
 0x3c5   : > { %v16293_v50 = vld [vmem:[%s18105_s10 + $0x824] sm:$0xf0] }
 0x3c6   : > { %v12710_v59 = vld [vmem:[%s18105_s10 + $0xa08] sm:$0xf]  ;;  %v12455_v14 = vor.u32 %v16293_v50, %v12454_v48  ;;  %9629 = vmatpush.bf16.msra.mxu3 %v13255_v51 }
 0x3c7   : > { %v16357_v26 = vld [vmem:[%s18105_s10 + $0xa24] sm:$0xf0] }
 0x3c8   : > { %v12966_v60 = vld [vmem:[%s18105_s10 + $0xc08] sm:$0xf]  ;;  %v12711_v19 = vor.u32 %v16357_v26, %v12710_v59  ;;  %9591 = vmatpush.bf16.msra.mxu0 %v12455_v14 }
 0x3c9   : > { %v16421_v5 = vld [vmem:[%s18105_s10 + $0xc24] sm:$0xf0] }
 0x3ca   : > { %v13222_v6 = vld [vmem:[%s18105_s10 + $0xe08] sm:$0xf]  ;;  %v12967_v20 = vor.u32 %v16421_v5, %v12966_v60  ;;  %9604 = vmatpush.bf16.msra.mxu1 %v12711_v19 }
 0x3cb   : > { %v16485_v9 = vld [vmem:[%s18105_s10 + $0xe24] sm:$0xf0]  ;;  %9592 = vmatmul.bf16.vlgmr.msra.gmra.mxu0 %v18270_v10 }
 0x3cc   : > { %v13702_v12 = vld [vmem:[%s18105_s10 + $0x11c8] sm:$0xf]  ;;  %v13223_v24 = vor.u32 %v16485_v9, %v13222_v6  ;;  %9617 = vmatpush.bf16.msra.mxu2 %v12967_v20 }
 0x3cd   : > { %v16605_v44 = vld [vmem:[%s18105_s10 + $0x11e4] sm:$0xf0]  ;;  %9605 = vmatmul.bf16.vlgmr.msra.gmra.mxu1 %v18274_v13 }
 0x3ce   : > { %v13958_v15 = vld [vmem:[%s18105_s10 + $0x13c8] sm:$0xf]  ;;  %v13703_v25 = vor.u32 %v16605_v44, %v13702_v12  ;;  %9630 = vmatpush.bf16.msra.mxu3 %v13223_v24  ;;  %v18966_v44 = vpop.f32.mrf.mxu0 }
 0x3cf   : > { %v16669_v16 = vld [vmem:[%s18105_s10 + $0x13e4] sm:$0xf0]  ;;  %9618 = vmatmul.bf16.vlgmr.msra.gmra.mxu2 %v18266_v7 }
 0x3d0   : > { %v14214_v17 = vld [vmem:[%s18105_s10 + $0x15c8] sm:$0xf]  ;;  %v13959_v27 = vor.u32 %v16669_v16, %v13958_v15  ;;  %9636 = vmatpush.bf16.msrb.mxu0 %v13703_v25 }
 0x3d1   : > { %v16733_v18 = vld [vmem:[%s18105_s10 + $0x15e4] sm:$0xf0]  ;;  %9631 = vmatmul.bf16.vlgmr.msra.gmra.mxu3 %v18272_v11 }
 0x3d2   : > { %v14470_v21 = vld [vmem:[%s18105_s10 + $0x17c8] sm:$0xf]  ;;  %v14215_v28 = vor.u32 %v16733_v18, %v14214_v17  ;;  %9649 = vmatpush.bf16.msrb.mxu1 %v13959_v27  ;;  %v18970_v17 = vpop.f32.mrf.mxu1 }
 0x3d3   : > { %v16797_v22 = vld [vmem:[%s18105_s10 + $0x17e4] sm:$0xf0] }
 0x3d4   : > { %v13670_v30 = vld [vmem:[%s18105_s10 + $0x1188] sm:$0xf]  ;;  %v14471_v41 = vor.u32 %v16797_v22, %v14470_v21  ;;  %9662 = vmatpush.bf16.msrb.mxu2 %v14215_v28 }
 0x3d5   : > { %v16597_v31 = vld [vmem:[%s18105_s10 + $0x11a4] sm:$0xf0] }
 0x3d6   : > { %v13926_v32 = vld [vmem:[%s18105_s10 + $0x1388] sm:$0xf]  ;;  %v13671_v36 = vor.u32 %v16597_v31, %v13670_v30  ;;  %9675 = vmatpush.bf16.msrb.mxu3 %v14471_v41 }
 0x3d7   : > { %v16661_v55 = vld [vmem:[%s18105_s10 + $0x13a4] sm:$0xf0] }
 0x3d8   : > { %v14182_v23 = vld [vmem:[%s18105_s10 + $0x1588] sm:$0xf]  ;;  %v13927_v38 = vor.u32 %v16661_v55, %v13926_v32  ;;  %9637 = vmatpush.bf16.msrb.mxu0 %v13671_v36  ;;  %v18983_v36 = vpop.f32.mrf.mxu2 }
 0x3d9   : > { %v16725_v33 = vld [vmem:[%s18105_s10 + $0x15a4] sm:$0xf0] }
 0x3da   : > { %v14438_v34 = vld [vmem:[%s18105_s10 + $0x1788] sm:$0xf]  ;;  %v14183_v40 = vor.u32 %v16725_v33, %v14182_v23  ;;  %9650 = vmatpush.bf16.msrb.mxu1 %v13927_v38 }
 0x3db   : > { %v16789_v35 = vld [vmem:[%s18105_s10 + $0x17a4] sm:$0xf0] }
 0x3dc   : > { %v13638_v42 = vld [vmem:[%s18105_s10 + $0x1148] sm:$0xf]  ;;  %v14439_v46 = vor.u32 %v16789_v35, %v14438_v34  ;;  %9663 = vmatpush.bf16.msrb.mxu2 %v14183_v40 }
 0x3dd   : > { %v16589_v43 = vld [vmem:[%s18105_s10 + $0x1164] sm:$0xf0] }
 0x3de   : > { %v13894_v45 = vld [vmem:[%s18105_s10 + $0x1348] sm:$0xf]  ;;  %v13639_v59 = vor.u32 %v16589_v43, %v13638_v42  ;;  %9676 = vmatpush.bf16.msrb.mxu3 %v14439_v46  ;;  %v18988_v43 = vpop.f32.mrf.mxu3 }
 0x3df   : > { %v16653_v47 = vld [vmem:[%s18105_s10 + $0x1364] sm:$0xf0] }
 0x3e0   : > { %v14150_v48 = vld [vmem:[%s18105_s10 + $0x1548] sm:$0xf]  ;;  %v13895_v26 = vor.u32 %v16653_v47, %v13894_v45  ;;  %9638 = vmatpush.bf16.msrb.mxu0 %v13639_v59  ;;  %v9387_v47 = vpop.f32.mrf.mxu0 }
 0x3e1   : > { %v16717_v50 = vld [vmem:[%s18105_s10 + $0x1564] sm:$0xf0] }
 0x3e2   : > { %v14406_v52 = vld [vmem:[%s18105_s10 + $0x1748] sm:$0xf]  ;;  %v14151_v60 = vor.u32 %v16717_v50, %v14150_v48  ;;  %9651 = vmatpush.bf16.msrb.mxu1 %v13895_v26  ;;  %v9400_v50 = vpop.f32.mrf.mxu1 }
 0x3e3   : > { %v16781_v57 = vld [vmem:[%s18105_s10 + $0x1764] sm:$0xf0] }
 0x3e4   : > { %v13606_v3 = vld [vmem:[%s18105_s10 + $0x1108] sm:$0xf]  ;;  %v14407_v6 = vor.u32 %v16781_v57, %v14406_v52  ;;  %9664 = vmatpush.bf16.msrb.mxu2 %v14151_v60 }
 0x3e5   : > { %v16581_v51 = vld [vmem:[%s18105_s10 + $0x1124] sm:$0xf0] }
 0x3e6   : > { %v13862_v5 = vld [vmem:[%s18105_s10 + $0x1308] sm:$0xf]  ;;  %v13607_v16 = vor.u32 %v16581_v51, %v13606_v3  ;;  %9677 = vmatpush.bf16.msrb.mxu3 %v14407_v6 }
 0x3e7   : > { %v16645_v9 = vld [vmem:[%s18105_s10 + $0x1324] sm:$0xf0] }
 0x3e8   : > { %v14118_v49 = vld [vmem:[%s18105_s10 + $0x1508] sm:$0xf]  ;;  %v13863_v18 = vor.u32 %v16645_v9, %v13862_v5  ;;  %9639 = vmatpush.bf16.msrb.mxu0 %v13607_v16 }
 0x3e9   : > { %v16709_v12 = vld [vmem:[%s18105_s10 + $0x1524] sm:$0xf0] }
 0x3ea   : > { %v14374_v15 = vld [vmem:[%s18105_s10 + $0x1708] sm:$0xf]  ;;  %v14119_v19 = vor.u32 %v16709_v12, %v14118_v49  ;;  %9652 = vmatpush.bf16.msrb.mxu1 %v13863_v18 }
 0x3eb   : > { %v16773_v14 = vld [vmem:[%s18105_s10 + $0x1724] sm:$0xf0] }
 0x3ec   : > { %v13574_v20 = vld [vmem:[%s18105_s10 + $0x10c8] sm:$0xf]  ;;  %v14375_v24 = vor.u32 %v16773_v14, %v14374_v15  ;;  %9665 = vmatpush.bf16.msrb.mxu2 %v14119_v19 }
 0x3ed   : > { %v16573_v21 = vld [vmem:[%s18105_s10 + $0x10e4] sm:$0xf0] }
 0x3ee   : > { %v13830_v22 = vld [vmem:[%s18105_s10 + $0x12c8] sm:$0xf]  ;;  %v13575_v32 = vor.u32 %v16573_v21, %v13574_v20  ;;  %9678 = vmatpush.bf16.msrb.mxu3 %v14375_v24 }
 0x3ef   : > { %v16637_v25 = vld [vmem:[%s18105_s10 + $0x12e4] sm:$0xf0] }
 0x3f0   : > { %v14086_v27 = vld [vmem:[%s18105_s10 + $0x14c8] sm:$0xf]  ;;  %v13831_v41 = vor.u32 %v16637_v25, %v13830_v22  ;;  %9640 = vmatpush.bf16.msrb.mxu0 %v13575_v32 }
 0x3f1   : > { %v16701_v28 = vld [vmem:[%s18105_s10 + $0x14e4] sm:$0xf0] }
 0x3f2   : > { %v14342_v30 = vld [vmem:[%s18105_s10 + $0x16c8] sm:$0xf]  ;;  %v14087_v55 = vor.u32 %v16701_v28, %v14086_v27  ;;  %9653 = vmatpush.bf16.msrb.mxu1 %v13831_v41  ;;  %v9413_v28 = vpop.f32.mrf.mxu2  ;;  %v9426_v41 = vpop.f32.mrf.mxu3 }
 0x3f3   : > { %v16765_v31 = vld [vmem:[%s18105_s10 + $0x16e4] sm:$0xf0] }
 0x3f4   : > { %v13542_v23 = vld [vmem:[%s18105_s10 + $0x1088] sm:$0xf]  ;;  %v14343_v35 = vor.u32 %v16765_v31, %v14342_v30  ;;  %9666 = vmatpush.bf16.msrb.mxu2 %v14087_v55 }
 0x3f5   : > { %v16565_v33 = vld [vmem:[%s18105_s10 + $0x10a4] sm:$0xf0] }
 0x3f6   : > { %v13798_v34 = vld [vmem:[%s18105_s10 + $0x1288] sm:$0xf]  ;;  %v13543_v48 = vor.u32 %v16565_v33, %v13542_v23  ;;  %9679 = vmatpush.bf16.msrb.mxu3 %v14343_v35 }
 0x3f7   : > { %v16629_v38 = vld [vmem:[%s18105_s10 + $0x12a4] sm:$0xf0] }
 0x3f8   : > { %v14054_v40 = vld [vmem:[%s18105_s10 + $0x1488] sm:$0xf]  ;;  %v13799_v52 = vor.u32 %v16629_v38, %v13798_v34  ;;  %9641 = vmatpush.bf16.msrb.mxu0 %v13543_v48 }
 0x3f9   : > { %v16693_v42 = vld [vmem:[%s18105_s10 + $0x14a4] sm:$0xf0] }
 0x3fa   : > { %v14310_v45 = vld [vmem:[%s18105_s10 + $0x1688] sm:$0xf]  ;;  %v14055_v57 = vor.u32 %v16693_v42, %v14054_v40  ;;  %9654 = vmatpush.bf16.msrb.mxu1 %v13799_v52 }
 0x3fb   : > { %v16757_v46 = vld [vmem:[%s18105_s10 + $0x16a4] sm:$0xf0] }
 0x3fc   : > { %v13510_v59 = vld [vmem:[%s18105_s10 + $0x1048] sm:$0xf]  ;;  %v14311_v3 = vor.u32 %v16757_v46, %v14310_v45  ;;  %9667 = vmatpush.bf16.msrb.mxu2 %v14055_v57 }
 0x3fd   : > { %v16557_v26 = vld [vmem:[%s18105_s10 + $0x1064] sm:$0xf0] }
 0x3fe   : > { %v13766_v60 = vld [vmem:[%s18105_s10 + $0x1248] sm:$0xf]  ;;  %v13511_v12 = vor.u32 %v16557_v26, %v13510_v59  ;;  %9680 = vmatpush.bf16.msrb.mxu3 %v14311_v3 }
 0x3ff   : > { %v16621_v51 = vld [vmem:[%s18105_s10 + $0x1264] sm:$0xf0] }
 0x400   : > { %v14022_v5 = vld [vmem:[%s18105_s10 + $0x1448] sm:$0xf]  ;;  %v13767_v16 = vor.u32 %v16621_v51, %v13766_v60  ;;  %9642 = vmatpush.bf16.msrb.mxu0 %v13511_v12 }
 0x401   : > { %v16685_v6 = vld [vmem:[%s18105_s10 + $0x1464] sm:$0xf0] }
 0x402   : > { %v14278_v9 = vld [vmem:[%s18105_s10 + $0x1648] sm:$0xf]  ;;  %v14023_v18 = vor.u32 %v16685_v6, %v14022_v5  ;;  %9655 = vmatpush.bf16.msrb.mxu1 %v13767_v16 }
 0x403   : > { %v16749_v49 = vld [vmem:[%s18105_s10 + $0x1664] sm:$0xf0] }
 0x404   : > { %v13478_v15 = vld [vmem:[%s18105_s10 + $0x1008] sm:$0xf]  ;;  %v14279_v22 = vor.u32 %v16749_v49, %v14278_v9  ;;  %9668 = vmatpush.bf16.msrb.mxu2 %v14023_v18 }
 0x405   : > { %v16549_v14 = vld [vmem:[%s18105_s10 + $0x1024] sm:$0xf0] }
 0x406   : > { %v13734_v19 = vld [vmem:[%s18105_s10 + $0x1208] sm:$0xf]  ;;  %v13479_v55 = vor.u32 %v16549_v14, %v13478_v15  ;;  %9681 = vmatpush.bf16.msrb.mxu3 %v14279_v22 }
 0x407   : > { %v16613_v20 = vld [vmem:[%s18105_s10 + $0x1224] sm:$0xf0] }
 0x408   : > { %v13990_v21 = vld [vmem:[%s18105_s10 + $0x1408] sm:$0xf]  ;;  %v13735_v35 = vor.u32 %v16613_v20, %v13734_v19  ;;  %9643 = vmatpush.bf16.msrb.mxu0 %v13479_v55 }
 0x409   : > { %v16677_v24 = vld [vmem:[%s18105_s10 + $0x1424] sm:$0xf0] }
 0x40a   : > { %v14246_v25 = vld [vmem:[%s18105_s10 + $0x1608] sm:$0xf]  ;;  %v13991_v38 = vor.u32 %v16677_v24, %v13990_v21  ;;  %9656 = vmatpush.bf16.msrb.mxu1 %v13735_v35 }
 0x40b   : > { %v16741_v27 = vld [vmem:[%s18105_s10 + $0x1624] sm:$0xf0]  ;;  %9644 = vmatmul.bf16.vlgmr.msrb.gmra.mxu0 %v18341_v58 }
 0x40c   : > { %v14726_v30 = vld [vmem:[%s18105_s10 + $0x19c8] sm:$0xf]  ;;  %v14247_v45 = vor.u32 %v16741_v27, %v14246_v25  ;;  %9669 = vmatpush.bf16.msrb.mxu2 %v13991_v38 }
 0x40d   : > { %v16861_v31 = vld [vmem:[%s18105_s10 + $0x19e4] sm:$0xf0]  ;;  %9657 = vmatmul.bf16.vlgmr.msrb.gmra.mxu1 %v18348_v63 }
 0x40e   : > { %v14982_v32 = vld [vmem:[%s18105_s10 + $0x1bc8] sm:$0xf]  ;;  %v14727_v46 = vor.u32 %v16861_v31, %v14726_v30  ;;  %9682 = vmatpush.bf16.msrb.mxu3 %v14247_v45 }
 0x40f   : > { %v16925_v23 = vld [vmem:[%s18105_s10 + $0x1be4] sm:$0xf0]  ;;  %9670 = vmatmul.bf16.vlgmr.msrb.gmra.mxu2 %v18346_v62 }
 0x410   : > { %v15238_v33 = vld [vmem:[%s18105_s10 + $0x1dc8] sm:$0xf]  ;;  %v14983_v47 = vor.u32 %v16925_v23, %v14982_v32  ;;  %9688 = vmatpush.bf16.msra.mxu0 %v14727_v46 }
 0x411   : > { %v16989_v34 = vld [vmem:[%s18105_s10 + $0x1de4] sm:$0xf0]  ;;  %9683 = vmatmul.bf16.vlgmr.msrb.gmra.mxu3 %v18352_v2 }
 0x412   : > { %v15494_v40 = vld [vmem:[%s18105_s10 + $0x1fc8] sm:$0xf]  ;;  %v15239_v48 = vor.u32 %v16989_v34, %v15238_v33  ;;  %9701 = vmatpush.bf16.msra.mxu1 %v14983_v47  ;;  %v19042_v33 = vpop.f32.mrf.mxu0 }
 0x413   : > { %v17053_v42 = vld [vmem:[%s18105_s10 + $0x1fe4] sm:$0xf0] }
 0x414   : > { %v14694_v50 = vld [vmem:[%s18105_s10 + $0x1988] sm:$0xf]  ;;  %v15495_v59 = vor.u32 %v17053_v42, %v15494_v40  ;;  %9714 = vmatpush.bf16.msra.mxu2 %v15239_v48  ;;  %v19046_v40 = vpop.f32.mrf.mxu1 }
 0x415   : > { %v16853_v52 = vld [vmem:[%s18105_s10 + $0x19a4] sm:$0xf0] }
 0x416   : > { %v14950_v57 = vld [vmem:[%s18105_s10 + $0x1b88] sm:$0xf]  ;;  %v14695_v6 = vor.u32 %v16853_v52, %v14694_v50  ;;  %9727 = vmatpush.bf16.msra.mxu3 %v15495_v59 }
 0x417   : > { %v16917_v26 = vld [vmem:[%s18105_s10 + $0x1ba4] sm:$0xf0] }
 0x418   : > { %v15206_v60 = vld [vmem:[%s18105_s10 + $0x1d88] sm:$0xf]  ;;  %v14951_v9 = vor.u32 %v16917_v26, %v14950_v57  ;;  %9689 = vmatpush.bf16.msra.mxu0 %v14695_v6 }
 0x419   : > { %v16981_v3 = vld [vmem:[%s18105_s10 + $0x1da4] sm:$0xf0] }
 0x41a   : > { %v15462_v51 = vld [vmem:[%s18105_s10 + $0x1f88] sm:$0xf]  ;;  %v15207_v49 = vor.u32 %v16981_v3, %v15206_v60  ;;  %9702 = vmatpush.bf16.msra.mxu1 %v14951_v9 }
 0x41b   : > { %v17045_v5 = vld [vmem:[%s18105_s10 + $0x1fa4] sm:$0xf0] }
 0x41c   : > { %v14662_v12 = vld [vmem:[%s18105_s10 + $0x1948] sm:$0xf]  ;;  %v15463_v16 = vor.u32 %v17045_v5, %v15462_v51  ;;  %9715 = vmatpush.bf16.msra.mxu2 %v15207_v49 }
 0x41d   : > { %v16845_v15 = vld [vmem:[%s18105_s10 + $0x1964] sm:$0xf0] }
 0x41e   : > { %v14918_v14 = vld [vmem:[%s18105_s10 + $0x1b48] sm:$0xf]  ;;  %v14663_v24 = vor.u32 %v16845_v15, %v14662_v12  ;;  %9728 = vmatpush.bf16.msra.mxu3 %v15463_v16  ;;  %v19059_v15 = vpop.f32.mrf.mxu2 }
 0x41f   : > { %v16909_v18 = vld [vmem:[%s18105_s10 + $0x1b64] sm:$0xf0] }
 0x420   : > { %v15174_v19 = vld [vmem:[%s18105_s10 + $0x1d48] sm:$0xf]  ;;  %v14919_v25 = vor.u32 %v16909_v18, %v14918_v14  ;;  %9690 = vmatpush.bf16.msra.mxu0 %v14663_v24  ;;  %v9439_v24 = vpop.f32.mrf.mxu0 }
 0x421   : > { %v16973_v20 = vld [vmem:[%s18105_s10 + $0x1d64] sm:$0xf0]  ;;  %v11912_v24 = vld [vmem:[%s18105_s10 + $0x3e8] sm:$0xf0] }
 0x422   : > { %v15430_v21 = vld [vmem:[%s18105_s10 + $0x1f48] sm:$0xf]  ;;  %v15175_v27 = vor.u32 %v16973_v20, %v15174_v19  ;;  %9703 = vmatpush.bf16.msra.mxu1 %v14919_v25  ;;  %v9386_v19 = vadd.f32 %v18966_v44, %v18914_v29  ;;  %v19066_v20 = vpop.f32.mrf.mxu3 }
 0x423   : > { %v17037_v22 = vld [vmem:[%s18105_s10 + $0x1f64] sm:$0xf0] }
 0x424   : > { %v14630_v28 = vld [vmem:[%s18105_s10 + $0x1908] sm:$0xf]  ;;  %v15431_v32 = vor.u32 %v17037_v22, %v15430_v21  ;;  %9716 = vmatpush.bf16.msra.mxu2 %v15175_v27  ;;  %v9452_v27 = vpop.f32.mrf.mxu1 }
 0x425   : > { %v16837_v30 = vld [vmem:[%s18105_s10 + $0x1924] sm:$0xf0] }
 0x426   : > { %v14886_v31 = vld [vmem:[%s18105_s10 + $0x1b08] sm:$0xf]  ;;  %v14631_v38 = vor.u32 %v16837_v30, %v14630_v28  ;;  %9729 = vmatpush.bf16.msra.mxu3 %v15431_v32 }
 0x427   : > { %v16901_v41 = vld [vmem:[%s18105_s10 + $0x1b24] sm:$0xf0] }
 0x428   : > { %v15142_v55 = vld [vmem:[%s18105_s10 + $0x1d08] sm:$0xf]  ;;  %v14887_v42 = vor.u32 %v16901_v41, %v14886_v31  ;;  %9691 = vmatpush.bf16.msra.mxu0 %v14631_v38 }
 0x429   : > { %v16965_v23 = vld [vmem:[%s18105_s10 + $0x1d24] sm:$0xf0] }
 0x42a   : > { %v15398_v34 = vld [vmem:[%s18105_s10 + $0x1f08] sm:$0xf]  ;;  %v15143_v45 = vor.u32 %v16965_v23, %v15142_v55  ;;  %9704 = vmatpush.bf16.msra.mxu1 %v14887_v42 }
 0x42b   : > { %v17029_v35 = vld [vmem:[%s18105_s10 + $0x1f24] sm:$0xf0] }
 0x42c   : > { %v14598_v46 = vld [vmem:[%s18105_s10 + $0x18c8] sm:$0xf]  ;;  %v15399_v50 = vor.u32 %v17029_v35, %v15398_v34  ;;  %9717 = vmatpush.bf16.msra.mxu2 %v15143_v45  ;;  %v9399_v34 = vadd.f32 %v18970_v17, %v9386_v19 }
 0x42d   : > { %v16829_v47 = vld [vmem:[%s18105_s10 + $0x18e4] sm:$0xf0] }
 0x42e   : > { %v14854_v48 = vld [vmem:[%s18105_s10 + $0x1ac8] sm:$0xf]  ;;  %v14599_v3 = vor.u32 %v16829_v47, %v14598_v46  ;;  %9730 = vmatpush.bf16.msra.mxu3 %v15399_v50  ;;  %v9412_v47 = vadd.f32 %v18983_v36, %v9399_v34  ;;  %v16145_v34 = vld [vmem:[%s18105_s10 + $0x38c] sm:$0xf] }
 0x42f   : > { %v16893_v52 = vld [vmem:[%s18105_s10 + $0x1ae4] sm:$0xf0] }
 0x430   : > { %v15110_v57 = vld [vmem:[%s18105_s10 + $0x1cc8] sm:$0xf]  ;;  %v14855_v51 = vor.u32 %v16893_v52, %v14854_v48  ;;  %9692 = vmatpush.bf16.msra.mxu0 %v14599_v3 }
 0x431   : > { %v16957_v59 = vld [vmem:[%s18105_s10 + $0x1ce4] sm:$0xf0] }
 0x432   : > { %v15366_v26 = vld [vmem:[%s18105_s10 + $0x1ec8] sm:$0xf]  ;;  %v15111_v5 = vor.u32 %v16957_v59, %v15110_v57  ;;  %9705 = vmatpush.bf16.msra.mxu1 %v14855_v51  ;;  %v9465_v51 = vpop.f32.mrf.mxu2 }
 0x433   : > { %v17021_v60 = vld [vmem:[%s18105_s10 + $0x1ee4] sm:$0xf0] }
 0x434   : > { %v14566_v6 = vld [vmem:[%s18105_s10 + $0x1888] sm:$0xf]  ;;  %v15367_v12 = vor.u32 %v17021_v60, %v15366_v26  ;;  %9718 = vmatpush.bf16.msra.mxu2 %v15111_v5 }
 0x435   : > { %v16821_v9 = vld [vmem:[%s18105_s10 + $0x18a4] sm:$0xf0] }
 0x436   : > { %v14822_v49 = vld [vmem:[%s18105_s10 + $0x1a88] sm:$0xf]  ;;  %v14567_v25 = vor.u32 %v16821_v9, %v14566_v6  ;;  %9731 = vmatpush.bf16.msra.mxu3 %v15367_v12  ;;  %v9478_v9 = vpop.f32.mrf.mxu3 }
 0x437   : > { %v16885_v14 = vld [vmem:[%s18105_s10 + $0x1aa4] sm:$0xf0] }
 0x438   : > { %v15078_v16 = vld [vmem:[%s18105_s10 + $0x1c88] sm:$0xf]  ;;  %v14823_v28 = vor.u32 %v16885_v14, %v14822_v49  ;;  %9693 = vmatpush.bf16.msra.mxu0 %v14567_v25  ;;  %v16089_v14 = vld [vmem:[%s18105_s10 + $0x1cc] sm:$0xf] }
 0x439   : > { %v16949_v18 = vld [vmem:[%s18105_s10 + $0x1ca4] sm:$0xf0] }
 0x43a   : > { %v15334_v21 = vld [vmem:[%s18105_s10 + $0x1e88] sm:$0xf]  ;;  %v15079_v30 = vor.u32 %v16949_v18, %v15078_v16  ;;  %9706 = vmatpush.bf16.msra.mxu1 %v14823_v28  ;;  %v11656_v16 = vld [vmem:[%s18105_s10 + $0x1e8] sm:$0xf0]  ;;  %v9425_v18 = vadd.f32 %v18988_v43, %v9412_v47 }
 0x43b   : > { %v17013_v22 = vld [vmem:[%s18105_s10 + $0x1ea4] sm:$0xf0] }
 0x43c   : > { %v14534_v29 = vld [vmem:[%s18105_s10 + $0x1848] sm:$0xf]  ;;  %v15335_v32 = vor.u32 %v17013_v22, %v15334_v21  ;;  %9719 = vmatpush.bf16.msra.mxu2 %v15079_v30  ;;  %v16153_v22 = vld [vmem:[%s18105_s10 + $0x3cc] sm:$0xf]  ;;  %v9438_v28 = vadd.f32 %v19042_v33, %v9425_v18 }
 0x43d   : > { %v16813_v44 = vld [vmem:[%s18105_s10 + $0x1864] sm:$0xf0]  ;;  %v16129_v18 = vld [vmem:[%s18105_s10 + $0x30c] sm:$0xf] }
 0x43e   : > { %v14790_v31 = vld [vmem:[%s18105_s10 + $0x1a48] sm:$0xf]  ;;  %v14535_v42 = vor.u32 %v16813_v44, %v14534_v29  ;;  %9732 = vmatpush.bf16.msra.mxu3 %v15335_v32  ;;  %v11659_v29 = vor.u32 %v16089_v14, %v11656_v16  ;;  %v11915_v32 = vor.u32 %v16153_v22, %v11912_v24  ;;  %v9489_v16 = vpop.f32.mrf.mxu0  ;;  %v9502_v22 = vpop.f32.mrf.mxu1 }
 0x43f   : > { %v16877_v41 = vld [vmem:[%s18105_s10 + $0x1a64] sm:$0xf0] }
 0x440   : > { %v15046_v55 = vld [vmem:[%s18105_s10 + $0x1c48] sm:$0xf]  ;;  %v14791_v48 = vor.u32 %v16877_v41, %v14790_v31  ;;  %9694 = vmatpush.bf16.msra.mxu0 %v14535_v42 }
 0x441   : > { %v16941_v23 = vld [vmem:[%s18105_s10 + $0x1c64] sm:$0xf0] }
 0x442   : > { %v15302_v35 = vld [vmem:[%s18105_s10 + $0x1e48] sm:$0xf]  ;;  %v15047_v50 = vor.u32 %v16941_v23, %v15046_v55  ;;  %9707 = vmatpush.bf16.msra.mxu1 %v14791_v48  ;;  %v16081_v55 = vld [vmem:[%s18105_s10 + $0x18c] sm:$0xf] }
 0x443   : > { %v17005_v38 = vld [vmem:[%s18105_s10 + $0x1e64] sm:$0xf0]  ;;  %v11624_v23 = vld [vmem:[%s18105_s10 + $0x1a8] sm:$0xf0] }
 0x444   : > { %v14502_v45 = vld [vmem:[%s18105_s10 + $0x1808] sm:$0xf]  ;;  %v15303_v59 = vor.u32 %v17005_v38, %v15302_v35  ;;  %9720 = vmatpush.bf16.msra.mxu2 %v15047_v50  ;;  %v11880_v35 = vld [vmem:[%s18105_s10 + $0x3a8] sm:$0xf0]  ;;  %v9451_v38 = vadd.f32 %v19046_v40, %v9438_v28 }
 0x445   : > { %v16805_v46 = vld [vmem:[%s18105_s10 + $0x1824] sm:$0xf0]  ;;  %v11883_v50 = vor.u32 %v16145_v34, %v11880_v35 }
 0x446   : > { %v14758_v17 = vld [vmem:[%s18105_s10 + $0x1a08] sm:$0xf]  ;;  %v14503_v49 = vor.u32 %v16805_v46, %v14502_v45  ;;  %9733 = vmatpush.bf16.msra.mxu3 %v15303_v59  ;;  %v11627_v45 = vor.u32 %v16081_v55, %v11624_v23  ;;  %v9464_v40 = vadd.f32 %v19059_v15, %v9451_v38  ;;  %v16137_v59 = vld [vmem:[%s18105_s10 + $0x34c] sm:$0xf] }
 0x447   : > { %v16869_v52 = vld [vmem:[%s18105_s10 + $0x1a24] sm:$0xf0] }
 0x448   : > { %v15014_v57 = vld [vmem:[%s18105_s10 + $0x1c08] sm:$0xf]  ;;  %v14759_v19 = vor.u32 %v16869_v52, %v14758_v17  ;;  %9695 = vmatpush.bf16.msra.mxu0 %v14503_v49  ;;  %v16073_v52 = vld [vmem:[%s18105_s10 + $0x14c] sm:$0xf]  ;;  %v9477_v14 = vadd.f32 %v19066_v20, %v9464_v40 }
 0x449   : > { %v16933_v26 = vld [vmem:[%s18105_s10 + $0x1c24] sm:$0xf0]  ;;  %v16065_v49 = vld [vmem:[%s18105_s10 + $0x10c] sm:$0xf] }
 0x44a   : > { %v15270_v60 = vld [vmem:[%s18105_s10 + $0x1e08] sm:$0xf]  ;;  %v15015_v21 = vor.u32 %v16933_v26, %v15014_v57  ;;  %9708 = vmatpush.bf16.msra.mxu1 %v14759_v19  ;;  %v11592_v57 = vld [vmem:[%s18105_s10 + $0x168] sm:$0xf0]  ;;  %v9490_v24 = vadd.f32 %v9489_v16, %v9477_v14 }
 0x44b   : > { %v16997_v3 = vld [vmem:[%s18105_s10 + $0x1e24] sm:$0xf0]  ;;  %9696 = vmatmul.bf16.vlgmr.msra.gmra.mxu0 %v18419_v56  ;;  %v11848_v26 = vld [vmem:[%s18105_s10 + $0x368] sm:$0xf0]  ;;  %v11595_v51 = vor.u32 %v16073_v52, %v11592_v57  ;;  %v9528_v52 = vpop.f32.mrf.mxu3 }
 0x44c   : > { %v15750_v36 = vld [vmem:[%s18105_s10 + $0x21c8] sm:$0xf]  ;;  %v15271_v25 = vor.u32 %v16997_v3, %v15270_v60  ;;  %9721 = vmatpush.bf16.msra.mxu2 %v15015_v21  ;;  %v11816_v19 = vld [vmem:[%s18105_s10 + $0x328] sm:$0xf0]  ;;  %v9503_v23 = vadd.f32 %v9502_v22, %v9490_v24 }
 0x44d   : > { %v17117_v5 = vld [vmem:[%s18105_s10 + $0x21e4] sm:$0xf0]  ;;  %9709 = vmatmul.bf16.vlgmr.msra.gmra.mxu1 %v18426_v0  ;;  %v16113_v57 = vld [vmem:[%s18105_s10 + $0x28c] sm:$0xf] }
 0x44e   : > { %v16006_v6 = vld [vmem:[%s18105_s10 + $0x23c8] sm:$0xf]  ;;  %v15751_v27 = vor.u32 %v17117_v5, %v15750_v36  ;;  %9734 = vmatpush.bf16.msra.mxu3 %v15271_v25  ;;  %v11752_v40 = vld [vmem:[%s18105_s10 + $0x2a8] sm:$0xf0] }
 0x44f   : > { %v17181_v12 = vld [vmem:[%s18105_s10 + $0x23e4] sm:$0xf0]  ;;  %9722 = vmatmul.bf16.vlgmr.msra.gmra.mxu2 %v18424_v61  ;;  %v16041_v14 = vld [vmem:[%s18105_s10 + $0x4c] sm:$0xf] }
 0x450   : > { %v16007_v30 = vor.u32 %v17181_v12, %v16006_v6  ;;  %v15718_v44 = vld [vmem:[%s18105_s10 + $0x2188] sm:$0xf]  ;;  %9740 = vmatpush.bf16.msrb.mxu0 %v15751_v27  ;;  %9766 = vmatpush.bf16.msrb.mxu2 %v11659_v29  ;;  %v11851_v6 = vor.u32 %v16137_v59, %v11848_v26  ;;  %v11560_v12 = vld [vmem:[%s18105_s10 + $0x128] sm:$0xf0]  ;;  %v11819_v29 = vor.u32 %v16129_v18, %v11816_v19  ;;  %v9491_v59 = vpop.f32.mrf.mxu0  ;;  %v2073_v26 = vld [vmem:[#allocation2] sm:$0xff] }
 0x451   : > { %v17109_v43 = vld [vmem:[%s18105_s10 + $0x21a4] sm:$0xf0]  ;;  %9735 = vmatmul.bf16.vlgmr.msra.gmra.mxu3 %v18430_v4  ;;  %v11563_v27 = vor.u32 %v16065_v49, %v11560_v12  ;;  %v11755_v49 = vor.u32 %v16113_v57, %v11752_v40  ;;  %v11464_v16 = vld [vmem:[%s18105_s10 + $0x68] sm:$0xf0] }
 0x452   : > { %v15974_v31 = vld [vmem:[%s18105_s10 + $0x2388] sm:$0xf]  ;;  %v15719_v33 = vor.u32 %v17109_v43, %v15718_v44  ;;  %9753 = vmatpush.bf16.msrb.mxu1 %v16007_v30  ;;  %9779 = vmatpush.bf16.msrb.mxu3 %v11915_v32  ;;  %v16057_v43 = vld [vmem:[%s18105_s10 + $0xcc] sm:$0xf] }
 0x453   : > { %v17173_v41 = vld [vmem:[%s18105_s10 + $0x23a4] sm:$0xf0]  ;;  %v16121_v32 = vld [vmem:[%s18105_s10 + $0x2cc] sm:$0xf] }
 0x454   : > { %v15975_v42 = vor.u32 %v17173_v41, %v15974_v31  ;;  %v15686_v46 = vld [vmem:[%s18105_s10 + $0x2148] sm:$0xf]  ;;  %9741 = vmatpush.bf16.msrb.mxu0 %v15719_v33  ;;  %9767 = vmatpush.bf16.msrb.mxu2 %v11627_v45  ;;  %v11528_v31 = vld [vmem:[%s18105_s10 + $0xe8] sm:$0xf0] }
 0x455   : > { %v17101_v47 = vld [vmem:[%s18105_s10 + $0x2164] sm:$0xf0]  ;;  %v11784_v41 = vld [vmem:[%s18105_s10 + $0x2e8] sm:$0xf0]  ;;  %v11531_v35 = vor.u32 %v16057_v43, %v11528_v31 }
 0x456   : > { %v15942_v48 = vld [vmem:[%s18105_s10 + $0x2348] sm:$0xf]  ;;  %v15687_v60 = vor.u32 %v17101_v47, %v15686_v46  ;;  %9754 = vmatpush.bf16.msrb.mxu1 %v15975_v42  ;;  %9780 = vmatpush.bf16.msrb.mxu3 %v11883_v50  ;;  %v11787_v45 = vor.u32 %v16121_v32, %v11784_v41  ;;  %v9515_v46 = vpop.f32.mrf.mxu2  ;;  %v11496_v50 = vld [vmem:[%s18105_s10 + $0xa8] sm:$0xf0] }
 0x457   : > { %v17165_v17 = vld [vmem:[%s18105_s10 + $0x2364] sm:$0xf0]  ;;  %v16105_v19 = vld [vmem:[%s18105_s10 + $0x24c] sm:$0xf] }
 0x458   : > { %v15943_v3 = vor.u32 %v17165_v17, %v15942_v48  ;;  %v15654_v15 = vld [vmem:[%s18105_s10 + $0x2108] sm:$0xf]  ;;  %9742 = vmatpush.bf16.msrb.mxu0 %v15687_v60  ;;  %9768 = vmatpush.bf16.msrb.mxu2 %v11595_v51  ;;  %v16049_v48 = vld [vmem:[%s18105_s10 + $0x8c] sm:$0xf]  ;;  %v9516_v17 = vadd.f32 %v9515_v46, %v9503_v23 }
 0x459   : > { %v17093_v36 = vld [vmem:[%s18105_s10 + $0x2124] sm:$0xf0]  ;;  %v11432_v43 = vld [vmem:[%s18105_s10 + $0x28] sm:$0xf0] }
 0x45a   : > { %v15910_v5 = vld [vmem:[%s18105_s10 + $0x2308] sm:$0xf]  ;;  %v15655_v21 = vor.u32 %v17093_v36, %v15654_v15  ;;  %9755 = vmatpush.bf16.msrb.mxu1 %v15943_v3  ;;  %9781 = vmatpush.bf16.msrb.mxu3 %v11851_v6  ;;  %v9504_v3 = vpop.f32.mrf.mxu1  ;;  %v9529_v51 = vadd.f32 %v9528_v52, %v9516_v17  ;;  %v11499_v36 = vor.u32 %v16049_v48, %v11496_v50  ;;  %v16097_v31 = vld [vmem:[%s18105_s10 + $0x20c] sm:$0xf] }
 0x45b   : > { %v17157_v9 = vld [vmem:[%s18105_s10 + $0x2324] sm:$0xf0]  ;;  %v11688_v32 = vld [vmem:[%s18105_s10 + $0x228] sm:$0xf0] }
 0x45c   : > { %v15911_v25 = vor.u32 %v17157_v9, %v15910_v5  ;;  %v15622_v28 = vld [vmem:[%s18105_s10 + $0x20c8] sm:$0xf]  ;;  %9743 = vmatpush.bf16.msrb.mxu0 %v15655_v21  ;;  %9769 = vmatpush.bf16.msrb.mxu2 %v11563_v27  ;;  %v10937_v18 = vadd.f32 %v9529_v51, %v2073_v26  ;;  %v11720_v21 = vld [vmem:[%s18105_s10 + $0x268] sm:$0xf0]  ;;  %v11691_v17 = vor.u32 %v16097_v31, %v11688_v32 }
 0x45d   : > { %v17085_v30 = vld [vmem:[%s18105_s10 + $0x20e4] sm:$0xf0]  ;;  %v12168_v23 = vld [vmem:[%s18105_s10 + $0x5e8] sm:$0xf0] }
 0x45e   : > { %v15878_v20 = vld [vmem:[%s18105_s10 + $0x22c8] sm:$0xf]  ;;  %v15623_v55 = vor.u32 %v17085_v30, %v15622_v28  ;;  %9756 = vmatpush.bf16.msrb.mxu1 %v15911_v25  ;;  %9782 = vmatpush.bf16.msrb.mxu3 %v11819_v29  ;;  %10945 = vst [vmem:[#allocation2] sm:$0xff] %v10937_v18  ;;  %v11467_v30 = vor.u32 %v16041_v14, %v11464_v16  ;;  %v16033_v29 = vld [vmem:[%s18105_s10 + $0xc] sm:$0xf]  ;;  %v9517_v41 = vpop.f32.mrf.mxu2 }
 0x45f   : > { %v17149_v44 = vld [vmem:[%s18105_s10 + $0x22e4] sm:$0xf0]  ;;  %v16409_v48 = vld [vmem:[%s18105_s10 + $0xbcc] sm:$0xf] }
 0x460   : > { %v15879_v34 = vor.u32 %v17149_v44, %v15878_v20  ;;  %v15590_v33 = vld [vmem:[%s18105_s10 + $0x2088] sm:$0xf]  ;;  %9744 = vmatpush.bf16.msrb.mxu0 %v15623_v55  ;;  %9770 = vmatpush.bf16.msrb.mxu2 %v11531_v35  ;;  %v11723_v44 = vor.u32 %v16105_v19, %v11720_v21  ;;  %v16217_v55 = vld [vmem:[%s18105_s10 + $0x5cc] sm:$0xf]  ;;  %v9530_v35 = vpop.f32.mrf.mxu3 }
 0x461   : > { %v17077_v38 = vld [vmem:[%s18105_s10 + $0x20a4] sm:$0xf0]  ;;  %v12936_v50 = vld [vmem:[%s18105_s10 + $0xbe8] sm:$0xf0]  ;;  %v12171_v52 = vor.u32 %v16217_v55, %v12168_v23 }
 0x462   : > { %v15846_v42 = vld [vmem:[%s18105_s10 + $0x2288] sm:$0xf]  ;;  %v15591_v60 = vor.u32 %v17077_v38, %v15590_v33  ;;  %9757 = vmatpush.bf16.msrb.mxu1 %v15879_v34  ;;  %9783 = vmatpush.bf16.msrb.mxu3 %v11787_v45  ;;  %v16281_v34 = vld [vmem:[%s18105_s10 + $0x7cc] sm:$0xf]  ;;  %v12939_v3 = vor.u32 %v16409_v48, %v12936_v50  ;;  %v9554_v48 = vpop.f32.mrf.mxu1 }
 0x463   : > { %v17141_v47 = vld [vmem:[%s18105_s10 + $0x22a4] sm:$0xf0]  ;;  %v12424_v38 = vld [vmem:[%s18105_s10 + $0x7e8] sm:$0xf0] }
 0x464   : > { %v15847_v15 = vor.u32 %v17141_v47, %v15846_v42  ;;  %v15558_v5 = vld [vmem:[%s18105_s10 + $0x2048] sm:$0xf]  ;;  %9745 = vmatpush.bf16.msrb.mxu0 %v15591_v60  ;;  %9771 = vmatpush.bf16.msrb.mxu2 %v11499_v36  ;;  %v16345_v42 = vld [vmem:[%s18105_s10 + $0x9cc] sm:$0xf]  ;;  %v11435_v47 = vor.u32 %v16033_v29, %v11432_v43  ;;  %v12427_v57 = vor.u32 %v16281_v34, %v12424_v38 }
 0x465   : > { %v17069_v6 = vld [vmem:[%s18105_s10 + $0x2064] sm:$0xf0]  ;;  %v12680_v45 = vld [vmem:[%s18105_s10 + $0x9e8] sm:$0xf0] }
 0x466   : > { %v15814_v9 = vld [vmem:[%s18105_s10 + $0x2248] sm:$0xf]  ;;  %v15559_v22 = vor.u32 %v17069_v6, %v15558_v5  ;;  %9758 = vmatpush.bf16.msrb.mxu1 %v15847_v15  ;;  %9784 = vmatpush.bf16.msrb.mxu3 %v11755_v49  ;;  %v12683_v40 = vor.u32 %v16345_v42, %v12680_v45  ;;  %v16209_v59 = vld [vmem:[%s18105_s10 + $0x58c] sm:$0xf] }
 0x467   : > { %v17133_v12 = vld [vmem:[%s18105_s10 + $0x2264] sm:$0xf0]  ;;  %v12136_v26 = vld [vmem:[%s18105_s10 + $0x5a8] sm:$0xf0] }
 0x468   : > { %v15526_v24 = vld [vmem:[%s18105_s10 + $0x2008] sm:$0xf]  ;;  %v15815_v28 = vor.u32 %v17133_v12, %v15814_v9  ;;  %9746 = vmatpush.bf16.msrb.mxu0 %v15559_v22  ;;  %9772 = vmatpush.bf16.msrb.mxu2 %v11467_v30  ;;  %v16273_v60 = vld [vmem:[%s18105_s10 + $0x78c] sm:$0xf]  ;;  %v12139_v9 = vor.u32 %v16209_v59, %v12136_v26 }
 0x469   : > { %v17061_v25 = vld [vmem:[%s18105_s10 + $0x2024] sm:$0xf0]  ;;  %v12392_v51 = vld [vmem:[%s18105_s10 + $0x7a8] sm:$0xf0] }
 0x46a   : > { %v15782_v27 = vld [vmem:[%s18105_s10 + $0x2208] sm:$0xf]  ;;  %v15527_v33 = vor.u32 %v17061_v25, %v15526_v24  ;;  %9759 = vmatpush.bf16.msrb.mxu1 %v15815_v28  ;;  %9785 = vmatpush.bf16.msrb.mxu3 %v11723_v44  ;;  %v16337_v15 = vld [vmem:[%s18105_s10 + $0x98c] sm:$0xf]  ;;  %v12395_v49 = vor.u32 %v16273_v60, %v12392_v51 }
 0x46b   : > { %v17125_v20 = vld [vmem:[%s18105_s10 + $0x2224] sm:$0xf0]  ;;  %v12648_v36 = vld [vmem:[%s18105_s10 + $0x9a8] sm:$0xf0] }
 0x46c   : > { %v15783_v46 = vor.u32 %v17125_v20, %v15782_v27  ;;  %9747 = vmatpush.bf16.msrb.mxu0 %v15527_v33  ;;  %9773 = vmatpush.bf16.msrb.mxu2 %v11435_v47  ;;  %v16401_v5 = vld [vmem:[%s18105_s10 + $0xb8c] sm:$0xf]  ;;  %v12651_v12 = vor.u32 %v16337_v15, %v12648_v36  ;;  %v9541_v33 = vpop.f32.mrf.mxu0 }
 0x46d   : > { %v12904_v6 = vld [vmem:[%s18105_s10 + $0xba8] sm:$0xf0] }
 0x46e   : > { %9760 = vmatpush.bf16.msrb.mxu1 %v15783_v46  ;;  %9786 = vmatpush.bf16.msrb.mxu3 %v11691_v17  ;;  %v16201_v14 = vld [vmem:[%s18105_s10 + $0x54c] sm:$0xf]  ;;  %v12907_v19 = vor.u32 %v16401_v5, %v12904_v6  ;;  %v9567_v6 = vpop.f32.mrf.mxu2 }
 0x46f   : > { %v12104_v16 = vld [vmem:[%s18105_s10 + $0x568] sm:$0xf0]  ;;  %9748 = vmatmul.bf16.vlgmr.msrb.gmra.mxu0 %v18496_v1  ;;  %9774 = vmatmul.bf16.vlgmr.msrb.gmra.mxu2 %v18211_v53 }
 0x470   : > { %9792 = vmatpush.bf16.msra.mxu0 %v12171_v52  ;;  %9818 = vmatpush.bf16.msra.mxu2 %v12683_v40  ;;  %v16265_v18 = vld [vmem:[%s18105_s10 + $0x74c] sm:$0xf]  ;;  %v12107_v28 = vor.u32 %v16201_v14, %v12104_v16  ;;  %v9555_v40 = vadd.f32 %v9554_v48, %v9541_v33 }
 0x471   : > { %v12360_v21 = vld [vmem:[%s18105_s10 + $0x768] sm:$0xf0]  ;;  %9761 = vmatmul.bf16.vlgmr.msrb.gmra.mxu1 %v18501_v8  ;;  %9787 = vmatmul.bf16.vlgmr.msrb.gmra.mxu3 %v18214_v54 }
 0x472   : > { %9805 = vmatpush.bf16.msra.mxu1 %v12427_v57  ;;  %9831 = vmatpush.bf16.msra.mxu3 %v12939_v3  ;;  %v16329_v22 = vld [vmem:[%s18105_s10 + $0x94c] sm:$0xf]  ;;  %v12363_v30 = vor.u32 %v16265_v18, %v12360_v21  ;;  %v9568_v16 = vadd.f32 %v9567_v6, %v9555_v40  ;;  %v9580_v18 = vpop.f32.mrf.mxu3 }
 0x473   : > { %v12616_v24 = vld [vmem:[%s18105_s10 + $0x968] sm:$0xf0] }
 0x474   : > { %v16393_v25 = vld [vmem:[%s18105_s10 + $0xb4c] sm:$0xf]  ;;  %9793 = vmatpush.bf16.msra.mxu0 %v12139_v9  ;;  %9819 = vmatpush.bf16.msra.mxu2 %v12651_v12  ;;  %v12619_v20 = vor.u32 %v16329_v22, %v12616_v24  ;;  %v19213_v24 = vadd.f32 %v9580_v18, %v9568_v16 }
 0x475   : > { %v12872_v27 = vld [vmem:[%s18105_s10 + $0xb68] sm:$0xf0] }
 0x476   : > { %9806 = vmatpush.bf16.msra.mxu1 %v12395_v49  ;;  %v16193_v29 = vld [vmem:[%s18105_s10 + $0x50c] sm:$0xf]  ;;  %9832 = vmatpush.bf16.msra.mxu3 %v12907_v19  ;;  %v12875_v31 = vor.u32 %v16393_v25, %v12872_v27  ;;  %v9543_v25 = vpop.f32.mrf.mxu0  ;;  %v9569_v48 = vpop.f32.mrf.mxu2 }
 0x477   : > { %v12072_v44 = vld [vmem:[%s18105_s10 + $0x528] sm:$0xf0] }
 0x478   : > { %v16257_v43 = vld [vmem:[%s18105_s10 + $0x70c] sm:$0xf]  ;;  %9794 = vmatpush.bf16.msra.mxu0 %v12107_v28  ;;  %v12075_v35 = vor.u32 %v16193_v29, %v12072_v44  ;;  %9820 = vmatpush.bf16.msra.mxu2 %v12619_v20  ;;  %v9556_v44 = vpop.f32.mrf.mxu1 }
 0x479   : > { %v12328_v32 = vld [vmem:[%s18105_s10 + $0x728] sm:$0xf0] }
 0x47a   : > { %v16321_v41 = vld [vmem:[%s18105_s10 + $0x90c] sm:$0xf]  ;;  %9807 = vmatpush.bf16.msra.mxu1 %v12363_v30  ;;  %v12331_v38 = vor.u32 %v16257_v43, %v12328_v32  ;;  %9833 = vmatpush.bf16.msra.mxu3 %v12875_v31  ;;  %v9582_v40 = vpop.f32.mrf.mxu3 }
 0x47b   : > { %v12584_v55 = vld [vmem:[%s18105_s10 + $0x928] sm:$0xf0] }
 0x47c   : > { %v16385_v23 = vld [vmem:[%s18105_s10 + $0xb0c] sm:$0xf]  ;;  %v12587_v42 = vor.u32 %v16321_v41, %v12584_v55  ;;  %9795 = vmatpush.bf16.msra.mxu0 %v12075_v35 }
 0x47d   : > { %v12840_v34 = vld [vmem:[%s18105_s10 + $0xb28] sm:$0xf0] }
 0x47e   : > { %v16185_v45 = vld [vmem:[%s18105_s10 + $0x4cc] sm:$0xf]  ;;  %v12843_v50 = vor.u32 %v16385_v23, %v12840_v34  ;;  %9808 = vmatpush.bf16.msra.mxu1 %v12331_v38  ;;  %9821 = vmatpush.bf16.msra.mxu2 %v12587_v42 }
 0x47f   : > { %v12040_v46 = vld [vmem:[%s18105_s10 + $0x4e8] sm:$0xf0] }
 0x480   : > { %v16249_v47 = vld [vmem:[%s18105_s10 + $0x6cc] sm:$0xf]  ;;  %v12043_v60 = vor.u32 %v16185_v45, %v12040_v46  ;;  %9834 = vmatpush.bf16.msra.mxu3 %v12843_v50 }
 0x481   : > { %v12296_v17 = vld [vmem:[%s18105_s10 + $0x6e8] sm:$0xf0] }
 0x482   : > { %v16313_v52 = vld [vmem:[%s18105_s10 + $0x8cc] sm:$0xf]  ;;  %v12299_v3 = vor.u32 %v16249_v47, %v12296_v17  ;;  %9796 = vmatpush.bf16.msra.mxu0 %v12043_v60 }
 0x483   : > { %v12552_v57 = vld [vmem:[%s18105_s10 + $0x8e8] sm:$0xf0] }
 0x484   : > { %v16377_v59 = vld [vmem:[%s18105_s10 + $0xacc] sm:$0xf]  ;;  %v12555_v51 = vor.u32 %v16313_v52, %v12552_v57  ;;  %9809 = vmatpush.bf16.msra.mxu1 %v12299_v3 }
 0x485   : > { %v12808_v26 = vld [vmem:[%s18105_s10 + $0xae8] sm:$0xf0] }
 0x486   : > { %v16177_v15 = vld [vmem:[%s18105_s10 + $0x48c] sm:$0xf]  ;;  %v12811_v9 = vor.u32 %v16377_v59, %v12808_v26  ;;  %9822 = vmatpush.bf16.msra.mxu2 %v12555_v51 }
 0x487   : > { %v12008_v36 = vld [vmem:[%s18105_s10 + $0x4a8] sm:$0xf0] }
 0x488   : > { %v16241_v5 = vld [vmem:[%s18105_s10 + $0x68c] sm:$0xf]  ;;  %v12011_v22 = vor.u32 %v16177_v15, %v12008_v36  ;;  %9835 = vmatpush.bf16.msra.mxu3 %v12811_v9 }
 0x489   : > { %v12264_v49 = vld [vmem:[%s18105_s10 + $0x6a8] sm:$0xf0] }
 0x48a   : > { %v16305_v12 = vld [vmem:[%s18105_s10 + $0x88c] sm:$0xf]  ;;  %v12267_v27 = vor.u32 %v16241_v5, %v12264_v49  ;;  %9797 = vmatpush.bf16.msra.mxu0 %v12011_v22 }
 0x48b   : > { %v12520_v14 = vld [vmem:[%s18105_s10 + $0x8a8] sm:$0xf0] }
 0x48c   : > { %v16369_v19 = vld [vmem:[%s18105_s10 + $0xa8c] sm:$0xf]  ;;  %v12523_v28 = vor.u32 %v16305_v12, %v12520_v14  ;;  %9810 = vmatpush.bf16.msra.mxu1 %v12267_v27 }
 0x48d   : > { %v12776_v21 = vld [vmem:[%s18105_s10 + $0xaa8] sm:$0xf0] }
 0x48e   : > { %v16169_v30 = vld [vmem:[%s18105_s10 + $0x44c] sm:$0xf]  ;;  %v12779_v43 = vor.u32 %v16369_v19, %v12776_v21  ;;  %9823 = vmatpush.bf16.msra.mxu2 %v12523_v28 }
 0x48f   : > { %v11976_v20 = vld [vmem:[%s18105_s10 + $0x468] sm:$0xf0] }
 0x490   : > { %v16233_v29 = vld [vmem:[%s18105_s10 + $0x64c] sm:$0xf]  ;;  %v11979_v34 = vor.u32 %v16169_v30, %v11976_v20  ;;  %9836 = vmatpush.bf16.msra.mxu3 %v12779_v43 }
 0x491   : > { %v12232_v31 = vld [vmem:[%s18105_s10 + $0x668] sm:$0xf0] }
 0x492   : > { %v16297_v32 = vld [vmem:[%s18105_s10 + $0x84c] sm:$0xf]  ;;  %v12235_v38 = vor.u32 %v16233_v29, %v12232_v31  ;;  %9798 = vmatpush.bf16.msra.mxu0 %v11979_v34 }
 0x493   : > { %v12488_v41 = vld [vmem:[%s18105_s10 + $0x868] sm:$0xf0] }
 0x494   : > { %v16361_v55 = vld [vmem:[%s18105_s10 + $0xa4c] sm:$0xf]  ;;  %v12491_v42 = vor.u32 %v16297_v32, %v12488_v41  ;;  %9811 = vmatpush.bf16.msra.mxu1 %v12235_v38 }
 0x495   : > { %v12744_v23 = vld [vmem:[%s18105_s10 + $0xa68] sm:$0xf0] }
 0x496   : > { %v16161_v35 = vld [vmem:[%s18105_s10 + $0x40c] sm:$0xf]  ;;  %v12747_v50 = vor.u32 %v16361_v55, %v12744_v23  ;;  %9824 = vmatpush.bf16.msra.mxu2 %v12491_v42 }
 0x497   : > { %v11944_v33 = vld [vmem:[%s18105_s10 + $0x428] sm:$0xf0] }
 0x498   : > { %v16225_v45 = vld [vmem:[%s18105_s10 + $0x60c] sm:$0xf]  ;;  %v11947_v3 = vor.u32 %v16161_v35, %v11944_v33  ;;  %9837 = vmatpush.bf16.msra.mxu3 %v12747_v50 }
 0x499   : > { %v12200_v46 = vld [vmem:[%s18105_s10 + $0x628] sm:$0xf0] }
 0x49a   : > { %v16289_v47 = vld [vmem:[%s18105_s10 + $0x80c] sm:$0xf]  ;;  %v12203_v5 = vor.u32 %v16225_v45, %v12200_v46  ;;  %9799 = vmatpush.bf16.msra.mxu0 %v11947_v3 }
 0x49b   : > { %v12456_v17 = vld [vmem:[%s18105_s10 + $0x828] sm:$0xf0] }
 0x49c   : > { %v16353_v52 = vld [vmem:[%s18105_s10 + $0xa0c] sm:$0xf]  ;;  %v12459_v6 = vor.u32 %v16289_v47, %v12456_v17  ;;  %9812 = vmatpush.bf16.msra.mxu1 %v12203_v5 }
 0x49d   : > { %v12712_v57 = vld [vmem:[%s18105_s10 + $0xa28] sm:$0xf0]  ;;  %9800 = vmatmul.bf16.vlgmr.msra.gmra.mxu0 %v18197_v37 }
 0x49e   : > { %v16473_v59 = vld [vmem:[%s18105_s10 + $0xdcc] sm:$0xf]  ;;  %v12715_v12 = vor.u32 %v16353_v52, %v12712_v57  ;;  %9825 = vmatpush.bf16.msra.mxu2 %v12459_v6 }
 0x49f   : > { %v13192_v26 = vld [vmem:[%s18105_s10 + $0xde8] sm:$0xf0]  ;;  %9813 = vmatmul.bf16.vlgmr.msra.gmra.mxu1 %v18200_v39 }
 0x4a0   : > { %v16537_v60 = vld [vmem:[%s18105_s10 + $0xfcc] sm:$0xf]  ;;  %v13195_v14 = vor.u32 %v16473_v59, %v13192_v26  ;;  %9838 = vmatpush.bf16.msra.mxu3 %v12715_v12  ;;  %v9606_v12 = vpop.f32.mrf.mxu1 }
 0x4a1   : > { %v13448_v51 = vld [vmem:[%s18105_s10 + $0xfe8] sm:$0xf0]  ;;  %9826 = vmatmul.bf16.vlgmr.msra.gmra.mxu2 %v18270_v10 }
 0x4a2   : > { %v16601_v15 = vld [vmem:[%s18105_s10 + $0x11cc] sm:$0xf]  ;;  %v13451_v16 = vor.u32 %v16537_v60, %v13448_v51  ;;  %9844 = vmatpush.bf16.msrb.mxu0 %v13195_v14  ;;  %v9593_v51 = vpop.f32.mrf.mxu0 }
 0x4a3   : > { %v13704_v36 = vld [vmem:[%s18105_s10 + $0x11e8] sm:$0xf0]  ;;  %9839 = vmatmul.bf16.vlgmr.msra.gmra.mxu3 %v18274_v13 }
 0x4a4   : > { %v16665_v9 = vld [vmem:[%s18105_s10 + $0x13cc] sm:$0xf]  ;;  %v13707_v18 = vor.u32 %v16601_v15, %v13704_v36  ;;  %9857 = vmatpush.bf16.msrb.mxu1 %v13451_v16 }
 0x4a5   : > { %v13960_v49 = vld [vmem:[%s18105_s10 + $0x13e8] sm:$0xf0] }
 0x4a6   : > { %v16465_v19 = vld [vmem:[%s18105_s10 + $0xd8c] sm:$0xf]  ;;  %v13963_v25 = vor.u32 %v16665_v9, %v13960_v49  ;;  %9870 = vmatpush.bf16.msrb.mxu2 %v13707_v18  ;;  %v9594_v49 = vadd.f32 %v9593_v51, %v19213_v24 }
 0x4a7   : > { %v13160_v21 = vld [vmem:[%s18105_s10 + $0xda8] sm:$0xf0] }
 0x4a8   : > { %v16529_v22 = vld [vmem:[%s18105_s10 + $0xf8c] sm:$0xf]  ;;  %v13163_v44 = vor.u32 %v16465_v19, %v13160_v21  ;;  %9883 = vmatpush.bf16.msrb.mxu3 %v13963_v25  ;;  %v9607_v25 = vadd.f32 %v9606_v12, %v9594_v49 }
 0x4a9   : > { %v13416_v27 = vld [vmem:[%s18105_s10 + $0xfa8] sm:$0xf0] }
 0x4aa   : > { %v16593_v28 = vld [vmem:[%s18105_s10 + $0x118c] sm:$0xf]  ;;  %v13419_v43 = vor.u32 %v16529_v22, %v13416_v27  ;;  %9845 = vmatpush.bf16.msrb.mxu0 %v13163_v44  ;;  %v9619_v44 = vpop.f32.mrf.mxu2 }
 0x4ab   : > { %v13672_v30 = vld [vmem:[%s18105_s10 + $0x11a8] sm:$0xf0] }
 0x4ac   : > { %v16657_v20 = vld [vmem:[%s18105_s10 + $0x138c] sm:$0xf]  ;;  %v13675_v31 = vor.u32 %v16593_v28, %v13672_v30  ;;  %9858 = vmatpush.bf16.msrb.mxu1 %v13419_v43 }
 0x4ad   : > { %v13928_v29 = vld [vmem:[%s18105_s10 + $0x13a8] sm:$0xf0] }
 0x4ae   : > { %v16457_v32 = vld [vmem:[%s18105_s10 + $0xd4c] sm:$0xf]  ;;  %v13931_v23 = vor.u32 %v16657_v20, %v13928_v29  ;;  %9871 = vmatpush.bf16.msrb.mxu2 %v13675_v31 }
 0x4af   : > { %v13128_v41 = vld [vmem:[%s18105_s10 + $0xd68] sm:$0xf0] }
 0x4b0   : > { %v16521_v55 = vld [vmem:[%s18105_s10 + $0xf4c] sm:$0xf]  ;;  %v13131_v45 = vor.u32 %v16457_v32, %v13128_v41  ;;  %9884 = vmatpush.bf16.msrb.mxu3 %v13931_v23  ;;  %v9632_v23 = vpop.f32.mrf.mxu3 }
 0x4b1   : > { %v13384_v34 = vld [vmem:[%s18105_s10 + $0xf68] sm:$0xf0] }
 0x4b2   : > { %v16585_v35 = vld [vmem:[%s18105_s10 + $0x114c] sm:$0xf]  ;;  %v13387_v46 = vor.u32 %v16521_v55, %v13384_v34  ;;  %9846 = vmatpush.bf16.msrb.mxu0 %v13131_v45  ;;  %v9620_v55 = vadd.f32 %v9619_v44, %v9607_v25  ;;  %v9621_v12 = vpop.f32.mrf.mxu2 }
 0x4b3   : > { %v13640_v33 = vld [vmem:[%s18105_s10 + $0x1168] sm:$0xf0] }
 0x4b4   : > { %v16649_v38 = vld [vmem:[%s18105_s10 + $0x134c] sm:$0xf]  ;;  %v13643_v47 = vor.u32 %v16585_v35, %v13640_v33  ;;  %9859 = vmatpush.bf16.msrb.mxu1 %v13387_v46 }
 0x4b5   : > { %v13896_v42 = vld [vmem:[%s18105_s10 + $0x1368] sm:$0xf0] }
 0x4b6   : > { %v16449_v48 = vld [vmem:[%s18105_s10 + $0xd0c] sm:$0xf]  ;;  %v13899_v52 = vor.u32 %v16649_v38, %v13896_v42  ;;  %9872 = vmatpush.bf16.msrb.mxu2 %v13643_v47  ;;  %v19284_v38 = vadd.f32 %v9632_v23, %v9620_v55  ;;  %v9595_v42 = vpop.f32.mrf.mxu0 }
 0x4b7   : > { %v13096_v50 = vld [vmem:[%s18105_s10 + $0xd28] sm:$0xf0] }
 0x4b8   : > { %v16513_v17 = vld [vmem:[%s18105_s10 + $0xf0c] sm:$0xf]  ;;  %v13099_v3 = vor.u32 %v16449_v48, %v13096_v50  ;;  %9885 = vmatpush.bf16.msrb.mxu3 %v13899_v52 }
 0x4b9   : > { %v13352_v57 = vld [vmem:[%s18105_s10 + $0xf28] sm:$0xf0] }
 0x4ba   : > { %v16577_v40 = vld [vmem:[%s18105_s10 + $0x110c] sm:$0xf]  ;;  %v13355_v15 = vor.u32 %v16513_v17, %v13352_v57  ;;  %9847 = vmatpush.bf16.msrb.mxu0 %v13099_v3  ;;  %v9608_v17 = vpop.f32.mrf.mxu1 }
 0x4bb   : > { %v13608_v59 = vld [vmem:[%s18105_s10 + $0x1128] sm:$0xf0] }
 0x4bc   : > { %v16641_v26 = vld [vmem:[%s18105_s10 + $0x130c] sm:$0xf]  ;;  %v13611_v36 = vor.u32 %v16577_v40, %v13608_v59  ;;  %9860 = vmatpush.bf16.msrb.mxu1 %v13355_v15 }
 0x4bd   : > { %v13864_v60 = vld [vmem:[%s18105_s10 + $0x1328] sm:$0xf0] }
 0x4be   : > { %v16441_v5 = vld [vmem:[%s18105_s10 + $0xccc] sm:$0xf]  ;;  %v13867_v14 = vor.u32 %v16641_v26, %v13864_v60  ;;  %9873 = vmatpush.bf16.msrb.mxu2 %v13611_v36 }
 0x4bf   : > { %v13064_v6 = vld [vmem:[%s18105_s10 + $0xce8] sm:$0xf0] }
 0x4c0   : > { %v16505_v9 = vld [vmem:[%s18105_s10 + $0xecc] sm:$0xf]  ;;  %v13067_v27 = vor.u32 %v16441_v5, %v13064_v6  ;;  %9886 = vmatpush.bf16.msrb.mxu3 %v13867_v14 }
 0x4c1   : > { %v13320_v16 = vld [vmem:[%s18105_s10 + $0xee8] sm:$0xf0] }
 0x4c2   : > { %v16569_v18 = vld [vmem:[%s18105_s10 + $0x10cc] sm:$0xf]  ;;  %v13323_v24 = vor.u32 %v16505_v9, %v13320_v16  ;;  %9848 = vmatpush.bf16.msrb.mxu0 %v13067_v27 }
 0x4c3   : > { %v13576_v19 = vld [vmem:[%s18105_s10 + $0x10e8] sm:$0xf0] }
 0x4c4   : > { %v16633_v21 = vld [vmem:[%s18105_s10 + $0x12cc] sm:$0xf]  ;;  %v13579_v28 = vor.u32 %v16569_v18, %v13576_v19  ;;  %9861 = vmatpush.bf16.msrb.mxu1 %v13323_v24 }
 0x4c5   : > { %v13832_v22 = vld [vmem:[%s18105_s10 + $0x12e8] sm:$0xf0] }
 0x4c6   : > { %v16433_v30 = vld [vmem:[%s18105_s10 + $0xc8c] sm:$0xf]  ;;  %v13835_v43 = vor.u32 %v16633_v21, %v13832_v22  ;;  %9874 = vmatpush.bf16.msrb.mxu2 %v13579_v28  ;;  %v9634_v21 = vpop.f32.mrf.mxu3 }
 0x4c7   : > { %v13032_v20 = vld [vmem:[%s18105_s10 + $0xca8] sm:$0xf0] }
 0x4c8   : > { %v16497_v29 = vld [vmem:[%s18105_s10 + $0xe8c] sm:$0xf]  ;;  %v13035_v33 = vor.u32 %v16433_v30, %v13032_v20  ;;  %9887 = vmatpush.bf16.msrb.mxu3 %v13835_v43 }
 0x4c9   : > { %v13288_v31 = vld [vmem:[%s18105_s10 + $0xea8] sm:$0xf0] }
 0x4ca   : > { %v16561_v32 = vld [vmem:[%s18105_s10 + $0x108c] sm:$0xf]  ;;  %v13291_v45 = vor.u32 %v16497_v29, %v13288_v31  ;;  %9849 = vmatpush.bf16.msrb.mxu0 %v13035_v33 }
 0x4cb   : > { %v13544_v41 = vld [vmem:[%s18105_s10 + $0x10a8] sm:$0xf0] }
 0x4cc   : > { %v16625_v34 = vld [vmem:[%s18105_s10 + $0x128c] sm:$0xf]  ;;  %v13547_v46 = vor.u32 %v16561_v32, %v13544_v41  ;;  %9862 = vmatpush.bf16.msrb.mxu1 %v13291_v45 }
 0x4cd   : > { %v13800_v35 = vld [vmem:[%s18105_s10 + $0x12a8] sm:$0xf0] }
 0x4ce   : > { %v16425_v47 = vld [vmem:[%s18105_s10 + $0xc4c] sm:$0xf]  ;;  %v13803_v52 = vor.u32 %v16625_v34, %v13800_v35  ;;  %9875 = vmatpush.bf16.msrb.mxu2 %v13547_v46 }
 0x4cf   : > { %v13000_v48 = vld [vmem:[%s18105_s10 + $0xc68] sm:$0xf0] }
 0x4d0   : > { %v16489_v50 = vld [vmem:[%s18105_s10 + $0xe4c] sm:$0xf]  ;;  %v13003_v3 = vor.u32 %v16425_v47, %v13000_v48  ;;  %9888 = vmatpush.bf16.msrb.mxu3 %v13803_v52 }
 0x4d1   : > { %v13256_v57 = vld [vmem:[%s18105_s10 + $0xe68] sm:$0xf0] }
 0x4d2   : > { %v16553_v40 = vld [vmem:[%s18105_s10 + $0x104c] sm:$0xf]  ;;  %v13259_v36 = vor.u32 %v16489_v50, %v13256_v57  ;;  %9850 = vmatpush.bf16.msrb.mxu0 %v13003_v3 }
 0x4d3   : > { %v13512_v59 = vld [vmem:[%s18105_s10 + $0x1068] sm:$0xf0] }
 0x4d4   : > { %v16617_v26 = vld [vmem:[%s18105_s10 + $0x124c] sm:$0xf]  ;;  %v13515_v5 = vor.u32 %v16553_v40, %v13512_v59  ;;  %9863 = vmatpush.bf16.msrb.mxu1 %v13259_v36 }
 0x4d5   : > { %v13768_v60 = vld [vmem:[%s18105_s10 + $0x1268] sm:$0xf0] }
 0x4d6   : > { %v16417_v51 = vld [vmem:[%s18105_s10 + $0xc0c] sm:$0xf]  ;;  %v13771_v14 = vor.u32 %v16617_v26, %v13768_v60  ;;  %9876 = vmatpush.bf16.msrb.mxu2 %v13515_v5 }
 0x4d7   : > { %v12968_v15 = vld [vmem:[%s18105_s10 + $0xc28] sm:$0xf0] }
 0x4d8   : > { %v16481_v6 = vld [vmem:[%s18105_s10 + $0xe0c] sm:$0xf]  ;;  %v12971_v24 = vor.u32 %v16417_v51, %v12968_v15  ;;  %9889 = vmatpush.bf16.msrb.mxu3 %v13771_v14 }
 0x4d9   : > { %v13224_v9 = vld [vmem:[%s18105_s10 + $0xe28] sm:$0xf0] }
 0x4da   : > { %v16545_v49 = vld [vmem:[%s18105_s10 + $0x100c] sm:$0xf]  ;;  %v13227_v29 = vor.u32 %v16481_v6, %v13224_v9  ;;  %9851 = vmatpush.bf16.msrb.mxu0 %v12971_v24 }
 0x4db   : > { %v13480_v16 = vld [vmem:[%s18105_s10 + $0x1028] sm:$0xf0] }
 0x4dc   : > { %v16609_v18 = vld [vmem:[%s18105_s10 + $0x120c] sm:$0xf]  ;;  %v13483_v44 = vor.u32 %v16545_v49, %v13480_v16  ;;  %9864 = vmatpush.bf16.msrb.mxu1 %v13227_v29 }
 0x4dd   : > { %v13736_v19 = vld [vmem:[%s18105_s10 + $0x1228] sm:$0xf0]  ;;  %9852 = vmatmul.bf16.vlgmr.msrb.gmra.mxu0 %v18266_v7 }
 0x4de   : > { %v16729_v22 = vld [vmem:[%s18105_s10 + $0x15cc] sm:$0xf]  ;;  %v13739_v32 = vor.u32 %v16609_v18, %v13736_v19  ;;  %9877 = vmatpush.bf16.msrb.mxu2 %v13483_v44 }
 0x4df   : > { %v14216_v25 = vld [vmem:[%s18105_s10 + $0x15e8] sm:$0xf0]  ;;  %9865 = vmatmul.bf16.vlgmr.msrb.gmra.mxu1 %v18272_v11 }
 0x4e0   : > { %v16793_v27 = vld [vmem:[%s18105_s10 + $0x17cc] sm:$0xf]  ;;  %v14219_v41 = vor.u32 %v16729_v22, %v14216_v25  ;;  %9890 = vmatpush.bf16.msrb.mxu3 %v13739_v32  ;;  %v19336_v25 = vpop.f32.mrf.mxu0 }
 0x4e1   : > { %v14472_v28 = vld [vmem:[%s18105_s10 + $0x17e8] sm:$0xf0]  ;;  %9878 = vmatmul.bf16.vlgmr.msrb.gmra.mxu2 %v18341_v58 }
 0x4e2   : > { %v16857_v30 = vld [vmem:[%s18105_s10 + $0x19cc] sm:$0xf]  ;;  %v14475_v55 = vor.u32 %v16793_v27, %v14472_v28  ;;  %9896 = vmatpush.bf16.msra.mxu0 %v14219_v41 }
 0x4e3   : > { %v14728_v20 = vld [vmem:[%s18105_s10 + $0x19e8] sm:$0xf0]  ;;  %9891 = vmatmul.bf16.vlgmr.msrb.gmra.mxu3 %v18348_v63 }
 0x4e4   : > { %v16921_v43 = vld [vmem:[%s18105_s10 + $0x1bcc] sm:$0xf]  ;;  %v14731_v23 = vor.u32 %v16857_v30, %v14728_v20  ;;  %9909 = vmatpush.bf16.msra.mxu1 %v14475_v55  ;;  %v19340_v30 = vpop.f32.mrf.mxu1 }
 0x4e5   : > { %v14984_v31 = vld [vmem:[%s18105_s10 + $0x1be8] sm:$0xf0] }
 0x4e6   : > { %v16721_v34 = vld [vmem:[%s18105_s10 + $0x158c] sm:$0xf]  ;;  %v14987_v42 = vor.u32 %v16921_v43, %v14984_v31  ;;  %9922 = vmatpush.bf16.msra.mxu2 %v14731_v23 }
 0x4e7   : > { %v14184_v35 = vld [vmem:[%s18105_s10 + $0x15a8] sm:$0xf0] }
 0x4e8   : > { %v16785_v33 = vld [vmem:[%s18105_s10 + $0x178c] sm:$0xf]  ;;  %v14187_v17 = vor.u32 %v16721_v34, %v14184_v35  ;;  %9935 = vmatpush.bf16.msra.mxu3 %v14987_v42 }
 0x4e9   : > { %v14440_v45 = vld [vmem:[%s18105_s10 + $0x17a8] sm:$0xf0] }
 0x4ea   : > { %v16849_v46 = vld [vmem:[%s18105_s10 + $0x198c] sm:$0xf]  ;;  %v14443_v52 = vor.u32 %v16785_v33, %v14440_v45  ;;  %9897 = vmatpush.bf16.msra.mxu0 %v14187_v17  ;;  %v19353_v17 = vpop.f32.mrf.mxu2 }
 0x4eb   : > { %v14696_v47 = vld [vmem:[%s18105_s10 + $0x19a8] sm:$0xf0] }
 0x4ec   : > { %v16913_v48 = vld [vmem:[%s18105_s10 + $0x1b8c] sm:$0xf]  ;;  %v14699_v57 = vor.u32 %v16849_v46, %v14696_v47  ;;  %9910 = vmatpush.bf16.msra.mxu1 %v14443_v52 }
 0x4ed   : > { %v14952_v50 = vld [vmem:[%s18105_s10 + $0x1ba8] sm:$0xf0] }
 0x4ee   : > { %v16713_v40 = vld [vmem:[%s18105_s10 + $0x154c] sm:$0xf]  ;;  %v14955_v60 = vor.u32 %v16913_v48, %v14952_v50  ;;  %9923 = vmatpush.bf16.msra.mxu2 %v14699_v57 }
 0x4ef   : > { %v14152_v59 = vld [vmem:[%s18105_s10 + $0x1568] sm:$0xf0] }
 0x4f0   : > { %v16777_v26 = vld [vmem:[%s18105_s10 + $0x174c] sm:$0xf]  ;;  %v14155_v6 = vor.u32 %v16713_v40, %v14152_v59  ;;  %9936 = vmatpush.bf16.msra.mxu3 %v14955_v60  ;;  %v19358_v59 = vpop.f32.mrf.mxu3 }
 0x4f1   : > { %v14408_v3 = vld [vmem:[%s18105_s10 + $0x1768] sm:$0xf0] }
 0x4f2   : > { %v16841_v51 = vld [vmem:[%s18105_s10 + $0x194c] sm:$0xf]  ;;  %v14411_v9 = vor.u32 %v16777_v26, %v14408_v3  ;;  %9898 = vmatpush.bf16.msra.mxu0 %v14155_v6  ;;  %v9647_v3 = vpop.f32.mrf.mxu0 }
 0x4f3   : > { %v14664_v15 = vld [vmem:[%s18105_s10 + $0x1968] sm:$0xf0] }
 0x4f4   : > { %v16905_v36 = vld [vmem:[%s18105_s10 + $0x1b4c] sm:$0xf]  ;;  %v14667_v49 = vor.u32 %v16841_v51, %v14664_v15  ;;  %9911 = vmatpush.bf16.msra.mxu1 %v14411_v9  ;;  %v9660_v15 = vpop.f32.mrf.mxu1 }
 0x4f5   : > { %v14920_v5 = vld [vmem:[%s18105_s10 + $0x1b68] sm:$0xf0] }
 0x4f6   : > { %v16705_v12 = vld [vmem:[%s18105_s10 + $0x150c] sm:$0xf]  ;;  %v14923_v18 = vor.u32 %v16905_v36, %v14920_v5  ;;  %9924 = vmatpush.bf16.msra.mxu2 %v14667_v49 }
 0x4f7   : > { %v14120_v14 = vld [vmem:[%s18105_s10 + $0x1528] sm:$0xf0] }
 0x4f8   : > { %v16769_v16 = vld [vmem:[%s18105_s10 + $0x170c] sm:$0xf]  ;;  %v14123_v28 = vor.u32 %v16705_v12, %v14120_v14  ;;  %9937 = vmatpush.bf16.msra.mxu3 %v14923_v18 }
 0x4f9   : > { %v14376_v19 = vld [vmem:[%s18105_s10 + $0x1728] sm:$0xf0] }
 0x4fa   : > { %v16833_v21 = vld [vmem:[%s18105_s10 + $0x190c] sm:$0xf]  ;;  %v14379_v20 = vor.u32 %v16769_v16, %v14376_v19  ;;  %9899 = vmatpush.bf16.msra.mxu0 %v14123_v28 }
 0x4fb   : > { %v14632_v22 = vld [vmem:[%s18105_s10 + $0x1928] sm:$0xf0] }
 0x4fc   : > { %v16897_v27 = vld [vmem:[%s18105_s10 + $0x1b0c] sm:$0xf]  ;;  %v14635_v29 = vor.u32 %v16833_v21, %v14632_v22  ;;  %9912 = vmatpush.bf16.msra.mxu1 %v14379_v20 }
 0x4fd   : > { %v14888_v24 = vld [vmem:[%s18105_s10 + $0x1b28] sm:$0xf0] }
 0x4fe   : > { %v16697_v44 = vld [vmem:[%s18105_s10 + $0x14cc] sm:$0xf]  ;;  %v14891_v32 = vor.u32 %v16897_v27, %v14888_v24  ;;  %9925 = vmatpush.bf16.msra.mxu2 %v14635_v29 }
 0x4ff   : > { %v14088_v43 = vld [vmem:[%s18105_s10 + $0x14e8] sm:$0xf0] }
 0x500   : > { %v16761_v31 = vld [vmem:[%s18105_s10 + $0x16cc] sm:$0xf]  ;;  %v14091_v33 = vor.u32 %v16697_v44, %v14088_v43  ;;  %9938 = vmatpush.bf16.msra.mxu3 %v14891_v32 }
 0x501   : > { %v14344_v41 = vld [vmem:[%s18105_s10 + $0x16e8] sm:$0xf0] }
 0x502   : > { %v16825_v55 = vld [vmem:[%s18105_s10 + $0x18cc] sm:$0xf]  ;;  %v14347_v42 = vor.u32 %v16761_v31, %v14344_v41  ;;  %9900 = vmatpush.bf16.msra.mxu0 %v14091_v33 }
 0x503   : > { %v14600_v23 = vld [vmem:[%s18105_s10 + $0x18e8] sm:$0xf0] }
 0x504   : > { %v16889_v34 = vld [vmem:[%s18105_s10 + $0x1acc] sm:$0xf]  ;;  %v14603_v45 = vor.u32 %v16825_v55, %v14600_v23  ;;  %9913 = vmatpush.bf16.msra.mxu1 %v14347_v42  ;;  %v9673_v23 = vpop.f32.mrf.mxu2  ;;  %v9686_v42 = vpop.f32.mrf.mxu3 }
 0x505   : > { %v14856_v35 = vld [vmem:[%s18105_s10 + $0x1ae8] sm:$0xf0] }
 0x506   : > { %v16689_v46 = vld [vmem:[%s18105_s10 + $0x148c] sm:$0xf]  ;;  %v14859_v50 = vor.u32 %v16889_v34, %v14856_v35  ;;  %9926 = vmatpush.bf16.msra.mxu2 %v14603_v45 }
 0x507   : > { %v14056_v47 = vld [vmem:[%s18105_s10 + $0x14a8] sm:$0xf0] }
 0x508   : > { %v16753_v48 = vld [vmem:[%s18105_s10 + $0x168c] sm:$0xf]  ;;  %v14059_v51 = vor.u32 %v16689_v46, %v14056_v47  ;;  %9939 = vmatpush.bf16.msra.mxu3 %v14859_v50 }
 0x509   : > { %v14312_v52 = vld [vmem:[%s18105_s10 + $0x16a8] sm:$0xf0] }
 0x50a   : > { %v16817_v57 = vld [vmem:[%s18105_s10 + $0x188c] sm:$0xf]  ;;  %v14315_v36 = vor.u32 %v16753_v48, %v14312_v52  ;;  %9901 = vmatpush.bf16.msra.mxu0 %v14059_v51 }
 0x50b   : > { %v14568_v40 = vld [vmem:[%s18105_s10 + $0x18a8] sm:$0xf0] }
 0x50c   : > { %v16881_v26 = vld [vmem:[%s18105_s10 + $0x1a8c] sm:$0xf]  ;;  %v14571_v5 = vor.u32 %v16817_v57, %v14568_v40  ;;  %9914 = vmatpush.bf16.msra.mxu1 %v14315_v36 }
 0x50d   : > { %v14824_v60 = vld [vmem:[%s18105_s10 + $0x1aa8] sm:$0xf0] }
 0x50e   : > { %v16681_v6 = vld [vmem:[%s18105_s10 + $0x144c] sm:$0xf]  ;;  %v14827_v12 = vor.u32 %v16881_v26, %v14824_v60  ;;  %9927 = vmatpush.bf16.msra.mxu2 %v14571_v5 }
 0x50f   : > { %v14024_v9 = vld [vmem:[%s18105_s10 + $0x1468] sm:$0xf0] }
 0x510   : > { %v16745_v49 = vld [vmem:[%s18105_s10 + $0x164c] sm:$0xf]  ;;  %v14027_v22 = vor.u32 %v16681_v6, %v14024_v9  ;;  %9940 = vmatpush.bf16.msra.mxu3 %v14827_v12 }
 0x511   : > { %v14280_v14 = vld [vmem:[%s18105_s10 + $0x1668] sm:$0xf0] }
 0x512   : > { %v16809_v16 = vld [vmem:[%s18105_s10 + $0x184c] sm:$0xf]  ;;  %v14283_v28 = vor.u32 %v16745_v49, %v14280_v14  ;;  %9902 = vmatpush.bf16.msra.mxu0 %v14027_v22 }
 0x513   : > { %v14536_v18 = vld [vmem:[%s18105_s10 + $0x1868] sm:$0xf0] }
 0x514   : > { %v16873_v19 = vld [vmem:[%s18105_s10 + $0x1a4c] sm:$0xf]  ;;  %v14539_v20 = vor.u32 %v16809_v16, %v14536_v18  ;;  %9915 = vmatpush.bf16.msra.mxu1 %v14283_v28 }
 0x515   : > { %v14792_v21 = vld [vmem:[%s18105_s10 + $0x1a68] sm:$0xf0] }
 0x516   : > { %v16673_v27 = vld [vmem:[%s18105_s10 + $0x140c] sm:$0xf]  ;;  %v14795_v31 = vor.u32 %v16873_v19, %v14792_v21  ;;  %9928 = vmatpush.bf16.msra.mxu2 %v14539_v20 }
 0x517   : > { %v13992_v24 = vld [vmem:[%s18105_s10 + $0x1428] sm:$0xf0] }
 0x518   : > { %v16737_v29 = vld [vmem:[%s18105_s10 + $0x160c] sm:$0xf]  ;;  %v13995_v45 = vor.u32 %v16673_v27, %v13992_v24  ;;  %9941 = vmatpush.bf16.msra.mxu3 %v14795_v31 }
 0x519   : > { %v14248_v44 = vld [vmem:[%s18105_s10 + $0x1628] sm:$0xf0] }
 0x51a   : > { %v16801_v43 = vld [vmem:[%s18105_s10 + $0x180c] sm:$0xf]  ;;  %v14251_v50 = vor.u32 %v16737_v29, %v14248_v44  ;;  %9903 = vmatpush.bf16.msra.mxu0 %v13995_v45 }
 0x51b   : > { %v14504_v32 = vld [vmem:[%s18105_s10 + $0x1828] sm:$0xf0] }
 0x51c   : > { %v16865_v41 = vld [vmem:[%s18105_s10 + $0x1a0c] sm:$0xf]  ;;  %v14507_v52 = vor.u32 %v16801_v43, %v14504_v32  ;;  %9916 = vmatpush.bf16.msra.mxu1 %v14251_v50 }
 0x51d   : > { %v14760_v55 = vld [vmem:[%s18105_s10 + $0x1a28] sm:$0xf0]  ;;  %9904 = vmatmul.bf16.vlgmr.msra.gmra.mxu0 %v18346_v62 }
 0x51e   : > { %v16985_v34 = vld [vmem:[%s18105_s10 + $0x1dcc] sm:$0xf]  ;;  %v14763_v26 = vor.u32 %v16865_v41, %v14760_v55  ;;  %9929 = vmatpush.bf16.msra.mxu2 %v14507_v52 }
 0x51f   : > { %v15240_v35 = vld [vmem:[%s18105_s10 + $0x1de8] sm:$0xf0]  ;;  %9917 = vmatmul.bf16.vlgmr.msra.gmra.mxu1 %v18352_v2 }
 0x520   : > { %v17049_v33 = vld [vmem:[%s18105_s10 + $0x1fcc] sm:$0xf]  ;;  %v15243_v60 = vor.u32 %v16985_v34, %v15240_v35  ;;  %9942 = vmatpush.bf16.msra.mxu3 %v14763_v26 }
 0x521   : > { %v15496_v46 = vld [vmem:[%s18105_s10 + $0x1fe8] sm:$0xf0]  ;;  %9930 = vmatmul.bf16.vlgmr.msra.gmra.mxu2 %v18419_v56 }
 0x522   : > { %v17113_v47 = vld [vmem:[%s18105_s10 + $0x21cc] sm:$0xf]  ;;  %v15499_v3 = vor.u32 %v17049_v33, %v15496_v46  ;;  %9948 = vmatpush.bf16.msrb.mxu0 %v15243_v60 }
 0x523   : > { %v15752_v48 = vld [vmem:[%s18105_s10 + $0x21e8] sm:$0xf0]  ;;  %9943 = vmatmul.bf16.vlgmr.msra.gmra.mxu3 %v18426_v0 }
 0x524   : > { %v17177_v57 = vld [vmem:[%s18105_s10 + $0x23cc] sm:$0xf]  ;;  %v15755_v51 = vor.u32 %v17113_v47, %v15752_v48  ;;  %9961 = vmatpush.bf16.msrb.mxu1 %v15499_v3  ;;  %v19412_v47 = vpop.f32.mrf.mxu0 }
 0x525   : > { %v16008_v40 = vld [vmem:[%s18105_s10 + $0x23e8] sm:$0xf0] }
 0x526   : > { %v16977_v15 = vld [vmem:[%s18105_s10 + $0x1d8c] sm:$0xf]  ;;  %v16011_v6 = vor.u32 %v17177_v57, %v16008_v40  ;;  %9974 = vmatpush.bf16.msrb.mxu2 %v15755_v51  ;;  %v19416_v57 = vpop.f32.mrf.mxu1 }
 0x527   : > { %v15208_v36 = vld [vmem:[%s18105_s10 + $0x1da8] sm:$0xf0] }
 0x528   : > { %v17041_v5 = vld [vmem:[%s18105_s10 + $0x1f8c] sm:$0xf]  ;;  %v15211_v18 = vor.u32 %v16977_v15, %v15208_v36  ;;  %9987 = vmatpush.bf16.msrb.mxu3 %v16011_v6 }
 0x529   : > { %v15464_v9 = vld [vmem:[%s18105_s10 + $0x1fa8] sm:$0xf0] }
 0x52a   : > { %v17105_v49 = vld [vmem:[%s18105_s10 + $0x218c] sm:$0xf]  ;;  %v15467_v19 = vor.u32 %v17041_v5, %v15464_v9  ;;  %9949 = vmatpush.bf16.msrb.mxu0 %v15211_v18 }
 0x52b   : > { %v15720_v12 = vld [vmem:[%s18105_s10 + $0x21a8] sm:$0xf0] }
 0x52c   : > { %v17169_v14 = vld [vmem:[%s18105_s10 + $0x238c] sm:$0xf]  ;;  %v15723_v21 = vor.u32 %v17105_v49, %v15720_v12  ;;  %9962 = vmatpush.bf16.msrb.mxu1 %v15467_v19 }
 0x52d   : > { %v15976_v16 = vld [vmem:[%s18105_s10 + $0x23a8] sm:$0xf0] }
 0x52e   : > { %v16969_v22 = vld [vmem:[%s18105_s10 + $0x1d4c] sm:$0xf]  ;;  %v15979_v28 = vor.u32 %v17169_v14, %v15976_v16  ;;  %9975 = vmatpush.bf16.msrb.mxu2 %v15723_v21 }
 0x52f   : > { %v15176_v27 = vld [vmem:[%s18105_s10 + $0x1d68] sm:$0xf0] }
 0x530   : > { %v17033_v24 = vld [vmem:[%s18105_s10 + $0x1f4c] sm:$0xf]  ;;  %v15179_v32 = vor.u32 %v16969_v22, %v15176_v27  ;;  %9988 = vmatpush.bf16.msrb.mxu3 %v15979_v28  ;;  %v9646_v22 = vadd.f32 %v19336_v25, %v19284_v38  ;;  %v9712_v25 = vpop.f32.mrf.mxu1 }
 0x531   : > { %v15432_v20 = vld [vmem:[%s18105_s10 + $0x1f68] sm:$0xf0] }
 0x532   : > { %v17097_v29 = vld [vmem:[%s18105_s10 + $0x214c] sm:$0xf]  ;;  %v15435_v41 = vor.u32 %v17033_v24, %v15432_v20  ;;  %9950 = vmatpush.bf16.msrb.mxu0 %v15179_v32  ;;  %v19431_v24 = vpop.f32.mrf.mxu2  ;;  %v9699_v32 = vpop.f32.mrf.mxu0 }
 0x533   : > { %v15688_v44 = vld [vmem:[%s18105_s10 + $0x2168] sm:$0xf0]  ;;  %v16286_v32 = vld [vmem:[%s18105_s10 + $0x7ec] sm:$0xf0] }
 0x534   : > { %v17161_v43 = vld [vmem:[%s18105_s10 + $0x234c] sm:$0xf]  ;;  %v15691_v55 = vor.u32 %v17097_v29, %v15688_v44  ;;  %9963 = vmatpush.bf16.msrb.mxu1 %v15435_v41  ;;  %v19436_v44 = vpop.f32.mrf.mxu3 }
 0x535   : > { %v15944_v31 = vld [vmem:[%s18105_s10 + $0x2368] sm:$0xf0] }
 0x536   : > { %v16961_v23 = vld [vmem:[%s18105_s10 + $0x1d0c] sm:$0xf]  ;;  %v15947_v33 = vor.u32 %v17161_v43, %v15944_v31  ;;  %9976 = vmatpush.bf16.msrb.mxu2 %v15691_v55 }
 0x537   : > { %v15144_v34 = vld [vmem:[%s18105_s10 + $0x1d28] sm:$0xf0] }
 0x538   : > { %v17025_v35 = vld [vmem:[%s18105_s10 + $0x1f0c] sm:$0xf]  ;;  %v15147_v52 = vor.u32 %v16961_v23, %v15144_v34  ;;  %9989 = vmatpush.bf16.msrb.mxu3 %v15947_v33  ;;  %v9659_v33 = vadd.f32 %v19340_v30, %v9646_v22 }
 0x539   : > { %v15400_v42 = vld [vmem:[%s18105_s10 + $0x1f28] sm:$0xf0] }
 0x53a   : > { %v17089_v45 = vld [vmem:[%s18105_s10 + $0x210c] sm:$0xf]  ;;  %v15403_v40 = vor.u32 %v17025_v35, %v15400_v42  ;;  %9951 = vmatpush.bf16.msrb.mxu0 %v15147_v52 }
 0x53b   : > { %v15656_v46 = vld [vmem:[%s18105_s10 + $0x2128] sm:$0xf0] }
 0x53c   : > { %v17153_v48 = vld [vmem:[%s18105_s10 + $0x230c] sm:$0xf]  ;;  %v15659_v26 = vor.u32 %v17089_v45, %v15656_v46  ;;  %9964 = vmatpush.bf16.msrb.mxu1 %v15403_v40  ;;  %v9672_v40 = vadd.f32 %v19353_v17, %v9659_v33 }
 0x53d   : > { %v15912_v50 = vld [vmem:[%s18105_s10 + $0x2328] sm:$0xf0] }
 0x53e   : > { %v16953_v60 = vld [vmem:[%s18105_s10 + $0x1ccc] sm:$0xf]  ;;  %v15915_v15 = vor.u32 %v17153_v48, %v15912_v50  ;;  %9977 = vmatpush.bf16.msrb.mxu2 %v15659_v26 }
 0x53f   : > { %v15112_v3 = vld [vmem:[%s18105_s10 + $0x1ce8] sm:$0xf0] }
 0x540   : > { %v17017_v51 = vld [vmem:[%s18105_s10 + $0x1ecc] sm:$0xf]  ;;  %v15115_v12 = vor.u32 %v16953_v60, %v15112_v3  ;;  %9990 = vmatpush.bf16.msrb.mxu3 %v15915_v15 }
 0x541   : > { %v15368_v36 = vld [vmem:[%s18105_s10 + $0x1ee8] sm:$0xf0] }
 0x542   : > { %v17081_v5 = vld [vmem:[%s18105_s10 + $0x20cc] sm:$0xf]  ;;  %v15371_v14 = vor.u32 %v17017_v51, %v15368_v36  ;;  %9952 = vmatpush.bf16.msrb.mxu0 %v15115_v12  ;;  %v9725_v12 = vpop.f32.mrf.mxu2 }
 0x543   : > { %v15624_v6 = vld [vmem:[%s18105_s10 + $0x20e8] sm:$0xf0]  ;;  %v11566_v12 = vld [vmem:[%s18105_s10 + $0x110] sm:$0xf] }
 0x544   : > { %v17145_v9 = vld [vmem:[%s18105_s10 + $0x22cc] sm:$0xf]  ;;  %v15627_v16 = vor.u32 %v17081_v5, %v15624_v6  ;;  %9965 = vmatpush.bf16.msrb.mxu1 %v15371_v14  ;;  %v11662_v14 = vld [vmem:[%s18105_s10 + $0x1d0] sm:$0xf] }
 0x545   : > { %v15880_v49 = vld [vmem:[%s18105_s10 + $0x22e8] sm:$0xf0] }
 0x546   : > { %v16945_v18 = vld [vmem:[%s18105_s10 + $0x1c8c] sm:$0xf]  ;;  %v15883_v27 = vor.u32 %v17145_v9, %v15880_v49  ;;  %9978 = vmatpush.bf16.msrb.mxu2 %v15627_v16  ;;  %v16094_v16 = vld [vmem:[%s18105_s10 + $0x1ec] sm:$0xf0] }
 0x547   : > { %v15080_v19 = vld [vmem:[%s18105_s10 + $0x1ca8] sm:$0xf0]  ;;  %v11663_v25 = vor.u32 %v16094_v16, %v11662_v14  ;;  %v16070_v14 = vld [vmem:[%s18105_s10 + $0x12c] sm:$0xf0] }
 0x548   : > { %v17009_v21 = vld [vmem:[%s18105_s10 + $0x1e8c] sm:$0xf]  ;;  %v15083_v38 = vor.u32 %v16945_v18, %v15080_v19  ;;  %9991 = vmatpush.bf16.msrb.mxu3 %v15883_v27  ;;  %v11918_v18 = vld [vmem:[%s18105_s10 + $0x3d0] sm:$0xf]  ;;  %v9738_v19 = vpop.f32.mrf.mxu3 }
 0x549   : > { %v15336_v28 = vld [vmem:[%s18105_s10 + $0x1ea8] sm:$0xf0]  ;;  %v16158_v27 = vld [vmem:[%s18105_s10 + $0x3ec] sm:$0xf0] }
 0x54a   : > { %v17073_v20 = vld [vmem:[%s18105_s10 + $0x208c] sm:$0xf]  ;;  %v15339_v41 = vor.u32 %v17009_v21, %v15336_v28  ;;  %9953 = vmatpush.bf16.msrb.mxu0 %v15083_v38  ;;  %v9685_v21 = vadd.f32 %v19358_v59, %v9672_v40  ;;  %v12174_v28 = vld [vmem:[%s18105_s10 + $0x5d0] sm:$0xf] }
 0x54b   : > { %v15592_v29 = vld [vmem:[%s18105_s10 + $0x20a8] sm:$0xf0]  ;;  %v11822_v16 = vld [vmem:[%s18105_s10 + $0x310] sm:$0xf] }
 0x54c   : > { %v17137_v43 = vld [vmem:[%s18105_s10 + $0x228c] sm:$0xf]  ;;  %v15595_v55 = vor.u32 %v17073_v20, %v15592_v29  ;;  %9966 = vmatpush.bf16.msrb.mxu1 %v15339_v41  ;;  %v16222_v20 = vld [vmem:[%s18105_s10 + $0x5ec] sm:$0xf0]  ;;  %v9698_v38 = vadd.f32 %v19412_v47, %v9685_v21  ;;  %v11919_v41 = vor.u32 %v16158_v27, %v11918_v18 }
 0x54d   : > { %v15848_v31 = vld [vmem:[%s18105_s10 + $0x22a8] sm:$0xf0]  ;;  %v12398_v47 = vld [vmem:[%s18105_s10 + $0x790] sm:$0xf] }
 0x54e   : > { %v16937_v23 = vld [vmem:[%s18105_s10 + $0x1c4c] sm:$0xf]  ;;  %v15851_v42 = vor.u32 %v17137_v43, %v15848_v31  ;;  %9979 = vmatpush.bf16.msrb.mxu2 %v15595_v55  ;;  %v12430_v31 = vld [vmem:[%s18105_s10 + $0x7d0] sm:$0xf]  ;;  %v12175_v55 = vor.u32 %v16222_v20, %v12174_v28  ;;  %v9749_v28 = vpop.f32.mrf.mxu0 }
 0x54f   : > { %v15048_v34 = vld [vmem:[%s18105_s10 + $0x1c68] sm:$0xf0]  ;;  %v12431_v33 = vor.u32 %v16286_v32, %v12430_v31  ;;  %v16134_v21 = vld [vmem:[%s18105_s10 + $0x32c] sm:$0xf0]  ;;  %v11567_v31 = vor.u32 %v16070_v14, %v11566_v12  ;;  %v2074_v32 = vld [vmem:[#allocation2 + $0x18] sm:$0xff] }
 0x550   : > { %v17001_v35 = vld [vmem:[%s18105_s10 + $0x1e4c] sm:$0xf]  ;;  %v15051_v26 = vor.u32 %v16937_v23, %v15048_v34  ;;  %9992 = vmatpush.bf16.msrb.mxu3 %v15851_v42  ;;  %v11630_v23 = vld [vmem:[%s18105_s10 + $0x190] sm:$0xf] }
 0x551   : > { %v15304_v45 = vld [vmem:[%s18105_s10 + $0x1e68] sm:$0xf0]  ;;  %v16086_v34 = vld [vmem:[%s18105_s10 + $0x1ac] sm:$0xf0] }
 0x552   : > { %v17065_v46 = vld [vmem:[%s18105_s10 + $0x204c] sm:$0xf]  ;;  %v15307_v3 = vor.u32 %v17001_v35, %v15304_v45  ;;  %9954 = vmatpush.bf16.msrb.mxu0 %v15051_v26  ;;  %v11886_v35 = vld [vmem:[%s18105_s10 + $0x390] sm:$0xf] }
 0x553   : > { %v15560_v48 = vld [vmem:[%s18105_s10 + $0x2068] sm:$0xf0]  ;;  %v16150_v42 = vld [vmem:[%s18105_s10 + $0x3ac] sm:$0xf0] }
 0x554   : > { %v17129_v50 = vld [vmem:[%s18105_s10 + $0x224c] sm:$0xf]  ;;  %v15563_v51 = vor.u32 %v17065_v46, %v15560_v48  ;;  %9967 = vmatpush.bf16.msrb.mxu1 %v15307_v3  ;;  %v12142_v45 = vld [vmem:[%s18105_s10 + $0x590] sm:$0xf]  ;;  %v11887_v40 = vor.u32 %v16150_v42, %v11886_v35 }
 0x555   : > { %v15816_v52 = vld [vmem:[%s18105_s10 + $0x2268] sm:$0xf0]  ;;  %v16214_v46 = vld [vmem:[%s18105_s10 + $0x5ac] sm:$0xf0] }
 0x556   : > { %v16929_v60 = vld [vmem:[%s18105_s10 + $0x1c0c] sm:$0xf]  ;;  %v15819_v17 = vor.u32 %v17129_v50, %v15816_v52  ;;  %9980 = vmatpush.bf16.msrb.mxu2 %v15563_v51  ;;  %v16278_v48 = vld [vmem:[%s18105_s10 + $0x7ac] sm:$0xf0]  ;;  %v9711_v50 = vadd.f32 %v19416_v57, %v9698_v38  ;;  %v11631_v52 = vor.u32 %v16086_v34, %v11630_v23  ;;  %v12143_v26 = vor.u32 %v16214_v46, %v12142_v45 }
 0x557   : > { %v15016_v30 = vld [vmem:[%s18105_s10 + $0x1c28] sm:$0xf0]  ;;  %v11854_v3 = vld [vmem:[%s18105_s10 + $0x350] sm:$0xf]  ;;  %v12399_v57 = vor.u32 %v16278_v48, %v12398_v47  ;;  %v11823_v38 = vor.u32 %v16134_v21, %v11822_v16 }
 0x558   : > { %v16993_v15 = vld [vmem:[%s18105_s10 + $0x1e0c] sm:$0xf]  ;;  %v15019_v22 = vor.u32 %v16929_v60, %v15016_v30  ;;  %9993 = vmatpush.bf16.msrb.mxu3 %v15819_v17  ;;  %v11598_v60 = vld [vmem:[%s18105_s10 + $0x150] sm:$0xf]  ;;  %v9724_v51 = vadd.f32 %v19431_v24, %v9711_v50 }
 0x559   : > { %v15272_v36 = vld [vmem:[%s18105_s10 + $0x1e28] sm:$0xf0]  ;;  %v16078_v30 = vld [vmem:[%s18105_s10 + $0x16c] sm:$0xf0] }
 0x55a   : > { %v17057_v5 = vld [vmem:[%s18105_s10 + $0x200c] sm:$0xf]  ;;  %v15275_v29 = vor.u32 %v16993_v15, %v15272_v36  ;;  %9955 = vmatpush.bf16.msrb.mxu0 %v15019_v22  ;;  %v16142_v15 = vld [vmem:[%s18105_s10 + $0x36c] sm:$0xf0]  ;;  %v11599_v24 = vor.u32 %v16078_v30, %v11598_v60  ;;  %v9737_v18 = vadd.f32 %v19436_v44, %v9724_v51  ;;  %v9762_v44 = vpop.f32.mrf.mxu1 }
 0x55b   : > { %v15528_v6 = vld [vmem:[%s18105_s10 + $0x2028] sm:$0xf0]  ;;  %v12110_v36 = vld [vmem:[%s18105_s10 + $0x550] sm:$0xf] }
 0x55c   : > { %v17121_v9 = vld [vmem:[%s18105_s10 + $0x220c] sm:$0xf]  ;;  %v15531_v43 = vor.u32 %v17057_v5, %v15528_v6  ;;  %9968 = vmatpush.bf16.msrb.mxu1 %v15275_v29  ;;  %v16206_v5 = vld [vmem:[%s18105_s10 + $0x56c] sm:$0xf0] }
 0x55d   : > { %v15784_v49 = vld [vmem:[%s18105_s10 + $0x2228] sm:$0xf0]  ;;  %9956 = vmatmul.bf16.vlgmr.msrb.gmra.mxu0 %v18424_v61  ;;  %v12366_v17 = vld [vmem:[%s18105_s10 + $0x750] sm:$0xf] }
 0x55e   : > { %v15787_v59 = vor.u32 %v17121_v9, %v15784_v49  ;;  %9981 = vmatpush.bf16.msrb.mxu2 %v15531_v43  ;;  %10000 = vmatpush.bf16.msra.mxu0 %v11663_v25  ;;  %v16270_v6 = vld [vmem:[%s18105_s10 + $0x76c] sm:$0xf0]  ;;  %v11855_v9 = vor.u32 %v16142_v15, %v11854_v3  ;;  %v12111_v49 = vor.u32 %v16206_v5, %v12110_v36  ;;  %v9775_v15 = vpop.f32.mrf.mxu2 }
 0x55f   : > { %9969 = vmatmul.bf16.vlgmr.msrb.gmra.mxu1 %v18430_v4  ;;  %v12367_v19 = vor.u32 %v16270_v6, %v12366_v17  ;;  %v12078_v22 = vld [vmem:[%s18105_s10 + $0x510] sm:$0xf]  ;;  %v9750_v43 = vadd.f32 %v9749_v28, %v9737_v18  ;;  %v9788_v17 = vpop.f32.mrf.mxu3  ;;  %v9751_v6 = vpop.f32.mrf.mxu0 }
 0x560   : > { %9994 = vmatpush.bf16.msrb.mxu3 %v15787_v59  ;;  %10013 = vmatpush.bf16.msra.mxu1 %v11919_v41  ;;  %v16198_v27 = vld [vmem:[%s18105_s10 + $0x52c] sm:$0xf0] }
 0x561   : > { %9982 = vmatmul.bf16.vlgmr.msrb.gmra.mxu2 %v18496_v1  ;;  %v12334_v20 = vld [vmem:[%s18105_s10 + $0x710] sm:$0xf]  ;;  %v12079_v59 = vor.u32 %v16198_v27, %v12078_v22  ;;  %v9763_v34 = vadd.f32 %v9762_v44, %v9750_v43 }
 0x562   : > { %10026 = vmatpush.bf16.msra.mxu2 %v12175_v55  ;;  %10001 = vmatpush.bf16.msra.mxu0 %v11631_v52  ;;  %v16262_v29 = vld [vmem:[%s18105_s10 + $0x72c] sm:$0xf0] }
 0x563   : > { %9995 = vmatmul.bf16.vlgmr.msrb.gmra.mxu3 %v18501_v8  ;;  %v11534_v25 = vld [vmem:[%s18105_s10 + $0xd0] sm:$0xf]  ;;  %v12335_v23 = vor.u32 %v16262_v29, %v12334_v20  ;;  %v10938_v47 = vadd.f32 %v9763_v34, %v2074_v32 }
 0x564   : > { %10039 = vmatpush.bf16.msra.mxu3 %v12431_v33  ;;  %10014 = vmatpush.bf16.msra.mxu1 %v11887_v40  ;;  %v16062_v41 = vld [vmem:[%s18105_s10 + $0xec] sm:$0xf0] }
 0x565   : > { %v11790_v55 = vld [vmem:[%s18105_s10 + $0x2d0] sm:$0xf]  ;;  %v11535_v48 = vor.u32 %v16062_v41, %v11534_v25  ;;  %10946 = vst [vmem:[#allocation2 + $0x18] sm:$0xff] %v10938_v47 }
 0x566   : > { %10027 = vmatpush.bf16.msra.mxu2 %v12143_v26  ;;  %10002 = vmatpush.bf16.msra.mxu0 %v11599_v24  ;;  %v16126_v35 = vld [vmem:[%s18105_s10 + $0x2ec] sm:$0xf0] }
 0x567   : > { %v12046_v33 = vld [vmem:[%s18105_s10 + $0x4d0] sm:$0xf]  ;;  %v11791_v52 = vor.u32 %v16126_v35, %v11790_v55  ;;  %v9790_v47 = vpop.f32.mrf.mxu3 }
 0x568   : > { %10040 = vmatpush.bf16.msra.mxu3 %v12399_v57  ;;  %10015 = vmatpush.bf16.msra.mxu1 %v11855_v9  ;;  %v16190_v42 = vld [vmem:[%s18105_s10 + $0x4ec] sm:$0xf0]  ;;  %v19515_v9 = vadd.f32 %v9788_v17, %v9775_v15 }
 0x569   : > { %v12302_v45 = vld [vmem:[%s18105_s10 + $0x6d0] sm:$0xf]  ;;  %v12047_v40 = vor.u32 %v16190_v42, %v12046_v33  ;;  %v9777_v33 = vpop.f32.mrf.mxu2 }
 0x56a   : > { %10028 = vmatpush.bf16.msra.mxu2 %v12111_v49  ;;  %v16254_v46 = vld [vmem:[%s18105_s10 + $0x6ec] sm:$0xf0]  ;;  %10003 = vmatpush.bf16.msra.mxu0 %v11567_v31  ;;  %v9764_v49 = vpop.f32.mrf.mxu1 }
 0x56b   : > { %v11502_v50 = vld [vmem:[%s18105_s10 + $0x90] sm:$0xf]  ;;  %v12303_v3 = vor.u32 %v16254_v46, %v12302_v45 }
 0x56c   : > { %10041 = vmatpush.bf16.msra.mxu3 %v12367_v19  ;;  %10016 = vmatpush.bf16.msra.mxu1 %v11823_v38  ;;  %v16054_v26 = vld [vmem:[%s18105_s10 + $0xac] sm:$0xf0] }
 0x56d   : > { %v11758_v60 = vld [vmem:[%s18105_s10 + $0x290] sm:$0xf]  ;;  %v11503_v24 = vor.u32 %v16054_v26, %v11502_v50 }
 0x56e   : > { %10029 = vmatpush.bf16.msra.mxu2 %v12079_v59  ;;  %v16118_v30 = vld [vmem:[%s18105_s10 + $0x2ac] sm:$0xf0]  ;;  %10004 = vmatpush.bf16.msra.mxu0 %v11535_v48 }
 0x56f   : > { %v12014_v51 = vld [vmem:[%s18105_s10 + $0x490] sm:$0xf]  ;;  %v11759_v12 = vor.u32 %v16118_v30, %v11758_v60 }
 0x570   : > { %10042 = vmatpush.bf16.msra.mxu3 %v12335_v23  ;;  %v16182_v57 = vld [vmem:[%s18105_s10 + $0x4ac] sm:$0xf0]  ;;  %10017 = vmatpush.bf16.msra.mxu1 %v11791_v52 }
 0x571   : > { %v12270_v36 = vld [vmem:[%s18105_s10 + $0x690] sm:$0xf]  ;;  %v12015_v14 = vor.u32 %v16182_v57, %v12014_v51 }
 0x572   : > { %v16246_v5 = vld [vmem:[%s18105_s10 + $0x6ac] sm:$0xf0]  ;;  %10030 = vmatpush.bf16.msra.mxu2 %v12047_v40  ;;  %10005 = vmatpush.bf16.msra.mxu0 %v11503_v24 }
 0x573   : > { %v11470_v16 = vld [vmem:[%s18105_s10 + $0x50] sm:$0xf]  ;;  %v12271_v21 = vor.u32 %v16246_v5, %v12270_v36 }
 0x574   : > { %v16046_v18 = vld [vmem:[%s18105_s10 + $0x6c] sm:$0xf0]  ;;  %10043 = vmatpush.bf16.msra.mxu3 %v12303_v3  ;;  %10018 = vmatpush.bf16.msra.mxu1 %v11759_v12 }
 0x575   : > { %v11726_v19 = vld [vmem:[%s18105_s10 + $0x250] sm:$0xf]  ;;  %v11471_v43 = vor.u32 %v16046_v18, %v11470_v16 }
 0x576   : > { %v16110_v22 = vld [vmem:[%s18105_s10 + $0x26c] sm:$0xf0]  ;;  %10031 = vmatpush.bf16.msra.mxu2 %v12015_v14 }
 0x577   : > { %v11982_v27 = vld [vmem:[%s18105_s10 + $0x450] sm:$0xf]  ;;  %v11727_v44 = vor.u32 %v16110_v22, %v11726_v19  ;;  %10006 = vmatpush.bf16.msra.mxu0 %v11471_v43 }
 0x578   : > { %v16174_v28 = vld [vmem:[%s18105_s10 + $0x46c] sm:$0xf0]  ;;  %10044 = vmatpush.bf16.msra.mxu3 %v12271_v21 }
 0x579   : > { %v12238_v20 = vld [vmem:[%s18105_s10 + $0x650] sm:$0xf]  ;;  %v11983_v38 = vor.u32 %v16174_v28, %v11982_v27  ;;  %10019 = vmatpush.bf16.msra.mxu1 %v11727_v44 }
 0x57a   : > { %v16238_v29 = vld [vmem:[%s18105_s10 + $0x66c] sm:$0xf0] }
 0x57b   : > { %v11438_v31 = vld [vmem:[%s18105_s10 + $0x10] sm:$0xf]  ;;  %v12239_v55 = vor.u32 %v16238_v29, %v12238_v20  ;;  %10032 = vmatpush.bf16.msra.mxu2 %v11983_v38 }
 0x57c   : > { %v16038_v32 = vld [vmem:[%s18105_s10 + $0x2c] sm:$0xf0] }
 0x57d   : > { %v11694_v59 = vld [vmem:[%s18105_s10 + $0x210] sm:$0xf]  ;;  %v11439_v48 = vor.u32 %v16038_v32, %v11438_v31  ;;  %10045 = vmatpush.bf16.msra.mxu3 %v12239_v55 }
 0x57e   : > { %v16102_v25 = vld [vmem:[%s18105_s10 + $0x22c] sm:$0xf0] }
 0x57f   : > { %v11950_v41 = vld [vmem:[%s18105_s10 + $0x410] sm:$0xf]  ;;  %v11695_v26 = vor.u32 %v16102_v25, %v11694_v59  ;;  %10007 = vmatpush.bf16.msra.mxu0 %v11439_v48 }
 0x580   : > { %v16166_v23 = vld [vmem:[%s18105_s10 + $0x42c] sm:$0xf0] }
 0x581   : > { %v12206_v34 = vld [vmem:[%s18105_s10 + $0x610] sm:$0xf]  ;;  %v11951_v60 = vor.u32 %v16166_v23, %v11950_v41  ;;  %10020 = vmatpush.bf16.msra.mxu1 %v11695_v26 }
 0x582   : > { %v16230_v35 = vld [vmem:[%s18105_s10 + $0x62c] sm:$0xf0]  ;;  %10008 = vmatmul.bf16.vlgmr.msra.gmra.mxu0 %v18211_v53 }
 0x583   : > { %v12686_v42 = vld [vmem:[%s18105_s10 + $0x9d0] sm:$0xf]  ;;  %v12207_v51 = vor.u32 %v16230_v35, %v12206_v34  ;;  %10033 = vmatpush.bf16.msra.mxu2 %v11951_v60 }
 0x584   : > { %v16350_v45 = vld [vmem:[%s18105_s10 + $0x9ec] sm:$0xf0]  ;;  %10021 = vmatmul.bf16.vlgmr.msra.gmra.mxu1 %v18214_v54 }
 0x585   : > { %v12942_v46 = vld [vmem:[%s18105_s10 + $0xbd0] sm:$0xf]  ;;  %v12687_v57 = vor.u32 %v16350_v45, %v12686_v42  ;;  %10046 = vmatpush.bf16.msra.mxu3 %v12207_v51  ;;  %v9814_v51 = vpop.f32.mrf.mxu1 }
 0x586   : > { %v16414_v50 = vld [vmem:[%s18105_s10 + $0xbec] sm:$0xf0]  ;;  %10034 = vmatmul.bf16.vlgmr.msra.gmra.mxu2 %v18197_v37 }
 0x587   : > { %v13198_v52 = vld [vmem:[%s18105_s10 + $0xdd0] sm:$0xf]  ;;  %v12943_v15 = vor.u32 %v16414_v50, %v12942_v46  ;;  %10052 = vmatpush.bf16.msrb.mxu0 %v12687_v57  ;;  %v9801_v50 = vpop.f32.mrf.mxu0 }
 0x588   : > { %v16478_v40 = vld [vmem:[%s18105_s10 + $0xdec] sm:$0xf0]  ;;  %10047 = vmatmul.bf16.vlgmr.msra.gmra.mxu3 %v18200_v39 }
 0x589   : > { %v13454_v30 = vld [vmem:[%s18105_s10 + $0xfd0] sm:$0xf]  ;;  %v13199_v36 = vor.u32 %v16478_v40, %v13198_v52  ;;  %10065 = vmatpush.bf16.msrb.mxu1 %v12943_v15 }
 0x58a   : > { %v16542_v3 = vld [vmem:[%s18105_s10 + $0xfec] sm:$0xf0] }
 0x58b   : > { %v12654_v5 = vld [vmem:[%s18105_s10 + $0x990] sm:$0xf]  ;;  %v13455_v24 = vor.u32 %v16542_v3, %v13454_v30  ;;  %10078 = vmatpush.bf16.msrb.mxu2 %v13199_v36  ;;  %v9802_v3 = vadd.f32 %v9801_v50, %v19515_v9 }
 0x58c   : > { %v16342_v17 = vld [vmem:[%s18105_s10 + $0x9ac] sm:$0xf0] }
 0x58d   : > { %v12910_v6 = vld [vmem:[%s18105_s10 + $0xb90] sm:$0xf]  ;;  %v12655_v19 = vor.u32 %v16342_v17, %v12654_v5  ;;  %10091 = vmatpush.bf16.msrb.mxu3 %v13455_v24  ;;  %v9815_v24 = vadd.f32 %v9814_v51, %v9802_v3 }
 0x58e   : > { %v16406_v49 = vld [vmem:[%s18105_s10 + $0xbac] sm:$0xf0] }
 0x58f   : > { %v13166_v12 = vld [vmem:[%s18105_s10 + $0xd90] sm:$0xf]  ;;  %v12911_v21 = vor.u32 %v16406_v49, %v12910_v6  ;;  %10053 = vmatpush.bf16.msrb.mxu0 %v12655_v19  ;;  %v9827_v19 = vpop.f32.mrf.mxu2 }
 0x590   : > { %v16470_v14 = vld [vmem:[%s18105_s10 + $0xdac] sm:$0xf0] }
 0x591   : > { %v13422_v16 = vld [vmem:[%s18105_s10 + $0xf90] sm:$0xf]  ;;  %v13167_v22 = vor.u32 %v16470_v14, %v13166_v12  ;;  %10066 = vmatpush.bf16.msrb.mxu1 %v12911_v21 }
 0x592   : > { %v16534_v18 = vld [vmem:[%s18105_s10 + $0xfac] sm:$0xf0] }
 0x593   : > { %v12622_v27 = vld [vmem:[%s18105_s10 + $0x950] sm:$0xf]  ;;  %v13423_v29 = vor.u32 %v16534_v18, %v13422_v16  ;;  %10079 = vmatpush.bf16.msrb.mxu2 %v13167_v22 }
 0x594   : > { %v16334_v28 = vld [vmem:[%s18105_s10 + $0x96c] sm:$0xf0] }
 0x595   : > { %v12878_v20 = vld [vmem:[%s18105_s10 + $0xb50] sm:$0xf]  ;;  %v12623_v59 = vor.u32 %v16334_v28, %v12622_v27  ;;  %10092 = vmatpush.bf16.msrb.mxu3 %v13423_v29  ;;  %v9840_v29 = vpop.f32.mrf.mxu3 }
 0x596   : > { %v16398_v43 = vld [vmem:[%s18105_s10 + $0xb6c] sm:$0xf0] }
 0x597   : > { %v13134_v31 = vld [vmem:[%s18105_s10 + $0xd50] sm:$0xf]  ;;  %v12879_v25 = vor.u32 %v16398_v43, %v12878_v20  ;;  %10054 = vmatpush.bf16.msrb.mxu0 %v12623_v59  ;;  %v9828_v20 = vadd.f32 %v9827_v19, %v9815_v24  ;;  %v9829_v51 = vpop.f32.mrf.mxu2 }
 0x598   : > { %v16462_v32 = vld [vmem:[%s18105_s10 + $0xd6c] sm:$0xf0] }
 0x599   : > { %v13390_v44 = vld [vmem:[%s18105_s10 + $0xf50] sm:$0xf]  ;;  %v13135_v41 = vor.u32 %v16462_v32, %v13134_v31  ;;  %10067 = vmatpush.bf16.msrb.mxu1 %v12879_v25 }
 0x59a   : > { %v16526_v38 = vld [vmem:[%s18105_s10 + $0xf6c] sm:$0xf0] }
 0x59b   : > { %v12590_v55 = vld [vmem:[%s18105_s10 + $0x910] sm:$0xf]  ;;  %v13391_v35 = vor.u32 %v16526_v38, %v13390_v44  ;;  %10080 = vmatpush.bf16.msrb.mxu2 %v13135_v41  ;;  %v19586_v44 = vadd.f32 %v9840_v29, %v9828_v20  ;;  %v9803_v38 = vpop.f32.mrf.mxu0 }
 0x59c   : > { %v16326_v23 = vld [vmem:[%s18105_s10 + $0x92c] sm:$0xf0] }
 0x59d   : > { %v12846_v34 = vld [vmem:[%s18105_s10 + $0xb10] sm:$0xf]  ;;  %v12591_v48 = vor.u32 %v16326_v23, %v12590_v55  ;;  %10093 = vmatpush.bf16.msrb.mxu3 %v13391_v35 }
 0x59e   : > { %v16390_v33 = vld [vmem:[%s18105_s10 + $0xb2c] sm:$0xf0] }
 0x59f   : > { %v13102_v42 = vld [vmem:[%s18105_s10 + $0xd10] sm:$0xf]  ;;  %v12847_v52 = vor.u32 %v16390_v33, %v12846_v34  ;;  %10055 = vmatpush.bf16.msrb.mxu0 %v12591_v48  ;;  %v9816_v34 = vpop.f32.mrf.mxu1 }
 0x5a0   : > { %v16454_v45 = vld [vmem:[%s18105_s10 + $0xd2c] sm:$0xf0] }
 0x5a1   : > { %v13358_v46 = vld [vmem:[%s18105_s10 + $0xf10] sm:$0xf]  ;;  %v13103_v40 = vor.u32 %v16454_v45, %v13102_v42  ;;  %10068 = vmatpush.bf16.msrb.mxu1 %v12847_v52 }
 0x5a2   : > { %v16518_v47 = vld [vmem:[%s18105_s10 + $0xf2c] sm:$0xf0] }
 0x5a3   : > { %v12558_v26 = vld [vmem:[%s18105_s10 + $0x8d0] sm:$0xf]  ;;  %v13359_v57 = vor.u32 %v16518_v47, %v13358_v46  ;;  %10081 = vmatpush.bf16.msrb.mxu2 %v13103_v40 }
 0x5a4   : > { %v16318_v60 = vld [vmem:[%s18105_s10 + $0x8ec] sm:$0xf0] }
 0x5a5   : > { %v12814_v30 = vld [vmem:[%s18105_s10 + $0xad0] sm:$0xf]  ;;  %v12559_v49 = vor.u32 %v16318_v60, %v12558_v26  ;;  %10094 = vmatpush.bf16.msrb.mxu3 %v13359_v57 }
 0x5a6   : > { %v16382_v15 = vld [vmem:[%s18105_s10 + $0xaec] sm:$0xf0] }
 0x5a7   : > { %v13070_v36 = vld [vmem:[%s18105_s10 + $0xcd0] sm:$0xf]  ;;  %v12815_v9 = vor.u32 %v16382_v15, %v12814_v30  ;;  %10056 = vmatpush.bf16.msrb.mxu0 %v12559_v49 }
 0x5a8   : > { %v16446_v5 = vld [vmem:[%s18105_s10 + $0xcec] sm:$0xf0] }
 0x5a9   : > { %v13326_v17 = vld [vmem:[%s18105_s10 + $0xed0] sm:$0xf]  ;;  %v13071_v12 = vor.u32 %v16446_v5, %v13070_v36  ;;  %10069 = vmatpush.bf16.msrb.mxu1 %v12815_v9 }
 0x5aa   : > { %v16510_v6 = vld [vmem:[%s18105_s10 + $0xeec] sm:$0xf0] }
 0x5ab   : > { %v12526_v14 = vld [vmem:[%s18105_s10 + $0x890] sm:$0xf]  ;;  %v13327_v21 = vor.u32 %v16510_v6, %v13326_v17  ;;  %10082 = vmatpush.bf16.msrb.mxu2 %v13071_v12  ;;  %v9842_v17 = vpop.f32.mrf.mxu3 }
 0x5ac   : > { %v16310_v16 = vld [vmem:[%s18105_s10 + $0x8ac] sm:$0xf0] }
 0x5ad   : > { %v12782_v18 = vld [vmem:[%s18105_s10 + $0xa90] sm:$0xf]  ;;  %v12527_v32 = vor.u32 %v16310_v16, %v12526_v14  ;;  %10095 = vmatpush.bf16.msrb.mxu3 %v13327_v21 }
 0x5ae   : > { %v16374_v22 = vld [vmem:[%s18105_s10 + $0xaac] sm:$0xf0] }
 0x5af   : > { %v13038_v27 = vld [vmem:[%s18105_s10 + $0xc90] sm:$0xf]  ;;  %v12783_v59 = vor.u32 %v16374_v22, %v12782_v18  ;;  %10057 = vmatpush.bf16.msrb.mxu0 %v12527_v32 }
 0x5b0   : > { %v16438_v28 = vld [vmem:[%s18105_s10 + $0xcac] sm:$0xf0] }
 0x5b1   : > { %v13294_v43 = vld [vmem:[%s18105_s10 + $0xe90] sm:$0xf]  ;;  %v13039_v25 = vor.u32 %v16438_v28, %v13038_v27  ;;  %10070 = vmatpush.bf16.msrb.mxu1 %v12783_v59 }
 0x5b2   : > { %v16502_v31 = vld [vmem:[%s18105_s10 + $0xeac] sm:$0xf0] }
 0x5b3   : > { %v12494_v41 = vld [vmem:[%s18105_s10 + $0x850] sm:$0xf]  ;;  %v13295_v35 = vor.u32 %v16502_v31, %v13294_v43  ;;  %10083 = vmatpush.bf16.msrb.mxu2 %v13039_v25 }
 0x5b4   : > { %v16302_v55 = vld [vmem:[%s18105_s10 + $0x86c] sm:$0xf0] }
 0x5b5   : > { %v12750_v23 = vld [vmem:[%s18105_s10 + $0xa50] sm:$0xf]  ;;  %v12495_v48 = vor.u32 %v16302_v55, %v12494_v41  ;;  %10096 = vmatpush.bf16.msrb.mxu3 %v13295_v35 }
 0x5b6   : > { %v16366_v33 = vld [vmem:[%s18105_s10 + $0xa6c] sm:$0xf0] }
 0x5b7   : > { %v13006_v42 = vld [vmem:[%s18105_s10 + $0xc50] sm:$0xf]  ;;  %v12751_v40 = vor.u32 %v16366_v33, %v12750_v23  ;;  %10058 = vmatpush.bf16.msrb.mxu0 %v12495_v48 }
 0x5b8   : > { %v16430_v45 = vld [vmem:[%s18105_s10 + $0xc6c] sm:$0xf0] }
 0x5b9   : > { %v13262_v46 = vld [vmem:[%s18105_s10 + $0xe50] sm:$0xf]  ;;  %v13007_v26 = vor.u32 %v16430_v45, %v13006_v42  ;;  %10071 = vmatpush.bf16.msrb.mxu1 %v12751_v40 }
 0x5ba   : > { %v16494_v47 = vld [vmem:[%s18105_s10 + $0xe6c] sm:$0xf0] }
 0x5bb   : > { %v12462_v50 = vld [vmem:[%s18105_s10 + $0x810] sm:$0xf]  ;;  %v13263_v57 = vor.u32 %v16494_v47, %v13262_v46  ;;  %10084 = vmatpush.bf16.msrb.mxu2 %v13007_v26 }
 0x5bc   : > { %v16294_v52 = vld [vmem:[%s18105_s10 + $0x82c] sm:$0xf0] }
 0x5bd   : > { %v12718_v60 = vld [vmem:[%s18105_s10 + $0xa10] sm:$0xf]  ;;  %v12463_v9 = vor.u32 %v16294_v52, %v12462_v50  ;;  %10097 = vmatpush.bf16.msrb.mxu3 %v13263_v57 }
 0x5be   : > { %v16358_v30 = vld [vmem:[%s18105_s10 + $0xa2c] sm:$0xf0] }
 0x5bf   : > { %v12974_v3 = vld [vmem:[%s18105_s10 + $0xc10] sm:$0xf]  ;;  %v12719_v18 = vor.u32 %v16358_v30, %v12718_v60  ;;  %10059 = vmatpush.bf16.msrb.mxu0 %v12463_v9 }
 0x5c0   : > { %v16422_v15 = vld [vmem:[%s18105_s10 + $0xc2c] sm:$0xf0] }
 0x5c1   : > { %v13230_v36 = vld [vmem:[%s18105_s10 + $0xe10] sm:$0xf]  ;;  %v12975_v19 = vor.u32 %v16422_v15, %v12974_v3  ;;  %10072 = vmatpush.bf16.msrb.mxu1 %v12719_v18 }
 0x5c2   : > { %v16486_v5 = vld [vmem:[%s18105_s10 + $0xe2c] sm:$0xf0]  ;;  %10060 = vmatmul.bf16.vlgmr.msrb.gmra.mxu0 %v18270_v10 }
 0x5c3   : > { %v13710_v6 = vld [vmem:[%s18105_s10 + $0x11d0] sm:$0xf]  ;;  %v13231_v27 = vor.u32 %v16486_v5, %v13230_v36  ;;  %10085 = vmatpush.bf16.msrb.mxu2 %v12975_v19 }
 0x5c4   : > { %v16606_v24 = vld [vmem:[%s18105_s10 + $0x11ec] sm:$0xf0]  ;;  %10073 = vmatmul.bf16.vlgmr.msrb.gmra.mxu1 %v18274_v13 }
 0x5c5   : > { %v13966_v49 = vld [vmem:[%s18105_s10 + $0x13d0] sm:$0xf]  ;;  %v13711_v28 = vor.u32 %v16606_v24, %v13710_v6  ;;  %10098 = vmatpush.bf16.msrb.mxu3 %v13231_v27  ;;  %v19638_v24 = vpop.f32.mrf.mxu0 }
 0x5c6   : > { %v16670_v12 = vld [vmem:[%s18105_s10 + $0x13ec] sm:$0xf0]  ;;  %10086 = vmatmul.bf16.vlgmr.msrb.gmra.mxu2 %v18266_v7 }
 0x5c7   : > { %v14222_v14 = vld [vmem:[%s18105_s10 + $0x15d0] sm:$0xf]  ;;  %v13967_v20 = vor.u32 %v16670_v12, %v13966_v49  ;;  %10104 = vmatpush.bf16.msra.mxu0 %v13711_v28 }
 0x5c8   : > { %v16734_v16 = vld [vmem:[%s18105_s10 + $0x15ec] sm:$0xf0]  ;;  %10099 = vmatmul.bf16.vlgmr.msrb.gmra.mxu3 %v18272_v11 }
 0x5c9   : > { %v14478_v21 = vld [vmem:[%s18105_s10 + $0x17d0] sm:$0xf]  ;;  %v14223_v29 = vor.u32 %v16734_v16, %v14222_v14  ;;  %10117 = vmatpush.bf16.msra.mxu1 %v13967_v20  ;;  %v19642_v14 = vpop.f32.mrf.mxu1 }
 0x5ca   : > { %v16798_v22 = vld [vmem:[%s18105_s10 + $0x17ec] sm:$0xf0] }
 0x5cb   : > { %v13678_v43 = vld [vmem:[%s18105_s10 + $0x1190] sm:$0xf]  ;;  %v14479_v38 = vor.u32 %v16798_v22, %v14478_v21  ;;  %10130 = vmatpush.bf16.msra.mxu2 %v14223_v29 }
 0x5cc   : > { %v16598_v31 = vld [vmem:[%s18105_s10 + $0x11ac] sm:$0xf0] }
 0x5cd   : > { %v13934_v32 = vld [vmem:[%s18105_s10 + $0x1390] sm:$0xf]  ;;  %v13679_v34 = vor.u32 %v16598_v31, %v13678_v43  ;;  %10143 = vmatpush.bf16.msra.mxu3 %v14479_v38 }
 0x5ce   : > { %v16662_v59 = vld [vmem:[%s18105_s10 + $0x13ac] sm:$0xf0] }
 0x5cf   : > { %v14190_v25 = vld [vmem:[%s18105_s10 + $0x1590] sm:$0xf]  ;;  %v13935_v35 = vor.u32 %v16662_v59, %v13934_v32  ;;  %10105 = vmatpush.bf16.msra.mxu0 %v13679_v34  ;;  %v19655_v34 = vpop.f32.mrf.mxu2 }
 0x5d0   : > { %v16726_v41 = vld [vmem:[%s18105_s10 + $0x15ac] sm:$0xf0] }
 0x5d1   : > { %v14446_v55 = vld [vmem:[%s18105_s10 + $0x1790] sm:$0xf]  ;;  %v14191_v33 = vor.u32 %v16726_v41, %v14190_v25  ;;  %10118 = vmatpush.bf16.msra.mxu1 %v13935_v35 }
 0x5d2   : > { %v16790_v23 = vld [vmem:[%s18105_s10 + $0x17ac] sm:$0xf0] }
 0x5d3   : > { %v13646_v42 = vld [vmem:[%s18105_s10 + $0x1150] sm:$0xf]  ;;  %v14447_v47 = vor.u32 %v16790_v23, %v14446_v55  ;;  %10131 = vmatpush.bf16.msra.mxu2 %v14191_v33 }
 0x5d4   : > { %v16590_v45 = vld [vmem:[%s18105_s10 + $0x116c] sm:$0xf0] }
 0x5d5   : > { %v13902_v46 = vld [vmem:[%s18105_s10 + $0x1350] sm:$0xf]  ;;  %v13647_v60 = vor.u32 %v16590_v45, %v13646_v42  ;;  %10144 = vmatpush.bf16.msra.mxu3 %v14447_v47  ;;  %v19660_v45 = vpop.f32.mrf.mxu3 }
 0x5d6   : > { %v16654_v48 = vld [vmem:[%s18105_s10 + $0x136c] sm:$0xf0] }
 0x5d7   : > { %v14158_v50 = vld [vmem:[%s18105_s10 + $0x1550] sm:$0xf]  ;;  %v13903_v30 = vor.u32 %v16654_v48, %v13902_v46  ;;  %10106 = vmatpush.bf16.msra.mxu0 %v13647_v60  ;;  %v9855_v48 = vpop.f32.mrf.mxu0 }
 0x5d8   : > { %v16718_v52 = vld [vmem:[%s18105_s10 + $0x156c] sm:$0xf0] }
 0x5d9   : > { %v14414_v40 = vld [vmem:[%s18105_s10 + $0x1750] sm:$0xf]  ;;  %v14159_v3 = vor.u32 %v16718_v52, %v14158_v50  ;;  %10119 = vmatpush.bf16.msra.mxu1 %v13903_v30  ;;  %v9868_v52 = vpop.f32.mrf.mxu1 }
 0x5da   : > { %v16782_v26 = vld [vmem:[%s18105_s10 + $0x176c] sm:$0xf0] }
 0x5db   : > { %v13614_v51 = vld [vmem:[%s18105_s10 + $0x1110] sm:$0xf]  ;;  %v14415_v36 = vor.u32 %v16782_v26, %v14414_v40  ;;  %10132 = vmatpush.bf16.msra.mxu2 %v14159_v3 }
 0x5dc   : > { %v16582_v57 = vld [vmem:[%s18105_s10 + $0x112c] sm:$0xf0] }
 0x5dd   : > { %v13870_v15 = vld [vmem:[%s18105_s10 + $0x1310] sm:$0xf]  ;;  %v13615_v12 = vor.u32 %v16582_v57, %v13614_v51  ;;  %10145 = vmatpush.bf16.msra.mxu3 %v14415_v36 }
 0x5de   : > { %v16646_v5 = vld [vmem:[%s18105_s10 + $0x132c] sm:$0xf0] }
 0x5df   : > { %v14126_v17 = vld [vmem:[%s18105_s10 + $0x1510] sm:$0xf]  ;;  %v13871_v16 = vor.u32 %v16646_v5, %v13870_v15  ;;  %10107 = vmatpush.bf16.msra.mxu0 %v13615_v12 }
 0x5e0   : > { %v16710_v6 = vld [vmem:[%s18105_s10 + $0x152c] sm:$0xf0] }
 0x5e1   : > { %v14382_v49 = vld [vmem:[%s18105_s10 + $0x1710] sm:$0xf]  ;;  %v14127_v18 = vor.u32 %v16710_v6, %v14126_v17  ;;  %10120 = vmatpush.bf16.msra.mxu1 %v13871_v16 }
 0x5e2   : > { %v16774_v9 = vld [vmem:[%s18105_s10 + $0x172c] sm:$0xf0] }
 0x5e3   : > { %v13582_v19 = vld [vmem:[%s18105_s10 + $0x10d0] sm:$0xf]  ;;  %v14383_v27 = vor.u32 %v16774_v9, %v14382_v49  ;;  %10133 = vmatpush.bf16.msra.mxu2 %v14127_v18 }
 0x5e4   : > { %v16574_v21 = vld [vmem:[%s18105_s10 + $0x10ec] sm:$0xf0] }
 0x5e5   : > { %v13838_v22 = vld [vmem:[%s18105_s10 + $0x12d0] sm:$0xf]  ;;  %v13583_v32 = vor.u32 %v16574_v21, %v13582_v19  ;;  %10146 = vmatpush.bf16.msra.mxu3 %v14383_v27 }
 0x5e6   : > { %v16638_v28 = vld [vmem:[%s18105_s10 + $0x12ec] sm:$0xf0] }
 0x5e7   : > { %v14094_v20 = vld [vmem:[%s18105_s10 + $0x14d0] sm:$0xf]  ;;  %v13839_v38 = vor.u32 %v16638_v28, %v13838_v22  ;;  %10108 = vmatpush.bf16.msra.mxu0 %v13583_v32 }
 0x5e8   : > { %v16702_v29 = vld [vmem:[%s18105_s10 + $0x14ec] sm:$0xf0] }
 0x5e9   : > { %v14350_v43 = vld [vmem:[%s18105_s10 + $0x16d0] sm:$0xf]  ;;  %v14095_v59 = vor.u32 %v16702_v29, %v14094_v20  ;;  %10121 = vmatpush.bf16.msra.mxu1 %v13839_v38  ;;  %v9881_v29 = vpop.f32.mrf.mxu2  ;;  %v9894_v38 = vpop.f32.mrf.mxu3 }
 0x5ea   : > { %v16766_v31 = vld [vmem:[%s18105_s10 + $0x16ec] sm:$0xf0] }
 0x5eb   : > { %v13550_v25 = vld [vmem:[%s18105_s10 + $0x1090] sm:$0xf]  ;;  %v14351_v23 = vor.u32 %v16766_v31, %v14350_v43  ;;  %10134 = vmatpush.bf16.msra.mxu2 %v14095_v59 }
 0x5ec   : > { %v16566_v41 = vld [vmem:[%s18105_s10 + $0x10ac] sm:$0xf0] }
 0x5ed   : > { %v13806_v55 = vld [vmem:[%s18105_s10 + $0x1290] sm:$0xf]  ;;  %v13551_v50 = vor.u32 %v16566_v41, %v13550_v25  ;;  %10147 = vmatpush.bf16.msra.mxu3 %v14351_v23 }
 0x5ee   : > { %v16630_v35 = vld [vmem:[%s18105_s10 + $0x12ac] sm:$0xf0] }
 0x5ef   : > { %v14062_v33 = vld [vmem:[%s18105_s10 + $0x1490] sm:$0xf]  ;;  %v13807_v40 = vor.u32 %v16630_v35, %v13806_v55  ;;  %10109 = vmatpush.bf16.msra.mxu0 %v13551_v50 }
 0x5f0   : > { %v16694_v42 = vld [vmem:[%s18105_s10 + $0x14ac] sm:$0xf0] }
 0x5f1   : > { %v14318_v46 = vld [vmem:[%s18105_s10 + $0x1690] sm:$0xf]  ;;  %v14063_v26 = vor.u32 %v16694_v42, %v14062_v33  ;;  %10122 = vmatpush.bf16.msra.mxu1 %v13807_v40 }
 0x5f2   : > { %v16758_v47 = vld [vmem:[%s18105_s10 + $0x16ac] sm:$0xf0] }
 0x5f3   : > { %v13518_v60 = vld [vmem:[%s18105_s10 + $0x1050] sm:$0xf]  ;;  %v14319_v51 = vor.u32 %v16758_v47, %v14318_v46  ;;  %10135 = vmatpush.bf16.msra.mxu2 %v14063_v26 }
 0x5f4   : > { %v16558_v30 = vld [vmem:[%s18105_s10 + $0x106c] sm:$0xf0] }
 0x5f5   : > { %v13774_v3 = vld [vmem:[%s18105_s10 + $0x1250] sm:$0xf]  ;;  %v13519_v6 = vor.u32 %v16558_v30, %v13518_v60  ;;  %10148 = vmatpush.bf16.msra.mxu3 %v14319_v51 }
 0x5f6   : > { %v16622_v57 = vld [vmem:[%s18105_s10 + $0x126c] sm:$0xf0] }
 0x5f7   : > { %v14030_v15 = vld [vmem:[%s18105_s10 + $0x1450] sm:$0xf]  ;;  %v13775_v12 = vor.u32 %v16622_v57, %v13774_v3  ;;  %10110 = vmatpush.bf16.msra.mxu0 %v13519_v6 }
 0x5f8   : > { %v16686_v36 = vld [vmem:[%s18105_s10 + $0x146c] sm:$0xf0] }
 0x5f9   : > { %v14286_v5 = vld [vmem:[%s18105_s10 + $0x1650] sm:$0xf]  ;;  %v14031_v16 = vor.u32 %v16686_v36, %v14030_v15  ;;  %10123 = vmatpush.bf16.msra.mxu1 %v13775_v12 }
 0x5fa   : > { %v16750_v17 = vld [vmem:[%s18105_s10 + $0x166c] sm:$0xf0] }
 0x5fb   : > { %v13486_v49 = vld [vmem:[%s18105_s10 + $0x1010] sm:$0xf]  ;;  %v14287_v22 = vor.u32 %v16750_v17, %v14286_v5  ;;  %10136 = vmatpush.bf16.msra.mxu2 %v14031_v16 }
 0x5fc   : > { %v16550_v9 = vld [vmem:[%s18105_s10 + $0x102c] sm:$0xf0] }
 0x5fd   : > { %v13742_v18 = vld [vmem:[%s18105_s10 + $0x1210] sm:$0xf]  ;;  %v13487_v59 = vor.u32 %v16550_v9, %v13486_v49  ;;  %10149 = vmatpush.bf16.msra.mxu3 %v14287_v22 }
 0x5fe   : > { %v16614_v19 = vld [vmem:[%s18105_s10 + $0x122c] sm:$0xf0] }
 0x5ff   : > { %v13998_v21 = vld [vmem:[%s18105_s10 + $0x1410] sm:$0xf]  ;;  %v13743_v23 = vor.u32 %v16614_v19, %v13742_v18  ;;  %10111 = vmatpush.bf16.msra.mxu0 %v13487_v59 }
 0x600   : > { %v16678_v27 = vld [vmem:[%s18105_s10 + $0x142c] sm:$0xf0] }
 0x601   : > { %v14254_v28 = vld [vmem:[%s18105_s10 + $0x1610] sm:$0xf]  ;;  %v13999_v35 = vor.u32 %v16678_v27, %v13998_v21  ;;  %10124 = vmatpush.bf16.msra.mxu1 %v13743_v23 }
 0x602   : > { %v16742_v20 = vld [vmem:[%s18105_s10 + $0x162c] sm:$0xf0]  ;;  %10112 = vmatmul.bf16.vlgmr.msra.gmra.mxu0 %v18341_v58 }
 0x603   : > { %v14734_v43 = vld [vmem:[%s18105_s10 + $0x19d0] sm:$0xf]  ;;  %v14255_v46 = vor.u32 %v16742_v20, %v14254_v28  ;;  %10137 = vmatpush.bf16.msra.mxu2 %v13999_v35 }
 0x604   : > { %v16862_v31 = vld [vmem:[%s18105_s10 + $0x19ec] sm:$0xf0]  ;;  %10125 = vmatmul.bf16.vlgmr.msra.gmra.mxu1 %v18348_v63 }
 0x605   : > { %v14990_v32 = vld [vmem:[%s18105_s10 + $0x1bd0] sm:$0xf]  ;;  %v14735_v47 = vor.u32 %v16862_v31, %v14734_v43  ;;  %10150 = vmatpush.bf16.msra.mxu3 %v14255_v46 }
 0x606   : > { %v16926_v25 = vld [vmem:[%s18105_s10 + $0x1bec] sm:$0xf0]  ;;  %10138 = vmatmul.bf16.vlgmr.msra.gmra.mxu2 %v18346_v62 }
 0x607   : > { %v15246_v41 = vld [vmem:[%s18105_s10 + $0x1dd0] sm:$0xf]  ;;  %v14991_v48 = vor.u32 %v16926_v25, %v14990_v32  ;;  %10156 = vmatpush.bf16.msrb.mxu0 %v14735_v47 }
 0x608   : > { %v16990_v55 = vld [vmem:[%s18105_s10 + $0x1dec] sm:$0xf0]  ;;  %10151 = vmatmul.bf16.vlgmr.msra.gmra.mxu3 %v18352_v2 }
 0x609   : > { %v15502_v33 = vld [vmem:[%s18105_s10 + $0x1fd0] sm:$0xf]  ;;  %v15247_v50 = vor.u32 %v16990_v55, %v15246_v41  ;;  %10169 = vmatpush.bf16.msrb.mxu1 %v14991_v48  ;;  %v19714_v41 = vpop.f32.mrf.mxu0 }
 0x60a   : > { %v17054_v42 = vld [vmem:[%s18105_s10 + $0x1fec] sm:$0xf0] }
 0x60b   : > { %v14702_v52 = vld [vmem:[%s18105_s10 + $0x1990] sm:$0xf]  ;;  %v15503_v60 = vor.u32 %v17054_v42, %v15502_v33  ;;  %10182 = vmatpush.bf16.msrb.mxu2 %v15247_v50  ;;  %v19718_v33 = vpop.f32.mrf.mxu1 }
 0x60c   : > { %v16854_v40 = vld [vmem:[%s18105_s10 + $0x19ac] sm:$0xf0] }
 0x60d   : > { %v14958_v26 = vld [vmem:[%s18105_s10 + $0x1b90] sm:$0xf]  ;;  %v14703_v36 = vor.u32 %v16854_v40, %v14702_v52  ;;  %10195 = vmatpush.bf16.msrb.mxu3 %v15503_v60 }
 0x60e   : > { %v16918_v30 = vld [vmem:[%s18105_s10 + $0x1bac] sm:$0xf0] }
 0x60f   : > { %v15214_v3 = vld [vmem:[%s18105_s10 + $0x1d90] sm:$0xf]  ;;  %v14959_v5 = vor.u32 %v16918_v30, %v14958_v26  ;;  %10157 = vmatpush.bf16.msrb.mxu0 %v14703_v36 }
 0x610   : > { %v16982_v51 = vld [vmem:[%s18105_s10 + $0x1dac] sm:$0xf0] }
 0x611   : > { %v15470_v57 = vld [vmem:[%s18105_s10 + $0x1f90] sm:$0xf]  ;;  %v15215_v17 = vor.u32 %v16982_v51, %v15214_v3  ;;  %10170 = vmatpush.bf16.msrb.mxu1 %v14959_v5 }
 0x612   : > { %v17046_v15 = vld [vmem:[%s18105_s10 + $0x1fac] sm:$0xf0] }
 0x613   : > { %v14670_v6 = vld [vmem:[%s18105_s10 + $0x1950] sm:$0xf]  ;;  %v15471_v12 = vor.u32 %v17046_v15, %v15470_v57  ;;  %10183 = vmatpush.bf16.msrb.mxu2 %v15215_v17 }
 0x614   : > { %v16846_v49 = vld [vmem:[%s18105_s10 + $0x196c] sm:$0xf0] }
 0x615   : > { %v14926_v9 = vld [vmem:[%s18105_s10 + $0x1b50] sm:$0xf]  ;;  %v14671_v27 = vor.u32 %v16846_v49, %v14670_v6  ;;  %10196 = vmatpush.bf16.msrb.mxu3 %v15471_v12  ;;  %v19731_v49 = vpop.f32.mrf.mxu2 }
 0x616   : > { %v16910_v16 = vld [vmem:[%s18105_s10 + $0x1b6c] sm:$0xf0] }
 0x617   : > { %v15182_v18 = vld [vmem:[%s18105_s10 + $0x1d50] sm:$0xf]  ;;  %v14927_v28 = vor.u32 %v16910_v16, %v14926_v9  ;;  %10158 = vmatpush.bf16.msrb.mxu0 %v14671_v27  ;;  %v9907_v27 = vpop.f32.mrf.mxu0 }
 0x618   : > { %v16974_v19 = vld [vmem:[%s18105_s10 + $0x1d6c] sm:$0xf0]  ;;  %v11920_v27 = vld [vmem:[%s18105_s10 + $0x3f0] sm:$0xf0] }
 0x619   : > { %v15438_v21 = vld [vmem:[%s18105_s10 + $0x1f50] sm:$0xf]  ;;  %v15183_v20 = vor.u32 %v16974_v19, %v15182_v18  ;;  %10171 = vmatpush.bf16.msrb.mxu1 %v14927_v28  ;;  %v9854_v18 = vadd.f32 %v19638_v24, %v19586_v44  ;;  %v19738_v19 = vpop.f32.mrf.mxu3 }
 0x61a   : > { %v17038_v22 = vld [vmem:[%s18105_s10 + $0x1f6c] sm:$0xf0] }
 0x61b   : > { %v14638_v29 = vld [vmem:[%s18105_s10 + $0x1910] sm:$0xf]  ;;  %v15439_v32 = vor.u32 %v17038_v22, %v15438_v21  ;;  %10184 = vmatpush.bf16.msrb.mxu2 %v15183_v20  ;;  %v9920_v20 = vpop.f32.mrf.mxu1 }
 0x61c   : > { %v16838_v43 = vld [vmem:[%s18105_s10 + $0x192c] sm:$0xf0] }
 0x61d   : > { %v14894_v31 = vld [vmem:[%s18105_s10 + $0x1b10] sm:$0xf]  ;;  %v14639_v35 = vor.u32 %v16838_v43, %v14638_v29  ;;  %10197 = vmatpush.bf16.msrb.mxu3 %v15439_v32 }
 0x61e   : > { %v16902_v38 = vld [vmem:[%s18105_s10 + $0x1b2c] sm:$0xf0] }
 0x61f   : > { %v15150_v59 = vld [vmem:[%s18105_s10 + $0x1d10] sm:$0xf]  ;;  %v14895_v42 = vor.u32 %v16902_v38, %v14894_v31  ;;  %10159 = vmatpush.bf16.msrb.mxu0 %v14639_v35 }
 0x620   : > { %v16966_v25 = vld [vmem:[%s18105_s10 + $0x1d2c] sm:$0xf0] }
 0x621   : > { %v15406_v55 = vld [vmem:[%s18105_s10 + $0x1f10] sm:$0xf]  ;;  %v15151_v46 = vor.u32 %v16966_v25, %v15150_v59  ;;  %10172 = vmatpush.bf16.msrb.mxu1 %v14895_v42 }
 0x622   : > { %v17030_v23 = vld [vmem:[%s18105_s10 + $0x1f2c] sm:$0xf0] }
 0x623   : > { %v14606_v47 = vld [vmem:[%s18105_s10 + $0x18d0] sm:$0xf]  ;;  %v15407_v52 = vor.u32 %v17030_v23, %v15406_v55  ;;  %10185 = vmatpush.bf16.msrb.mxu2 %v15151_v46  ;;  %v9867_v55 = vadd.f32 %v19642_v14, %v9854_v18 }
 0x624   : > { %v16830_v48 = vld [vmem:[%s18105_s10 + $0x18ec] sm:$0xf0] }
 0x625   : > { %v14862_v50 = vld [vmem:[%s18105_s10 + $0x1ad0] sm:$0xf]  ;;  %v14607_v51 = vor.u32 %v16830_v48, %v14606_v47  ;;  %10198 = vmatpush.bf16.msrb.mxu3 %v15407_v52  ;;  %v9880_v48 = vadd.f32 %v19655_v34, %v9867_v55  ;;  %v16146_v55 = vld [vmem:[%s18105_s10 + $0x394] sm:$0xf] }
 0x626   : > { %v16894_v40 = vld [vmem:[%s18105_s10 + $0x1aec] sm:$0xf0] }
 0x627   : > { %v15118_v26 = vld [vmem:[%s18105_s10 + $0x1cd0] sm:$0xf]  ;;  %v14863_v57 = vor.u32 %v16894_v40, %v14862_v50  ;;  %10160 = vmatpush.bf16.msrb.mxu0 %v14607_v51 }
 0x628   : > { %v16958_v60 = vld [vmem:[%s18105_s10 + $0x1cec] sm:$0xf0] }
 0x629   : > { %v15374_v30 = vld [vmem:[%s18105_s10 + $0x1ed0] sm:$0xf]  ;;  %v15119_v15 = vor.u32 %v16958_v60, %v15118_v26  ;;  %10173 = vmatpush.bf16.msrb.mxu1 %v14863_v57  ;;  %v9933_v57 = vpop.f32.mrf.mxu2 }
 0x62a   : > { %v17022_v3 = vld [vmem:[%s18105_s10 + $0x1eec] sm:$0xf0] }
 0x62b   : > { %v14574_v36 = vld [vmem:[%s18105_s10 + $0x1890] sm:$0xf]  ;;  %v15375_v6 = vor.u32 %v17022_v3, %v15374_v30  ;;  %10186 = vmatpush.bf16.msrb.mxu2 %v15119_v15 }
 0x62c   : > { %v16822_v5 = vld [vmem:[%s18105_s10 + $0x18ac] sm:$0xf0] }
 0x62d   : > { %v14830_v17 = vld [vmem:[%s18105_s10 + $0x1a90] sm:$0xf]  ;;  %v14575_v28 = vor.u32 %v16822_v5, %v14574_v36  ;;  %10199 = vmatpush.bf16.msrb.mxu3 %v15375_v6  ;;  %v9946_v5 = vpop.f32.mrf.mxu3 }
 0x62e   : > { %v16886_v9 = vld [vmem:[%s18105_s10 + $0x1aac] sm:$0xf0] }
 0x62f   : > { %v15086_v12 = vld [vmem:[%s18105_s10 + $0x1c90] sm:$0xf]  ;;  %v14831_v29 = vor.u32 %v16886_v9, %v14830_v17  ;;  %10161 = vmatpush.bf16.msrb.mxu0 %v14575_v28  ;;  %v16090_v9 = vld [vmem:[%s18105_s10 + $0x1d4] sm:$0xf] }
 0x630   : > { %v16950_v16 = vld [vmem:[%s18105_s10 + $0x1cac] sm:$0xf0] }
 0x631   : > { %v15342_v21 = vld [vmem:[%s18105_s10 + $0x1e90] sm:$0xf]  ;;  %v15087_v43 = vor.u32 %v16950_v16, %v15086_v12  ;;  %10174 = vmatpush.bf16.msrb.mxu1 %v14831_v29  ;;  %v11664_v12 = vld [vmem:[%s18105_s10 + $0x1f0] sm:$0xf0]  ;;  %v9893_v16 = vadd.f32 %v19660_v45, %v9880_v48 }
 0x632   : > { %v17014_v22 = vld [vmem:[%s18105_s10 + $0x1eac] sm:$0xf0] }
 0x633   : > { %v14542_v44 = vld [vmem:[%s18105_s10 + $0x1850] sm:$0xf]  ;;  %v15343_v32 = vor.u32 %v17014_v22, %v15342_v21  ;;  %10187 = vmatpush.bf16.msrb.mxu2 %v15087_v43  ;;  %v16154_v22 = vld [vmem:[%s18105_s10 + $0x3d4] sm:$0xf]  ;;  %v9906_v29 = vadd.f32 %v19714_v41, %v9893_v16 }
 0x634   : > { %v16814_v24 = vld [vmem:[%s18105_s10 + $0x186c] sm:$0xf0]  ;;  %v16130_v16 = vld [vmem:[%s18105_s10 + $0x314] sm:$0xf] }
 0x635   : > { %v14798_v31 = vld [vmem:[%s18105_s10 + $0x1a50] sm:$0xf]  ;;  %v14543_v42 = vor.u32 %v16814_v24, %v14542_v44  ;;  %10200 = vmatpush.bf16.msrb.mxu3 %v15343_v32  ;;  %v11667_v44 = vor.u32 %v16090_v9, %v11664_v12  ;;  %v11923_v32 = vor.u32 %v16154_v22, %v11920_v27  ;;  %v9957_v12 = vpop.f32.mrf.mxu0  ;;  %v9970_v22 = vpop.f32.mrf.mxu1 }
 0x636   : > { %v16878_v38 = vld [vmem:[%s18105_s10 + $0x1a6c] sm:$0xf0] }
 0x637   : > { %v15054_v59 = vld [vmem:[%s18105_s10 + $0x1c50] sm:$0xf]  ;;  %v14799_v50 = vor.u32 %v16878_v38, %v14798_v31  ;;  %10162 = vmatpush.bf16.msrb.mxu0 %v14543_v42 }
 0x638   : > { %v16942_v25 = vld [vmem:[%s18105_s10 + $0x1c6c] sm:$0xf0] }
 0x639   : > { %v15310_v23 = vld [vmem:[%s18105_s10 + $0x1e50] sm:$0xf]  ;;  %v15055_v52 = vor.u32 %v16942_v25, %v15054_v59  ;;  %10175 = vmatpush.bf16.msrb.mxu1 %v14799_v50  ;;  %v16082_v59 = vld [vmem:[%s18105_s10 + $0x194] sm:$0xf] }
 0x63a   : > { %v17006_v35 = vld [vmem:[%s18105_s10 + $0x1e6c] sm:$0xf0]  ;;  %v11632_v25 = vld [vmem:[%s18105_s10 + $0x1b0] sm:$0xf0] }
 0x63b   : > { %v14510_v46 = vld [vmem:[%s18105_s10 + $0x1810] sm:$0xf]  ;;  %v15311_v60 = vor.u32 %v17006_v35, %v15310_v23  ;;  %10188 = vmatpush.bf16.msrb.mxu2 %v15055_v52  ;;  %v11888_v23 = vld [vmem:[%s18105_s10 + $0x3b0] sm:$0xf0]  ;;  %v9919_v35 = vadd.f32 %v19718_v33, %v9906_v29 }
 0x63c   : > { %v16806_v47 = vld [vmem:[%s18105_s10 + $0x182c] sm:$0xf0]  ;;  %v11891_v52 = vor.u32 %v16146_v55, %v11888_v23 }
 0x63d   : > { %v14766_v14 = vld [vmem:[%s18105_s10 + $0x1a10] sm:$0xf]  ;;  %v14511_v17 = vor.u32 %v16806_v47, %v14510_v46  ;;  %10201 = vmatpush.bf16.msrb.mxu3 %v15311_v60  ;;  %v11635_v46 = vor.u32 %v16082_v59, %v11632_v25  ;;  %v9932_v33 = vadd.f32 %v19731_v49, %v9919_v35  ;;  %v16138_v60 = vld [vmem:[%s18105_s10 + $0x354] sm:$0xf] }
 0x63e   : > { %v16870_v40 = vld [vmem:[%s18105_s10 + $0x1a2c] sm:$0xf0] }
 0x63f   : > { %v15022_v26 = vld [vmem:[%s18105_s10 + $0x1c10] sm:$0xf]  ;;  %v14767_v18 = vor.u32 %v16870_v40, %v14766_v14  ;;  %10163 = vmatpush.bf16.msrb.mxu0 %v14511_v17  ;;  %v16074_v40 = vld [vmem:[%s18105_s10 + $0x154] sm:$0xf]  ;;  %v9945_v9 = vadd.f32 %v19738_v19, %v9932_v33 }
 0x640   : > { %v16934_v30 = vld [vmem:[%s18105_s10 + $0x1c2c] sm:$0xf0]  ;;  %v16066_v17 = vld [vmem:[%s18105_s10 + $0x114] sm:$0xf] }
 0x641   : > { %v15278_v3 = vld [vmem:[%s18105_s10 + $0x1e10] sm:$0xf]  ;;  %v15023_v21 = vor.u32 %v16934_v30, %v15022_v26  ;;  %10176 = vmatpush.bf16.msrb.mxu1 %v14767_v18  ;;  %v11600_v26 = vld [vmem:[%s18105_s10 + $0x170] sm:$0xf0]  ;;  %v9958_v27 = vadd.f32 %v9957_v12, %v9945_v9 }
 0x642   : > { %v16998_v51 = vld [vmem:[%s18105_s10 + $0x1e2c] sm:$0xf0]  ;;  %10164 = vmatmul.bf16.vlgmr.msrb.gmra.mxu0 %v18419_v56  ;;  %v11856_v30 = vld [vmem:[%s18105_s10 + $0x370] sm:$0xf0]  ;;  %v11603_v57 = vor.u32 %v16074_v40, %v11600_v26  ;;  %v9996_v40 = vpop.f32.mrf.mxu3 }
 0x643   : > { %v15758_v34 = vld [vmem:[%s18105_s10 + $0x21d0] sm:$0xf]  ;;  %v15279_v28 = vor.u32 %v16998_v51, %v15278_v3  ;;  %10189 = vmatpush.bf16.msrb.mxu2 %v15023_v21  ;;  %v11824_v18 = vld [vmem:[%s18105_s10 + $0x330] sm:$0xf0]  ;;  %v9971_v25 = vadd.f32 %v9970_v22, %v9958_v27 }
 0x644   : > { %v17118_v15 = vld [vmem:[%s18105_s10 + $0x21ec] sm:$0xf0]  ;;  %10177 = vmatmul.bf16.vlgmr.msrb.gmra.mxu1 %v18426_v0  ;;  %v16114_v26 = vld [vmem:[%s18105_s10 + $0x294] sm:$0xf] }
 0x645   : > { %v16014_v36 = vld [vmem:[%s18105_s10 + $0x23d0] sm:$0xf]  ;;  %v15759_v20 = vor.u32 %v17118_v15, %v15758_v34  ;;  %10202 = vmatpush.bf16.msrb.mxu3 %v15279_v28  ;;  %v11760_v33 = vld [vmem:[%s18105_s10 + $0x2b0] sm:$0xf0] }
 0x646   : > { %v17182_v6 = vld [vmem:[%s18105_s10 + $0x23ec] sm:$0xf0]  ;;  %10190 = vmatmul.bf16.vlgmr.msrb.gmra.mxu2 %v18424_v61  ;;  %v16042_v9 = vld [vmem:[%s18105_s10 + $0x54] sm:$0xf] }
 0x647   : > { %v16015_v43 = vor.u32 %v17182_v6, %v16014_v36  ;;  %v15726_v24 = vld [vmem:[%s18105_s10 + $0x2190] sm:$0xf]  ;;  %10208 = vmatpush.bf16.msra.mxu0 %v15759_v20  ;;  %10234 = vmatpush.bf16.msra.mxu2 %v11667_v44  ;;  %v11859_v36 = vor.u32 %v16138_v60, %v11856_v30  ;;  %v11568_v6 = vld [vmem:[%s18105_s10 + $0x130] sm:$0xf0]  ;;  %v11827_v44 = vor.u32 %v16130_v16, %v11824_v18  ;;  %v9959_v60 = vpop.f32.mrf.mxu0 }
 0x648   : > { %v17110_v45 = vld [vmem:[%s18105_s10 + $0x21ac] sm:$0xf0]  ;;  %10203 = vmatmul.bf16.vlgmr.msrb.gmra.mxu3 %v18430_v4  ;;  %v11571_v20 = vor.u32 %v16066_v17, %v11568_v6  ;;  %v11763_v17 = vor.u32 %v16114_v26, %v11760_v33  ;;  %v11472_v12 = vld [vmem:[%s18105_s10 + $0x70] sm:$0xf0] }
 0x649   : > { %v15982_v31 = vld [vmem:[%s18105_s10 + $0x2390] sm:$0xf]  ;;  %v15727_v41 = vor.u32 %v17110_v45, %v15726_v24  ;;  %10221 = vmatpush.bf16.msra.mxu1 %v16015_v43  ;;  %10247 = vmatpush.bf16.msra.mxu3 %v11923_v32  ;;  %v16058_v45 = vld [vmem:[%s18105_s10 + $0xd4] sm:$0xf] }
 0x64a   : > { %v17174_v38 = vld [vmem:[%s18105_s10 + $0x23ac] sm:$0xf0]  ;;  %v16122_v32 = vld [vmem:[%s18105_s10 + $0x2d4] sm:$0xf] }
 0x64b   : > { %v15983_v42 = vor.u32 %v17174_v38, %v15982_v31  ;;  %v15694_v47 = vld [vmem:[%s18105_s10 + $0x2150] sm:$0xf]  ;;  %10209 = vmatpush.bf16.msra.mxu0 %v15727_v41  ;;  %10235 = vmatpush.bf16.msra.mxu2 %v11635_v46  ;;  %v11536_v31 = vld [vmem:[%s18105_s10 + $0xf0] sm:$0xf0] }
 0x64c   : > { %v17102_v48 = vld [vmem:[%s18105_s10 + $0x216c] sm:$0xf0]  ;;  %v11792_v38 = vld [vmem:[%s18105_s10 + $0x2f0] sm:$0xf0]  ;;  %v11539_v23 = vor.u32 %v16058_v45, %v11536_v31 }
 0x64d   : > { %v15950_v50 = vld [vmem:[%s18105_s10 + $0x2350] sm:$0xf]  ;;  %v15695_v3 = vor.u32 %v17102_v48, %v15694_v47  ;;  %10222 = vmatpush.bf16.msra.mxu1 %v15983_v42  ;;  %10248 = vmatpush.bf16.msra.mxu3 %v11891_v52  ;;  %v11795_v46 = vor.u32 %v16122_v32, %v11792_v38  ;;  %v9983_v47 = vpop.f32.mrf.mxu2  ;;  %v11504_v52 = vld [vmem:[%s18105_s10 + $0xb0] sm:$0xf0] }
 0x64e   : > { %v17166_v14 = vld [vmem:[%s18105_s10 + $0x236c] sm:$0xf0]  ;;  %v16106_v18 = vld [vmem:[%s18105_s10 + $0x254] sm:$0xf] }
 0x64f   : > { %v15951_v51 = vor.u32 %v17166_v14, %v15950_v50  ;;  %v15662_v49 = vld [vmem:[%s18105_s10 + $0x2110] sm:$0xf]  ;;  %10210 = vmatpush.bf16.msra.mxu0 %v15695_v3  ;;  %10236 = vmatpush.bf16.msra.mxu2 %v11603_v57  ;;  %v16050_v50 = vld [vmem:[%s18105_s10 + $0x94] sm:$0xf]  ;;  %v9984_v14 = vadd.f32 %v9983_v47, %v9971_v25 }
 0x650   : > { %v17094_v34 = vld [vmem:[%s18105_s10 + $0x212c] sm:$0xf0]  ;;  %v11440_v45 = vld [vmem:[%s18105_s10 + $0x30] sm:$0xf0] }
 0x651   : > { %v15918_v15 = vld [vmem:[%s18105_s10 + $0x2310] sm:$0xf]  ;;  %v15663_v21 = vor.u32 %v17094_v34, %v15662_v49  ;;  %10223 = vmatpush.bf16.msra.mxu1 %v15951_v51  ;;  %10249 = vmatpush.bf16.msra.mxu3 %v11859_v36  ;;  %v9972_v51 = vpop.f32.mrf.mxu1  ;;  %v9997_v57 = vadd.f32 %v9996_v40, %v9984_v14  ;;  %v11507_v34 = vor.u32 %v16050_v50, %v11504_v52  ;;  %v16098_v31 = vld [vmem:[%s18105_s10 + $0x214] sm:$0xf] }
 0x652   : > { %v17158_v5 = vld [vmem:[%s18105_s10 + $0x232c] sm:$0xf0]  ;;  %v11696_v32 = vld [vmem:[%s18105_s10 + $0x230] sm:$0xf0] }
 0x653   : > { %v15919_v28 = vor.u32 %v17158_v5, %v15918_v15  ;;  %v15630_v29 = vld [vmem:[%s18105_s10 + $0x20d0] sm:$0xf]  ;;  %10211 = vmatpush.bf16.msra.mxu0 %v15663_v21  ;;  %10237 = vmatpush.bf16.msra.mxu2 %v11571_v20  ;;  %v11728_v21 = vld [vmem:[%s18105_s10 + $0x270] sm:$0xf0]  ;;  %v11699_v14 = vor.u32 %v16098_v31, %v11696_v32 }
 0x654   : > { %v17086_v43 = vld [vmem:[%s18105_s10 + $0x20ec] sm:$0xf0]  ;;  %v12176_v25 = vld [vmem:[%s18105_s10 + $0x5f0] sm:$0xf0] }
 0x655   : > { %v15886_v19 = vld [vmem:[%s18105_s10 + $0x22d0] sm:$0xf]  ;;  %v15631_v59 = vor.u32 %v17086_v43, %v15630_v29  ;;  %10224 = vmatpush.bf16.msra.mxu1 %v15919_v28  ;;  %10250 = vmatpush.bf16.msra.mxu3 %v11827_v44  ;;  %v11475_v43 = vor.u32 %v16042_v9, %v11472_v12  ;;  %v16034_v44 = vld [vmem:[%s18105_s10 + $0x14] sm:$0xf]  ;;  %v9985_v38 = vpop.f32.mrf.mxu2 }
 0x656   : > { %v17150_v24 = vld [vmem:[%s18105_s10 + $0x22ec] sm:$0xf0]  ;;  %v16410_v50 = vld [vmem:[%s18105_s10 + $0xbd4] sm:$0xf] }
 0x657   : > { %v15887_v55 = vor.u32 %v17150_v24, %v15886_v19  ;;  %v15598_v41 = vld [vmem:[%s18105_s10 + $0x2090] sm:$0xf]  ;;  %10212 = vmatpush.bf16.msra.mxu0 %v15631_v59  ;;  %10238 = vmatpush.bf16.msra.mxu2 %v11539_v23  ;;  %v11731_v24 = vor.u32 %v16106_v18, %v11728_v21  ;;  %v16218_v59 = vld [vmem:[%s18105_s10 + $0x5d4] sm:$0xf]  ;;  %v9998_v23 = vpop.f32.mrf.mxu3 }
 0x658   : > { %v17078_v35 = vld [vmem:[%s18105_s10 + $0x20ac] sm:$0xf0]  ;;  %v12944_v52 = vld [vmem:[%s18105_s10 + $0xbf0] sm:$0xf0]  ;;  %v12179_v40 = vor.u32 %v16218_v59, %v12176_v25 }
 0x659   : > { %v15854_v42 = vld [vmem:[%s18105_s10 + $0x2290] sm:$0xf]  ;;  %v15599_v3 = vor.u32 %v17078_v35, %v15598_v41  ;;  %10225 = vmatpush.bf16.msra.mxu1 %v15887_v55  ;;  %10251 = vmatpush.bf16.msra.mxu3 %v11795_v46  ;;  %v16282_v55 = vld [vmem:[%s18105_s10 + $0x7d4] sm:$0xf]  ;;  %v12947_v51 = vor.u32 %v16410_v50, %v12944_v52  ;;  %v10022_v50 = vpop.f32.mrf.mxu1 }
 0x65a   : > { %v17142_v48 = vld [vmem:[%s18105_s10 + $0x22ac] sm:$0xf0]  ;;  %v12432_v35 = vld [vmem:[%s18105_s10 + $0x7f0] sm:$0xf0] }
 0x65b   : > { %v2075_v30 = vld [vmem:[#allocation2 + $0x10] sm:$0xff]  ;;  %v15855_v49 = vor.u32 %v17142_v48, %v15854_v42  ;;  %10213 = vmatpush.bf16.msra.mxu0 %v15599_v3  ;;  %10239 = vmatpush.bf16.msra.mxu2 %v11507_v34  ;;  %v11443_v48 = vor.u32 %v16034_v44, %v11440_v45  ;;  %v12435_v26 = vor.u32 %v16282_v55, %v12432_v35 }
 0x65c   : > { %v15566_v15 = vld [vmem:[%s18105_s10 + $0x2050] sm:$0xf]  ;;  %v10939_v16 = vadd.f32 %v9997_v57, %v2075_v30  ;;  %v16346_v42 = vld [vmem:[%s18105_s10 + $0x9d4] sm:$0xf] }
 0x65d   : > { %v17070_v36 = vld [vmem:[%s18105_s10 + $0x206c] sm:$0xf0]  ;;  %10226 = vmatpush.bf16.msra.mxu1 %v15855_v49  ;;  %10252 = vmatpush.bf16.msra.mxu3 %v11763_v17  ;;  %v12688_v46 = vld [vmem:[%s18105_s10 + $0x9f0] sm:$0xf0] }
 0x65e   : > { %v15822_v5 = vld [vmem:[%s18105_s10 + $0x2250] sm:$0xf]  ;;  %v15567_v22 = vor.u32 %v17070_v36, %v15566_v15  ;;  %10947 = vst [vmem:[#allocation2 + $0x10] sm:$0xff] %v10939_v16  ;;  %v12691_v33 = vor.u32 %v16346_v42, %v12688_v46  ;;  %v16210_v60 = vld [vmem:[%s18105_s10 + $0x594] sm:$0xf] }
 0x65f   : > { %v17134_v6 = vld [vmem:[%s18105_s10 + $0x226c] sm:$0xf0]  ;;  %10240 = vmatpush.bf16.msra.mxu2 %v11475_v43  ;;  %v12144_v30 = vld [vmem:[%s18105_s10 + $0x5b0] sm:$0xf0] }
 0x660   : > { %v15534_v27 = vld [vmem:[%s18105_s10 + $0x2010] sm:$0xf]  ;;  %v15823_v29 = vor.u32 %v17134_v6, %v15822_v5  ;;  %10214 = vmatpush.bf16.msra.mxu0 %v15567_v22  ;;  %v16274_v3 = vld [vmem:[%s18105_s10 + $0x794] sm:$0xf]  ;;  %v12147_v5 = vor.u32 %v16210_v60, %v12144_v30 }
 0x661   : > { %v17062_v28 = vld [vmem:[%s18105_s10 + $0x202c] sm:$0xf0]  ;;  %10253 = vmatpush.bf16.msra.mxu3 %v11731_v24  ;;  %v12400_v57 = vld [vmem:[%s18105_s10 + $0x7b0] sm:$0xf0] }
 0x662   : > { %v15790_v20 = vld [vmem:[%s18105_s10 + $0x2210] sm:$0xf]  ;;  %v15535_v41 = vor.u32 %v17062_v28, %v15534_v27  ;;  %10227 = vmatpush.bf16.msra.mxu1 %v15823_v29  ;;  %v16338_v49 = vld [vmem:[%s18105_s10 + $0x994] sm:$0xf]  ;;  %v12403_v17 = vor.u32 %v16274_v3, %v12400_v57 }
 0x663   : > { %v17126_v19 = vld [vmem:[%s18105_s10 + $0x222c] sm:$0xf0]  ;;  %v12656_v34 = vld [vmem:[%s18105_s10 + $0x9b0] sm:$0xf0]  ;;  %10241 = vmatpush.bf16.msra.mxu2 %v11443_v48 }
 0x664   : > { %v15791_v47 = vor.u32 %v17126_v19, %v15790_v20  ;;  %10215 = vmatpush.bf16.msra.mxu0 %v15535_v41  ;;  %v16402_v15 = vld [vmem:[%s18105_s10 + $0xb94] sm:$0xf]  ;;  %v12659_v6 = vor.u32 %v16338_v49, %v12656_v34  ;;  %v10009_v41 = vpop.f32.mrf.mxu0 }
 0x665   : > { %v12912_v36 = vld [vmem:[%s18105_s10 + $0xbb0] sm:$0xf0]  ;;  %10254 = vmatpush.bf16.msra.mxu3 %v11699_v14 }
 0x666   : > { %10228 = vmatpush.bf16.msra.mxu1 %v15791_v47  ;;  %v16202_v9 = vld [vmem:[%s18105_s10 + $0x554] sm:$0xf]  ;;  %v12915_v18 = vor.u32 %v16402_v15, %v12912_v36  ;;  %10242 = vmatmul.bf16.vlgmr.msra.gmra.mxu2 %v18211_v53  ;;  %v10035_v36 = vpop.f32.mrf.mxu2 }
 0x667   : > { %10286 = vmatpush.bf16.msrb.mxu2 %v12691_v33  ;;  %v12112_v12 = vld [vmem:[%s18105_s10 + $0x570] sm:$0xf0]  ;;  %10216 = vmatmul.bf16.vlgmr.msra.gmra.mxu0 %v18496_v1  ;;  %v10023_v33 = vadd.f32 %v10022_v50, %v10009_v41 }
 0x668   : > { %10260 = vmatpush.bf16.msrb.mxu0 %v12179_v40  ;;  %v16266_v16 = vld [vmem:[%s18105_s10 + $0x754] sm:$0xf]  ;;  %v12115_v29 = vor.u32 %v16202_v9, %v12112_v12  ;;  %10255 = vmatmul.bf16.vlgmr.msra.gmra.mxu3 %v18214_v54 }
 0x669   : > { %10299 = vmatpush.bf16.msrb.mxu3 %v12947_v51  ;;  %v12368_v21 = vld [vmem:[%s18105_s10 + $0x770] sm:$0xf0]  ;;  %10229 = vmatmul.bf16.vlgmr.msra.gmra.mxu1 %v18501_v8  ;;  %v10036_v12 = vadd.f32 %v10035_v36, %v10023_v33 }
 0x66a   : > { %10273 = vmatpush.bf16.msrb.mxu1 %v12435_v26  ;;  %v16330_v22 = vld [vmem:[%s18105_s10 + $0x954] sm:$0xf]  ;;  %v12371_v43 = vor.u32 %v16266_v16, %v12368_v21  ;;  %v10048_v16 = vpop.f32.mrf.mxu3 }
 0x66b   : > { %v12624_v27 = vld [vmem:[%s18105_s10 + $0x970] sm:$0xf0]  ;;  %10287 = vmatpush.bf16.msrb.mxu2 %v12659_v6 }
 0x66c   : > { %v16394_v28 = vld [vmem:[%s18105_s10 + $0xb54] sm:$0xf]  ;;  %10261 = vmatpush.bf16.msrb.mxu0 %v12147_v5  ;;  %v12627_v19 = vor.u32 %v16330_v22, %v12624_v27  ;;  %v19885_v27 = vadd.f32 %v10048_v16, %v10036_v12 }
 0x66d   : > { %v12880_v20 = vld [vmem:[%s18105_s10 + $0xb70] sm:$0xf0]  ;;  %10300 = vmatpush.bf16.msrb.mxu3 %v12915_v18 }
 0x66e   : > { %10274 = vmatpush.bf16.msrb.mxu1 %v12403_v17  ;;  %v16194_v44 = vld [vmem:[%s18105_s10 + $0x514] sm:$0xf]  ;;  %v12883_v31 = vor.u32 %v16394_v28, %v12880_v20  ;;  %v10011_v28 = vpop.f32.mrf.mxu0  ;;  %v10037_v50 = vpop.f32.mrf.mxu2 }
 0x66f   : > { %v12080_v24 = vld [vmem:[%s18105_s10 + $0x530] sm:$0xf0]  ;;  %10288 = vmatpush.bf16.msrb.mxu2 %v12627_v19 }
 0x670   : > { %v16258_v45 = vld [vmem:[%s18105_s10 + $0x714] sm:$0xf]  ;;  %10262 = vmatpush.bf16.msrb.mxu0 %v12115_v29  ;;  %v12083_v23 = vor.u32 %v16194_v44, %v12080_v24  ;;  %v10024_v24 = vpop.f32.mrf.mxu1 }
 0x671   : > { %v12336_v32 = vld [vmem:[%s18105_s10 + $0x730] sm:$0xf0]  ;;  %10301 = vmatpush.bf16.msrb.mxu3 %v12883_v31 }
 0x672   : > { %v16322_v38 = vld [vmem:[%s18105_s10 + $0x914] sm:$0xf]  ;;  %10275 = vmatpush.bf16.msrb.mxu1 %v12371_v43  ;;  %v12339_v35 = vor.u32 %v16258_v45, %v12336_v32  ;;  %v10050_v33 = vpop.f32.mrf.mxu3 }
 0x673   : > { %v12592_v59 = vld [vmem:[%s18105_s10 + $0x930] sm:$0xf0] }
 0x674   : > { %v16386_v25 = vld [vmem:[%s18105_s10 + $0xb14] sm:$0xf]  ;;  %v12595_v42 = vor.u32 %v16322_v38, %v12592_v59  ;;  %10263 = vmatpush.bf16.msrb.mxu0 %v12083_v23 }
 0x675   : > { %v12848_v55 = vld [vmem:[%s18105_s10 + $0xb30] sm:$0xf0] }
 0x676   : > { %v16186_v46 = vld [vmem:[%s18105_s10 + $0x4d4] sm:$0xf]  ;;  %v12851_v52 = vor.u32 %v16386_v25, %v12848_v55  ;;  %10276 = vmatpush.bf16.msrb.mxu1 %v12339_v35  ;;  %10289 = vmatpush.bf16.msrb.mxu2 %v12595_v42 }
 0x677   : > { %v12048_v47 = vld [vmem:[%s18105_s10 + $0x4f0] sm:$0xf0] }
 0x678   : > { %v16250_v48 = vld [vmem:[%s18105_s10 + $0x6d4] sm:$0xf]  ;;  %v12051_v3 = vor.u32 %v16186_v46, %v12048_v47  ;;  %10302 = vmatpush.bf16.msrb.mxu3 %v12851_v52 }
 0x679   : > { %v12304_v14 = vld [vmem:[%s18105_s10 + $0x6f0] sm:$0xf0] }
 0x67a   : > { %v16314_v40 = vld [vmem:[%s18105_s10 + $0x8d4] sm:$0xf]  ;;  %v12307_v51 = vor.u32 %v16250_v48, %v12304_v14  ;;  %10264 = vmatpush.bf16.msrb.mxu0 %v12051_v3 }
 0x67b   : > { %v12560_v26 = vld [vmem:[%s18105_s10 + $0x8f0] sm:$0xf0] }
 0x67c   : > { %v16378_v60 = vld [vmem:[%s18105_s10 + $0xad4] sm:$0xf]  ;;  %v12563_v57 = vor.u32 %v16314_v40, %v12560_v26  ;;  %10277 = vmatpush.bf16.msrb.mxu1 %v12307_v51 }
 0x67d   : > { %v12816_v30 = vld [vmem:[%s18105_s10 + $0xaf0] sm:$0xf0] }
 0x67e   : > { %v16178_v49 = vld [vmem:[%s18105_s10 + $0x494] sm:$0xf]  ;;  %v12819_v5 = vor.u32 %v16378_v60, %v12816_v30  ;;  %10290 = vmatpush.bf16.msrb.mxu2 %v12563_v57 }
 0x67f   : > { %v12016_v34 = vld [vmem:[%s18105_s10 + $0x4b0] sm:$0xf0] }
 0x680   : > { %v16242_v15 = vld [vmem:[%s18105_s10 + $0x694] sm:$0xf]  ;;  %v12019_v22 = vor.u32 %v16178_v49, %v12016_v34  ;;  %10303 = vmatpush.bf16.msrb.mxu3 %v12819_v5 }
 0x681   : > { %v12272_v17 = vld [vmem:[%s18105_s10 + $0x6b0] sm:$0xf0] }
 0x682   : > { %v16306_v6 = vld [vmem:[%s18105_s10 + $0x894] sm:$0xf]  ;;  %v12275_v20 = vor.u32 %v16242_v15, %v12272_v17  ;;  %10265 = vmatpush.bf16.msrb.mxu0 %v12019_v22 }
 0x683   : > { %v12528_v9 = vld [vmem:[%s18105_s10 + $0x8b0] sm:$0xf0] }
 0x684   : > { %v16370_v18 = vld [vmem:[%s18105_s10 + $0xa94] sm:$0xf]  ;;  %v12531_v29 = vor.u32 %v16306_v6, %v12528_v9  ;;  %10278 = vmatpush.bf16.msrb.mxu1 %v12275_v20 }
 0x685   : > { %v12784_v21 = vld [vmem:[%s18105_s10 + $0xab0] sm:$0xf0] }
 0x686   : > { %v16170_v43 = vld [vmem:[%s18105_s10 + $0x454] sm:$0xf]  ;;  %v12787_v45 = vor.u32 %v16370_v18, %v12784_v21  ;;  %10291 = vmatpush.bf16.msrb.mxu2 %v12531_v29 }
 0x687   : > { %v11984_v19 = vld [vmem:[%s18105_s10 + $0x470] sm:$0xf0] }
 0x688   : > { %v16234_v44 = vld [vmem:[%s18105_s10 + $0x654] sm:$0xf]  ;;  %v11987_v55 = vor.u32 %v16170_v43, %v11984_v19  ;;  %10304 = vmatpush.bf16.msrb.mxu3 %v12787_v45 }
 0x689   : > { %v12240_v31 = vld [vmem:[%s18105_s10 + $0x670] sm:$0xf0] }
 0x68a   : > { %v16298_v32 = vld [vmem:[%s18105_s10 + $0x854] sm:$0xf]  ;;  %v12243_v35 = vor.u32 %v16234_v44, %v12240_v31  ;;  %10266 = vmatpush.bf16.msrb.mxu0 %v11987_v55 }
 0x68b   : > { %v12496_v38 = vld [vmem:[%s18105_s10 + $0x870] sm:$0xf0] }
 0x68c   : > { %v16362_v59 = vld [vmem:[%s18105_s10 + $0xa54] sm:$0xf]  ;;  %v12499_v42 = vor.u32 %v16298_v32, %v12496_v38  ;;  %10279 = vmatpush.bf16.msrb.mxu1 %v12243_v35 }
 0x68d   : > { %v12752_v25 = vld [vmem:[%s18105_s10 + $0xa70] sm:$0xf0] }
 0x68e   : > { %v16162_v23 = vld [vmem:[%s18105_s10 + $0x414] sm:$0xf]  ;;  %v12755_v52 = vor.u32 %v16362_v59, %v12752_v25  ;;  %10292 = vmatpush.bf16.msrb.mxu2 %v12499_v42 }
 0x68f   : > { %v11952_v41 = vld [vmem:[%s18105_s10 + $0x430] sm:$0xf0] }
 0x690   : > { %v16226_v46 = vld [vmem:[%s18105_s10 + $0x614] sm:$0xf]  ;;  %v11955_v51 = vor.u32 %v16162_v23, %v11952_v41  ;;  %10305 = vmatpush.bf16.msrb.mxu3 %v12755_v52 }
 0x691   : > { %v12208_v47 = vld [vmem:[%s18105_s10 + $0x630] sm:$0xf0] }
 0x692   : > { %v16290_v48 = vld [vmem:[%s18105_s10 + $0x814] sm:$0xf]  ;;  %v12211_v15 = vor.u32 %v16226_v46, %v12208_v47  ;;  %10267 = vmatpush.bf16.msrb.mxu0 %v11955_v51 }
 0x693   : > { %v12464_v14 = vld [vmem:[%s18105_s10 + $0x830] sm:$0xf0] }
 0x694   : > { %v16354_v40 = vld [vmem:[%s18105_s10 + $0xa14] sm:$0xf]  ;;  %v12467_v36 = vor.u32 %v16290_v48, %v12464_v14  ;;  %10280 = vmatpush.bf16.msrb.mxu1 %v12211_v15 }
 0x695   : > { %v12720_v26 = vld [vmem:[%s18105_s10 + $0xa30] sm:$0xf0]  ;;  %10268 = vmatmul.bf16.vlgmr.msrb.gmra.mxu0 %v18197_v37 }
 0x696   : > { %v16474_v60 = vld [vmem:[%s18105_s10 + $0xdd4] sm:$0xf]  ;;  %v12723_v6 = vor.u32 %v16354_v40, %v12720_v26  ;;  %10293 = vmatpush.bf16.msrb.mxu2 %v12467_v36 }
 0x697   : > { %v13200_v30 = vld [vmem:[%s18105_s10 + $0xdf0] sm:$0xf0]  ;;  %10281 = vmatmul.bf16.vlgmr.msrb.gmra.mxu1 %v18200_v39 }
 0x698   : > { %v16538_v3 = vld [vmem:[%s18105_s10 + $0xfd4] sm:$0xf]  ;;  %v13203_v9 = vor.u32 %v16474_v60, %v13200_v30  ;;  %10306 = vmatpush.bf16.msrb.mxu3 %v12723_v6  ;;  %v10074_v6 = vpop.f32.mrf.mxu1 }
 0x699   : > { %v13456_v57 = vld [vmem:[%s18105_s10 + $0xff0] sm:$0xf0]  ;;  %10294 = vmatmul.bf16.vlgmr.msrb.gmra.mxu2 %v18270_v10 }
 0x69a   : > { %v16602_v49 = vld [vmem:[%s18105_s10 + $0x11d4] sm:$0xf]  ;;  %v13459_v12 = vor.u32 %v16538_v3, %v13456_v57  ;;  %10312 = vmatpush.bf16.msra.mxu0 %v13203_v9  ;;  %v10061_v57 = vpop.f32.mrf.mxu0 }
 0x69b   : > { %v13712_v34 = vld [vmem:[%s18105_s10 + $0x11f0] sm:$0xf0]  ;;  %10307 = vmatmul.bf16.vlgmr.msrb.gmra.mxu3 %v18274_v13 }
 0x69c   : > { %v16666_v5 = vld [vmem:[%s18105_s10 + $0x13d4] sm:$0xf]  ;;  %v13715_v16 = vor.u32 %v16602_v49, %v13712_v34  ;;  %10325 = vmatpush.bf16.msra.mxu1 %v13459_v12 }
 0x69d   : > { %v13968_v17 = vld [vmem:[%s18105_s10 + $0x13f0] sm:$0xf0] }
 0x69e   : > { %v16466_v18 = vld [vmem:[%s18105_s10 + $0xd94] sm:$0xf]  ;;  %v13971_v28 = vor.u32 %v16666_v5, %v13968_v17  ;;  %10338 = vmatpush.bf16.msra.mxu2 %v13715_v16  ;;  %v10062_v17 = vadd.f32 %v10061_v57, %v19885_v27 }
 0x69f   : > { %v13168_v21 = vld [vmem:[%s18105_s10 + $0xdb0] sm:$0xf0] }
 0x6a0   : > { %v16530_v22 = vld [vmem:[%s18105_s10 + $0xf94] sm:$0xf]  ;;  %v13171_v24 = vor.u32 %v16466_v18, %v13168_v21  ;;  %10351 = vmatpush.bf16.msra.mxu3 %v13971_v28  ;;  %v10075_v28 = vadd.f32 %v10074_v6, %v10062_v17 }
 0x6a1   : > { %v13424_v20 = vld [vmem:[%s18105_s10 + $0xfb0] sm:$0xf0] }
 0x6a2   : > { %v16594_v29 = vld [vmem:[%s18105_s10 + $0x1194] sm:$0xf]  ;;  %v13427_v45 = vor.u32 %v16530_v22, %v13424_v20  ;;  %10313 = vmatpush.bf16.msra.mxu0 %v13171_v24  ;;  %v10087_v24 = vpop.f32.mrf.mxu2 }
 0x6a3   : > { %v13680_v43 = vld [vmem:[%s18105_s10 + $0x11b0] sm:$0xf0] }
 0x6a4   : > { %v16658_v19 = vld [vmem:[%s18105_s10 + $0x1394] sm:$0xf]  ;;  %v13683_v31 = vor.u32 %v16594_v29, %v13680_v43  ;;  %10326 = vmatpush.bf16.msra.mxu1 %v13427_v45 }
 0x6a5   : > { %v13936_v44 = vld [vmem:[%s18105_s10 + $0x13b0] sm:$0xf0] }
 0x6a6   : > { %v16458_v32 = vld [vmem:[%s18105_s10 + $0xd54] sm:$0xf]  ;;  %v13939_v25 = vor.u32 %v16658_v19, %v13936_v44  ;;  %10339 = vmatpush.bf16.msra.mxu2 %v13683_v31 }
 0x6a7   : > { %v13136_v38 = vld [vmem:[%s18105_s10 + $0xd70] sm:$0xf0] }
 0x6a8   : > { %v16522_v59 = vld [vmem:[%s18105_s10 + $0xf54] sm:$0xf]  ;;  %v13139_v46 = vor.u32 %v16458_v32, %v13136_v38  ;;  %10352 = vmatpush.bf16.msra.mxu3 %v13939_v25  ;;  %v10100_v25 = vpop.f32.mrf.mxu3 }
 0x6a9   : > { %v13392_v55 = vld [vmem:[%s18105_s10 + $0xf70] sm:$0xf0] }
 0x6aa   : > { %v16586_v23 = vld [vmem:[%s18105_s10 + $0x1154] sm:$0xf]  ;;  %v13395_v47 = vor.u32 %v16522_v59, %v13392_v55  ;;  %10314 = vmatpush.bf16.msra.mxu0 %v13139_v46  ;;  %v10088_v59 = vadd.f32 %v10087_v24, %v10075_v28  ;;  %v10089_v6 = vpop.f32.mrf.mxu2 }
 0x6ab   : > { %v13648_v41 = vld [vmem:[%s18105_s10 + $0x1170] sm:$0xf0] }
 0x6ac   : > { %v16650_v35 = vld [vmem:[%s18105_s10 + $0x1354] sm:$0xf]  ;;  %v13651_v48 = vor.u32 %v16586_v23, %v13648_v41  ;;  %10327 = vmatpush.bf16.msra.mxu1 %v13395_v47 }
 0x6ad   : > { %v13904_v42 = vld [vmem:[%s18105_s10 + $0x1370] sm:$0xf0] }
 0x6ae   : > { %v16450_v50 = vld [vmem:[%s18105_s10 + $0xd14] sm:$0xf]  ;;  %v13907_v40 = vor.u32 %v16650_v35, %v13904_v42  ;;  %10340 = vmatpush.bf16.msra.mxu2 %v13651_v48  ;;  %v19956_v35 = vadd.f32 %v10100_v25, %v10088_v59  ;;  %v10063_v42 = vpop.f32.mrf.mxu0 }
 0x6af   : > { %v13104_v52 = vld [vmem:[%s18105_s10 + $0xd30] sm:$0xf0] }
 0x6b0   : > { %v16514_v14 = vld [vmem:[%s18105_s10 + $0xf14] sm:$0xf]  ;;  %v13107_v51 = vor.u32 %v16450_v50, %v13104_v52  ;;  %10353 = vmatpush.bf16.msra.mxu3 %v13907_v40 }
 0x6b1   : > { %v13360_v26 = vld [vmem:[%s18105_s10 + $0xf30] sm:$0xf0] }
 0x6b2   : > { %v16578_v33 = vld [vmem:[%s18105_s10 + $0x1114] sm:$0xf]  ;;  %v13363_v49 = vor.u32 %v16514_v14, %v13360_v26  ;;  %10315 = vmatpush.bf16.msra.mxu0 %v13107_v51  ;;  %v10076_v14 = vpop.f32.mrf.mxu1 }
 0x6b3   : > { %v13616_v60 = vld [vmem:[%s18105_s10 + $0x1130] sm:$0xf0] }
 0x6b4   : > { %v16642_v30 = vld [vmem:[%s18105_s10 + $0x1314] sm:$0xf]  ;;  %v13619_v34 = vor.u32 %v16578_v33, %v13616_v60  ;;  %10328 = vmatpush.bf16.msra.mxu1 %v13363_v49 }
 0x6b5   : > { %v13872_v3 = vld [vmem:[%s18105_s10 + $0x1330] sm:$0xf0] }
 0x6b6   : > { %v16442_v15 = vld [vmem:[%s18105_s10 + $0xcd4] sm:$0xf]  ;;  %v13875_v9 = vor.u32 %v16642_v30, %v13872_v3  ;;  %10341 = vmatpush.bf16.msra.mxu2 %v13619_v34 }
 0x6b7   : > { %v13072_v36 = vld [vmem:[%s18105_s10 + $0xcf0] sm:$0xf0] }
 0x6b8   : > { %v16506_v5 = vld [vmem:[%s18105_s10 + $0xed4] sm:$0xf]  ;;  %v13075_v20 = vor.u32 %v16442_v15, %v13072_v36  ;;  %10354 = vmatpush.bf16.msra.mxu3 %v13875_v9 }
 0x6b9   : > { %v13328_v12 = vld [vmem:[%s18105_s10 + $0xef0] sm:$0xf0] }
 0x6ba   : > { %v16570_v16 = vld [vmem:[%s18105_s10 + $0x10d4] sm:$0xf]  ;;  %v13331_v27 = vor.u32 %v16506_v5, %v13328_v12  ;;  %10316 = vmatpush.bf16.msra.mxu0 %v13075_v20 }
 0x6bb   : > { %v13584_v18 = vld [vmem:[%s18105_s10 + $0x10f0] sm:$0xf0] }
 0x6bc   : > { %v16634_v21 = vld [vmem:[%s18105_s10 + $0x12d4] sm:$0xf]  ;;  %v13587_v29 = vor.u32 %v16570_v16, %v13584_v18  ;;  %10329 = vmatpush.bf16.msra.mxu1 %v13331_v27 }
 0x6bd   : > { %v13840_v22 = vld [vmem:[%s18105_s10 + $0x12f0] sm:$0xf0] }
 0x6be   : > { %v16434_v43 = vld [vmem:[%s18105_s10 + $0xc94] sm:$0xf]  ;;  %v13843_v45 = vor.u32 %v16634_v21, %v13840_v22  ;;  %10342 = vmatpush.bf16.msra.mxu2 %v13587_v29  ;;  %v10102_v21 = vpop.f32.mrf.mxu3 }
 0x6bf   : > { %v13040_v19 = vld [vmem:[%s18105_s10 + $0xcb0] sm:$0xf0] }
 0x6c0   : > { %v16498_v44 = vld [vmem:[%s18105_s10 + $0xe94] sm:$0xf]  ;;  %v13043_v41 = vor.u32 %v16434_v43, %v13040_v19  ;;  %10355 = vmatpush.bf16.msra.mxu3 %v13843_v45 }
 0x6c1   : > { %v13296_v31 = vld [vmem:[%s18105_s10 + $0xeb0] sm:$0xf0] }
 0x6c2   : > { %v16562_v32 = vld [vmem:[%s18105_s10 + $0x1094] sm:$0xf]  ;;  %v13299_v46 = vor.u32 %v16498_v44, %v13296_v31  ;;  %10317 = vmatpush.bf16.msra.mxu0 %v13043_v41 }
 0x6c3   : > { %v13552_v38 = vld [vmem:[%s18105_s10 + $0x10b0] sm:$0xf0] }
 0x6c4   : > { %v16626_v55 = vld [vmem:[%s18105_s10 + $0x1294] sm:$0xf]  ;;  %v13555_v47 = vor.u32 %v16562_v32, %v13552_v38  ;;  %10330 = vmatpush.bf16.msra.mxu1 %v13299_v46 }
 0x6c5   : > { %v13808_v23 = vld [vmem:[%s18105_s10 + $0x12b0] sm:$0xf0] }
 0x6c6   : > { %v16426_v48 = vld [vmem:[%s18105_s10 + $0xc54] sm:$0xf]  ;;  %v13811_v40 = vor.u32 %v16626_v55, %v13808_v23  ;;  %10343 = vmatpush.bf16.msra.mxu2 %v13555_v47 }
 0x6c7   : > { %v13008_v50 = vld [vmem:[%s18105_s10 + $0xc70] sm:$0xf0] }
 0x6c8   : > { %v16490_v52 = vld [vmem:[%s18105_s10 + $0xe54] sm:$0xf]  ;;  %v13011_v51 = vor.u32 %v16426_v48, %v13008_v50  ;;  %10356 = vmatpush.bf16.msra.mxu3 %v13811_v40 }
 0x6c9   : > { %v13264_v26 = vld [vmem:[%s18105_s10 + $0xe70] sm:$0xf0] }
 0x6ca   : > { %v16554_v33 = vld [vmem:[%s18105_s10 + $0x1054] sm:$0xf]  ;;  %v13267_v34 = vor.u32 %v16490_v52, %v13264_v26  ;;  %10318 = vmatpush.bf16.msra.mxu0 %v13011_v51 }
 0x6cb   : > { %v13520_v60 = vld [vmem:[%s18105_s10 + $0x1070] sm:$0xf0] }
 0x6cc   : > { %v16618_v30 = vld [vmem:[%s18105_s10 + $0x1254] sm:$0xf]  ;;  %v13523_v15 = vor.u32 %v16554_v33, %v13520_v60  ;;  %10331 = vmatpush.bf16.msra.mxu1 %v13267_v34 }
 0x6cd   : > { %v13776_v3 = vld [vmem:[%s18105_s10 + $0x1270] sm:$0xf0] }
 0x6ce   : > { %v16418_v57 = vld [vmem:[%s18105_s10 + $0xc14] sm:$0xf]  ;;  %v13779_v9 = vor.u32 %v16618_v30, %v13776_v3  ;;  %10344 = vmatpush.bf16.msra.mxu2 %v13523_v15 }
 0x6cf   : > { %v12976_v49 = vld [vmem:[%s18105_s10 + $0xc30] sm:$0xf0] }
 0x6d0   : > { %v16482_v36 = vld [vmem:[%s18105_s10 + $0xe14] sm:$0xf]  ;;  %v12979_v27 = vor.u32 %v16418_v57, %v12976_v49  ;;  %10357 = vmatpush.bf16.msra.mxu3 %v13779_v9 }
 0x6d1   : > { %v13232_v5 = vld [vmem:[%s18105_s10 + $0xe30] sm:$0xf0] }
 0x6d2   : > { %v16546_v17 = vld [vmem:[%s18105_s10 + $0x1014] sm:$0xf]  ;;  %v13235_v44 = vor.u32 %v16482_v36, %v13232_v5  ;;  %10319 = vmatpush.bf16.msra.mxu0 %v12979_v27 }
 0x6d3   : > { %v13488_v12 = vld [vmem:[%s18105_s10 + $0x1030] sm:$0xf0] }
 0x6d4   : > { %v16610_v16 = vld [vmem:[%s18105_s10 + $0x1214] sm:$0xf]  ;;  %v13491_v24 = vor.u32 %v16546_v17, %v13488_v12  ;;  %10332 = vmatpush.bf16.msra.mxu1 %v13235_v44 }
 0x6d5   : > { %v13744_v18 = vld [vmem:[%s18105_s10 + $0x1230] sm:$0xf0]  ;;  %10320 = vmatmul.bf16.vlgmr.msra.gmra.mxu0 %v18266_v7 }
 0x6d6   : > { %v16730_v22 = vld [vmem:[%s18105_s10 + $0x15d4] sm:$0xf]  ;;  %v13747_v32 = vor.u32 %v16610_v16, %v13744_v18  ;;  %10345 = vmatpush.bf16.msra.mxu2 %v13491_v24 }
 0x6d7   : > { %v14224_v28 = vld [vmem:[%s18105_s10 + $0x15f0] sm:$0xf0]  ;;  %10333 = vmatmul.bf16.vlgmr.msra.gmra.mxu1 %v18272_v11 }
 0x6d8   : > { %v16794_v20 = vld [vmem:[%s18105_s10 + $0x17d4] sm:$0xf]  ;;  %v14227_v38 = vor.u32 %v16730_v22, %v14224_v28  ;;  %10358 = vmatpush.bf16.msra.mxu3 %v13747_v32  ;;  %v20008_v28 = vpop.f32.mrf.mxu0 }
 0x6d9   : > { %v14480_v29 = vld [vmem:[%s18105_s10 + $0x17f0] sm:$0xf0]  ;;  %10346 = vmatmul.bf16.vlgmr.msra.gmra.mxu2 %v18341_v58 }
 0x6da   : > { %v16858_v43 = vld [vmem:[%s18105_s10 + $0x19d4] sm:$0xf]  ;;  %v14483_v59 = vor.u32 %v16794_v20, %v14480_v29  ;;  %10364 = vmatpush.bf16.msrb.mxu0 %v14227_v38 }
 0x6db   : > { %v14736_v19 = vld [vmem:[%s18105_s10 + $0x19f0] sm:$0xf0]  ;;  %10359 = vmatmul.bf16.vlgmr.msra.gmra.mxu3 %v18348_v63 }
 0x6dc   : > { %v16922_v45 = vld [vmem:[%s18105_s10 + $0x1bd4] sm:$0xf]  ;;  %v14739_v25 = vor.u32 %v16858_v43, %v14736_v19  ;;  %10377 = vmatpush.bf16.msrb.mxu1 %v14483_v59  ;;  %v20012_v43 = vpop.f32.mrf.mxu1 }
 0x6dd   : > { %v14992_v31 = vld [vmem:[%s18105_s10 + $0x1bf0] sm:$0xf0] }
 0x6de   : > { %v16722_v55 = vld [vmem:[%s18105_s10 + $0x1594] sm:$0xf]  ;;  %v14995_v42 = vor.u32 %v16922_v45, %v14992_v31  ;;  %10390 = vmatpush.bf16.msrb.mxu2 %v14739_v25 }
 0x6df   : > { %v14192_v23 = vld [vmem:[%s18105_s10 + $0x15b0] sm:$0xf0] }
 0x6e0   : > { %v16786_v41 = vld [vmem:[%s18105_s10 + $0x1794] sm:$0xf]  ;;  %v14195_v14 = vor.u32 %v16722_v55, %v14192_v23  ;;  %10403 = vmatpush.bf16.msrb.mxu3 %v14995_v42 }
 0x6e1   : > { %v14448_v46 = vld [vmem:[%s18105_s10 + $0x17b0] sm:$0xf0] }
 0x6e2   : > { %v16850_v47 = vld [vmem:[%s18105_s10 + $0x1994] sm:$0xf]  ;;  %v14451_v40 = vor.u32 %v16786_v41, %v14448_v46  ;;  %10365 = vmatpush.bf16.msrb.mxu0 %v14195_v14  ;;  %v20025_v14 = vpop.f32.mrf.mxu2 }
 0x6e3   : > { %v14704_v48 = vld [vmem:[%s18105_s10 + $0x19b0] sm:$0xf0] }
 0x6e4   : > { %v16914_v50 = vld [vmem:[%s18105_s10 + $0x1b94] sm:$0xf]  ;;  %v14707_v26 = vor.u32 %v16850_v47, %v14704_v48  ;;  %10378 = vmatpush.bf16.msrb.mxu1 %v14451_v40 }
 0x6e5   : > { %v14960_v52 = vld [vmem:[%s18105_s10 + $0x1bb0] sm:$0xf0] }
 0x6e6   : > { %v16714_v33 = vld [vmem:[%s18105_s10 + $0x1554] sm:$0xf]  ;;  %v14963_v3 = vor.u32 %v16914_v50, %v14960_v52  ;;  %10391 = vmatpush.bf16.msrb.mxu2 %v14707_v26 }
 0x6e7   : > { %v14160_v60 = vld [vmem:[%s18105_s10 + $0x1570] sm:$0xf0] }
 0x6e8   : > { %v16778_v30 = vld [vmem:[%s18105_s10 + $0x1754] sm:$0xf]  ;;  %v14163_v36 = vor.u32 %v16714_v33, %v14160_v60  ;;  %10404 = vmatpush.bf16.msrb.mxu3 %v14963_v3  ;;  %v20030_v60 = vpop.f32.mrf.mxu3 }
 0x6e9   : > { %v14416_v51 = vld [vmem:[%s18105_s10 + $0x1770] sm:$0xf0] }
 0x6ea   : > { %v16842_v57 = vld [vmem:[%s18105_s10 + $0x1954] sm:$0xf]  ;;  %v14419_v5 = vor.u32 %v16778_v30, %v14416_v51  ;;  %10366 = vmatpush.bf16.msrb.mxu0 %v14163_v36  ;;  %v10115_v51 = vpop.f32.mrf.mxu0 }
 0x6eb   : > { %v14672_v49 = vld [vmem:[%s18105_s10 + $0x1970] sm:$0xf0] }
 0x6ec   : > { %v16906_v34 = vld [vmem:[%s18105_s10 + $0x1b54] sm:$0xf]  ;;  %v14675_v17 = vor.u32 %v16842_v57, %v14672_v49  ;;  %10379 = vmatpush.bf16.msrb.mxu1 %v14419_v5  ;;  %v10128_v49 = vpop.f32.mrf.mxu1 }
 0x6ed   : > { %v14928_v15 = vld [vmem:[%s18105_s10 + $0x1b70] sm:$0xf0] }
 0x6ee   : > { %v16706_v6 = vld [vmem:[%s18105_s10 + $0x1514] sm:$0xf]  ;;  %v14931_v16 = vor.u32 %v16906_v34, %v14928_v15  ;;  %10392 = vmatpush.bf16.msrb.mxu2 %v14675_v17 }
 0x6ef   : > { %v14128_v9 = vld [vmem:[%s18105_s10 + $0x1530] sm:$0xf0] }
 0x6f0   : > { %v16770_v12 = vld [vmem:[%s18105_s10 + $0x1714] sm:$0xf]  ;;  %v14131_v29 = vor.u32 %v16706_v6, %v14128_v9  ;;  %10405 = vmatpush.bf16.msrb.mxu3 %v14931_v16 }
 0x6f1   : > { %v14384_v18 = vld [vmem:[%s18105_s10 + $0x1730] sm:$0xf0] }
 0x6f2   : > { %v16834_v21 = vld [vmem:[%s18105_s10 + $0x1914] sm:$0xf]  ;;  %v14387_v19 = vor.u32 %v16770_v12, %v14384_v18  ;;  %10367 = vmatpush.bf16.msrb.mxu0 %v14131_v29 }
 0x6f3   : > { %v14640_v22 = vld [vmem:[%s18105_s10 + $0x1930] sm:$0xf0] }
 0x6f4   : > { %v16898_v20 = vld [vmem:[%s18105_s10 + $0x1b14] sm:$0xf]  ;;  %v14643_v44 = vor.u32 %v16834_v21, %v14640_v22  ;;  %10380 = vmatpush.bf16.msrb.mxu1 %v14387_v19 }
 0x6f5   : > { %v14896_v27 = vld [vmem:[%s18105_s10 + $0x1b30] sm:$0xf0] }
 0x6f6   : > { %v16698_v24 = vld [vmem:[%s18105_s10 + $0x14d4] sm:$0xf]  ;;  %v14899_v32 = vor.u32 %v16898_v20, %v14896_v27  ;;  %10393 = vmatpush.bf16.msrb.mxu2 %v14643_v44 }
 0x6f7   : > { %v14096_v45 = vld [vmem:[%s18105_s10 + $0x14f0] sm:$0xf0] }
 0x6f8   : > { %v16762_v31 = vld [vmem:[%s18105_s10 + $0x16d4] sm:$0xf]  ;;  %v14099_v41 = vor.u32 %v16698_v24, %v14096_v45  ;;  %10406 = vmatpush.bf16.msrb.mxu3 %v14899_v32 }
 0x6f9   : > { %v14352_v38 = vld [vmem:[%s18105_s10 + $0x16f0] sm:$0xf0] }
 0x6fa   : > { %v16826_v59 = vld [vmem:[%s18105_s10 + $0x18d4] sm:$0xf]  ;;  %v14355_v42 = vor.u32 %v16762_v31, %v14352_v38  ;;  %10368 = vmatpush.bf16.msrb.mxu0 %v14099_v41 }
 0x6fb   : > { %v14608_v25 = vld [vmem:[%s18105_s10 + $0x18f0] sm:$0xf0] }
 0x6fc   : > { %v16890_v55 = vld [vmem:[%s18105_s10 + $0x1ad4] sm:$0xf]  ;;  %v14611_v46 = vor.u32 %v16826_v59, %v14608_v25  ;;  %10381 = vmatpush.bf16.msrb.mxu1 %v14355_v42  ;;  %v10141_v25 = vpop.f32.mrf.mxu2  ;;  %v10154_v42 = vpop.f32.mrf.mxu3 }
 0x6fd   : > { %v14864_v23 = vld [vmem:[%s18105_s10 + $0x1af0] sm:$0xf0] }
 0x6fe   : > { %v16690_v47 = vld [vmem:[%s18105_s10 + $0x1494] sm:$0xf]  ;;  %v14867_v52 = vor.u32 %v16890_v55, %v14864_v23  ;;  %10394 = vmatpush.bf16.msrb.mxu2 %v14611_v46 }
 0x6ff   : > { %v14064_v48 = vld [vmem:[%s18105_s10 + $0x14b0] sm:$0xf0] }
 0x700   : > { %v16754_v50 = vld [vmem:[%s18105_s10 + $0x1694] sm:$0xf]  ;;  %v14067_v57 = vor.u32 %v16690_v47, %v14064_v48  ;;  %10407 = vmatpush.bf16.msrb.mxu3 %v14867_v52 }
 0x701   : > { %v14320_v40 = vld [vmem:[%s18105_s10 + $0x16b0] sm:$0xf0] }
 0x702   : > { %v16818_v26 = vld [vmem:[%s18105_s10 + $0x1894] sm:$0xf]  ;;  %v14323_v34 = vor.u32 %v16754_v50, %v14320_v40  ;;  %10369 = vmatpush.bf16.msrb.mxu0 %v14067_v57 }
 0x703   : > { %v14576_v33 = vld [vmem:[%s18105_s10 + $0x18b0] sm:$0xf0] }
 0x704   : > { %v16882_v30 = vld [vmem:[%s18105_s10 + $0x1a94] sm:$0xf]  ;;  %v14579_v15 = vor.u32 %v16818_v26, %v14576_v33  ;;  %10382 = vmatpush.bf16.msrb.mxu1 %v14323_v34 }
 0x705   : > { %v14832_v3 = vld [vmem:[%s18105_s10 + $0x1ab0] sm:$0xf0] }
 0x706   : > { %v16682_v36 = vld [vmem:[%s18105_s10 + $0x1454] sm:$0xf]  ;;  %v14835_v6 = vor.u32 %v16882_v30, %v14832_v3  ;;  %10395 = vmatpush.bf16.msrb.mxu2 %v14579_v15 }
 0x707   : > { %v14032_v5 = vld [vmem:[%s18105_s10 + $0x1470] sm:$0xf0] }
 0x708   : > { %v16746_v17 = vld [vmem:[%s18105_s10 + $0x1654] sm:$0xf]  ;;  %v14035_v22 = vor.u32 %v16682_v36, %v14032_v5  ;;  %10408 = vmatpush.bf16.msrb.mxu3 %v14835_v6 }
 0x709   : > { %v14288_v9 = vld [vmem:[%s18105_s10 + $0x1670] sm:$0xf0] }
 0x70a   : > { %v16810_v12 = vld [vmem:[%s18105_s10 + $0x1854] sm:$0xf]  ;;  %v14291_v29 = vor.u32 %v16746_v17, %v14288_v9  ;;  %10370 = vmatpush.bf16.msrb.mxu0 %v14035_v22 }
 0x70b   : > { %v14544_v16 = vld [vmem:[%s18105_s10 + $0x1870] sm:$0xf0] }
 0x70c   : > { %v16874_v18 = vld [vmem:[%s18105_s10 + $0x1a54] sm:$0xf]  ;;  %v14547_v19 = vor.u32 %v16810_v12, %v14544_v16  ;;  %10383 = vmatpush.bf16.msrb.mxu1 %v14291_v29 }
 0x70d   : > { %v14800_v21 = vld [vmem:[%s18105_s10 + $0x1a70] sm:$0xf0] }
 0x70e   : > { %v16674_v20 = vld [vmem:[%s18105_s10 + $0x1414] sm:$0xf]  ;;  %v14803_v31 = vor.u32 %v16874_v18, %v14800_v21  ;;  %10396 = vmatpush.bf16.msrb.mxu2 %v14547_v19 }
 0x70f   : > { %v14000_v27 = vld [vmem:[%s18105_s10 + $0x1430] sm:$0xf0] }
 0x710   : > { %v16738_v44 = vld [vmem:[%s18105_s10 + $0x1614] sm:$0xf]  ;;  %v14003_v46 = vor.u32 %v16674_v20, %v14000_v27  ;;  %10409 = vmatpush.bf16.msrb.mxu3 %v14803_v31 }
 0x711   : > { %v14256_v24 = vld [vmem:[%s18105_s10 + $0x1630] sm:$0xf0] }
 0x712   : > { %v16802_v45 = vld [vmem:[%s18105_s10 + $0x1814] sm:$0xf]  ;;  %v14259_v52 = vor.u32 %v16738_v44, %v14256_v24  ;;  %10371 = vmatpush.bf16.msrb.mxu0 %v14003_v46 }
 0x713   : > { %v14512_v32 = vld [vmem:[%s18105_s10 + $0x1830] sm:$0xf0] }
 0x714   : > { %v16866_v38 = vld [vmem:[%s18105_s10 + $0x1a14] sm:$0xf]  ;;  %v14515_v40 = vor.u32 %v16802_v45, %v14512_v32  ;;  %10384 = vmatpush.bf16.msrb.mxu1 %v14259_v52 }
 0x715   : > { %v14768_v59 = vld [vmem:[%s18105_s10 + $0x1a30] sm:$0xf0]  ;;  %10372 = vmatmul.bf16.vlgmr.msrb.gmra.mxu0 %v18346_v62 }
 0x716   : > { %v16986_v55 = vld [vmem:[%s18105_s10 + $0x1dd4] sm:$0xf]  ;;  %v14771_v30 = vor.u32 %v16866_v38, %v14768_v59  ;;  %10397 = vmatpush.bf16.msrb.mxu2 %v14515_v40 }
 0x717   : > { %v15248_v23 = vld [vmem:[%s18105_s10 + $0x1df0] sm:$0xf0]  ;;  %10385 = vmatmul.bf16.vlgmr.msrb.gmra.mxu1 %v18352_v2 }
 0x718   : > { %v17050_v41 = vld [vmem:[%s18105_s10 + $0x1fd4] sm:$0xf]  ;;  %v15251_v3 = vor.u32 %v16986_v55, %v15248_v23  ;;  %10410 = vmatpush.bf16.msrb.mxu3 %v14771_v30 }
 0x719   : > { %v15504_v47 = vld [vmem:[%s18105_s10 + $0x1ff0] sm:$0xf0]  ;;  %10398 = vmatmul.bf16.vlgmr.msrb.gmra.mxu2 %v18419_v56 }
 0x71a   : > { %v17114_v48 = vld [vmem:[%s18105_s10 + $0x21d4] sm:$0xf]  ;;  %v15507_v51 = vor.u32 %v17050_v41, %v15504_v47  ;;  %10416 = vmatpush.bf16.msra.mxu0 %v15251_v3 }
 0x71b   : > { %v15760_v50 = vld [vmem:[%s18105_s10 + $0x21f0] sm:$0xf0]  ;;  %10411 = vmatmul.bf16.vlgmr.msrb.gmra.mxu3 %v18426_v0 }
 0x71c   : > { %v17178_v26 = vld [vmem:[%s18105_s10 + $0x23d4] sm:$0xf]  ;;  %v15763_v57 = vor.u32 %v17114_v48, %v15760_v50  ;;  %10429 = vmatpush.bf16.msra.mxu1 %v15507_v51  ;;  %v20084_v48 = vpop.f32.mrf.mxu0 }
 0x71d   : > { %v16016_v33 = vld [vmem:[%s18105_s10 + $0x23f0] sm:$0xf0] }
 0x71e   : > { %v16978_v49 = vld [vmem:[%s18105_s10 + $0x1d94] sm:$0xf]  ;;  %v16019_v36 = vor.u32 %v17178_v26, %v16016_v33  ;;  %10442 = vmatpush.bf16.msra.mxu2 %v15763_v57  ;;  %v20088_v26 = vpop.f32.mrf.mxu1 }
 0x71f   : > { %v15216_v34 = vld [vmem:[%s18105_s10 + $0x1db0] sm:$0xf0] }
 0x720   : > { %v17042_v15 = vld [vmem:[%s18105_s10 + $0x1f94] sm:$0xf]  ;;  %v15219_v16 = vor.u32 %v16978_v49, %v15216_v34  ;;  %10455 = vmatpush.bf16.msra.mxu3 %v16019_v36 }
 0x721   : > { %v15472_v5 = vld [vmem:[%s18105_s10 + $0x1fb0] sm:$0xf0] }
 0x722   : > { %v17106_v17 = vld [vmem:[%s18105_s10 + $0x2194] sm:$0xf]  ;;  %v15475_v18 = vor.u32 %v17042_v15, %v15472_v5  ;;  %10417 = vmatpush.bf16.msra.mxu0 %v15219_v16 }
 0x723   : > { %v15728_v6 = vld [vmem:[%s18105_s10 + $0x21b0] sm:$0xf0] }
 0x724   : > { %v17170_v9 = vld [vmem:[%s18105_s10 + $0x2394] sm:$0xf]  ;;  %v15731_v21 = vor.u32 %v17106_v17, %v15728_v6  ;;  %10430 = vmatpush.bf16.msra.mxu1 %v15475_v18 }
 0x725   : > { %v15984_v12 = vld [vmem:[%s18105_s10 + $0x23b0] sm:$0xf0] }
 0x726   : > { %v16970_v22 = vld [vmem:[%s18105_s10 + $0x1d54] sm:$0xf]  ;;  %v15987_v29 = vor.u32 %v17170_v9, %v15984_v12  ;;  %10443 = vmatpush.bf16.msra.mxu2 %v15731_v21 }
 0x727   : > { %v15184_v20 = vld [vmem:[%s18105_s10 + $0x1d70] sm:$0xf0] }
 0x728   : > { %v17034_v27 = vld [vmem:[%s18105_s10 + $0x1f54] sm:$0xf]  ;;  %v15187_v32 = vor.u32 %v16970_v22, %v15184_v20  ;;  %10456 = vmatpush.bf16.msra.mxu3 %v15987_v29  ;;  %v10114_v22 = vadd.f32 %v20008_v28, %v19956_v35  ;;  %v10180_v28 = vpop.f32.mrf.mxu1 }
 0x729   : > { %v15440_v19 = vld [vmem:[%s18105_s10 + $0x1f70] sm:$0xf0] }
 0x72a   : > { %v17098_v44 = vld [vmem:[%s18105_s10 + $0x2154] sm:$0xf]  ;;  %v15443_v38 = vor.u32 %v17034_v27, %v15440_v19  ;;  %10418 = vmatpush.bf16.msra.mxu0 %v15187_v32  ;;  %v20103_v27 = vpop.f32.mrf.mxu2  ;;  %v10167_v32 = vpop.f32.mrf.mxu0 }
 0x72b   : > { %v15696_v24 = vld [vmem:[%s18105_s10 + $0x2170] sm:$0xf0]  ;;  %v16287_v32 = vld [vmem:[%s18105_s10 + $0x7f4] sm:$0xf0] }
 0x72c   : > { %v17162_v45 = vld [vmem:[%s18105_s10 + $0x2354] sm:$0xf]  ;;  %v15699_v59 = vor.u32 %v17098_v44, %v15696_v24  ;;  %10431 = vmatpush.bf16.msra.mxu1 %v15443_v38  ;;  %v20108_v24 = vpop.f32.mrf.mxu3 }
 0x72d   : > { %v15952_v31 = vld [vmem:[%s18105_s10 + $0x2370] sm:$0xf0] }
 0x72e   : > { %v16962_v25 = vld [vmem:[%s18105_s10 + $0x1d14] sm:$0xf]  ;;  %v15955_v41 = vor.u32 %v17162_v45, %v15952_v31  ;;  %10444 = vmatpush.bf16.msra.mxu2 %v15699_v59 }
 0x72f   : > { %v15152_v55 = vld [vmem:[%s18105_s10 + $0x1d30] sm:$0xf0] }
 0x730   : > { %v17026_v23 = vld [vmem:[%s18105_s10 + $0x1f14] sm:$0xf]  ;;  %v15155_v40 = vor.u32 %v16962_v25, %v15152_v55  ;;  %10457 = vmatpush.bf16.msra.mxu3 %v15955_v41  ;;  %v10127_v41 = vadd.f32 %v20012_v43, %v10114_v22 }
 0x731   : > { %v15408_v42 = vld [vmem:[%s18105_s10 + $0x1f30] sm:$0xf0] }
 0x732   : > { %v17090_v46 = vld [vmem:[%s18105_s10 + $0x2114] sm:$0xf]  ;;  %v15411_v33 = vor.u32 %v17026_v23, %v15408_v42  ;;  %10419 = vmatpush.bf16.msra.mxu0 %v15155_v40 }
 0x733   : > { %v15664_v47 = vld [vmem:[%s18105_s10 + $0x2130] sm:$0xf0] }
 0x734   : > { %v17154_v50 = vld [vmem:[%s18105_s10 + $0x2314] sm:$0xf]  ;;  %v15667_v30 = vor.u32 %v17090_v46, %v15664_v47  ;;  %10432 = vmatpush.bf16.msra.mxu1 %v15411_v33  ;;  %v10140_v33 = vadd.f32 %v20025_v14, %v10127_v41 }
 0x735   : > { %v15920_v52 = vld [vmem:[%s18105_s10 + $0x2330] sm:$0xf0] }
 0x736   : > { %v16954_v3 = vld [vmem:[%s18105_s10 + $0x1cd4] sm:$0xf]  ;;  %v15923_v49 = vor.u32 %v17154_v50, %v15920_v52  ;;  %10445 = vmatpush.bf16.msra.mxu2 %v15667_v30 }
 0x737   : > { %v15120_v51 = vld [vmem:[%s18105_s10 + $0x1cf0] sm:$0xf0] }
 0x738   : > { %v17018_v57 = vld [vmem:[%s18105_s10 + $0x1ed4] sm:$0xf]  ;;  %v15123_v6 = vor.u32 %v16954_v3, %v15120_v51  ;;  %10458 = vmatpush.bf16.msra.mxu3 %v15923_v49 }
 0x739   : > { %v15376_v34 = vld [vmem:[%s18105_s10 + $0x1ef0] sm:$0xf0] }
 0x73a   : > { %v17082_v15 = vld [vmem:[%s18105_s10 + $0x20d4] sm:$0xf]  ;;  %v15379_v9 = vor.u32 %v17018_v57, %v15376_v34  ;;  %10420 = vmatpush.bf16.msra.mxu0 %v15123_v6  ;;  %v10193_v6 = vpop.f32.mrf.mxu2 }
 0x73b   : > { %v15632_v36 = vld [vmem:[%s18105_s10 + $0x20f0] sm:$0xf0]  ;;  %v11574_v6 = vld [vmem:[%s18105_s10 + $0x118] sm:$0xf] }
 0x73c   : > { %v17146_v5 = vld [vmem:[%s18105_s10 + $0x22d4] sm:$0xf]  ;;  %v15635_v12 = vor.u32 %v17082_v15, %v15632_v36  ;;  %10433 = vmatpush.bf16.msra.mxu1 %v15379_v9  ;;  %v11670_v9 = vld [vmem:[%s18105_s10 + $0x1d8] sm:$0xf] }
 0x73d   : > { %v15888_v17 = vld [vmem:[%s18105_s10 + $0x22f0] sm:$0xf0] }
 0x73e   : > { %v16946_v16 = vld [vmem:[%s18105_s10 + $0x1c94] sm:$0xf]  ;;  %v15891_v20 = vor.u32 %v17146_v5, %v15888_v17  ;;  %10446 = vmatpush.bf16.msra.mxu2 %v15635_v12  ;;  %v16095_v12 = vld [vmem:[%s18105_s10 + $0x1f4] sm:$0xf0] }
 0x73f   : > { %v15088_v18 = vld [vmem:[%s18105_s10 + $0x1cb0] sm:$0xf0]  ;;  %v11671_v28 = vor.u32 %v16095_v12, %v11670_v9  ;;  %v16071_v9 = vld [vmem:[%s18105_s10 + $0x134] sm:$0xf0] }
 0x740   : > { %v17010_v21 = vld [vmem:[%s18105_s10 + $0x1e94] sm:$0xf]  ;;  %v15091_v35 = vor.u32 %v16946_v16, %v15088_v18  ;;  %10459 = vmatpush.bf16.msra.mxu3 %v15891_v20  ;;  %v11926_v16 = vld [vmem:[%s18105_s10 + $0x3d8] sm:$0xf]  ;;  %v10206_v18 = vpop.f32.mrf.mxu3 }
 0x741   : > { %v15344_v29 = vld [vmem:[%s18105_s10 + $0x1eb0] sm:$0xf0]  ;;  %v16159_v20 = vld [vmem:[%s18105_s10 + $0x3f4] sm:$0xf0] }
 0x742   : > { %v17074_v19 = vld [vmem:[%s18105_s10 + $0x2094] sm:$0xf]  ;;  %v15347_v38 = vor.u32 %v17010_v21, %v15344_v29  ;;  %10421 = vmatpush.bf16.msra.mxu0 %v15091_v35  ;;  %v10153_v21 = vadd.f32 %v20030_v60, %v10140_v33  ;;  %v12182_v29 = vld [vmem:[%s18105_s10 + $0x5d8] sm:$0xf] }
 0x743   : > { %v15600_v44 = vld [vmem:[%s18105_s10 + $0x20b0] sm:$0xf0]  ;;  %v11830_v12 = vld [vmem:[%s18105_s10 + $0x318] sm:$0xf] }
 0x744   : > { %v17138_v45 = vld [vmem:[%s18105_s10 + $0x2294] sm:$0xf]  ;;  %v15603_v59 = vor.u32 %v17074_v19, %v15600_v44  ;;  %10434 = vmatpush.bf16.msra.mxu1 %v15347_v38  ;;  %v16223_v19 = vld [vmem:[%s18105_s10 + $0x5f4] sm:$0xf0]  ;;  %v10166_v35 = vadd.f32 %v20084_v48, %v10153_v21  ;;  %v11927_v38 = vor.u32 %v16159_v20, %v11926_v16 }
 0x745   : > { %v15856_v31 = vld [vmem:[%s18105_s10 + $0x22b0] sm:$0xf0]  ;;  %v12406_v48 = vld [vmem:[%s18105_s10 + $0x798] sm:$0xf] }
 0x746   : > { %v16938_v25 = vld [vmem:[%s18105_s10 + $0x1c54] sm:$0xf]  ;;  %v15859_v42 = vor.u32 %v17138_v45, %v15856_v31  ;;  %10447 = vmatpush.bf16.msra.mxu2 %v15603_v59  ;;  %v12438_v31 = vld [vmem:[%s18105_s10 + $0x7d8] sm:$0xf]  ;;  %v12183_v59 = vor.u32 %v16223_v19, %v12182_v29  ;;  %v10217_v29 = vpop.f32.mrf.mxu0 }
 0x747   : > { %v15056_v55 = vld [vmem:[%s18105_s10 + $0x1c70] sm:$0xf0]  ;;  %v12439_v41 = vor.u32 %v16287_v32, %v12438_v31  ;;  %v16135_v21 = vld [vmem:[%s18105_s10 + $0x334] sm:$0xf0]  ;;  %v11575_v31 = vor.u32 %v16071_v9, %v11574_v6  ;;  %v2076_v32 = vld [vmem:[#allocation2 + $0x8] sm:$0xff] }
 0x748   : > { %v17002_v23 = vld [vmem:[%s18105_s10 + $0x1e54] sm:$0xf]  ;;  %v15059_v30 = vor.u32 %v16938_v25, %v15056_v55  ;;  %10460 = vmatpush.bf16.msra.mxu3 %v15859_v42  ;;  %v11638_v25 = vld [vmem:[%s18105_s10 + $0x198] sm:$0xf] }
 0x749   : > { %v15312_v46 = vld [vmem:[%s18105_s10 + $0x1e70] sm:$0xf0]  ;;  %v16087_v55 = vld [vmem:[%s18105_s10 + $0x1b4] sm:$0xf0] }
 0x74a   : > { %v17066_v47 = vld [vmem:[%s18105_s10 + $0x2054] sm:$0xf]  ;;  %v15315_v51 = vor.u32 %v17002_v23, %v15312_v46  ;;  %10422 = vmatpush.bf16.msra.mxu0 %v15059_v30  ;;  %v11894_v23 = vld [vmem:[%s18105_s10 + $0x398] sm:$0xf] }
 0x74b   : > { %v15568_v50 = vld [vmem:[%s18105_s10 + $0x2070] sm:$0xf0]  ;;  %v16151_v42 = vld [vmem:[%s18105_s10 + $0x3b4] sm:$0xf0] }
 0x74c   : > { %v17130_v52 = vld [vmem:[%s18105_s10 + $0x2254] sm:$0xf]  ;;  %v15571_v57 = vor.u32 %v17066_v47, %v15568_v50  ;;  %10435 = vmatpush.bf16.msra.mxu1 %v15315_v51  ;;  %v12150_v46 = vld [vmem:[%s18105_s10 + $0x598] sm:$0xf]  ;;  %v11895_v33 = vor.u32 %v16151_v42, %v11894_v23 }
 0x74d   : > { %v15824_v40 = vld [vmem:[%s18105_s10 + $0x2270] sm:$0xf0]  ;;  %v16215_v47 = vld [vmem:[%s18105_s10 + $0x5b4] sm:$0xf0] }
 0x74e   : > { %v16930_v3 = vld [vmem:[%s18105_s10 + $0x1c14] sm:$0xf]  ;;  %v15827_v14 = vor.u32 %v17130_v52, %v15824_v40  ;;  %10448 = vmatpush.bf16.msra.mxu2 %v15571_v57  ;;  %v16279_v50 = vld [vmem:[%s18105_s10 + $0x7b4] sm:$0xf0]  ;;  %v10179_v52 = vadd.f32 %v20088_v26, %v10166_v35  ;;  %v11639_v40 = vor.u32 %v16087_v55, %v11638_v25  ;;  %v12151_v30 = vor.u32 %v16215_v47, %v12150_v46 }
 0x74f   : > { %v15024_v43 = vld [vmem:[%s18105_s10 + $0x1c30] sm:$0xf0]  ;;  %v11862_v51 = vld [vmem:[%s18105_s10 + $0x358] sm:$0xf]  ;;  %v12407_v26 = vor.u32 %v16279_v50, %v12406_v48  ;;  %v11831_v35 = vor.u32 %v16135_v21, %v11830_v12 }
 0x750   : > { %v16994_v49 = vld [vmem:[%s18105_s10 + $0x1e14] sm:$0xf]  ;;  %v15027_v22 = vor.u32 %v16930_v3, %v15024_v43  ;;  %10461 = vmatpush.bf16.msra.mxu3 %v15827_v14  ;;  %v11606_v3 = vld [vmem:[%s18105_s10 + $0x158] sm:$0xf]  ;;  %v10192_v57 = vadd.f32 %v20103_v27, %v10179_v52 }
 0x751   : > { %v15280_v34 = vld [vmem:[%s18105_s10 + $0x1e30] sm:$0xf0]  ;;  %v16079_v43 = vld [vmem:[%s18105_s10 + $0x174] sm:$0xf0] }
 0x752   : > { %v17058_v15 = vld [vmem:[%s18105_s10 + $0x2014] sm:$0xf]  ;;  %v15283_v44 = vor.u32 %v16994_v49, %v15280_v34  ;;  %10423 = vmatpush.bf16.msra.mxu0 %v15027_v22  ;;  %v16143_v49 = vld [vmem:[%s18105_s10 + $0x374] sm:$0xf0]  ;;  %v11607_v27 = vor.u32 %v16079_v43, %v11606_v3  ;;  %v10205_v16 = vadd.f32 %v20108_v24, %v10192_v57  ;;  %v10230_v24 = vpop.f32.mrf.mxu1 }
 0x753   : > { %v15536_v36 = vld [vmem:[%s18105_s10 + $0x2030] sm:$0xf0]  ;;  %v12118_v34 = vld [vmem:[%s18105_s10 + $0x558] sm:$0xf] }
 0x754   : > { %v17122_v5 = vld [vmem:[%s18105_s10 + $0x2214] sm:$0xf]  ;;  %v15539_v45 = vor.u32 %v17058_v15, %v15536_v36  ;;  %10436 = vmatpush.bf16.msra.mxu1 %v15283_v44  ;;  %v16207_v15 = vld [vmem:[%s18105_s10 + $0x574] sm:$0xf0] }
 0x755   : > { %v15792_v17 = vld [vmem:[%s18105_s10 + $0x2230] sm:$0xf0]  ;;  %10424 = vmatmul.bf16.vlgmr.msra.gmra.mxu0 %v18424_v61  ;;  %v12374_v14 = vld [vmem:[%s18105_s10 + $0x758] sm:$0xf] }
 0x756   : > { %v15795_v60 = vor.u32 %v17122_v5, %v15792_v17  ;;  %10449 = vmatpush.bf16.msra.mxu2 %v15539_v45  ;;  %10468 = vmatpush.bf16.msrb.mxu0 %v11671_v28  ;;  %v16271_v36 = vld [vmem:[%s18105_s10 + $0x774] sm:$0xf0]  ;;  %v11863_v5 = vor.u32 %v16143_v49, %v11862_v51  ;;  %v12119_v17 = vor.u32 %v16207_v15, %v12118_v34  ;;  %v10243_v49 = vpop.f32.mrf.mxu2 }
 0x757   : > { %10437 = vmatmul.bf16.vlgmr.msra.gmra.mxu1 %v18430_v4  ;;  %v12375_v18 = vor.u32 %v16271_v36, %v12374_v14  ;;  %v12086_v22 = vld [vmem:[%s18105_s10 + $0x518] sm:$0xf]  ;;  %v10218_v45 = vadd.f32 %v10217_v29, %v10205_v16  ;;  %v10256_v14 = vpop.f32.mrf.mxu3  ;;  %v10219_v36 = vpop.f32.mrf.mxu0 }
 0x758   : > { %10462 = vmatpush.bf16.msra.mxu3 %v15795_v60  ;;  %10481 = vmatpush.bf16.msrb.mxu1 %v11927_v38  ;;  %v16199_v20 = vld [vmem:[%s18105_s10 + $0x534] sm:$0xf0] }
 0x759   : > { %10450 = vmatmul.bf16.vlgmr.msra.gmra.mxu2 %v18496_v1  ;;  %v12342_v19 = vld [vmem:[%s18105_s10 + $0x718] sm:$0xf]  ;;  %v12087_v60 = vor.u32 %v16199_v20, %v12086_v22  ;;  %v10231_v55 = vadd.f32 %v10230_v24, %v10218_v45 }
 0x75a   : > { %10494 = vmatpush.bf16.msrb.mxu2 %v12183_v59  ;;  %10469 = vmatpush.bf16.msrb.mxu0 %v11639_v40  ;;  %v16263_v44 = vld [vmem:[%s18105_s10 + $0x734] sm:$0xf0] }
 0x75b   : > { %10463 = vmatmul.bf16.vlgmr.msra.gmra.mxu3 %v18501_v8  ;;  %v11542_v28 = vld [vmem:[%s18105_s10 + $0xd8] sm:$0xf]  ;;  %v12343_v25 = vor.u32 %v16263_v44, %v12342_v19  ;;  %v10940_v48 = vadd.f32 %v10231_v55, %v2076_v32 }
 0x75c   : > { %10507 = vmatpush.bf16.msrb.mxu3 %v12439_v41  ;;  %10482 = vmatpush.bf16.msrb.mxu1 %v11895_v33  ;;  %v16063_v38 = vld [vmem:[%s18105_s10 + $0xf4] sm:$0xf0] }
 0x75d   : > { %v11798_v59 = vld [vmem:[%s18105_s10 + $0x2d8] sm:$0xf]  ;;  %v11543_v50 = vor.u32 %v16063_v38, %v11542_v28  ;;  %10948 = vst [vmem:[#allocation2 + $0x8] sm:$0xff] %v10940_v48 }
 0x75e   : > { %10495 = vmatpush.bf16.msrb.mxu2 %v12151_v30  ;;  %10470 = vmatpush.bf16.msrb.mxu0 %v11607_v27  ;;  %v16127_v23 = vld [vmem:[%s18105_s10 + $0x2f4] sm:$0xf0] }
 0x75f   : > { %v12054_v41 = vld [vmem:[%s18105_s10 + $0x4d8] sm:$0xf]  ;;  %v11799_v40 = vor.u32 %v16127_v23, %v11798_v59  ;;  %v10258_v48 = vpop.f32.mrf.mxu3 }
 0x760   : > { %10508 = vmatpush.bf16.msrb.mxu3 %v12407_v26  ;;  %10483 = vmatpush.bf16.msrb.mxu1 %v11863_v5  ;;  %v16191_v42 = vld [vmem:[%s18105_s10 + $0x4f4] sm:$0xf0]  ;;  %v20187_v5 = vadd.f32 %v10256_v14, %v10243_v49 }
 0x761   : > { %v12310_v46 = vld [vmem:[%s18105_s10 + $0x6d8] sm:$0xf]  ;;  %v12055_v33 = vor.u32 %v16191_v42, %v12054_v41  ;;  %v10245_v41 = vpop.f32.mrf.mxu2 }
 0x762   : > { %10496 = vmatpush.bf16.msrb.mxu2 %v12119_v17  ;;  %v16255_v47 = vld [vmem:[%s18105_s10 + $0x6f4] sm:$0xf0]  ;;  %10471 = vmatpush.bf16.msrb.mxu0 %v11575_v31  ;;  %v10232_v17 = vpop.f32.mrf.mxu1 }
 0x763   : > { %v11510_v52 = vld [vmem:[%s18105_s10 + $0x98] sm:$0xf]  ;;  %v12311_v51 = vor.u32 %v16255_v47, %v12310_v46 }
 0x764   : > { %10509 = vmatpush.bf16.msrb.mxu3 %v12375_v18  ;;  %10484 = vmatpush.bf16.msrb.mxu1 %v11831_v35  ;;  %v16055_v30 = vld [vmem:[%s18105_s10 + $0xb4] sm:$0xf0] }
 0x765   : > { %v11766_v3 = vld [vmem:[%s18105_s10 + $0x298] sm:$0xf]  ;;  %v11511_v27 = vor.u32 %v16055_v30, %v11510_v52 }
 0x766   : > { %10497 = vmatpush.bf16.msrb.mxu2 %v12087_v60  ;;  %v16119_v43 = vld [vmem:[%s18105_s10 + $0x2b4] sm:$0xf0]  ;;  %10472 = vmatpush.bf16.msrb.mxu0 %v11543_v50 }
 0x767   : > { %v12022_v57 = vld [vmem:[%s18105_s10 + $0x498] sm:$0xf]  ;;  %v11767_v6 = vor.u32 %v16119_v43, %v11766_v3 }
 0x768   : > { %10510 = vmatpush.bf16.msrb.mxu3 %v12343_v25  ;;  %v16183_v26 = vld [vmem:[%s18105_s10 + $0x4b4] sm:$0xf0]  ;;  %10485 = vmatpush.bf16.msrb.mxu1 %v11799_v40 }
 0x769   : > { %v12278_v34 = vld [vmem:[%s18105_s10 + $0x698] sm:$0xf]  ;;  %v12023_v9 = vor.u32 %v16183_v26, %v12022_v57 }
 0x76a   : > { %v16247_v15 = vld [vmem:[%s18105_s10 + $0x6b4] sm:$0xf0]  ;;  %10498 = vmatpush.bf16.msrb.mxu2 %v12055_v33  ;;  %10473 = vmatpush.bf16.msrb.mxu0 %v11511_v27 }
 0x76b   : > { %v11478_v12 = vld [vmem:[%s18105_s10 + $0x58] sm:$0xf]  ;;  %v12279_v21 = vor.u32 %v16247_v15, %v12278_v34 }
 0x76c   : > { %v16047_v16 = vld [vmem:[%s18105_s10 + $0x74] sm:$0xf0]  ;;  %10511 = vmatpush.bf16.msrb.mxu3 %v12311_v51  ;;  %10486 = vmatpush.bf16.msrb.mxu1 %v11767_v6 }
 0x76d   : > { %v11734_v18 = vld [vmem:[%s18105_s10 + $0x258] sm:$0xf]  ;;  %v11479_v45 = vor.u32 %v16047_v16, %v11478_v12 }
 0x76e   : > { %v16111_v22 = vld [vmem:[%s18105_s10 + $0x274] sm:$0xf0]  ;;  %10499 = vmatpush.bf16.msrb.mxu2 %v12023_v9 }
 0x76f   : > { %v11990_v20 = vld [vmem:[%s18105_s10 + $0x458] sm:$0xf]  ;;  %v11735_v24 = vor.u32 %v16111_v22, %v11734_v18  ;;  %10474 = vmatpush.bf16.msrb.mxu0 %v11479_v45 }
 0x770   : > { %v16175_v29 = vld [vmem:[%s18105_s10 + $0x474] sm:$0xf0]  ;;  %10512 = vmatpush.bf16.msrb.mxu3 %v12279_v21 }
 0x771   : > { %v12246_v19 = vld [vmem:[%s18105_s10 + $0x658] sm:$0xf]  ;;  %v11991_v35 = vor.u32 %v16175_v29, %v11990_v20  ;;  %10487 = vmatpush.bf16.msrb.mxu1 %v11735_v24 }
 0x772   : > { %v16239_v44 = vld [vmem:[%s18105_s10 + $0x674] sm:$0xf0] }
 0x773   : > { %v11446_v31 = vld [vmem:[%s18105_s10 + $0x18] sm:$0xf]  ;;  %v12247_v59 = vor.u32 %v16239_v44, %v12246_v19  ;;  %10500 = vmatpush.bf16.msrb.mxu2 %v11991_v35 }
 0x774   : > { %v16039_v32 = vld [vmem:[%s18105_s10 + $0x34] sm:$0xf0] }
 0x775   : > { %v11702_v60 = vld [vmem:[%s18105_s10 + $0x218] sm:$0xf]  ;;  %v11447_v50 = vor.u32 %v16039_v32, %v11446_v31  ;;  %10513 = vmatpush.bf16.msrb.mxu3 %v12247_v59 }
 0x776   : > { %v16103_v28 = vld [vmem:[%s18105_s10 + $0x234] sm:$0xf0] }
 0x777   : > { %v11958_v38 = vld [vmem:[%s18105_s10 + $0x418] sm:$0xf]  ;;  %v11703_v30 = vor.u32 %v16103_v28, %v11702_v60  ;;  %10475 = vmatpush.bf16.msrb.mxu0 %v11447_v50 }
 0x778   : > { %v16167_v25 = vld [vmem:[%s18105_s10 + $0x434] sm:$0xf0] }
 0x779   : > { %v12214_v55 = vld [vmem:[%s18105_s10 + $0x618] sm:$0xf]  ;;  %v11959_v3 = vor.u32 %v16167_v25, %v11958_v38  ;;  %10488 = vmatpush.bf16.msrb.mxu1 %v11703_v30 }
 0x77a   : > { %v16231_v23 = vld [vmem:[%s18105_s10 + $0x634] sm:$0xf0]  ;;  %10476 = vmatmul.bf16.vlgmr.msrb.gmra.mxu0 %v18211_v53 }
 0x77b   : > { %v12694_v42 = vld [vmem:[%s18105_s10 + $0x9d8] sm:$0xf]  ;;  %v12215_v57 = vor.u32 %v16231_v23, %v12214_v55  ;;  %10501 = vmatpush.bf16.msrb.mxu2 %v11959_v3 }
 0x77c   : > { %v16351_v46 = vld [vmem:[%s18105_s10 + $0x9f4] sm:$0xf0]  ;;  %10489 = vmatmul.bf16.vlgmr.msrb.gmra.mxu1 %v18214_v54 }
 0x77d   : > { %v12950_v47 = vld [vmem:[%s18105_s10 + $0xbd8] sm:$0xf]  ;;  %v12695_v26 = vor.u32 %v16351_v46, %v12694_v42  ;;  %10514 = vmatpush.bf16.msrb.mxu3 %v12215_v57  ;;  %v10282_v57 = vpop.f32.mrf.mxu1 }
 0x77e   : > { %v16415_v52 = vld [vmem:[%s18105_s10 + $0xbf4] sm:$0xf0]  ;;  %10502 = vmatmul.bf16.vlgmr.msrb.gmra.mxu2 %v18197_v37 }
 0x77f   : > { %v13206_v40 = vld [vmem:[%s18105_s10 + $0xdd8] sm:$0xf]  ;;  %v12951_v49 = vor.u32 %v16415_v52, %v12950_v47  ;;  %10520 = vmatpush.bf16.msra.mxu0 %v12695_v26  ;;  %v10269_v52 = vpop.f32.mrf.mxu0 }
 0x780   : > { %v16479_v33 = vld [vmem:[%s18105_s10 + $0xdf4] sm:$0xf0]  ;;  %10515 = vmatmul.bf16.vlgmr.msrb.gmra.mxu3 %v18200_v39 }
 0x781   : > { %v13462_v43 = vld [vmem:[%s18105_s10 + $0xfd8] sm:$0xf]  ;;  %v13207_v34 = vor.u32 %v16479_v33, %v13206_v40  ;;  %10533 = vmatpush.bf16.msra.mxu1 %v12951_v49 }
 0x782   : > { %v16543_v51 = vld [vmem:[%s18105_s10 + $0xff4] sm:$0xf0] }
 0x783   : > { %v12662_v15 = vld [vmem:[%s18105_s10 + $0x998] sm:$0xf]  ;;  %v13463_v27 = vor.u32 %v16543_v51, %v13462_v43  ;;  %10546 = vmatpush.bf16.msra.mxu2 %v13207_v34  ;;  %v10270_v51 = vadd.f32 %v10269_v52, %v20187_v5 }
 0x784   : > { %v16343_v14 = vld [vmem:[%s18105_s10 + $0x9b4] sm:$0xf0] }
 0x785   : > { %v12918_v36 = vld [vmem:[%s18105_s10 + $0xb98] sm:$0xf]  ;;  %v12663_v18 = vor.u32 %v16343_v14, %v12662_v15  ;;  %10559 = vmatpush.bf16.msra.mxu3 %v13463_v27  ;;  %v10283_v27 = vadd.f32 %v10282_v57, %v10270_v51 }
 0x786   : > { %v16407_v17 = vld [vmem:[%s18105_s10 + $0xbb4] sm:$0xf0] }
 0x787   : > { %v13174_v6 = vld [vmem:[%s18105_s10 + $0xd98] sm:$0xf]  ;;  %v12919_v21 = vor.u32 %v16407_v17, %v12918_v36  ;;  %10521 = vmatpush.bf16.msra.mxu0 %v12663_v18  ;;  %v10295_v18 = vpop.f32.mrf.mxu2 }
 0x788   : > { %v16471_v9 = vld [vmem:[%s18105_s10 + $0xdb4] sm:$0xf0] }
 0x789   : > { %v13430_v12 = vld [vmem:[%s18105_s10 + $0xf98] sm:$0xf]  ;;  %v13175_v22 = vor.u32 %v16471_v9, %v13174_v6  ;;  %10534 = vmatpush.bf16.msra.mxu1 %v12919_v21 }
 0x78a   : > { %v16535_v16 = vld [vmem:[%s18105_s10 + $0xfb4] sm:$0xf0] }
 0x78b   : > { %v12630_v20 = vld [vmem:[%s18105_s10 + $0x958] sm:$0xf]  ;;  %v13431_v44 = vor.u32 %v16535_v16, %v13430_v12  ;;  %10547 = vmatpush.bf16.msra.mxu2 %v13175_v22 }
 0x78c   : > { %v16335_v29 = vld [vmem:[%s18105_s10 + $0x974] sm:$0xf0] }
 0x78d   : > { %v12886_v19 = vld [vmem:[%s18105_s10 + $0xb58] sm:$0xf]  ;;  %v12631_v60 = vor.u32 %v16335_v29, %v12630_v20  ;;  %10560 = vmatpush.bf16.msra.mxu3 %v13431_v44  ;;  %v10308_v44 = vpop.f32.mrf.mxu3 }
 0x78e   : > { %v16399_v45 = vld [vmem:[%s18105_s10 + $0xb74] sm:$0xf0] }
 0x78f   : > { %v13142_v31 = vld [vmem:[%s18105_s10 + $0xd58] sm:$0xf]  ;;  %v12887_v28 = vor.u32 %v16399_v45, %v12886_v19  ;;  %10522 = vmatpush.bf16.msra.mxu0 %v12631_v60  ;;  %v10296_v19 = vadd.f32 %v10295_v18, %v10283_v27  ;;  %v10297_v57 = vpop.f32.mrf.mxu2 }
 0x790   : > { %v16463_v32 = vld [vmem:[%s18105_s10 + $0xd74] sm:$0xf0] }
 0x791   : > { %v13398_v24 = vld [vmem:[%s18105_s10 + $0xf58] sm:$0xf]  ;;  %v13143_v38 = vor.u32 %v16463_v32, %v13142_v31  ;;  %10535 = vmatpush.bf16.msra.mxu1 %v12887_v28 }
 0x792   : > { %v16527_v35 = vld [vmem:[%s18105_s10 + $0xf74] sm:$0xf0] }
 0x793   : > { %v12598_v59 = vld [vmem:[%s18105_s10 + $0x918] sm:$0xf]  ;;  %v13399_v23 = vor.u32 %v16527_v35, %v13398_v24  ;;  %10548 = vmatpush.bf16.msra.mxu2 %v13143_v38  ;;  %v20258_v24 = vadd.f32 %v10308_v44, %v10296_v19  ;;  %v10271_v35 = vpop.f32.mrf.mxu0 }
 0x794   : > { %v16327_v25 = vld [vmem:[%s18105_s10 + $0x934] sm:$0xf0] }
 0x795   : > { %v12854_v55 = vld [vmem:[%s18105_s10 + $0xb18] sm:$0xf]  ;;  %v12599_v50 = vor.u32 %v16327_v25, %v12598_v59  ;;  %10561 = vmatpush.bf16.msra.mxu3 %v13399_v23 }
 0x796   : > { %v16391_v41 = vld [vmem:[%s18105_s10 + $0xb34] sm:$0xf0] }
 0x797   : > { %v13110_v42 = vld [vmem:[%s18105_s10 + $0xd18] sm:$0xf]  ;;  %v12855_v40 = vor.u32 %v16391_v41, %v12854_v55  ;;  %10523 = vmatpush.bf16.msra.mxu0 %v12599_v50  ;;  %v10284_v55 = vpop.f32.mrf.mxu1 }
 0x798   : > { %v16455_v46 = vld [vmem:[%s18105_s10 + $0xd34] sm:$0xf0] }
 0x799   : > { %v13366_v47 = vld [vmem:[%s18105_s10 + $0xf18] sm:$0xf]  ;;  %v13111_v33 = vor.u32 %v16455_v46, %v13110_v42  ;;  %10536 = vmatpush.bf16.msra.mxu1 %v12855_v40 }
 0x79a   : > { %v16519_v48 = vld [vmem:[%s18105_s10 + $0xf34] sm:$0xf0] }
 0x79b   : > { %v12566_v30 = vld [vmem:[%s18105_s10 + $0x8d8] sm:$0xf]  ;;  %v13367_v26 = vor.u32 %v16519_v48, %v13366_v47  ;;  %10549 = vmatpush.bf16.msra.mxu2 %v13111_v33 }
 0x79c   : > { %v16319_v3 = vld [vmem:[%s18105_s10 + $0x8f4] sm:$0xf0] }
 0x79d   : > { %v12822_v43 = vld [vmem:[%s18105_s10 + $0xad8] sm:$0xf]  ;;  %v12567_v17 = vor.u32 %v16319_v3, %v12566_v30  ;;  %10562 = vmatpush.bf16.msra.mxu3 %v13367_v26 }
 0x79e   : > { %v16383_v49 = vld [vmem:[%s18105_s10 + $0xaf4] sm:$0xf0] }
 0x79f   : > { %v13078_v34 = vld [vmem:[%s18105_s10 + $0xcd8] sm:$0xf]  ;;  %v12823_v5 = vor.u32 %v16383_v49, %v12822_v43  ;;  %10524 = vmatpush.bf16.msra.mxu0 %v12567_v17 }
 0x7a0   : > { %v16447_v15 = vld [vmem:[%s18105_s10 + $0xcf4] sm:$0xf0] }
 0x7a1   : > { %v13334_v14 = vld [vmem:[%s18105_s10 + $0xed8] sm:$0xf]  ;;  %v13079_v6 = vor.u32 %v16447_v15, %v13078_v34  ;;  %10537 = vmatpush.bf16.msra.mxu1 %v12823_v5 }
 0x7a2   : > { %v16511_v36 = vld [vmem:[%s18105_s10 + $0xef4] sm:$0xf0] }
 0x7a3   : > { %v12534_v9 = vld [vmem:[%s18105_s10 + $0x898] sm:$0xf]  ;;  %v13335_v21 = vor.u32 %v16511_v36, %v13334_v14  ;;  %10550 = vmatpush.bf16.msra.mxu2 %v13079_v6  ;;  %v10310_v14 = vpop.f32.mrf.mxu3 }
 0x7a4   : > { %v16311_v12 = vld [vmem:[%s18105_s10 + $0x8b4] sm:$0xf0] }
 0x7a5   : > { %v12790_v16 = vld [vmem:[%s18105_s10 + $0xa98] sm:$0xf]  ;;  %v12535_v32 = vor.u32 %v16311_v12, %v12534_v9  ;;  %10563 = vmatpush.bf16.msra.mxu3 %v13335_v21 }
 0x7a6   : > { %v16375_v22 = vld [vmem:[%s18105_s10 + $0xab4] sm:$0xf0] }
 0x7a7   : > { %v13046_v20 = vld [vmem:[%s18105_s10 + $0xc98] sm:$0xf]  ;;  %v12791_v60 = vor.u32 %v16375_v22, %v12790_v16  ;;  %10525 = vmatpush.bf16.msra.mxu0 %v12535_v32 }
 0x7a8   : > { %v16439_v29 = vld [vmem:[%s18105_s10 + $0xcb4] sm:$0xf0] }
 0x7a9   : > { %v13302_v45 = vld [vmem:[%s18105_s10 + $0xe98] sm:$0xf]  ;;  %v13047_v28 = vor.u32 %v16439_v29, %v13046_v20  ;;  %10538 = vmatpush.bf16.msra.mxu1 %v12791_v60 }
 0x7aa   : > { %v16503_v31 = vld [vmem:[%s18105_s10 + $0xeb4] sm:$0xf0] }
 0x7ab   : > { %v12502_v38 = vld [vmem:[%s18105_s10 + $0x858] sm:$0xf]  ;;  %v13303_v23 = vor.u32 %v16503_v31, %v13302_v45  ;;  %10551 = vmatpush.bf16.msra.mxu2 %v13047_v28 }
 0x7ac   : > { %v16303_v59 = vld [vmem:[%s18105_s10 + $0x874] sm:$0xf0] }
 0x7ad   : > { %v12758_v25 = vld [vmem:[%s18105_s10 + $0xa58] sm:$0xf]  ;;  %v12503_v50 = vor.u32 %v16303_v59, %v12502_v38  ;;  %10564 = vmatpush.bf16.msra.mxu3 %v13303_v23 }
 0x7ae   : > { %v16367_v41 = vld [vmem:[%s18105_s10 + $0xa74] sm:$0xf0] }
 0x7af   : > { %v13014_v42 = vld [vmem:[%s18105_s10 + $0xc58] sm:$0xf]  ;;  %v12759_v33 = vor.u32 %v16367_v41, %v12758_v25  ;;  %10526 = vmatpush.bf16.msra.mxu0 %v12503_v50 }
 0x7b0   : > { %v16431_v46 = vld [vmem:[%s18105_s10 + $0xc74] sm:$0xf0] }
 0x7b1   : > { %v13270_v47 = vld [vmem:[%s18105_s10 + $0xe58] sm:$0xf]  ;;  %v13015_v30 = vor.u32 %v16431_v46, %v13014_v42  ;;  %10539 = vmatpush.bf16.msra.mxu1 %v12759_v33 }
 0x7b2   : > { %v16495_v48 = vld [vmem:[%s18105_s10 + $0xe74] sm:$0xf0] }
 0x7b3   : > { %v12470_v52 = vld [vmem:[%s18105_s10 + $0x818] sm:$0xf]  ;;  %v13271_v26 = vor.u32 %v16495_v48, %v13270_v47  ;;  %10552 = vmatpush.bf16.msra.mxu2 %v13015_v30 }
 0x7b4   : > { %v16295_v40 = vld [vmem:[%s18105_s10 + $0x834] sm:$0xf0] }
 0x7b5   : > { %v12726_v3 = vld [vmem:[%s18105_s10 + $0xa18] sm:$0xf]  ;;  %v12471_v5 = vor.u32 %v16295_v40, %v12470_v52  ;;  %10565 = vmatpush.bf16.msra.mxu3 %v13271_v26 }
 0x7b6   : > { %v16359_v43 = vld [vmem:[%s18105_s10 + $0xa34] sm:$0xf0] }
 0x7b7   : > { %v12982_v51 = vld [vmem:[%s18105_s10 + $0xc18] sm:$0xf]  ;;  %v12727_v16 = vor.u32 %v16359_v43, %v12726_v3  ;;  %10527 = vmatpush.bf16.msra.mxu0 %v12471_v5 }
 0x7b8   : > { %v16423_v49 = vld [vmem:[%s18105_s10 + $0xc34] sm:$0xf0] }
 0x7b9   : > { %v13238_v34 = vld [vmem:[%s18105_s10 + $0xe18] sm:$0xf]  ;;  %v12983_v18 = vor.u32 %v16423_v49, %v12982_v51  ;;  %10540 = vmatpush.bf16.msra.mxu1 %v12727_v16 }
 0x7ba   : > { %v16487_v15 = vld [vmem:[%s18105_s10 + $0xe34] sm:$0xf0]  ;;  %10528 = vmatmul.bf16.vlgmr.msra.gmra.mxu0 %v18270_v10 }
 0x7bb   : > { %v13718_v36 = vld [vmem:[%s18105_s10 + $0x11d8] sm:$0xf]  ;;  %v13239_v20 = vor.u32 %v16487_v15, %v13238_v34  ;;  %10553 = vmatpush.bf16.msra.mxu2 %v12983_v18 }
 0x7bc   : > { %v16607_v27 = vld [vmem:[%s18105_s10 + $0x11f4] sm:$0xf0]  ;;  %10541 = vmatmul.bf16.vlgmr.msra.gmra.mxu1 %v18274_v13 }
 0x7bd   : > { %v13974_v17 = vld [vmem:[%s18105_s10 + $0x13d8] sm:$0xf]  ;;  %v13719_v29 = vor.u32 %v16607_v27, %v13718_v36  ;;  %10566 = vmatpush.bf16.msra.mxu3 %v13239_v20  ;;  %v20310_v27 = vpop.f32.mrf.mxu0 }
 0x7be   : > { %v16671_v6 = vld [vmem:[%s18105_s10 + $0x13f4] sm:$0xf0]  ;;  %10554 = vmatmul.bf16.vlgmr.msra.gmra.mxu2 %v18266_v7 }
 0x7bf   : > { %v14230_v9 = vld [vmem:[%s18105_s10 + $0x15d8] sm:$0xf]  ;;  %v13975_v19 = vor.u32 %v16671_v6, %v13974_v17  ;;  %10572 = vmatpush.bf16.msrb.mxu0 %v13719_v29 }
 0x7c0   : > { %v16735_v12 = vld [vmem:[%s18105_s10 + $0x15f4] sm:$0xf0]  ;;  %10567 = vmatmul.bf16.vlgmr.msra.gmra.mxu3 %v18272_v11 }
 0x7c1   : > { %v14486_v21 = vld [vmem:[%s18105_s10 + $0x17d8] sm:$0xf]  ;;  %v14231_v44 = vor.u32 %v16735_v12, %v14230_v9  ;;  %10585 = vmatpush.bf16.msrb.mxu1 %v13975_v19  ;;  %v20314_v9 = vpop.f32.mrf.mxu1 }
 0x7c2   : > { %v16799_v22 = vld [vmem:[%s18105_s10 + $0x17f4] sm:$0xf0] }
 0x7c3   : > { %v13686_v45 = vld [vmem:[%s18105_s10 + $0x1198] sm:$0xf]  ;;  %v14487_v35 = vor.u32 %v16799_v22, %v14486_v21  ;;  %10598 = vmatpush.bf16.msrb.mxu2 %v14231_v44 }
 0x7c4   : > { %v16599_v31 = vld [vmem:[%s18105_s10 + $0x11b4] sm:$0xf0] }
 0x7c5   : > { %v13942_v32 = vld [vmem:[%s18105_s10 + $0x1398] sm:$0xf]  ;;  %v13687_v55 = vor.u32 %v16599_v31, %v13686_v45  ;;  %10611 = vmatpush.bf16.msrb.mxu3 %v14487_v35 }
 0x7c6   : > { %v16663_v60 = vld [vmem:[%s18105_s10 + $0x13b4] sm:$0xf0] }
 0x7c7   : > { %v14198_v28 = vld [vmem:[%s18105_s10 + $0x1598] sm:$0xf]  ;;  %v13943_v23 = vor.u32 %v16663_v60, %v13942_v32  ;;  %10573 = vmatpush.bf16.msrb.mxu0 %v13687_v55  ;;  %v20327_v55 = vpop.f32.mrf.mxu2 }
 0x7c8   : > { %v16727_v38 = vld [vmem:[%s18105_s10 + $0x15b4] sm:$0xf0] }
 0x7c9   : > { %v14454_v59 = vld [vmem:[%s18105_s10 + $0x1798] sm:$0xf]  ;;  %v14199_v41 = vor.u32 %v16727_v38, %v14198_v28  ;;  %10586 = vmatpush.bf16.msrb.mxu1 %v13943_v23 }
 0x7ca   : > { %v16791_v25 = vld [vmem:[%s18105_s10 + $0x17b4] sm:$0xf0] }
 0x7cb   : > { %v13654_v42 = vld [vmem:[%s18105_s10 + $0x1158] sm:$0xf]  ;;  %v14455_v48 = vor.u32 %v16791_v25, %v14454_v59  ;;  %10599 = vmatpush.bf16.msrb.mxu2 %v14199_v41 }
 0x7cc   : > { %v16591_v46 = vld [vmem:[%s18105_s10 + $0x1174] sm:$0xf0] }
 0x7cd   : > { %v13910_v47 = vld [vmem:[%s18105_s10 + $0x1358] sm:$0xf]  ;;  %v13655_v3 = vor.u32 %v16591_v46, %v13654_v42  ;;  %10612 = vmatpush.bf16.msrb.mxu3 %v14455_v48  ;;  %v20332_v46 = vpop.f32.mrf.mxu3 }
 0x7ce   : > { %v16655_v50 = vld [vmem:[%s18105_s10 + $0x1374] sm:$0xf0] }
 0x7cf   : > { %v14166_v52 = vld [vmem:[%s18105_s10 + $0x1558] sm:$0xf]  ;;  %v13911_v43 = vor.u32 %v16655_v50, %v13910_v47  ;;  %10574 = vmatpush.bf16.msrb.mxu0 %v13655_v3  ;;  %v10323_v50 = vpop.f32.mrf.mxu0 }
 0x7d0   : > { %v16719_v40 = vld [vmem:[%s18105_s10 + $0x1574] sm:$0xf0] }
 0x7d1   : > { %v14422_v33 = vld [vmem:[%s18105_s10 + $0x1758] sm:$0xf]  ;;  %v14167_v51 = vor.u32 %v16719_v40, %v14166_v52  ;;  %10587 = vmatpush.bf16.msrb.mxu1 %v13911_v43  ;;  %v10336_v40 = vpop.f32.mrf.mxu1 }
 0x7d2   : > { %v16783_v30 = vld [vmem:[%s18105_s10 + $0x1774] sm:$0xf0] }
 0x7d3   : > { %v13622_v57 = vld [vmem:[%s18105_s10 + $0x1118] sm:$0xf]  ;;  %v14423_v34 = vor.u32 %v16783_v30, %v14422_v33  ;;  %10600 = vmatpush.bf16.msrb.mxu2 %v14167_v51 }
 0x7d4   : > { %v16583_v26 = vld [vmem:[%s18105_s10 + $0x1134] sm:$0xf0] }
 0x7d5   : > { %v13878_v49 = vld [vmem:[%s18105_s10 + $0x1318] sm:$0xf]  ;;  %v13623_v6 = vor.u32 %v16583_v26, %v13622_v57  ;;  %10613 = vmatpush.bf16.msrb.mxu3 %v14423_v34 }
 0x7d6   : > { %v16647_v15 = vld [vmem:[%s18105_s10 + $0x1334] sm:$0xf0] }
 0x7d7   : > { %v14134_v14 = vld [vmem:[%s18105_s10 + $0x1518] sm:$0xf]  ;;  %v13879_v12 = vor.u32 %v16647_v15, %v13878_v49  ;;  %10575 = vmatpush.bf16.msrb.mxu0 %v13623_v6 }
 0x7d8   : > { %v16711_v36 = vld [vmem:[%s18105_s10 + $0x1534] sm:$0xf0] }
 0x7d9   : > { %v14390_v17 = vld [vmem:[%s18105_s10 + $0x1718] sm:$0xf]  ;;  %v14135_v16 = vor.u32 %v16711_v36, %v14134_v14  ;;  %10588 = vmatpush.bf16.msrb.mxu1 %v13879_v12 }
 0x7da   : > { %v16775_v5 = vld [vmem:[%s18105_s10 + $0x1734] sm:$0xf0] }
 0x7db   : > { %v13590_v18 = vld [vmem:[%s18105_s10 + $0x10d8] sm:$0xf]  ;;  %v14391_v20 = vor.u32 %v16775_v5, %v14390_v17  ;;  %10601 = vmatpush.bf16.msrb.mxu2 %v14135_v16 }
 0x7dc   : > { %v16575_v21 = vld [vmem:[%s18105_s10 + $0x10f4] sm:$0xf0] }
 0x7dd   : > { %v13846_v22 = vld [vmem:[%s18105_s10 + $0x12d8] sm:$0xf]  ;;  %v13591_v32 = vor.u32 %v16575_v21, %v13590_v18  ;;  %10614 = vmatpush.bf16.msrb.mxu3 %v14391_v20 }
 0x7de   : > { %v16639_v29 = vld [vmem:[%s18105_s10 + $0x12f4] sm:$0xf0] }
 0x7df   : > { %v14102_v19 = vld [vmem:[%s18105_s10 + $0x14d8] sm:$0xf]  ;;  %v13847_v35 = vor.u32 %v16639_v29, %v13846_v22  ;;  %10576 = vmatpush.bf16.msrb.mxu0 %v13591_v32 }
 0x7e0   : > { %v16703_v44 = vld [vmem:[%s18105_s10 + $0x14f4] sm:$0xf0] }
 0x7e1   : > { %v14358_v45 = vld [vmem:[%s18105_s10 + $0x16d8] sm:$0xf]  ;;  %v14103_v60 = vor.u32 %v16703_v44, %v14102_v19  ;;  %10589 = vmatpush.bf16.msrb.mxu1 %v13847_v35  ;;  %v10349_v44 = vpop.f32.mrf.mxu2  ;;  %v10362_v35 = vpop.f32.mrf.mxu3 }
 0x7e2   : > { %v16767_v31 = vld [vmem:[%s18105_s10 + $0x16f4] sm:$0xf0] }
 0x7e3   : > { %v13558_v28 = vld [vmem:[%s18105_s10 + $0x1098] sm:$0xf]  ;;  %v14359_v25 = vor.u32 %v16767_v31, %v14358_v45  ;;  %10602 = vmatpush.bf16.msrb.mxu2 %v14103_v60 }
 0x7e4   : > { %v16567_v38 = vld [vmem:[%s18105_s10 + $0x10b4] sm:$0xf0] }
 0x7e5   : > { %v13814_v59 = vld [vmem:[%s18105_s10 + $0x1298] sm:$0xf]  ;;  %v13559_v52 = vor.u32 %v16567_v38, %v13558_v28  ;;  %10615 = vmatpush.bf16.msrb.mxu3 %v14359_v25 }
 0x7e6   : > { %v16631_v23 = vld [vmem:[%s18105_s10 + $0x12b4] sm:$0xf0] }
 0x7e7   : > { %v14070_v41 = vld [vmem:[%s18105_s10 + $0x1498] sm:$0xf]  ;;  %v13815_v33 = vor.u32 %v16631_v23, %v13814_v59  ;;  %10577 = vmatpush.bf16.msrb.mxu0 %v13559_v52 }
 0x7e8   : > { %v16695_v42 = vld [vmem:[%s18105_s10 + $0x14b4] sm:$0xf0] }
 0x7e9   : > { %v14326_v47 = vld [vmem:[%s18105_s10 + $0x1698] sm:$0xf]  ;;  %v14071_v30 = vor.u32 %v16695_v42, %v14070_v41  ;;  %10590 = vmatpush.bf16.msrb.mxu1 %v13815_v33 }
 0x7ea   : > { %v16759_v48 = vld [vmem:[%s18105_s10 + $0x16b4] sm:$0xf0] }
 0x7eb   : > { %v13526_v3 = vld [vmem:[%s18105_s10 + $0x1058] sm:$0xf]  ;;  %v14327_v57 = vor.u32 %v16759_v48, %v14326_v47  ;;  %10603 = vmatpush.bf16.msrb.mxu2 %v14071_v30 }
 0x7ec   : > { %v16559_v43 = vld [vmem:[%s18105_s10 + $0x1074] sm:$0xf0] }
 0x7ed   : > { %v13782_v51 = vld [vmem:[%s18105_s10 + $0x1258] sm:$0xf]  ;;  %v13527_v36 = vor.u32 %v16559_v43, %v13526_v3  ;;  %10616 = vmatpush.bf16.msrb.mxu3 %v14327_v57 }
 0x7ee   : > { %v16623_v26 = vld [vmem:[%s18105_s10 + $0x1274] sm:$0xf0] }
 0x7ef   : > { %v14038_v49 = vld [vmem:[%s18105_s10 + $0x1458] sm:$0xf]  ;;  %v13783_v6 = vor.u32 %v16623_v26, %v13782_v51  ;;  %10578 = vmatpush.bf16.msrb.mxu0 %v13527_v36 }
 0x7f0   : > { %v16687_v34 = vld [vmem:[%s18105_s10 + $0x1474] sm:$0xf0] }
 0x7f1   : > { %v14294_v15 = vld [vmem:[%s18105_s10 + $0x1658] sm:$0xf]  ;;  %v14039_v12 = vor.u32 %v16687_v34, %v14038_v49  ;;  %10591 = vmatpush.bf16.msrb.mxu1 %v13783_v6 }
 0x7f2   : > { %v16751_v14 = vld [vmem:[%s18105_s10 + $0x1674] sm:$0xf0] }
 0x7f3   : > { %v13494_v17 = vld [vmem:[%s18105_s10 + $0x1018] sm:$0xf]  ;;  %v14295_v22 = vor.u32 %v16751_v14, %v14294_v15  ;;  %10604 = vmatpush.bf16.msrb.mxu2 %v14039_v12 }
 0x7f4   : > { %v16551_v5 = vld [vmem:[%s18105_s10 + $0x1034] sm:$0xf0] }
 0x7f5   : > { %v13750_v16 = vld [vmem:[%s18105_s10 + $0x1218] sm:$0xf]  ;;  %v13495_v60 = vor.u32 %v16551_v5, %v13494_v17  ;;  %10617 = vmatpush.bf16.msrb.mxu3 %v14295_v22 }
 0x7f6   : > { %v16615_v18 = vld [vmem:[%s18105_s10 + $0x1234] sm:$0xf0] }
 0x7f7   : > { %v14006_v21 = vld [vmem:[%s18105_s10 + $0x1418] sm:$0xf]  ;;  %v13751_v25 = vor.u32 %v16615_v18, %v13750_v16  ;;  %10579 = vmatpush.bf16.msrb.mxu0 %v13495_v60 }
 0x7f8   : > { %v16679_v20 = vld [vmem:[%s18105_s10 + $0x1434] sm:$0xf0] }
 0x7f9   : > { %v14262_v29 = vld [vmem:[%s18105_s10 + $0x1618] sm:$0xf]  ;;  %v14007_v23 = vor.u32 %v16679_v20, %v14006_v21  ;;  %10592 = vmatpush.bf16.msrb.mxu1 %v13751_v25 }
 0x7fa   : > { %v16743_v19 = vld [vmem:[%s18105_s10 + $0x1634] sm:$0xf0]  ;;  %10580 = vmatmul.bf16.vlgmr.msrb.gmra.mxu0 %v18341_v58 }
 0x7fb   : > { %v14742_v45 = vld [vmem:[%s18105_s10 + $0x19d8] sm:$0xf]  ;;  %v14263_v47 = vor.u32 %v16743_v19, %v14262_v29  ;;  %10605 = vmatpush.bf16.msrb.mxu2 %v14007_v23 }
 0x7fc   : > { %v16863_v31 = vld [vmem:[%s18105_s10 + $0x19f4] sm:$0xf0]  ;;  %10593 = vmatmul.bf16.vlgmr.msrb.gmra.mxu1 %v18348_v63 }
 0x7fd   : > { %v14998_v32 = vld [vmem:[%s18105_s10 + $0x1bd8] sm:$0xf]  ;;  %v14743_v48 = vor.u32 %v16863_v31, %v14742_v45  ;;  %10618 = vmatpush.bf16.msrb.mxu3 %v14263_v47 }
 0x7fe   : > { %v16927_v28 = vld [vmem:[%s18105_s10 + $0x1bf4] sm:$0xf0]  ;;  %10606 = vmatmul.bf16.vlgmr.msrb.gmra.mxu2 %v18346_v62 }
 0x7ff   : > { %v15254_v38 = vld [vmem:[%s18105_s10 + $0x1dd8] sm:$0xf]  ;;  %v14999_v50 = vor.u32 %v16927_v28, %v14998_v32  ;;  %10624 = vmatpush.bf16.msra.mxu0 %v14743_v48 }
 0x800   : > { %v16991_v59 = vld [vmem:[%s18105_s10 + $0x1df4] sm:$0xf0]  ;;  %10619 = vmatmul.bf16.vlgmr.msrb.gmra.mxu3 %v18352_v2 }
 0x801   : > { %v15510_v41 = vld [vmem:[%s18105_s10 + $0x1fd8] sm:$0xf]  ;;  %v15255_v52 = vor.u32 %v16991_v59, %v15254_v38  ;;  %10637 = vmatpush.bf16.msra.mxu1 %v14999_v50  ;;  %v20386_v38 = vpop.f32.mrf.mxu0 }
 0x802   : > { %v17055_v42 = vld [vmem:[%s18105_s10 + $0x1ff4] sm:$0xf0] }
 0x803   : > { %v14710_v40 = vld [vmem:[%s18105_s10 + $0x1998] sm:$0xf]  ;;  %v15511_v3 = vor.u32 %v17055_v42, %v15510_v41  ;;  %10650 = vmatpush.bf16.msra.mxu2 %v15255_v52  ;;  %v20390_v41 = vpop.f32.mrf.mxu1 }
 0x804   : > { %v16855_v33 = vld [vmem:[%s18105_s10 + $0x19b4] sm:$0xf0] }
 0x805   : > { %v14966_v30 = vld [vmem:[%s18105_s10 + $0x1b98] sm:$0xf]  ;;  %v14711_v34 = vor.u32 %v16855_v33, %v14710_v40  ;;  %10663 = vmatpush.bf16.msra.mxu3 %v15511_v3 }
 0x806   : > { %v16919_v43 = vld [vmem:[%s18105_s10 + $0x1bb4] sm:$0xf0] }
 0x807   : > { %v15222_v51 = vld [vmem:[%s18105_s10 + $0x1d98] sm:$0xf]  ;;  %v14967_v15 = vor.u32 %v16919_v43, %v14966_v30  ;;  %10625 = vmatpush.bf16.msra.mxu0 %v14711_v34 }
 0x808   : > { %v16983_v57 = vld [vmem:[%s18105_s10 + $0x1db4] sm:$0xf0] }
 0x809   : > { %v15478_v26 = vld [vmem:[%s18105_s10 + $0x1f98] sm:$0xf]  ;;  %v15223_v14 = vor.u32 %v16983_v57, %v15222_v51  ;;  %10638 = vmatpush.bf16.msra.mxu1 %v14967_v15 }
 0x80a   : > { %v17047_v49 = vld [vmem:[%s18105_s10 + $0x1fb4] sm:$0xf0] }
 0x80b   : > { %v14678_v36 = vld [vmem:[%s18105_s10 + $0x1958] sm:$0xf]  ;;  %v15479_v6 = vor.u32 %v17047_v49, %v15478_v26  ;;  %10651 = vmatpush.bf16.msra.mxu2 %v15223_v14 }
 0x80c   : > { %v16847_v17 = vld [vmem:[%s18105_s10 + $0x1974] sm:$0xf0] }
 0x80d   : > { %v14934_v5 = vld [vmem:[%s18105_s10 + $0x1b58] sm:$0xf]  ;;  %v14679_v20 = vor.u32 %v16847_v17, %v14678_v36  ;;  %10664 = vmatpush.bf16.msra.mxu3 %v15479_v6  ;;  %v20403_v17 = vpop.f32.mrf.mxu2 }
 0x80e   : > { %v16911_v12 = vld [vmem:[%s18105_s10 + $0x1b74] sm:$0xf0] }
 0x80f   : > { %v15190_v16 = vld [vmem:[%s18105_s10 + $0x1d58] sm:$0xf]  ;;  %v14935_v29 = vor.u32 %v16911_v12, %v14934_v5  ;;  %10626 = vmatpush.bf16.msra.mxu0 %v14679_v20  ;;  %v10375_v20 = vpop.f32.mrf.mxu0 }
 0x810   : > { %v16975_v18 = vld [vmem:[%s18105_s10 + $0x1d74] sm:$0xf0]  ;;  %v11928_v20 = vld [vmem:[%s18105_s10 + $0x3f8] sm:$0xf0] }
 0x811   : > { %v15446_v21 = vld [vmem:[%s18105_s10 + $0x1f58] sm:$0xf]  ;;  %v15191_v19 = vor.u32 %v16975_v18, %v15190_v16  ;;  %10639 = vmatpush.bf16.msra.mxu1 %v14935_v29  ;;  %v10322_v16 = vadd.f32 %v20310_v27, %v20258_v24  ;;  %v20410_v18 = vpop.f32.mrf.mxu3 }
 0x812   : > { %v17039_v22 = vld [vmem:[%s18105_s10 + $0x1f74] sm:$0xf0] }
 0x813   : > { %v14646_v44 = vld [vmem:[%s18105_s10 + $0x1918] sm:$0xf]  ;;  %v15447_v32 = vor.u32 %v17039_v22, %v15446_v21  ;;  %10652 = vmatpush.bf16.msra.mxu2 %v15191_v19  ;;  %v10388_v19 = vpop.f32.mrf.mxu1 }
 0x814   : > { %v16839_v45 = vld [vmem:[%s18105_s10 + $0x1934] sm:$0xf0] }
 0x815   : > { %v14902_v31 = vld [vmem:[%s18105_s10 + $0x1b18] sm:$0xf]  ;;  %v14647_v23 = vor.u32 %v16839_v45, %v14646_v44  ;;  %10665 = vmatpush.bf16.msra.mxu3 %v15447_v32 }
 0x816   : > { %v16903_v35 = vld [vmem:[%s18105_s10 + $0x1b34] sm:$0xf0] }
 0x817   : > { %v15158_v60 = vld [vmem:[%s18105_s10 + $0x1d18] sm:$0xf]  ;;  %v14903_v42 = vor.u32 %v16903_v35, %v14902_v31  ;;  %10627 = vmatpush.bf16.msra.mxu0 %v14647_v23 }
 0x818   : > { %v16967_v28 = vld [vmem:[%s18105_s10 + $0x1d34] sm:$0xf0] }
 0x819   : > { %v15414_v59 = vld [vmem:[%s18105_s10 + $0x1f18] sm:$0xf]  ;;  %v15159_v47 = vor.u32 %v16967_v28, %v15158_v60  ;;  %10640 = vmatpush.bf16.msra.mxu1 %v14903_v42 }
 0x81a   : > { %v17031_v25 = vld [vmem:[%s18105_s10 + $0x1f34] sm:$0xf0] }
 0x81b   : > { %v14614_v48 = vld [vmem:[%s18105_s10 + $0x18d8] sm:$0xf]  ;;  %v15415_v40 = vor.u32 %v17031_v25, %v15414_v59  ;;  %10653 = vmatpush.bf16.msra.mxu2 %v15159_v47  ;;  %v10335_v59 = vadd.f32 %v20314_v9, %v10322_v16 }
 0x81c   : > { %v16831_v50 = vld [vmem:[%s18105_s10 + $0x18f4] sm:$0xf0] }
 0x81d   : > { %v14870_v52 = vld [vmem:[%s18105_s10 + $0x1ad8] sm:$0xf]  ;;  %v14615_v57 = vor.u32 %v16831_v50, %v14614_v48  ;;  %10666 = vmatpush.bf16.msra.mxu3 %v15415_v40  ;;  %v10348_v50 = vadd.f32 %v20327_v55, %v10335_v59  ;;  %v16147_v59 = vld [vmem:[%s18105_s10 + $0x39c] sm:$0xf] }
 0x81e   : > { %v16895_v33 = vld [vmem:[%s18105_s10 + $0x1af4] sm:$0xf0] }
 0x81f   : > { %v15126_v30 = vld [vmem:[%s18105_s10 + $0x1cd8] sm:$0xf]  ;;  %v14871_v26 = vor.u32 %v16895_v33, %v14870_v52  ;;  %10628 = vmatpush.bf16.msra.mxu0 %v14615_v57 }
 0x820   : > { %v16959_v3 = vld [vmem:[%s18105_s10 + $0x1cf4] sm:$0xf0] }
 0x821   : > { %v15382_v43 = vld [vmem:[%s18105_s10 + $0x1ed8] sm:$0xf]  ;;  %v15127_v49 = vor.u32 %v16959_v3, %v15126_v30  ;;  %10641 = vmatpush.bf16.msra.mxu1 %v14871_v26  ;;  %v10401_v26 = vpop.f32.mrf.mxu2 }
 0x822   : > { %v17023_v51 = vld [vmem:[%s18105_s10 + $0x1ef4] sm:$0xf0] }
 0x823   : > { %v14582_v34 = vld [vmem:[%s18105_s10 + $0x1898] sm:$0xf]  ;;  %v15383_v36 = vor.u32 %v17023_v51, %v15382_v43  ;;  %10654 = vmatpush.bf16.msra.mxu2 %v15127_v49 }
 0x824   : > { %v16823_v15 = vld [vmem:[%s18105_s10 + $0x18b4] sm:$0xf0] }
 0x825   : > { %v14838_v14 = vld [vmem:[%s18105_s10 + $0x1a98] sm:$0xf]  ;;  %v14583_v29 = vor.u32 %v16823_v15, %v14582_v34  ;;  %10667 = vmatpush.bf16.msra.mxu3 %v15383_v36  ;;  %v10414_v15 = vpop.f32.mrf.mxu3 }
 0x826   : > { %v16887_v5 = vld [vmem:[%s18105_s10 + $0x1ab4] sm:$0xf0] }
 0x827   : > { %v15094_v6 = vld [vmem:[%s18105_s10 + $0x1c98] sm:$0xf]  ;;  %v14839_v44 = vor.u32 %v16887_v5, %v14838_v14  ;;  %10629 = vmatpush.bf16.msra.mxu0 %v14583_v29  ;;  %v16091_v5 = vld [vmem:[%s18105_s10 + $0x1dc] sm:$0xf] }
 0x828   : > { %v16951_v12 = vld [vmem:[%s18105_s10 + $0x1cb4] sm:$0xf0] }
 0x829   : > { %v15350_v21 = vld [vmem:[%s18105_s10 + $0x1e98] sm:$0xf]  ;;  %v15095_v45 = vor.u32 %v16951_v12, %v15094_v6  ;;  %10642 = vmatpush.bf16.msra.mxu1 %v14839_v44  ;;  %v11672_v6 = vld [vmem:[%s18105_s10 + $0x1f8] sm:$0xf0]  ;;  %v10361_v12 = vadd.f32 %v20332_v46, %v10348_v50 }
 0x82a   : > { %v17015_v22 = vld [vmem:[%s18105_s10 + $0x1eb4] sm:$0xf0] }
 0x82b   : > { %v14550_v24 = vld [vmem:[%s18105_s10 + $0x1858] sm:$0xf]  ;;  %v15351_v32 = vor.u32 %v17015_v22, %v15350_v21  ;;  %10655 = vmatpush.bf16.msra.mxu2 %v15095_v45  ;;  %v16155_v22 = vld [vmem:[%s18105_s10 + $0x3dc] sm:$0xf]  ;;  %v10374_v44 = vadd.f32 %v20386_v38, %v10361_v12 }
 0x82c   : > { %v16815_v27 = vld [vmem:[%s18105_s10 + $0x1874] sm:$0xf0]  ;;  %v16131_v12 = vld [vmem:[%s18105_s10 + $0x31c] sm:$0xf] }
 0x82d   : > { %v14806_v31 = vld [vmem:[%s18105_s10 + $0x1a58] sm:$0xf]  ;;  %v14551_v42 = vor.u32 %v16815_v27, %v14550_v24  ;;  %10668 = vmatpush.bf16.msra.mxu3 %v15351_v32  ;;  %v11675_v24 = vor.u32 %v16091_v5, %v11672_v6  ;;  %v11931_v32 = vor.u32 %v16155_v22, %v11928_v20  ;;  %v10425_v6 = vpop.f32.mrf.mxu0  ;;  %v10438_v22 = vpop.f32.mrf.mxu1 }
 0x82e   : > { %v16879_v35 = vld [vmem:[%s18105_s10 + $0x1a74] sm:$0xf0] }
 0x82f   : > { %v15062_v60 = vld [vmem:[%s18105_s10 + $0x1c58] sm:$0xf]  ;;  %v14807_v52 = vor.u32 %v16879_v35, %v14806_v31  ;;  %10630 = vmatpush.bf16.msra.mxu0 %v14551_v42 }
 0x830   : > { %v16943_v28 = vld [vmem:[%s18105_s10 + $0x1c74] sm:$0xf0] }
 0x831   : > { %v15318_v25 = vld [vmem:[%s18105_s10 + $0x1e58] sm:$0xf]  ;;  %v15063_v40 = vor.u32 %v16943_v28, %v15062_v60  ;;  %10643 = vmatpush.bf16.msra.mxu1 %v14807_v52  ;;  %v16083_v60 = vld [vmem:[%s18105_s10 + $0x19c] sm:$0xf] }
 0x832   : > { %v17007_v23 = vld [vmem:[%s18105_s10 + $0x1e74] sm:$0xf0]  ;;  %v11640_v28 = vld [vmem:[%s18105_s10 + $0x1b8] sm:$0xf0] }
 0x833   : > { %v14518_v47 = vld [vmem:[%s18105_s10 + $0x1818] sm:$0xf]  ;;  %v15319_v3 = vor.u32 %v17007_v23, %v15318_v25  ;;  %10656 = vmatpush.bf16.msra.mxu2 %v15063_v40  ;;  %v11896_v25 = vld [vmem:[%s18105_s10 + $0x3b8] sm:$0xf0]  ;;  %v10387_v23 = vadd.f32 %v20390_v41, %v10374_v44 }
 0x834   : > { %v16807_v48 = vld [vmem:[%s18105_s10 + $0x1834] sm:$0xf0]  ;;  %v11899_v40 = vor.u32 %v16147_v59, %v11896_v25 }
 0x835   : > { %v14774_v9 = vld [vmem:[%s18105_s10 + $0x1a18] sm:$0xf]  ;;  %v14519_v14 = vor.u32 %v16807_v48, %v14518_v47  ;;  %10669 = vmatpush.bf16.msra.mxu3 %v15319_v3  ;;  %v11643_v47 = vor.u32 %v16083_v60, %v11640_v28  ;;  %v10400_v41 = vadd.f32 %v20403_v17, %v10387_v23  ;;  %v16139_v3 = vld [vmem:[%s18105_s10 + $0x35c] sm:$0xf] }
 0x836   : > { %v16871_v33 = vld [vmem:[%s18105_s10 + $0x1a34] sm:$0xf0] }
 0x837   : > { %v15030_v30 = vld [vmem:[%s18105_s10 + $0x1c18] sm:$0xf]  ;;  %v14775_v16 = vor.u32 %v16871_v33, %v14774_v9  ;;  %10631 = vmatpush.bf16.msra.mxu0 %v14519_v14  ;;  %v16075_v33 = vld [vmem:[%s18105_s10 + $0x15c] sm:$0xf]  ;;  %v10413_v5 = vadd.f32 %v20410_v18, %v10400_v41 }
 0x838   : > { %v16935_v43 = vld [vmem:[%s18105_s10 + $0x1c34] sm:$0xf0]  ;;  %v16067_v14 = vld [vmem:[%s18105_s10 + $0x11c] sm:$0xf] }
 0x839   : > { %v15286_v51 = vld [vmem:[%s18105_s10 + $0x1e18] sm:$0xf]  ;;  %v15031_v21 = vor.u32 %v16935_v43, %v15030_v30  ;;  %10644 = vmatpush.bf16.msra.mxu1 %v14775_v16  ;;  %v11608_v30 = vld [vmem:[%s18105_s10 + $0x178] sm:$0xf0]  ;;  %v10426_v20 = vadd.f32 %v10425_v6, %v10413_v5 }
 0x83a   : > { %v16999_v57 = vld [vmem:[%s18105_s10 + $0x1e34] sm:$0xf0]  ;;  %10632 = vmatmul.bf16.vlgmr.msra.gmra.mxu0 %v18419_v56  ;;  %v11864_v43 = vld [vmem:[%s18105_s10 + $0x378] sm:$0xf0]  ;;  %v11611_v26 = vor.u32 %v16075_v33, %v11608_v30  ;;  %v10464_v33 = vpop.f32.mrf.mxu3 }
 0x83b   : > { %v15766_v55 = vld [vmem:[%s18105_s10 + $0x21d8] sm:$0xf]  ;;  %v15287_v29 = vor.u32 %v16999_v57, %v15286_v51  ;;  %10657 = vmatpush.bf16.msra.mxu2 %v15031_v21  ;;  %v11832_v16 = vld [vmem:[%s18105_s10 + $0x338] sm:$0xf0]  ;;  %v10439_v28 = vadd.f32 %v10438_v22, %v10426_v20 }
 0x83c   : > { %v17119_v49 = vld [vmem:[%s18105_s10 + $0x21f4] sm:$0xf0]  ;;  %10645 = vmatmul.bf16.vlgmr.msra.gmra.mxu1 %v18426_v0  ;;  %v16115_v30 = vld [vmem:[%s18105_s10 + $0x29c] sm:$0xf] }
 0x83d   : > { %v16022_v34 = vld [vmem:[%s18105_s10 + $0x23d8] sm:$0xf]  ;;  %v15767_v19 = vor.u32 %v17119_v49, %v15766_v55  ;;  %10670 = vmatpush.bf16.msra.mxu3 %v15287_v29  ;;  %v11768_v41 = vld [vmem:[%s18105_s10 + $0x2b8] sm:$0xf0] }
 0x83e   : > { %v17183_v36 = vld [vmem:[%s18105_s10 + $0x23f4] sm:$0xf0]  ;;  %10658 = vmatmul.bf16.vlgmr.msra.gmra.mxu2 %v18424_v61  ;;  %v16043_v5 = vld [vmem:[%s18105_s10 + $0x5c] sm:$0xf] }
 0x83f   : > { %v16023_v45 = vor.u32 %v17183_v36, %v16022_v34  ;;  %v15734_v27 = vld [vmem:[%s18105_s10 + $0x2198] sm:$0xf]  ;;  %10676 = vmatpush.bf16.msrb.mxu0 %v15767_v19  ;;  %10702 = vmatpush.bf16.msrb.mxu2 %v11675_v24  ;;  %v11867_v34 = vor.u32 %v16139_v3, %v11864_v43  ;;  %v11576_v36 = vld [vmem:[%s18105_s10 + $0x138] sm:$0xf0]  ;;  %v11835_v24 = vor.u32 %v16131_v12, %v11832_v16  ;;  %v10427_v3 = vpop.f32.mrf.mxu0  ;;  %v2077_v43 = vld [vmem:[#allocation2 + $0x20] sm:$0xff] }
 0x840   : > { %v17111_v46 = vld [vmem:[%s18105_s10 + $0x21b4] sm:$0xf0]  ;;  %10671 = vmatmul.bf16.vlgmr.msra.gmra.mxu3 %v18430_v4  ;;  %v11579_v19 = vor.u32 %v16067_v14, %v11576_v36  ;;  %v11771_v14 = vor.u32 %v16115_v30, %v11768_v41  ;;  %v11480_v6 = vld [vmem:[%s18105_s10 + $0x78] sm:$0xf0] }
 0x841   : > { %v15990_v31 = vld [vmem:[%s18105_s10 + $0x2398] sm:$0xf]  ;;  %v15735_v38 = vor.u32 %v17111_v46, %v15734_v27  ;;  %10689 = vmatpush.bf16.msrb.mxu1 %v16023_v45  ;;  %10715 = vmatpush.bf16.msrb.mxu3 %v11931_v32  ;;  %v16059_v46 = vld [vmem:[%s18105_s10 + $0xdc] sm:$0xf] }
 0x842   : > { %v17175_v35 = vld [vmem:[%s18105_s10 + $0x23b4] sm:$0xf0]  ;;  %v16123_v32 = vld [vmem:[%s18105_s10 + $0x2dc] sm:$0xf] }
 0x843   : > { %v15991_v42 = vor.u32 %v17175_v35, %v15990_v31  ;;  %v15702_v48 = vld [vmem:[%s18105_s10 + $0x2158] sm:$0xf]  ;;  %10677 = vmatpush.bf16.msrb.mxu0 %v15735_v38  ;;  %10703 = vmatpush.bf16.msrb.mxu2 %v11643_v47  ;;  %v11544_v31 = vld [vmem:[%s18105_s10 + $0xf8] sm:$0xf0] }
 0x844   : > { %v17103_v50 = vld [vmem:[%s18105_s10 + $0x2174] sm:$0xf0]  ;;  %v11800_v35 = vld [vmem:[%s18105_s10 + $0x2f8] sm:$0xf0]  ;;  %v11547_v25 = vor.u32 %v16059_v46, %v11544_v31 }
 0x845   : > { %v15958_v52 = vld [vmem:[%s18105_s10 + $0x2358] sm:$0xf]  ;;  %v15703_v51 = vor.u32 %v17103_v50, %v15702_v48  ;;  %10690 = vmatpush.bf16.msrb.mxu1 %v15991_v42  ;;  %10716 = vmatpush.bf16.msrb.mxu3 %v11899_v40  ;;  %v11803_v47 = vor.u32 %v16123_v32, %v11800_v35  ;;  %v10451_v48 = vpop.f32.mrf.mxu2  ;;  %v11512_v40 = vld [vmem:[%s18105_s10 + $0xb8] sm:$0xf0] }
 0x846   : > { %v17167_v9 = vld [vmem:[%s18105_s10 + $0x2374] sm:$0xf0]  ;;  %v16107_v16 = vld [vmem:[%s18105_s10 + $0x25c] sm:$0xf] }
 0x847   : > { %v15959_v57 = vor.u32 %v17167_v9, %v15958_v52  ;;  %v15670_v17 = vld [vmem:[%s18105_s10 + $0x2118] sm:$0xf]  ;;  %10678 = vmatpush.bf16.msrb.mxu0 %v15703_v51  ;;  %10704 = vmatpush.bf16.msrb.mxu2 %v11611_v26  ;;  %v16051_v52 = vld [vmem:[%s18105_s10 + $0x9c] sm:$0xf]  ;;  %v10452_v9 = vadd.f32 %v10451_v48, %v10439_v28 }
 0x848   : > { %v17095_v55 = vld [vmem:[%s18105_s10 + $0x2134] sm:$0xf0]  ;;  %v11448_v46 = vld [vmem:[%s18105_s10 + $0x38] sm:$0xf0] }
 0x849   : > { %v15926_v49 = vld [vmem:[%s18105_s10 + $0x2318] sm:$0xf]  ;;  %v15671_v21 = vor.u32 %v17095_v55, %v15670_v17  ;;  %10691 = vmatpush.bf16.msrb.mxu1 %v15959_v57  ;;  %10717 = vmatpush.bf16.msrb.mxu3 %v11867_v34  ;;  %v10440_v57 = vpop.f32.mrf.mxu1  ;;  %v10465_v26 = vadd.f32 %v10464_v33, %v10452_v9  ;;  %v11515_v55 = vor.u32 %v16051_v52, %v11512_v40  ;;  %v16099_v31 = vld [vmem:[%s18105_s10 + $0x21c] sm:$0xf] }
 0x84a   : > { %v17159_v15 = vld [vmem:[%s18105_s10 + $0x2334] sm:$0xf0]  ;;  %v11704_v32 = vld [vmem:[%s18105_s10 + $0x238] sm:$0xf0] }
 0x84b   : > { %v15927_v29 = vor.u32 %v17159_v15, %v15926_v49  ;;  %v15638_v44 = vld [vmem:[%s18105_s10 + $0x20d8] sm:$0xf]  ;;  %10679 = vmatpush.bf16.msrb.mxu0 %v15671_v21  ;;  %10705 = vmatpush.bf16.msrb.mxu2 %v11579_v19  ;;  %v10941_v12 = vadd.f32 %v10465_v26, %v2077_v43  ;;  %v11736_v21 = vld [vmem:[%s18105_s10 + $0x278] sm:$0xf0]  ;;  %v11707_v9 = vor.u32 %v16099_v31, %v11704_v32 }
 0x84c   : > { %v17087_v45 = vld [vmem:[%s18105_s10 + $0x20f4] sm:$0xf0]  ;;  %v12184_v28 = vld [vmem:[%s18105_s10 + $0x5f8] sm:$0xf0] }
 0x84d   : > { %v15894_v18 = vld [vmem:[%s18105_s10 + $0x22d8] sm:$0xf]  ;;  %v15639_v60 = vor.u32 %v17087_v45, %v15638_v44  ;;  %10692 = vmatpush.bf16.msrb.mxu1 %v15927_v29  ;;  %10718 = vmatpush.bf16.msrb.mxu3 %v11835_v24  ;;  %10949 = vst [vmem:[#allocation2 + $0x20] sm:$0xff] %v10941_v12  ;;  %v11483_v45 = vor.u32 %v16043_v5, %v11480_v6  ;;  %v16035_v24 = vld [vmem:[%s18105_s10 + $0x1c] sm:$0xf]  ;;  %v10453_v35 = vpop.f32.mrf.mxu2 }
 0x84e   : > { %v17151_v27 = vld [vmem:[%s18105_s10 + $0x22f4] sm:$0xf0]  ;;  %v16411_v52 = vld [vmem:[%s18105_s10 + $0xbdc] sm:$0xf] }
 0x84f   : > { %v15895_v59 = vor.u32 %v17151_v27, %v15894_v18  ;;  %v15606_v38 = vld [vmem:[%s18105_s10 + $0x2098] sm:$0xf]  ;;  %10680 = vmatpush.bf16.msrb.mxu0 %v15639_v60  ;;  %10706 = vmatpush.bf16.msrb.mxu2 %v11547_v25  ;;  %v11739_v27 = vor.u32 %v16107_v16, %v11736_v21  ;;  %v16219_v60 = vld [vmem:[%s18105_s10 + $0x5dc] sm:$0xf]  ;;  %v10466_v25 = vpop.f32.mrf.mxu3 }
 0x850   : > { %v17079_v23 = vld [vmem:[%s18105_s10 + $0x20b4] sm:$0xf0]  ;;  %v12952_v40 = vld [vmem:[%s18105_s10 + $0xbf8] sm:$0xf0]  ;;  %v12187_v33 = vor.u32 %v16219_v60, %v12184_v28 }
 0x851   : > { %v15862_v42 = vld [vmem:[%s18105_s10 + $0x2298] sm:$0xf]  ;;  %v15607_v51 = vor.u32 %v17079_v23, %v15606_v38  ;;  %10693 = vmatpush.bf16.msrb.mxu1 %v15895_v59  ;;  %10719 = vmatpush.bf16.msrb.mxu3 %v11803_v47  ;;  %v16283_v59 = vld [vmem:[%s18105_s10 + $0x7dc] sm:$0xf]  ;;  %v12955_v57 = vor.u32 %v16411_v52, %v12952_v40 }
 0x852   : > { %v17143_v50 = vld [vmem:[%s18105_s10 + $0x22b4] sm:$0xf0]  ;;  %v12440_v23 = vld [vmem:[%s18105_s10 + $0x7f8] sm:$0xf0] }
 0x853   : > { %v15863_v17 = vor.u32 %v17143_v50, %v15862_v42  ;;  %v15574_v49 = vld [vmem:[%s18105_s10 + $0x2058] sm:$0xf]  ;;  %10681 = vmatpush.bf16.msrb.mxu0 %v15607_v51  ;;  %10707 = vmatpush.bf16.msrb.mxu2 %v11515_v55  ;;  %v16347_v42 = vld [vmem:[%s18105_s10 + $0x9dc] sm:$0xf]  ;;  %v11451_v50 = vor.u32 %v16035_v24, %v11448_v46  ;;  %v12443_v30 = vor.u32 %v16283_v59, %v12440_v23  ;;  %v10477_v59 = vpop.f32.mrf.mxu0 }
 0x854   : > { %v17071_v34 = vld [vmem:[%s18105_s10 + $0x2074] sm:$0xf0]  ;;  %v12696_v47 = vld [vmem:[%s18105_s10 + $0x9f8] sm:$0xf0] }
 0x855   : > { %v15830_v15 = vld [vmem:[%s18105_s10 + $0x2258] sm:$0xf]  ;;  %v15575_v22 = vor.u32 %v17071_v34, %v15574_v49  ;;  %10694 = vmatpush.bf16.msrb.mxu1 %v15863_v17  ;;  %10720 = vmatpush.bf16.msrb.mxu3 %v11771_v14  ;;  %v12699_v41 = vor.u32 %v16347_v42, %v12696_v47  ;;  %v16211_v3 = vld [vmem:[%s18105_s10 + $0x59c] sm:$0xf] }
 0x856   : > { %v17135_v36 = vld [vmem:[%s18105_s10 + $0x2274] sm:$0xf0]  ;;  %v12152_v43 = vld [vmem:[%s18105_s10 + $0x5b8] sm:$0xf0] }
 0x857   : > { %v15542_v20 = vld [vmem:[%s18105_s10 + $0x2018] sm:$0xf]  ;;  %v15831_v44 = vor.u32 %v17135_v36, %v15830_v15  ;;  %10682 = vmatpush.bf16.msrb.mxu0 %v15575_v22  ;;  %10708 = vmatpush.bf16.msrb.mxu2 %v11483_v45  ;;  %v16275_v51 = vld [vmem:[%s18105_s10 + $0x79c] sm:$0xf]  ;;  %v12155_v15 = vor.u32 %v16211_v3, %v12152_v43 }
 0x858   : > { %v17063_v29 = vld [vmem:[%s18105_s10 + $0x2034] sm:$0xf0]  ;;  %v12408_v26 = vld [vmem:[%s18105_s10 + $0x7b8] sm:$0xf0] }
 0x859   : > { %v15798_v19 = vld [vmem:[%s18105_s10 + $0x2218] sm:$0xf]  ;;  %v15543_v38 = vor.u32 %v17063_v29, %v15542_v20  ;;  %10695 = vmatpush.bf16.msrb.mxu1 %v15831_v44  ;;  %10721 = vmatpush.bf16.msrb.mxu3 %v11739_v27  ;;  %v16339_v17 = vld [vmem:[%s18105_s10 + $0x99c] sm:$0xf]  ;;  %v12411_v14 = vor.u32 %v16275_v51, %v12408_v26 }
 0x85a   : > { %v17127_v18 = vld [vmem:[%s18105_s10 + $0x2234] sm:$0xf0]  ;;  %v12664_v55 = vld [vmem:[%s18105_s10 + $0x9b8] sm:$0xf0] }
 0x85b   : > { %v15799_v48 = vor.u32 %v17127_v18, %v15798_v19  ;;  %10683 = vmatpush.bf16.msrb.mxu0 %v15543_v38  ;;  %10709 = vmatpush.bf16.msrb.mxu2 %v11451_v50  ;;  %v16403_v49 = vld [vmem:[%s18105_s10 + $0xb9c] sm:$0xf]  ;;  %v12667_v36 = vor.u32 %v16339_v17, %v12664_v55  ;;  %v10503_v55 = vpop.f32.mrf.mxu2 }
 0x85c   : > { %v12920_v34 = vld [vmem:[%s18105_s10 + $0xbb8] sm:$0xf0] }
 0x85d   : > { %10696 = vmatpush.bf16.msrb.mxu1 %v15799_v48  ;;  %10722 = vmatpush.bf16.msrb.mxu3 %v11707_v9  ;;  %v16203_v5 = vld [vmem:[%s18105_s10 + $0x55c] sm:$0xf]  ;;  %v12923_v16 = vor.u32 %v16403_v49, %v12920_v34  ;;  %v10490_v48 = vpop.f32.mrf.mxu1 }
 0x85e   : > { %v12120_v6 = vld [vmem:[%s18105_s10 + $0x578] sm:$0xf0]  ;;  %10684 = vmatmul.bf16.vlgmr.msrb.gmra.mxu0 %v18496_v1  ;;  %10710 = vmatmul.bf16.vlgmr.msrb.gmra.mxu2 %v18211_v53 }
 0x85f   : > { %10728 = vmatpush.bf16.msra.mxu0 %v12187_v33  ;;  %10754 = vmatpush.bf16.msra.mxu2 %v12699_v41  ;;  %v16267_v12 = vld [vmem:[%s18105_s10 + $0x75c] sm:$0xf]  ;;  %v12123_v44 = vor.u32 %v16203_v5, %v12120_v6  ;;  %v10491_v33 = vadd.f32 %v10490_v48, %v10477_v59  ;;  %v10516_v5 = vpop.f32.mrf.mxu3 }
 0x860   : > { %v12376_v21 = vld [vmem:[%s18105_s10 + $0x778] sm:$0xf0]  ;;  %10697 = vmatmul.bf16.vlgmr.msrb.gmra.mxu1 %v18501_v8  ;;  %10723 = vmatmul.bf16.vlgmr.msrb.gmra.mxu3 %v18214_v54 }
 0x861   : > { %10741 = vmatpush.bf16.msra.mxu1 %v12443_v30  ;;  %10767 = vmatpush.bf16.msra.mxu3 %v12955_v57  ;;  %v16331_v22 = vld [vmem:[%s18105_s10 + $0x95c] sm:$0xf]  ;;  %v12379_v45 = vor.u32 %v16267_v12, %v12376_v21 }
 0x862   : > { %v12632_v20 = vld [vmem:[%s18105_s10 + $0x978] sm:$0xf0] }
 0x863   : > { %v16395_v29 = vld [vmem:[%s18105_s10 + $0xb5c] sm:$0xf]  ;;  %10729 = vmatpush.bf16.msra.mxu0 %v12155_v15  ;;  %10755 = vmatpush.bf16.msra.mxu2 %v12667_v36  ;;  %v12635_v18 = vor.u32 %v16331_v22, %v12632_v20  ;;  %v10504_v36 = vadd.f32 %v10503_v55, %v10491_v33  ;;  %v10479_v22 = vpop.f32.mrf.mxu0 }
 0x864   : > { %v12888_v19 = vld [vmem:[%s18105_s10 + $0xb78] sm:$0xf0] }
 0x865   : > { %10742 = vmatpush.bf16.msra.mxu1 %v12411_v14  ;;  %v16195_v24 = vld [vmem:[%s18105_s10 + $0x51c] sm:$0xf]  ;;  %10768 = vmatpush.bf16.msra.mxu3 %v12923_v16  ;;  %v12891_v31 = vor.u32 %v16395_v29, %v12888_v19  ;;  %v20557_v21 = vadd.f32 %v10516_v5, %v10504_v36 }
 0x866   : > { %v12088_v27 = vld [vmem:[%s18105_s10 + $0x538] sm:$0xf0] }
 0x867   : > { %v16259_v46 = vld [vmem:[%s18105_s10 + $0x71c] sm:$0xf]  ;;  %10730 = vmatpush.bf16.msra.mxu0 %v12123_v44  ;;  %v12091_v54 = vor.u32 %v16195_v24, %v12088_v27  ;;  %10756 = vmatpush.bf16.msra.mxu2 %v12635_v18  ;;  %v10492_v18 = vpop.f32.mrf.mxu1 }
 0x868   : > { %v12344_v32 = vld [vmem:[%s18105_s10 + $0x738] sm:$0xf0] }
 0x869   : > { %v16323_v53 = vld [vmem:[%s18105_s10 + $0x91c] sm:$0xf]  ;;  %10743 = vmatpush.bf16.msra.mxu1 %v12379_v45  ;;  %v12347_v25 = vor.u32 %v16259_v46, %v12344_v32  ;;  %10769 = vmatpush.bf16.msra.mxu3 %v12891_v31 }
 0x86a   : > { %v12600_v35 = vld [vmem:[%s18105_s10 + $0x938] sm:$0xf0] }
 0x86b   : > { %v16387_v60 = vld [vmem:[%s18105_s10 + $0xb1c] sm:$0xf]  ;;  %v12603_v38 = vor.u32 %v16323_v53, %v12600_v35  ;;  %10731 = vmatpush.bf16.msra.mxu0 %v12091_v54 }
 0x86c   : > { %v12856_v28 = vld [vmem:[%s18105_s10 + $0xb38] sm:$0xf0] }
 0x86d   : > { %v16187_v23 = vld [vmem:[%s18105_s10 + $0x4dc] sm:$0xf]  ;;  %v12859_v50 = vor.u32 %v16387_v60, %v12856_v28  ;;  %10744 = vmatpush.bf16.msra.mxu1 %v12347_v25  ;;  %10757 = vmatpush.bf16.msra.mxu2 %v12603_v38 }
 0x86e   : > { %v12056_v42 = vld [vmem:[%s18105_s10 + $0x4f8] sm:$0xf0] }
 0x86f   : > { %v16251_v47 = vld [vmem:[%s18105_s10 + $0x6dc] sm:$0xf]  ;;  %v12059_v3 = vor.u32 %v16187_v23, %v12056_v42  ;;  %10770 = vmatpush.bf16.msra.mxu3 %v12859_v50  ;;  %v10505_v42 = vpop.f32.mrf.mxu2 }
 0x870   : > { %v12312_v52 = vld [vmem:[%s18105_s10 + $0x6f8] sm:$0xf0] }
 0x871   : > { %v16315_v40 = vld [vmem:[%s18105_s10 + $0x8dc] sm:$0xf]  ;;  %v12315_v43 = vor.u32 %v16251_v47, %v12312_v52  ;;  %10732 = vmatpush.bf16.msra.mxu0 %v12059_v3 }
 0x872   : > { %v12568_v9 = vld [vmem:[%s18105_s10 + $0x8f8] sm:$0xf0] }
 0x873   : > { %v16379_v30 = vld [vmem:[%s18105_s10 + $0xadc] sm:$0xf]  ;;  %v12571_v51 = vor.u32 %v16315_v40, %v12568_v9  ;;  %10745 = vmatpush.bf16.msra.mxu1 %v12315_v43  ;;  %v10518_v40 = vpop.f32.mrf.mxu3 }
 0x874   : > { %v12824_v41 = vld [vmem:[%s18105_s10 + $0xaf8] sm:$0xf0] }
 0x875   : > { %v16179_v57 = vld [vmem:[%s18105_s10 + $0x49c] sm:$0xf]  ;;  %v12827_v49 = vor.u32 %v16379_v30, %v12824_v41  ;;  %10758 = vmatpush.bf16.msra.mxu2 %v12571_v51 }
 0x876   : > { %v12024_v26 = vld [vmem:[%s18105_s10 + $0x4b8] sm:$0xf0] }
 0x877   : > { %v16243_v17 = vld [vmem:[%s18105_s10 + $0x69c] sm:$0xf]  ;;  %v12027_v16 = vor.u32 %v16179_v57, %v12024_v26  ;;  %10771 = vmatpush.bf16.msra.mxu3 %v12827_v49 }
 0x878   : > { %v12280_v34 = vld [vmem:[%s18105_s10 + $0x6b8] sm:$0xf0] }
 0x879   : > { %v16307_v15 = vld [vmem:[%s18105_s10 + $0x89c] sm:$0xf]  ;;  %v12283_v20 = vor.u32 %v16243_v17, %v12280_v34  ;;  %10733 = vmatpush.bf16.msra.mxu0 %v12027_v16 }
 0x87a   : > { %v12536_v14 = vld [vmem:[%s18105_s10 + $0x8b8] sm:$0xf0] }
 0x87b   : > { %v16371_v6 = vld [vmem:[%s18105_s10 + $0xa9c] sm:$0xf]  ;;  %v12539_v29 = vor.u32 %v16307_v15, %v12536_v14  ;;  %10746 = vmatpush.bf16.msra.mxu1 %v12283_v20 }
 0x87c   : > { %v12792_v12 = vld [vmem:[%s18105_s10 + $0xab8] sm:$0xf0] }
 0x87d   : > { %v16171_v19 = vld [vmem:[%s18105_s10 + $0x45c] sm:$0xf]  ;;  %v12795_v24 = vor.u32 %v16371_v6, %v12792_v12  ;;  %10759 = vmatpush.bf16.msra.mxu2 %v12539_v29 }
 0x87e   : > { %v11992_v44 = vld [vmem:[%s18105_s10 + $0x478] sm:$0xf0] }
 0x87f   : > { %v16235_v45 = vld [vmem:[%s18105_s10 + $0x65c] sm:$0xf]  ;;  %v11995_v35 = vor.u32 %v16171_v19, %v11992_v44  ;;  %10772 = vmatpush.bf16.msra.mxu3 %v12795_v24 }
 0x880   : > { %v12248_v27 = vld [vmem:[%s18105_s10 + $0x678] sm:$0xf0] }
 0x881   : > { %v16299_v46 = vld [vmem:[%s18105_s10 + $0x85c] sm:$0xf]  ;;  %v12251_v54 = vor.u32 %v16235_v45, %v12248_v27  ;;  %10734 = vmatpush.bf16.msra.mxu0 %v11995_v35 }
 0x882   : > { %v12504_v31 = vld [vmem:[%s18105_s10 + $0x878] sm:$0xf0] }
 0x883   : > { %v16363_v32 = vld [vmem:[%s18105_s10 + $0xa5c] sm:$0xf]  ;;  %v12507_v59 = vor.u32 %v16299_v46, %v12504_v31  ;;  %10747 = vmatpush.bf16.msra.mxu1 %v12251_v54 }
 0x884   : > { %v12760_v53 = vld [vmem:[%s18105_s10 + $0xa78] sm:$0xf0] }
 0x885   : > { %v16163_v60 = vld [vmem:[%s18105_s10 + $0x41c] sm:$0xf]  ;;  %v12763_v47 = vor.u32 %v16363_v32, %v12760_v53  ;;  %10760 = vmatpush.bf16.msra.mxu2 %v12507_v59 }
 0x886   : > { %v11960_v28 = vld [vmem:[%s18105_s10 + $0x438] sm:$0xf0] }
 0x887   : > { %v16227_v25 = vld [vmem:[%s18105_s10 + $0x61c] sm:$0xf]  ;;  %v11963_v41 = vor.u32 %v16163_v60, %v11960_v28  ;;  %10773 = vmatpush.bf16.msra.mxu3 %v12763_v47 }
 0x888   : > { %v12216_v38 = vld [vmem:[%s18105_s10 + $0x638] sm:$0xf0] }
 0x889   : > { %v16291_v23 = vld [vmem:[%s18105_s10 + $0x81c] sm:$0xf]  ;;  %v12219_v57 = vor.u32 %v16227_v25, %v12216_v38  ;;  %10735 = vmatpush.bf16.msra.mxu0 %v11963_v41 }
 0x88a   : > { %v12472_v48 = vld [vmem:[%s18105_s10 + $0x838] sm:$0xf0] }
 0x88b   : > { %v16355_v50 = vld [vmem:[%s18105_s10 + $0xa1c] sm:$0xf]  ;;  %v12475_v26 = vor.u32 %v16291_v23, %v12472_v48  ;;  %10748 = vmatpush.bf16.msra.mxu1 %v12219_v57 }
 0x88c   : > { %v12728_v52 = vld [vmem:[%s18105_s10 + $0xa38] sm:$0xf0]  ;;  %10736 = vmatmul.bf16.vlgmr.msra.gmra.mxu0 %v18197_v37 }
 0x88d   : > { %v16475_v9 = vld [vmem:[%s18105_s10 + $0xddc] sm:$0xf]  ;;  %v12731_v49 = vor.u32 %v16355_v50, %v12728_v52  ;;  %10761 = vmatpush.bf16.msra.mxu2 %v12475_v26  ;;  %v10529_v52 = vpop.f32.mrf.mxu0 }
 0x88e   : > { %v13208_v33 = vld [vmem:[%s18105_s10 + $0xdf8] sm:$0xf0]  ;;  %10749 = vmatmul.bf16.vlgmr.msra.gmra.mxu1 %v18200_v39 }
 0x88f   : > { %v16539_v30 = vld [vmem:[%s18105_s10 + $0xfdc] sm:$0xf]  ;;  %v13211_v34 = vor.u32 %v16475_v9, %v13208_v33  ;;  %10774 = vmatpush.bf16.msra.mxu3 %v12731_v49 }
 0x890   : > { %v13464_v3 = vld [vmem:[%s18105_s10 + $0xff8] sm:$0xf0]  ;;  %10762 = vmatmul.bf16.vlgmr.msra.gmra.mxu2 %v18270_v10 }
 0x891   : > { %v16603_v43 = vld [vmem:[%s18105_s10 + $0x11dc] sm:$0xf]  ;;  %v13467_v15 = vor.u32 %v16539_v30, %v13464_v3  ;;  %10780 = vmatpush.bf16.msrb.mxu0 %v13211_v34  ;;  %v10530_v3 = vadd.f32 %v10529_v52, %v20557_v21 }
 0x892   : > { %v13720_v51 = vld [vmem:[%s18105_s10 + $0x11f8] sm:$0xf0]  ;;  %10775 = vmatmul.bf16.vlgmr.msra.gmra.mxu3 %v18274_v13 }
 0x893   : > { %v16667_v17 = vld [vmem:[%s18105_s10 + $0x13dc] sm:$0xf]  ;;  %v13723_v14 = vor.u32 %v16603_v43, %v13720_v51  ;;  %10793 = vmatpush.bf16.msrb.mxu1 %v13467_v15  ;;  %v10542_v43 = vpop.f32.mrf.mxu1 }
 0x894   : > { %v13976_v55 = vld [vmem:[%s18105_s10 + $0x13f8] sm:$0xf0]  ;;  %v10543_v34 = vadd.f32 %v10542_v43, %v10530_v3 }
 0x895   : > { %v16467_v36 = vld [vmem:[%s18105_s10 + $0xd9c] sm:$0xf]  ;;  %v13979_v12 = vor.u32 %v16667_v17, %v13976_v55  ;;  %10806 = vmatpush.bf16.msrb.mxu2 %v13723_v14 }
 0x896   : > { %v13176_v5 = vld [vmem:[%s18105_s10 + $0xdb8] sm:$0xf0] }
 0x897   : > { %v16531_v6 = vld [vmem:[%s18105_s10 + $0xf9c] sm:$0xf]  ;;  %v13179_v44 = vor.u32 %v16467_v36, %v13176_v5  ;;  %10819 = vmatpush.bf16.msrb.mxu3 %v13979_v12  ;;  %v10555_v12 = vpop.f32.mrf.mxu2 }
 0x898   : > { %v13432_v16 = vld [vmem:[%s18105_s10 + $0xfb8] sm:$0xf0] }
 0x899   : > { %v16595_v22 = vld [vmem:[%s18105_s10 + $0x119c] sm:$0xf]  ;;  %v13435_v45 = vor.u32 %v16531_v6, %v13432_v16  ;;  %10781 = vmatpush.bf16.msrb.mxu0 %v13179_v44  ;;  %v10568_v44 = vpop.f32.mrf.mxu3 }
 0x89a   : > { %v13688_v20 = vld [vmem:[%s18105_s10 + $0x11b8] sm:$0xf0] }
 0x89b   : > { %v16659_v29 = vld [vmem:[%s18105_s10 + $0x139c] sm:$0xf]  ;;  %v13691_v18 = vor.u32 %v16595_v22, %v13688_v20  ;;  %10794 = vmatpush.bf16.msrb.mxu1 %v13435_v45 }
 0x89c   : > { %v13944_v19 = vld [vmem:[%s18105_s10 + $0x13b8] sm:$0xf0] }
 0x89d   : > { %v16459_v24 = vld [vmem:[%s18105_s10 + $0xd5c] sm:$0xf]  ;;  %v13947_v31 = vor.u32 %v16659_v29, %v13944_v19  ;;  %10807 = vmatpush.bf16.msrb.mxu2 %v13691_v18  ;;  %v10556_v19 = vadd.f32 %v10555_v12, %v10543_v34 }
 0x89e   : > { %v13144_v27 = vld [vmem:[%s18105_s10 + $0xd78] sm:$0xf0] }
 0x89f   : > { %v16523_v46 = vld [vmem:[%s18105_s10 + $0xf5c] sm:$0xf]  ;;  %v13147_v54 = vor.u32 %v16459_v24, %v13144_v27  ;;  %10820 = vmatpush.bf16.msrb.mxu3 %v13947_v31  ;;  %v20628_v27 = vadd.f32 %v10568_v44, %v10556_v19 }
 0x8a0   : > { %v13400_v32 = vld [vmem:[%s18105_s10 + $0xf78] sm:$0xf0] }
 0x8a1   : > { %v16587_v53 = vld [vmem:[%s18105_s10 + $0x115c] sm:$0xf]  ;;  %v13403_v10 = vor.u32 %v16523_v46, %v13400_v32  ;;  %10782 = vmatpush.bf16.msrb.mxu0 %v13147_v54  ;;  %v10531_v46 = vpop.f32.mrf.mxu0  ;;  %v10570_v3 = vpop.f32.mrf.mxu3 }
 0x8a2   : > { %v13656_v35 = vld [vmem:[%s18105_s10 + $0x1178] sm:$0xf0] }
 0x8a3   : > { %v16651_v60 = vld [vmem:[%s18105_s10 + $0x135c] sm:$0xf]  ;;  %v13659_v59 = vor.u32 %v16587_v53, %v13656_v35  ;;  %10795 = vmatpush.bf16.msrb.mxu1 %v13403_v10 }
 0x8a4   : > { %v13912_v28 = vld [vmem:[%s18105_s10 + $0x1378] sm:$0xf0] }
 0x8a5   : > { %v16451_v25 = vld [vmem:[%s18105_s10 + $0xd1c] sm:$0xf]  ;;  %v13915_v13 = vor.u32 %v16651_v60, %v13912_v28  ;;  %10808 = vmatpush.bf16.msrb.mxu2 %v13659_v59  ;;  %v10544_v28 = vpop.f32.mrf.mxu1 }
 0x8a6   : > { %v13112_v38 = vld [vmem:[%s18105_s10 + $0xd38] sm:$0xf0] }
 0x8a7   : > { %v16515_v37 = vld [vmem:[%s18105_s10 + $0xf1c] sm:$0xf]  ;;  %v13115_v39 = vor.u32 %v16451_v25, %v13112_v38  ;;  %10821 = vmatpush.bf16.msrb.mxu3 %v13915_v13 }
 0x8a8   : > { %v13368_v23 = vld [vmem:[%s18105_s10 + $0xf38] sm:$0xf0] }
 0x8a9   : > { %v16579_v42 = vld [vmem:[%s18105_s10 + $0x111c] sm:$0xf]  ;;  %v13371_v40 = vor.u32 %v16515_v37, %v13368_v23  ;;  %10783 = vmatpush.bf16.msrb.mxu0 %v13115_v39 }
 0x8aa   : > { %v13624_v47 = vld [vmem:[%s18105_s10 + $0x1138] sm:$0xf0] }
 0x8ab   : > { %v16643_v48 = vld [vmem:[%s18105_s10 + $0x131c] sm:$0xf]  ;;  %v13627_v9 = vor.u32 %v16579_v42, %v13624_v47  ;;  %10796 = vmatpush.bf16.msrb.mxu1 %v13371_v40  ;;  %v10557_v40 = vpop.f32.mrf.mxu2 }
 0x8ac   : > { %v13880_v50 = vld [vmem:[%s18105_s10 + $0x1338] sm:$0xf0] }
 0x8ad   : > { %v16443_v33 = vld [vmem:[%s18105_s10 + $0xcdc] sm:$0xf]  ;;  %v13883_v51 = vor.u32 %v16643_v48, %v13880_v50  ;;  %10809 = vmatpush.bf16.msrb.mxu2 %v13627_v9 }
 0x8ae   : > { %v13080_v30 = vld [vmem:[%s18105_s10 + $0xcf8] sm:$0xf0] }
 0x8af   : > { %v16507_v41 = vld [vmem:[%s18105_s10 + $0xedc] sm:$0xf]  ;;  %v13083_v15 = vor.u32 %v16443_v33, %v13080_v30  ;;  %10822 = vmatpush.bf16.msrb.mxu3 %v13883_v51 }
 0x8b0   : > { %v13336_v57 = vld [vmem:[%s18105_s10 + $0xef8] sm:$0xf0] }
 0x8b1   : > { %v16571_v26 = vld [vmem:[%s18105_s10 + $0x10dc] sm:$0xf]  ;;  %v13339_v21 = vor.u32 %v16507_v41, %v13336_v57  ;;  %10784 = vmatpush.bf16.msrb.mxu0 %v13083_v15 }
 0x8b2   : > { %v13592_v17 = vld [vmem:[%s18105_s10 + $0x10f8] sm:$0xf0] }
 0x8b3   : > { %v16635_v55 = vld [vmem:[%s18105_s10 + $0x12dc] sm:$0xf]  ;;  %v13595_v14 = vor.u32 %v16571_v26, %v13592_v17  ;;  %10797 = vmatpush.bf16.msrb.mxu1 %v13339_v21 }
 0x8b4   : > { %v13848_v49 = vld [vmem:[%s18105_s10 + $0x12f8] sm:$0xf0] }
 0x8b5   : > { %v16435_v36 = vld [vmem:[%s18105_s10 + $0xc9c] sm:$0xf]  ;;  %v13851_v16 = vor.u32 %v16635_v55, %v13848_v49  ;;  %10810 = vmatpush.bf16.msrb.mxu2 %v13595_v14 }
 0x8b6   : > { %v13048_v5 = vld [vmem:[%s18105_s10 + $0xcb8] sm:$0xf0] }
 0x8b7   : > { %v16499_v6 = vld [vmem:[%s18105_s10 + $0xe9c] sm:$0xf]  ;;  %v13051_v24 = vor.u32 %v16435_v36, %v13048_v5  ;;  %10823 = vmatpush.bf16.msrb.mxu3 %v13851_v16 }
 0x8b8   : > { %v13304_v22 = vld [vmem:[%s18105_s10 + $0xeb8] sm:$0xf0] }
 0x8b9   : > { %v16563_v20 = vld [vmem:[%s18105_s10 + $0x109c] sm:$0xf]  ;;  %v13307_v31 = vor.u32 %v16499_v6, %v13304_v22  ;;  %10785 = vmatpush.bf16.msrb.mxu0 %v13051_v24 }
 0x8ba   : > { %v13560_v29 = vld [vmem:[%s18105_s10 + $0x10b8] sm:$0xf0] }
 0x8bb   : > { %v16627_v45 = vld [vmem:[%s18105_s10 + $0x129c] sm:$0xf]  ;;  %v13563_v32 = vor.u32 %v16563_v20, %v13560_v29  ;;  %10798 = vmatpush.bf16.msrb.mxu1 %v13307_v31 }
 0x8bc   : > { %v13816_v18 = vld [vmem:[%s18105_s10 + $0x12b8] sm:$0xf0] }
 0x8bd   : > { %v16427_v53 = vld [vmem:[%s18105_s10 + $0xc5c] sm:$0xf]  ;;  %v13819_v54 = vor.u32 %v16627_v45, %v13816_v18  ;;  %10811 = vmatpush.bf16.msrb.mxu2 %v13563_v32 }
 0x8be   : > { %v13016_v35 = vld [vmem:[%s18105_s10 + $0xc78] sm:$0xf0] }
 0x8bf   : > { %v16491_v60 = vld [vmem:[%s18105_s10 + $0xe5c] sm:$0xf]  ;;  %v13019_v13 = vor.u32 %v16427_v53, %v13016_v35  ;;  %10824 = vmatpush.bf16.msrb.mxu3 %v13819_v54 }
 0x8c0   : > { %v13272_v10 = vld [vmem:[%s18105_s10 + $0xe78] sm:$0xf0] }
 0x8c1   : > { %v16555_v59 = vld [vmem:[%s18105_s10 + $0x105c] sm:$0xf]  ;;  %v13275_v47 = vor.u32 %v16491_v60, %v13272_v10  ;;  %10786 = vmatpush.bf16.msrb.mxu0 %v13019_v13 }
 0x8c2   : > { %v13528_v25 = vld [vmem:[%s18105_s10 + $0x1078] sm:$0xf0] }
 0x8c3   : > { %v16619_v38 = vld [vmem:[%s18105_s10 + $0x125c] sm:$0xf]  ;;  %v13531_v48 = vor.u32 %v16555_v59, %v13528_v25  ;;  %10799 = vmatpush.bf16.msrb.mxu1 %v13275_v47 }
 0x8c4   : > { %v13784_v37 = vld [vmem:[%s18105_s10 + $0x1278] sm:$0xf0] }
 0x8c5   : > { %v16419_v23 = vld [vmem:[%s18105_s10 + $0xc1c] sm:$0xf]  ;;  %v13787_v9 = vor.u32 %v16619_v38, %v13784_v37  ;;  %10812 = vmatpush.bf16.msrb.mxu2 %v13531_v48 }
 0x8c6   : > { %v12984_v42 = vld [vmem:[%s18105_s10 + $0xc38] sm:$0xf0] }
 0x8c7   : > { %v16483_v50 = vld [vmem:[%s18105_s10 + $0xe1c] sm:$0xf]  ;;  %v12987_v26 = vor.u32 %v16419_v23, %v12984_v42  ;;  %10825 = vmatpush.bf16.msrb.mxu3 %v13787_v9  ;;  %v20684_v9 = vpop.f32.mrf.mxu1 }
 0x8c8   : > { %v13240_v39 = vld [vmem:[%s18105_s10 + $0xe38] sm:$0xf0] }
 0x8c9   : > { %v16547_v52 = vld [vmem:[%s18105_s10 + $0x101c] sm:$0xf]  ;;  %v13243_v34 = vor.u32 %v16483_v50, %v13240_v39  ;;  %10787 = vmatpush.bf16.msrb.mxu0 %v12987_v26 }
 0x8ca   : > { %v13496_v33 = vld [vmem:[%s18105_s10 + $0x1038] sm:$0xf0] }
 0x8cb   : > { %v16611_v30 = vld [vmem:[%s18105_s10 + $0x121c] sm:$0xf]  ;;  %v13499_v15 = vor.u32 %v16547_v52, %v13496_v33  ;;  %10800 = vmatpush.bf16.msrb.mxu1 %v13243_v34 }
 0x8cc   : > { %v13752_v41 = vld [vmem:[%s18105_s10 + $0x1238] sm:$0xf0]  ;;  %10788 = vmatmul.bf16.vlgmr.msrb.gmra.mxu0 %v18266_v7 }
 0x8cd   : > { %v16731_v43 = vld [vmem:[%s18105_s10 + $0x15dc] sm:$0xf]  ;;  %v13755_v36 = vor.u32 %v16611_v30, %v13752_v41  ;;  %10813 = vmatpush.bf16.msrb.mxu2 %v13499_v15 }
 0x8ce   : > { %v14232_v51 = vld [vmem:[%s18105_s10 + $0x15f8] sm:$0xf0]  ;;  %10801 = vmatmul.bf16.vlgmr.msrb.gmra.mxu1 %v18272_v11 }
 0x8cf   : > { %v16795_v57 = vld [vmem:[%s18105_s10 + $0x17dc] sm:$0xf]  ;;  %v14235_v5 = vor.u32 %v16731_v43, %v14232_v51  ;;  %10826 = vmatpush.bf16.msrb.mxu3 %v13755_v36 }
 0x8d0   : > { %v14488_v17 = vld [vmem:[%s18105_s10 + $0x17f8] sm:$0xf0]  ;;  %10814 = vmatmul.bf16.vlgmr.msrb.gmra.mxu2 %v18341_v58 }
 0x8d1   : > { %v16859_v55 = vld [vmem:[%s18105_s10 + $0x19dc] sm:$0xf]  ;;  %v14491_v6 = vor.u32 %v16795_v57, %v14488_v17  ;;  %10832 = vmatpush.bf16.msra.mxu0 %v14235_v5 }
 0x8d2   : > { %v14744_v49 = vld [vmem:[%s18105_s10 + $0x19f8] sm:$0xf0]  ;;  %10827 = vmatmul.bf16.vlgmr.msrb.gmra.mxu3 %v18348_v63  ;;  %v20680_v63 = vpop.f32.mrf.mxu0 }
 0x8d3   : > { %v16923_v21 = vld [vmem:[%s18105_s10 + $0x1bdc] sm:$0xf]  ;;  %v14747_v12 = vor.u32 %v16859_v55, %v14744_v49  ;;  %10845 = vmatpush.bf16.msra.mxu1 %v14491_v6 }
 0x8d4   : > { %v15000_v14 = vld [vmem:[%s18105_s10 + $0x1bf8] sm:$0xf0] }
 0x8d5   : > { %v16723_v16 = vld [vmem:[%s18105_s10 + $0x159c] sm:$0xf]  ;;  %v15003_v29 = vor.u32 %v16923_v21, %v15000_v14  ;;  %10858 = vmatpush.bf16.msra.mxu2 %v14747_v12  ;;  %v20697_v12 = vpop.f32.mrf.mxu2 }
 0x8d6   : > { %v14200_v22 = vld [vmem:[%s18105_s10 + $0x15b8] sm:$0xf0] }
 0x8d7   : > { %v16787_v20 = vld [vmem:[%s18105_s10 + $0x179c] sm:$0xf]  ;;  %v14203_v46 = vor.u32 %v16723_v16, %v14200_v22  ;;  %10871 = vmatpush.bf16.msra.mxu3 %v15003_v29  ;;  %v20702_v29 = vpop.f32.mrf.mxu3 }
 0x8d8   : > { %v14456_v19 = vld [vmem:[%s18105_s10 + $0x17b8] sm:$0xf0] }
 0x8d9   : > { %v16851_v44 = vld [vmem:[%s18105_s10 + $0x199c] sm:$0xf]  ;;  %v14459_v31 = vor.u32 %v16787_v20, %v14456_v19  ;;  %10833 = vmatpush.bf16.msra.mxu0 %v14203_v46 }
 0x8da   : > { %v14712_v45 = vld [vmem:[%s18105_s10 + $0x19b8] sm:$0xf0] }
 0x8db   : > { %v16915_v18 = vld [vmem:[%s18105_s10 + $0x1b9c] sm:$0xf]  ;;  %v14715_v32 = vor.u32 %v16851_v44, %v14712_v45  ;;  %10846 = vmatpush.bf16.msra.mxu1 %v14459_v31  ;;  %v10583_v45 = vpop.f32.mrf.mxu0 }
 0x8dc   : > { %v14968_v24 = vld [vmem:[%s18105_s10 + $0x1bb8] sm:$0xf0] }
 0x8dd   : > { %v16715_v53 = vld [vmem:[%s18105_s10 + $0x155c] sm:$0xf]  ;;  %v14971_v28 = vor.u32 %v16915_v18, %v14968_v24  ;;  %10859 = vmatpush.bf16.msra.mxu2 %v14715_v32  ;;  %v10596_v24 = vpop.f32.mrf.mxu1 }
 0x8de   : > { %v14168_v35 = vld [vmem:[%s18105_s10 + $0x1578] sm:$0xf0] }
 0x8df   : > { %v16779_v60 = vld [vmem:[%s18105_s10 + $0x175c] sm:$0xf]  ;;  %v14171_v7 = vor.u32 %v16715_v53, %v14168_v35  ;;  %10872 = vmatpush.bf16.msra.mxu3 %v14971_v28 }
 0x8e0   : > { %v14424_v54 = vld [vmem:[%s18105_s10 + $0x1778] sm:$0xf0] }
 0x8e1   : > { %v16843_v10 = vld [vmem:[%s18105_s10 + $0x195c] sm:$0xf]  ;;  %v14427_v37 = vor.u32 %v16779_v60, %v14424_v54  ;;  %10834 = vmatpush.bf16.msra.mxu0 %v14171_v7 }
 0x8e2   : > { %v14680_v59 = vld [vmem:[%s18105_s10 + $0x1978] sm:$0xf0] }
 0x8e3   : > { %v16907_v25 = vld [vmem:[%s18105_s10 + $0x1b5c] sm:$0xf]  ;;  %v14683_v13 = vor.u32 %v16843_v10, %v14680_v59  ;;  %10847 = vmatpush.bf16.msra.mxu1 %v14427_v37 }
 0x8e4   : > { %v14936_v38 = vld [vmem:[%s18105_s10 + $0x1b78] sm:$0xf0] }
 0x8e5   : > { %v16707_v23 = vld [vmem:[%s18105_s10 + $0x151c] sm:$0xf]  ;;  %v14939_v11 = vor.u32 %v16907_v25, %v14936_v38  ;;  %10860 = vmatpush.bf16.msra.mxu2 %v14683_v13 }
 0x8e6   : > { %v14136_v42 = vld [vmem:[%s18105_s10 + $0x1538] sm:$0xf0] }
 0x8e7   : > { %v16771_v58 = vld [vmem:[%s18105_s10 + $0x171c] sm:$0xf]  ;;  %v14139_v40 = vor.u32 %v16707_v23, %v14136_v42  ;;  %10873 = vmatpush.bf16.msra.mxu3 %v14939_v11 }
 0x8e8   : > { %v14392_v47 = vld [vmem:[%s18105_s10 + $0x1738] sm:$0xf0] }
 0x8e9   : > { %v16835_v48 = vld [vmem:[%s18105_s10 + $0x191c] sm:$0xf]  ;;  %v14395_v33 = vor.u32 %v16771_v58, %v14392_v47  ;;  %10835 = vmatpush.bf16.msra.mxu0 %v14139_v40 }
 0x8ea   : > { %v14648_v50 = vld [vmem:[%s18105_s10 + $0x1938] sm:$0xf0] }
 0x8eb   : > { %v16899_v39 = vld [vmem:[%s18105_s10 + $0x1b1c] sm:$0xf]  ;;  %v14651_v30 = vor.u32 %v16835_v48, %v14648_v50  ;;  %10848 = vmatpush.bf16.msra.mxu1 %v14395_v33 }
 0x8ec   : > { %v14904_v52 = vld [vmem:[%s18105_s10 + $0x1b38] sm:$0xf0] }
 0x8ed   : > { %v16699_v41 = vld [vmem:[%s18105_s10 + $0x14dc] sm:$0xf]  ;;  %v14907_v51 = vor.u32 %v16899_v39, %v14904_v52  ;;  %10861 = vmatpush.bf16.msra.mxu2 %v14651_v30  ;;  %v10609_v52 = vpop.f32.mrf.mxu2 }
 0x8ee   : > { %v14104_v3 = vld [vmem:[%s18105_s10 + $0x14f8] sm:$0xf0] }
 0x8ef   : > { %v16763_v43 = vld [vmem:[%s18105_s10 + $0x16dc] sm:$0xf]  ;;  %v14107_v34 = vor.u32 %v16699_v41, %v14104_v3  ;;  %10874 = vmatpush.bf16.msra.mxu3 %v14907_v51  ;;  %v10622_v41 = vpop.f32.mrf.mxu3 }
 0x8f0   : > { %v14360_v57 = vld [vmem:[%s18105_s10 + $0x16f8] sm:$0xf0] }
 0x8f1   : > { %v16827_v26 = vld [vmem:[%s18105_s10 + $0x18dc] sm:$0xf]  ;;  %v14363_v15 = vor.u32 %v16763_v43, %v14360_v57  ;;  %10836 = vmatpush.bf16.msra.mxu0 %v14107_v34 }
 0x8f2   : > { %v14616_v17 = vld [vmem:[%s18105_s10 + $0x18f8] sm:$0xf0] }
 0x8f3   : > { %v16891_v55 = vld [vmem:[%s18105_s10 + $0x1adc] sm:$0xf]  ;;  %v14619_v21 = vor.u32 %v16827_v26, %v14616_v17  ;;  %10849 = vmatpush.bf16.msra.mxu1 %v14363_v15 }
 0x8f4   : > { %v14872_v49 = vld [vmem:[%s18105_s10 + $0x1af8] sm:$0xf0] }
 0x8f5   : > { %v16691_v14 = vld [vmem:[%s18105_s10 + $0x149c] sm:$0xf]  ;;  %v14875_v6 = vor.u32 %v16891_v55, %v14872_v49  ;;  %10862 = vmatpush.bf16.msra.mxu2 %v14619_v21 }
 0x8f6   : > { %v14072_v36 = vld [vmem:[%s18105_s10 + $0x14b8] sm:$0xf0] }
 0x8f7   : > { %v16755_v5 = vld [vmem:[%s18105_s10 + $0x169c] sm:$0xf]  ;;  %v14075_v18 = vor.u32 %v16691_v14, %v14072_v36  ;;  %10875 = vmatpush.bf16.msra.mxu3 %v14875_v6 }
 0x8f8   : > { %v14328_v16 = vld [vmem:[%s18105_s10 + $0x16b8] sm:$0xf0] }
 0x8f9   : > { %v16819_v22 = vld [vmem:[%s18105_s10 + $0x189c] sm:$0xf]  ;;  %v14331_v46 = vor.u32 %v16755_v5, %v14328_v16  ;;  %10837 = vmatpush.bf16.msra.mxu0 %v14075_v18 }
 0x8fa   : > { %v14584_v20 = vld [vmem:[%s18105_s10 + $0x18b8] sm:$0xf0] }
 0x8fb   : > { %v16883_v19 = vld [vmem:[%s18105_s10 + $0x1a9c] sm:$0xf]  ;;  %v14587_v31 = vor.u32 %v16819_v22, %v14584_v20  ;;  %10850 = vmatpush.bf16.msra.mxu1 %v14331_v46 }
 0x8fc   : > { %v14840_v44 = vld [vmem:[%s18105_s10 + $0x1ab8] sm:$0xf0] }
 0x8fd   : > { %v16683_v32 = vld [vmem:[%s18105_s10 + $0x145c] sm:$0xf]  ;;  %v14843_v60 = vor.u32 %v16883_v19, %v14840_v44  ;;  %10863 = vmatpush.bf16.msra.mxu2 %v14587_v31 }
 0x8fe   : > { %v14040_v53 = vld [vmem:[%s18105_s10 + $0x1478] sm:$0xf0] }
 0x8ff   : > { %v16747_v35 = vld [vmem:[%s18105_s10 + $0x165c] sm:$0xf]  ;;  %v14043_v38 = vor.u32 %v16683_v32, %v14040_v53  ;;  %10876 = vmatpush.bf16.msra.mxu3 %v14843_v60 }
 0x900   : > { %v14296_v28 = vld [vmem:[%s18105_s10 + $0x1678] sm:$0xf0] }
 0x901   : > { %v16811_v54 = vld [vmem:[%s18105_s10 + $0x185c] sm:$0xf]  ;;  %v14299_v13 = vor.u32 %v16747_v35, %v14296_v28  ;;  %10838 = vmatpush.bf16.msra.mxu0 %v14043_v38 }
 0x902   : > { %v14552_v10 = vld [vmem:[%s18105_s10 + $0x1878] sm:$0xf0] }
 0x903   : > { %v16875_v59 = vld [vmem:[%s18105_s10 + $0x1a5c] sm:$0xf]  ;;  %v14555_v23 = vor.u32 %v16811_v54, %v14552_v10  ;;  %10851 = vmatpush.bf16.msra.mxu1 %v14299_v13 }
 0x904   : > { %v14808_v25 = vld [vmem:[%s18105_s10 + $0x1a78] sm:$0xf0] }
 0x905   : > { %v16675_v7 = vld [vmem:[%s18105_s10 + $0x141c] sm:$0xf]  ;;  %v14811_v47 = vor.u32 %v16875_v59, %v14808_v25  ;;  %10864 = vmatpush.bf16.msra.mxu2 %v14555_v23 }
 0x906   : > { %v14008_v37 = vld [vmem:[%s18105_s10 + $0x1438] sm:$0xf0] }
 0x907   : > { %v16739_v42 = vld [vmem:[%s18105_s10 + $0x161c] sm:$0xf]  ;;  %v14011_v3 = vor.u32 %v16675_v7, %v14008_v37  ;;  %10877 = vmatpush.bf16.msra.mxu3 %v14811_v47 }
 0x908   : > { %v14264_v58 = vld [vmem:[%s18105_s10 + $0x1638] sm:$0xf0] }
 0x909   : > { %v16803_v11 = vld [vmem:[%s18105_s10 + $0x181c] sm:$0xf]  ;;  %v14267_v26 = vor.u32 %v16739_v42, %v14264_v58  ;;  %10839 = vmatpush.bf16.msra.mxu0 %v14011_v3 }
 0x90a   : > { %v14520_v48 = vld [vmem:[%s18105_s10 + $0x1838] sm:$0xf0] }
 0x90b   : > { %v16867_v50 = vld [vmem:[%s18105_s10 + $0x1a1c] sm:$0xf]  ;;  %v14523_v17 = vor.u32 %v16803_v11, %v14520_v48  ;;  %10852 = vmatpush.bf16.msra.mxu1 %v14267_v26  ;;  %v20760_v48 = vpop.f32.mrf.mxu1 }
 0x90c   : > { %v14776_v39 = vld [vmem:[%s18105_s10 + $0x1a38] sm:$0xf0]  ;;  %10840 = vmatmul.bf16.vlgmr.msra.gmra.mxu0 %v18346_v62 }
 0x90d   : > { %v16987_v40 = vld [vmem:[%s18105_s10 + $0x1ddc] sm:$0xf]  ;;  %v14779_v34 = vor.u32 %v16867_v50, %v14776_v39  ;;  %10865 = vmatpush.bf16.msra.mxu2 %v14523_v17 }
 0x90e   : > { %v15256_v33 = vld [vmem:[%s18105_s10 + $0x1df8] sm:$0xf0]  ;;  %10853 = vmatmul.bf16.vlgmr.msra.gmra.mxu1 %v18352_v2 }
 0x90f   : > { %v17051_v30 = vld [vmem:[%s18105_s10 + $0x1fdc] sm:$0xf]  ;;  %v15259_v15 = vor.u32 %v16987_v40, %v15256_v33  ;;  %10878 = vmatpush.bf16.msra.mxu3 %v14779_v34 }
 0x910   : > { %v15512_v43 = vld [vmem:[%s18105_s10 + $0x1ff8] sm:$0xf0]  ;;  %10866 = vmatmul.bf16.vlgmr.msra.gmra.mxu2 %v18419_v56 }
 0x911   : > { %v17115_v51 = vld [vmem:[%s18105_s10 + $0x21dc] sm:$0xf]  ;;  %v15515_v21 = vor.u32 %v17051_v30, %v15512_v43  ;;  %10884 = vmatpush.bf16.msrb.mxu0 %v15259_v15 }
 0x912   : > { %v15768_v57 = vld [vmem:[%s18105_s10 + $0x21f8] sm:$0xf0]  ;;  %10879 = vmatmul.bf16.vlgmr.msra.gmra.mxu3 %v18426_v0  ;;  %v20756_v0 = vpop.f32.mrf.mxu0 }
 0x913   : > { %v17179_v55 = vld [vmem:[%s18105_s10 + $0x23dc] sm:$0xf]  ;;  %v15771_v14 = vor.u32 %v17115_v51, %v15768_v57  ;;  %10897 = vmatpush.bf16.msrb.mxu1 %v15515_v21  ;;  %v10582_v21 = vadd.f32 %v20680_v63, %v20628_v27  ;;  %v10648_v27 = vpop.f32.mrf.mxu1 }
 0x914   : > { %v16024_v49 = vld [vmem:[%s18105_s10 + $0x23f8] sm:$0xf0] }
 0x915   : > { %v16979_v36 = vld [vmem:[%s18105_s10 + $0x1d9c] sm:$0xf]  ;;  %v16027_v16 = vor.u32 %v17179_v55, %v16024_v49  ;;  %10910 = vmatpush.bf16.msrb.mxu2 %v15771_v14 }
 0x916   : > { %v15224_v5 = vld [vmem:[%s18105_s10 + $0x1db8] sm:$0xf0] }
 0x917   : > { %v17043_v6 = vld [vmem:[%s18105_s10 + $0x1f9c] sm:$0xf]  ;;  %v15227_v18 = vor.u32 %v16979_v36, %v15224_v5  ;;  %10923 = vmatpush.bf16.msrb.mxu3 %v16027_v16  ;;  %v10659_v36 = vpop.f32.mrf.mxu2 }
 0x918   : > { %v15480_v22 = vld [vmem:[%s18105_s10 + $0x1fb8] sm:$0xf0] }
 0x919   : > { %v17107_v20 = vld [vmem:[%s18105_s10 + $0x219c] sm:$0xf]  ;;  %v15483_v24 = vor.u32 %v17043_v6, %v15480_v22  ;;  %10885 = vmatpush.bf16.msrb.mxu0 %v15227_v18  ;;  %v10672_v22 = vpop.f32.mrf.mxu3 }
 0x91a   : > { %v15736_v19 = vld [vmem:[%s18105_s10 + $0x21b8] sm:$0xf0] }
 0x91b   : > { %v17171_v44 = vld [vmem:[%s18105_s10 + $0x239c] sm:$0xf]  ;;  %v15739_v46 = vor.u32 %v17107_v20, %v15736_v19  ;;  %10898 = vmatpush.bf16.msrb.mxu1 %v15483_v24 }
 0x91c   : > { %v15992_v45 = vld [vmem:[%s18105_s10 + $0x23b8] sm:$0xf0] }
 0x91d   : > { %v16971_v31 = vld [vmem:[%s18105_s10 + $0x1d5c] sm:$0xf]  ;;  %v15995_v35 = vor.u32 %v17171_v44, %v15992_v45  ;;  %10911 = vmatpush.bf16.msrb.mxu2 %v15739_v46  ;;  %v10635_v44 = vpop.f32.mrf.mxu0 }
 0x91e   : > { %v15192_v32 = vld [vmem:[%s18105_s10 + $0x1d78] sm:$0xf0] }
 0x91f   : > { %v17035_v53 = vld [vmem:[%s18105_s10 + $0x1f5c] sm:$0xf]  ;;  %v15195_v62 = vor.u32 %v16971_v31, %v15192_v32  ;;  %10924 = vmatpush.bf16.msrb.mxu3 %v15995_v35  ;;  %v10595_v32 = vadd.f32 %v20684_v9, %v10582_v21 }
 0x920   : > { %v15448_v60 = vld [vmem:[%s18105_s10 + $0x1f78] sm:$0xf0] }
 0x921   : > { %v17099_v28 = vld [vmem:[%s18105_s10 + $0x215c] sm:$0xf]  ;;  %v15451_v25 = vor.u32 %v17035_v53, %v15448_v60  ;;  %10886 = vmatpush.bf16.msrb.mxu0 %v15195_v62 }
 0x922   : > { %v15704_v54 = vld [vmem:[%s18105_s10 + $0x2178] sm:$0xf0] }
 0x923   : > { %v17163_v10 = vld [vmem:[%s18105_s10 + $0x235c] sm:$0xf]  ;;  %v15707_v38 = vor.u32 %v17099_v28, %v15704_v54  ;;  %10899 = vmatpush.bf16.msrb.mxu1 %v15451_v25 }
 0x924   : > { %v15960_v59 = vld [vmem:[%s18105_s10 + $0x2378] sm:$0xf0] }
 0x925   : > { %v16963_v7 = vld [vmem:[%s18105_s10 + $0x1d1c] sm:$0xf]  ;;  %v15963_v2 = vor.u32 %v17163_v10, %v15960_v59  ;;  %10912 = vmatpush.bf16.msrb.mxu2 %v15707_v38  ;;  %v10608_v59 = vadd.f32 %v20697_v12, %v10595_v32  ;;  %v10674_v12 = vpop.f32.mrf.mxu3 }
 0x926   : > { %v15160_v37 = vld [vmem:[%s18105_s10 + $0x1d38] sm:$0xf0] }
 0x927   : > { %v17027_v56 = vld [vmem:[%s18105_s10 + $0x1f1c] sm:$0xf]  ;;  %v15163_v47 = vor.u32 %v16963_v7, %v15160_v37  ;;  %10925 = vmatpush.bf16.msrb.mxu3 %v15963_v2 }
 0x928   : > { %v15416_v13 = vld [vmem:[%s18105_s10 + $0x1f38] sm:$0xf0] }
 0x929   : > { %v17091_v23 = vld [vmem:[%s18105_s10 + $0x211c] sm:$0xf]  ;;  %v15419_v50 = vor.u32 %v17027_v56, %v15416_v13  ;;  %10887 = vmatpush.bf16.msrb.mxu0 %v15163_v47  ;;  %v10621_v47 = vadd.f32 %v20702_v29, %v10608_v59 }
 0x92a   : > { %v15672_v42 = vld [vmem:[%s18105_s10 + $0x2138] sm:$0xf0] }
 0x92b   : > { %v17155_v58 = vld [vmem:[%s18105_s10 + $0x231c] sm:$0xf]  ;;  %v15675_v39 = vor.u32 %v17091_v23, %v15672_v42  ;;  %10900 = vmatpush.bf16.msrb.mxu1 %v15419_v50  ;;  %v10661_v42 = vpop.f32.mrf.mxu2 }
 0x92c   : > { %v15928_v11 = vld [vmem:[%s18105_s10 + $0x2338] sm:$0xf0] }
 0x92d   : > { %v16955_v52 = vld [vmem:[%s18105_s10 + $0x1cdc] sm:$0xf]  ;;  %v15931_v30 = vor.u32 %v17155_v58, %v15928_v11  ;;  %10913 = vmatpush.bf16.msrb.mxu2 %v15675_v39 }
 0x92e   : > { %v15128_v40 = vld [vmem:[%s18105_s10 + $0x1cf8] sm:$0xf0] }
 0x92f   : > { %v17019_v33 = vld [vmem:[%s18105_s10 + $0x1edc] sm:$0xf]  ;;  %v15131_v26 = vor.u32 %v16955_v52, %v15128_v40  ;;  %10926 = vmatpush.bf16.msrb.mxu3 %v15931_v30  ;;  %v10634_v40 = vadd.f32 %v20756_v0, %v10621_v47 }
 0x930   : > { %v15384_v41 = vld [vmem:[%s18105_s10 + $0x1ef8] sm:$0xf0] }
 0x931   : > { %v17083_v3 = vld [vmem:[%s18105_s10 + $0x20dc] sm:$0xf]  ;;  %v15387_v17 = vor.u32 %v17019_v33, %v15384_v41  ;;  %10888 = vmatpush.bf16.msrb.mxu0 %v15131_v26  ;;  %v10647_v30 = vadd.f32 %v20760_v48, %v10634_v40  ;;  %v10724_v48 = vpop.f32.mrf.mxu3 }
 0x932   : > { %v15640_v43 = vld [vmem:[%s18105_s10 + $0x20f8] sm:$0xf0] }
 0x933   : > { %v17147_v51 = vld [vmem:[%s18105_s10 + $0x22dc] sm:$0xf]  ;;  %v15643_v55 = vor.u32 %v17083_v3, %v15640_v43  ;;  %10901 = vmatpush.bf16.msrb.mxu1 %v15387_v17  ;;  %v10660_v41 = vadd.f32 %v10659_v36, %v10647_v30  ;;  %v10685_v3 = vpop.f32.mrf.mxu0  ;;  %v10698_v43 = vpop.f32.mrf.mxu1 }
 0x934   : > { %v15896_v57 = vld [vmem:[%s18105_s10 + $0x22f8] sm:$0xf0]  ;;  %v10711_v17 = vpop.f32.mrf.mxu2 }
 0x935   : > { %v16947_v49 = vld [vmem:[%s18105_s10 + $0x1c9c] sm:$0xf]  ;;  %v15899_v14 = vor.u32 %v17147_v51, %v15896_v57  ;;  %10914 = vmatpush.bf16.msrb.mxu2 %v15643_v55  ;;  %v10673_v29 = vadd.f32 %v10672_v22, %v10660_v41  ;;  %v2078_v51 = vld [vmem:[#allocation2 + $0x28] sm:$0xff] }
 0x936   : > { %v15096_v34 = vld [vmem:[%s18105_s10 + $0x1cb8] sm:$0xf0] }
 0x937   : > { %v17011_v15 = vld [vmem:[%s18105_s10 + $0x1e9c] sm:$0xf]  ;;  %v15099_v45 = vor.u32 %v16947_v49, %v15096_v34  ;;  %10927 = vmatpush.bf16.msrb.mxu3 %v15899_v14  ;;  %v10686_v0 = vadd.f32 %v10685_v3, %v10673_v29  ;;  %v10725_v49 = vadd.f32 %v10724_v48, %v10711_v17 }
 0x938   : > { %v15352_v5 = vld [vmem:[%s18105_s10 + $0x1eb8] sm:$0xf0] }
 0x939   : > { %v17075_v6 = vld [vmem:[%s18105_s10 + $0x209c] sm:$0xf]  ;;  %v15355_v63 = vor.u32 %v17011_v15, %v15352_v5  ;;  %10889 = vmatpush.bf16.msrb.mxu0 %v15099_v45  ;;  %v10699_v57 = vadd.f32 %v10698_v43, %v10686_v0  ;;  %v10726_v15 = vpop.f32.mrf.mxu3 }
 0x93a   : > { %v15608_v16 = vld [vmem:[%s18105_s10 + $0x20b8] sm:$0xf0] }
 0x93b   : > { %v17139_v20 = vld [vmem:[%s18105_s10 + $0x229c] sm:$0xf]  ;;  %v15611_v18 = vor.u32 %v17075_v6, %v15608_v16  ;;  %10902 = vmatpush.bf16.msrb.mxu1 %v15355_v63  ;;  %v10942_v26 = vadd.f32 %v10699_v57, %v2078_v51  ;;  %v10687_v55 = vpop.f32.mrf.mxu0 }
 0x93c   : > { %v15864_v19 = vld [vmem:[%s18105_s10 + $0x22b8] sm:$0xf0]  ;;  %v10713_v34 = vpop.f32.mrf.mxu2 }
 0x93d   : > { %v16939_v24 = vld [vmem:[%s18105_s10 + $0x1c5c] sm:$0xf]  ;;  %v15867_v53 = vor.u32 %v17139_v20, %v15864_v19  ;;  %10915 = vmatpush.bf16.msrb.mxu2 %v15611_v18  ;;  %10950 = vst [vmem:[#allocation2 + $0x28] sm:$0xff] %v10942_v26 }
 0x93e   : > { %v15064_v46 = vld [vmem:[%s18105_s10 + $0x1c78] sm:$0xf0] }
 0x93f   : > { %v17003_v31 = vld [vmem:[%s18105_s10 + $0x1e5c] sm:$0xf]  ;;  %v15067_v62 = vor.u32 %v16939_v24, %v15064_v46  ;;  %10928 = vmatpush.bf16.msrb.mxu3 %v15867_v53 }
 0x940   : > { %v15320_v35 = vld [vmem:[%s18105_s10 + $0x1e78] sm:$0xf0] }
 0x941   : > { %v17067_v60 = vld [vmem:[%s18105_s10 + $0x205c] sm:$0xf]  ;;  %v15323_v9 = vor.u32 %v17003_v31, %v15320_v35  ;;  %10890 = vmatpush.bf16.msrb.mxu0 %v15067_v62  ;;  %v10776_v5 = vpop.f32.mrf.mxu3 }
 0x942   : > { %v15576_v28 = vld [vmem:[%s18105_s10 + $0x2078] sm:$0xf0] }
 0x943   : > { %v17131_v54 = vld [vmem:[%s18105_s10 + $0x225c] sm:$0xf]  ;;  %v15579_v25 = vor.u32 %v17067_v60, %v15576_v28  ;;  %10903 = vmatpush.bf16.msrb.mxu1 %v15323_v9 }
 0x944   : > { %v15832_v10 = vld [vmem:[%s18105_s10 + $0x2278] sm:$0xf0] }
 0x945   : > { %v16931_v38 = vld [vmem:[%s18105_s10 + $0x1c1c] sm:$0xf]  ;;  %v15835_v56 = vor.u32 %v17131_v54, %v15832_v10  ;;  %10916 = vmatpush.bf16.msrb.mxu2 %v15579_v25 }
 0x946   : > { %v15032_v7 = vld [vmem:[%s18105_s10 + $0x1c38] sm:$0xf0] }
 0x947   : > { %v16995_v37 = vld [vmem:[%s18105_s10 + $0x1e1c] sm:$0xf]  ;;  %v15035_v50 = vor.u32 %v16931_v38, %v15032_v7  ;;  %10929 = vmatpush.bf16.msrb.mxu3 %v15835_v56 }
 0x948   : > { %v15288_v2 = vld [vmem:[%s18105_s10 + $0x1e38] sm:$0xf0] }
 0x949   : > { %v17059_v13 = vld [vmem:[%s18105_s10 + $0x201c] sm:$0xf]  ;;  %v15291_v39 = vor.u32 %v16995_v37, %v15288_v2  ;;  %10891 = vmatpush.bf16.msrb.mxu0 %v15035_v50  ;;  %v10778_v19 = vpop.f32.mrf.mxu3 }
 0x94a   : > { %v15544_v23 = vld [vmem:[%s18105_s10 + $0x2038] sm:$0xf0] }
 0x94b   : > { %v17123_v58 = vld [vmem:[%s18105_s10 + $0x221c] sm:$0xf]  ;;  %v15547_v52 = vor.u32 %v17059_v13, %v15544_v23  ;;  %10904 = vmatpush.bf16.msrb.mxu1 %v15291_v39 }
 0x94c   : > { %v15800_v11 = vld [vmem:[%s18105_s10 + $0x2238] sm:$0xf0]  ;;  %10892 = vmatmul.bf16.vlgmr.msrb.gmra.mxu0 %v18424_v61  ;;  %v10700_v61 = vpop.f32.mrf.mxu1 }
 0x94d   : > { %v15803_v33 = vor.u32 %v17123_v58, %v15800_v11  ;;  %10917 = vmatpush.bf16.msrb.mxu2 %v15547_v52  ;;  %v2079_v39 = vld [vmem:[#allocation2 + $0x38] sm:$0xff] }
 0x94e   : > { %10905 = vmatmul.bf16.vlgmr.msrb.gmra.mxu1 %v18430_v4  ;;  %v10737_v4 = vpop.f32.mrf.mxu0 }
 0x94f   : > { %10930 = vmatpush.bf16.msrb.mxu3 %v15803_v33  ;;  %v10738_v21 = vadd.f32 %v10737_v4, %v10725_v49 }
 0x950   : > { %10918 = vmatmul.bf16.vlgmr.msrb.gmra.mxu2 %v18496_v1 }
 0x952   : > { %10931 = vmatmul.bf16.vlgmr.msrb.gmra.mxu3 %v18501_v8  ;;  %v10763_v8 = vpop.f32.mrf.mxu2 }
 0x954   : > { %v10750_v1 = vpop.f32.mrf.mxu1 }
 0x955   : > { %v10751_v14 = vadd.f32 %v10750_v1, %v10738_v21  ;;  %v10828_v63 = vpop.f32.mrf.mxu3 }
 0x956   : > { %v10739_v16 = vpop.f32.mrf.mxu0 }
 0x957   : > { %v10764_v36 = vadd.f32 %v10763_v8, %v10751_v14 }
 0x959   : > { %v10777_v6 = vadd.f32 %v10776_v5, %v10764_v36 }
 0x95a   : > { %v10765_v20 = vpop.f32.mrf.mxu2 }
 0x95c   : > { %v10752_v22 = vpop.f32.mrf.mxu1 }
 0x95d   : > { %v10830_v31 = vpop.f32.mrf.mxu3 }
 0x95e   : > { %v10789_v44 = vpop.f32.mrf.mxu0 }
 0x95f   : > { %v10790_v35 = vadd.f32 %v10789_v44, %v10777_v6 }
 0x962   : > { %v10815_v27 = vpop.f32.mrf.mxu2 }
 0x964   : > { %v10802_v45 = vpop.f32.mrf.mxu1 }
 0x965   : > { %v10803_v59 = vadd.f32 %v10802_v45, %v10790_v35 }
 0x966   : > { %v10791_v18 = vpop.f32.mrf.mxu0 }
 0x967   : > { %v10816_v62 = vadd.f32 %v10815_v27, %v10803_v59 }
 0x969   : > { %v10829_v38 = vadd.f32 %v10828_v63, %v10816_v62 }
 0x96a   : > { %v10817_v46 = vpop.f32.mrf.mxu2 }
 0x96c   : > { %v10804_v24 = vpop.f32.mrf.mxu1 }
 0x989   : > { %v10841_v32 = vpop.f32.mrf.mxu0 }
 0x98a   : > { %v10842_v7 = vadd.f32 %v10841_v32, %v10829_v38 }
 0x98b   : > { %v10854_v53 = vpop.f32.mrf.mxu1 }
 0x98c   : > { %v10855_v37 = vadd.f32 %v10854_v53, %v10842_v7 }
 0x991   : > { %v10843_v54 = vpop.f32.mrf.mxu0 }
 0x993   : > { %v10867_v60 = vpop.f32.mrf.mxu2  ;;  %v10856_v10 = vpop.f32.mrf.mxu1 }
 0x994   : > { %v10868_v56 = vadd.f32 %v10867_v60, %v10855_v37 }
 0x995   : > { %v10880_v28 = vpop.f32.mrf.mxu3 }
 0x996   : > { %v10881_v2 = vadd.f32 %v10880_v28, %v10868_v56 }
 0x99b   : > { %v10869_v9 = vpop.f32.mrf.mxu2 }
 0x99d   : > { %v10882_v25 = vpop.f32.mrf.mxu3 }
 0x9c9   : > { %v10893_v13 = vpop.f32.mrf.mxu0 }
 0x9ca   : > { %v10894_v42 = vadd.f32 %v10893_v13, %v10881_v2 }
 0x9cb   : > { %v10906_v23 = vpop.f32.mrf.mxu1 }
 0x9cc   : > { %v10907_v58 = vadd.f32 %v10906_v23, %v10894_v42 }
 0x9d1   : > { %v10895_v50 = vpop.f32.mrf.mxu0 }
 0x9d3   : > { %v10919_v11 = vpop.f32.mrf.mxu2  ;;  %v10908_v52 = vpop.f32.mrf.mxu1 }
 0x9d4   : > { %v10920_v12 = vadd.f32 %v10919_v11, %v10907_v58 }
 0x9d5   : > { %v10932_v47 = vpop.f32.mrf.mxu3 }
 0x9d6   : > { %v10933_v40 = vadd.f32 %v10932_v47, %v10920_v12 }
 0x9d8   : > { %v10943_v33 = vadd.f32 %v10933_v40, %v2079_v39 }
 0x9d9   : > { %10955 = sbr.rel (%p16028_p3) target bundleno = 2730 (0xaaa), region = 81 }
 0x9da   : > { %10951 = vst [vmem:[#allocation2 + $0x38] sm:$0xff] %v10943_v33 }
 0x9db   : > { %v10921_v30 = vpop.f32.mrf.mxu2 }
 0x9dd   : > { %v10934_v41 = vpop.f32.mrf.mxu3 }
 0x9de   : > { %v11005_v29 = vld [vmem:[%s18097_s29 + $0x78] sm:$0xff]  ;;  %v11004_v0 = vld [vmem:[%s18097_s29 + $0x70] sm:$0xff]  ;;  %v11003_v26 = vld [vmem:[%s18097_s29 + $0x68] sm:$0xff]  ;;  %vm11278_vm0 = vcmask 654336  }
 0x9df   : > { %v11037_v3 = vld [vmem:[%s18097_s29 + $0x178] sm:$0xff]  ;;  %11118 = vmatpush.msra.mxu0 %v11005_v29  ;;  %v11036_v51 = vld [vmem:[%s18097_s29 + $0x170] sm:$0xff]  ;;  %v11035_v48 = vld [vmem:[%s18097_s29 + $0x168] sm:$0xff] }
 0x9e0   : > { %11158 = vmatpush.msra.mxu2 %v11037_v3  ;;  %v11021_v43 = vld [vmem:[%s18097_s29 + $0xf8] sm:$0xff]  ;;  %v11020_v17 = vld [vmem:[%s18097_s29 + $0xf0] sm:$0xff]  ;;  %v11019_v49 = vld [vmem:[%s18097_s29 + $0xe8] sm:$0xff] }
 0x9e1   : > { %v11053_v57 = vld [vmem:[%s18097_s29 + $0x1f8] sm:$0xff]  ;;  %11138 = vmatpush.msra.mxu1 %v11021_v43  ;;  %11119 = vmatpush.msra.mxu0 %v11004_v0  ;;  %v11052_v55 = vld [vmem:[%s18097_s29 + $0x1f0] sm:$0xff]  ;;  %v11002_v61 = vld [vmem:[%s18097_s29 + $0x60] sm:$0xff] }
 0x9e2   : > { %11178 = vmatpush.msra.mxu3 %v11053_v57  ;;  %11159 = vmatpush.msra.mxu2 %v11036_v51  ;;  %v11034_v34 = vld [vmem:[%s18097_s29 + $0x160] sm:$0xff]  ;;  %v11051_v15 = vld [vmem:[%s18097_s29 + $0x1e8] sm:$0xff]  ;;  %v11001_v1 = vld [vmem:[%s18097_s29 + $0x58] sm:$0xff] }
 0x9e3   : > { %11139 = vmatpush.msra.mxu1 %v11020_v17  ;;  %11120 = vmatpush.msra.mxu0 %v11003_v26  ;;  %v11018_v4 = vld [vmem:[%s18097_s29 + $0xe0] sm:$0xff]  ;;  %v11033_v14 = vld [vmem:[%s18097_s29 + $0x158] sm:$0xff]  ;;  %v11000_v5 = vld [vmem:[%s18097_s29 + $0x50] sm:$0xff] }
 0x9e4   : > { %11179 = vmatpush.msra.mxu3 %v11052_v55  ;;  %11160 = vmatpush.msra.mxu2 %v11035_v48  ;;  %v11050_v21 = vld [vmem:[%s18097_s29 + $0x1e0] sm:$0xff]  ;;  %v11017_v8 = vld [vmem:[%s18097_s29 + $0xd8] sm:$0xff]  ;;  %v11032_v6 = vld [vmem:[%s18097_s29 + $0x150] sm:$0xff] }
 0x9e5   : > { %11140 = vmatpush.msra.mxu1 %v11019_v49  ;;  %11121 = vmatpush.msra.mxu0 %v11002_v61  ;;  %v11049_v36 = vld [vmem:[%s18097_s29 + $0x1d8] sm:$0xff]  ;;  %v11016_v16 = vld [vmem:[%s18097_s29 + $0xd0] sm:$0xff]  ;;  %v10999_v20 = vld [vmem:[%s18097_s29 + $0x48] sm:$0xff] }
 0x9e6   : > { %11180 = vmatpush.msra.mxu3 %v11051_v15  ;;  %11161 = vmatpush.msra.mxu2 %v11034_v34  ;;  %v11048_v22 = vld [vmem:[%s18097_s29 + $0x1d0] sm:$0xff]  ;;  %v11031_v19 = vld [vmem:[%s18097_s29 + $0x148] sm:$0xff]  ;;  %v10998_v27 = vld [vmem:[%s18097_s29 + $0x40] sm:$0xff] }
 0x9e7   : > { %11141 = vmatpush.msra.mxu1 %v11018_v4  ;;  %11122 = vmatpush.msra.mxu0 %v11001_v1  ;;  %v11015_v44 = vld [vmem:[%s18097_s29 + $0xc8] sm:$0xff]  ;;  %v11030_v63 = vld [vmem:[%s18097_s29 + $0x140] sm:$0xff]  ;;  %v10997_v46 = vld [vmem:[%s18097_s29 + $0x38] sm:$0xff] }
 0x9e8   : > { %11181 = vmatpush.msra.mxu3 %v11050_v21  ;;  %11162 = vmatpush.msra.mxu2 %v11033_v14  ;;  %v11047_v45 = vld [vmem:[%s18097_s29 + $0x1c8] sm:$0xff]  ;;  %v11014_v18 = vld [vmem:[%s18097_s29 + $0xc0] sm:$0xff]  ;;  %v11029_v31 = vld [vmem:[%s18097_s29 + $0x138] sm:$0xff] }
 0x9e9   : > { %11142 = vmatpush.msra.mxu1 %v11017_v8  ;;  %11123 = vmatpush.msra.mxu0 %v11000_v5  ;;  %v11046_v24 = vld [vmem:[%s18097_s29 + $0x1c0] sm:$0xff]  ;;  %v11013_v32 = vld [vmem:[%s18097_s29 + $0xb8] sm:$0xff]  ;;  %v10996_v35 = vld [vmem:[%s18097_s29 + $0x30] sm:$0xff] }
 0x9ea   : > { %11182 = vmatpush.msra.mxu3 %v11049_v36  ;;  %11163 = vmatpush.msra.mxu2 %v11032_v6  ;;  %v11045_v53 = vld [vmem:[%s18097_s29 + $0x1b8] sm:$0xff]  ;;  %v11028_v60 = vld [vmem:[%s18097_s29 + $0x130] sm:$0xff]  ;;  %v10995_v10 = vld [vmem:[%s18097_s29 + $0x28] sm:$0xff] }
 0x9eb   : > { %11143 = vmatpush.msra.mxu1 %v11016_v16  ;;  %11124 = vmatpush.msra.mxu0 %v10999_v20  ;;  %v11012_v28 = vld [vmem:[%s18097_s29 + $0xb0] sm:$0xff]  ;;  %v11027_v59 = vld [vmem:[%s18097_s29 + $0x128] sm:$0xff]  ;;  %v10994_v25 = vld [vmem:[%s18097_s29 + $0x20] sm:$0xff] }
 0x9ec   : > { %11183 = vmatpush.msra.mxu3 %v11048_v22  ;;  %11164 = vmatpush.msra.mxu2 %v11031_v19  ;;  %v11044_v54 = vld [vmem:[%s18097_s29 + $0x1b0] sm:$0xff]  ;;  %v11011_v62 = vld [vmem:[%s18097_s29 + $0xa8] sm:$0xff]  ;;  %v11026_v38 = vld [vmem:[%s18097_s29 + $0x120] sm:$0xff] }
 0x9ed   : > { %11144 = vmatpush.msra.mxu1 %v11015_v44  ;;  %11125 = vmatpush.msra.mxu0 %v10998_v27  ;;  %v11043_v9 = vld [vmem:[%s18097_s29 + $0x1a8] sm:$0xff]  ;;  %v11010_v7 = vld [vmem:[%s18097_s29 + $0xa0] sm:$0xff]  ;;  %v10993_v56 = vld [vmem:[%s18097_s29 + $0x18] sm:$0xff] }
 0x9ee   : > { %11184 = vmatpush.msra.mxu3 %v11047_v45  ;;  %11165 = vmatpush.msra.mxu2 %v11030_v63  ;;  %v11042_v37 = vld [vmem:[%s18097_s29 + $0x1a0] sm:$0xff]  ;;  %v11025_v2 = vld [vmem:[%s18097_s29 + $0x118] sm:$0xff]  ;;  %v10992_v42 = vld [vmem:[%s18097_s29 + $0x10] sm:$0xff] }
 0x9ef   : > { %11145 = vmatpush.msra.mxu1 %v11014_v18  ;;  %11126 = vmatpush.msra.mxu0 %v10997_v46  ;;  %v11009_v13 = vld [vmem:[%s18097_s29 + $0x98] sm:$0xff]  ;;  %v11024_v58 = vld [vmem:[%s18097_s29 + $0x110] sm:$0xff]  ;;  %v10991_v47 = vld [vmem:[%s18097_s29 + $0x8] sm:$0xff] }
 0x9f0   : > { %11185 = vmatpush.msra.mxu3 %v11046_v24  ;;  %11166 = vmatpush.msra.mxu2 %v11029_v31  ;;  %v11041_v23 = vld [vmem:[%s18097_s29 + $0x198] sm:$0xff]  ;;  %v11008_v11 = vld [vmem:[%s18097_s29 + $0x90] sm:$0xff]  ;;  %v11023_v50 = vld [vmem:[%s18097_s29 + $0x108] sm:$0xff] }
 0x9f1   : > { %11146 = vmatpush.msra.mxu1 %v11013_v32  ;;  %11127 = vmatpush.msra.mxu0 %v10996_v35  ;;  %v11040_v12 = vld [vmem:[%s18097_s29 + $0x190] sm:$0xff]  ;;  %v11007_v39 = vld [vmem:[%s18097_s29 + $0x88] sm:$0xff]  ;;  %v10990_v40 = vld [vmem:[%s18097_s29] sm:$0xff] }
 0x9f2   : > { %11186 = vmatpush.msra.mxu3 %v11045_v53  ;;  %11167 = vmatpush.msra.mxu2 %v11028_v60  ;;  %v11039_v52 = vld [vmem:[%s18097_s29 + $0x188] sm:$0xff]  ;;  %v11022_v33 = vld [vmem:[%s18097_s29 + $0x100] sm:$0xff]  ;;  %v11069_v30 = vld [vmem:[%s18097_s29 + $0x278] sm:$0xff] }
 0x9f3   : > { %11147 = vmatpush.msra.mxu1 %v11012_v28  ;;  %11128 = vmatpush.msra.mxu0 %v10995_v10  ;;  %v11101_v41 = vld [vmem:[%s18097_s29 + $0x378] sm:$0xff]  ;;  %v11006_v29 = vld [vmem:[%s18097_s29 + $0x80] sm:$0xff]  ;;  %v11068_v0 = vld [vmem:[%s18097_s29 + $0x270] sm:$0xff] }
 0x9f4   : > { %11187 = vmatpush.msra.mxu3 %v11044_v54  ;;  %11168 = vmatpush.msra.mxu2 %v11027_v59  ;;  %v11038_v3 = vld [vmem:[%s18097_s29 + $0x180] sm:$0xff]  ;;  %v11085_v43 = vld [vmem:[%s18097_s29 + $0x2f8] sm:$0xff]  ;;  %v11100_v51 = vld [vmem:[%s18097_s29 + $0x370] sm:$0xff] }
 0x9f5   : > { %11148 = vmatpush.msra.mxu1 %v11011_v62  ;;  %11129 = vmatpush.msra.mxu0 %v10994_v25  ;;  %v11117_v57 = vld [vmem:[%s18097_s29 + $0x3f8] sm:$0xff]  ;;  %v11067_v26 = vld [vmem:[%s18097_s29 + $0x268] sm:$0xff]  ;;  %v11084_v17 = vld [vmem:[%s18097_s29 + $0x2f0] sm:$0xff] }
 0x9f6   : > { %11188 = vmatpush.msra.mxu3 %v11043_v9  ;;  %11169 = vmatpush.msra.mxu2 %v11026_v38  ;;  %v11099_v48 = vld [vmem:[%s18097_s29 + $0x368] sm:$0xff]  ;;  %v11116_v55 = vld [vmem:[%s18097_s29 + $0x3f0] sm:$0xff]  ;;  %v11066_v49 = vld [vmem:[%s18097_s29 + $0x260] sm:$0xff] }
 0x9f7   : > { %11149 = vmatpush.msra.mxu1 %v11010_v7  ;;  %11130 = vmatpush.msra.mxu0 %v10993_v56  ;;  %v11083_v61 = vld [vmem:[%s18097_s29 + $0x2e8] sm:$0xff]  ;;  %v11098_v34 = vld [vmem:[%s18097_s29 + $0x360] sm:$0xff]  ;;  %v11065_v4 = vld [vmem:[%s18097_s29 + $0x258] sm:$0xff] }
 0x9f8   : > { %11189 = vmatpush.msra.mxu3 %v11042_v37  ;;  %11170 = vmatpush.msra.mxu2 %v11025_v2  ;;  %v11115_v15 = vld [vmem:[%s18097_s29 + $0x3e8] sm:$0xff]  ;;  %v11082_v21 = vld [vmem:[%s18097_s29 + $0x2e0] sm:$0xff]  ;;  %v11097_v1 = vld [vmem:[%s18097_s29 + $0x358] sm:$0xff] }
 0x9f9   : > { %11150 = vmatpush.msra.mxu1 %v11009_v13  ;;  %11131 = vmatpush.msra.mxu0 %v10992_v42  ;;  %v11114_v14 = vld [vmem:[%s18097_s29 + $0x3e0] sm:$0xff]  ;;  %v11064_v8 = vld [vmem:[%s18097_s29 + $0x250] sm:$0xff]  ;;  %v11081_v36 = vld [vmem:[%s18097_s29 + $0x2d8] sm:$0xff] }
 0x9fa   : > { %11190 = vmatpush.msra.mxu3 %v11041_v23  ;;  %11171 = vmatpush.msra.mxu2 %v11024_v58  ;;  %v11096_v5 = vld [vmem:[%s18097_s29 + $0x350] sm:$0xff]  ;;  %v11113_v6 = vld [vmem:[%s18097_s29 + $0x3d8] sm:$0xff]  ;;  %v11063_v16 = vld [vmem:[%s18097_s29 + $0x248] sm:$0xff] }
 0x9fb   : > { %11151 = vmatpush.msra.mxu1 %v11008_v11  ;;  %11132 = vmatpush.msra.mxu0 %v10991_v47  ;;  %v11080_v22 = vld [vmem:[%s18097_s29 + $0x2d0] sm:$0xff]  ;;  %v11095_v20 = vld [vmem:[%s18097_s29 + $0x348] sm:$0xff]  ;;  %v11062_v44 = vld [vmem:[%s18097_s29 + $0x240] sm:$0xff] }
 0x9fc   : > { %11191 = vmatpush.msra.mxu3 %v11040_v12  ;;  %11172 = vmatpush.msra.mxu2 %v11023_v50  ;;  %v11112_v19 = vld [vmem:[%s18097_s29 + $0x3d0] sm:$0xff]  ;;  %v11079_v45 = vld [vmem:[%s18097_s29 + $0x2c8] sm:$0xff]  ;;  %v20903_v27 = vld [vmem:[%s2048_s24] sm:$0xff] }
 0x9fd   : > { %11152 = vmatpush.msra.mxu1 %v11007_v39  ;;  %11133 = vmatpush.msra.mxu0 %v10990_v40  ;;  %v11094_v63 = vld [vmem:[%s18097_s29 + $0x340] sm:$0xff]  ;;  %v11111_v18 = vld [vmem:[%s18097_s29 + $0x3c8] sm:$0xff]  ;;  %v11061_v24 = vld [vmem:[%s18097_s29 + $0x238] sm:$0xff]  ;;  %v10968_v53 = vperm.slane %v20903_v27, 2  ;;  %v10966_v59 = vperm.slane %v20903_v27, 0  ;;  %v10969_v38 = vperm.slane %v20903_v27, 3 }
 0x9fe   : > { %11192 = vmatpush.msra.mxu3 %v11039_v52  ;;  %11173 = vmatpush.msra.mxu2 %v11022_v33  ;;  %v11078_v46 = vld [vmem:[%s18097_s29 + $0x2c0] sm:$0xff]  ;;  %v11093_v31 = vld [vmem:[%s18097_s29 + $0x338] sm:$0xff]  ;;  %v11060_v35 = vld [vmem:[%s18097_s29 + $0x230] sm:$0xff]  ;;  %v10967_v23 = vperm.slane %v20903_v27, 1 }
 0x9ff   : > { %11198 = vmatpush.msrb.mxu0 %v11069_v30  ;;  %11153 = vmatpush.msra.mxu1 %v11006_v29  ;;  %v11110_v32 = vld [vmem:[%s18097_s29 + $0x3c0] sm:$0xff]  ;;  %v11077_v60 = vld [vmem:[%s18097_s29 + $0x2b8] sm:$0xff]  ;;  %v11092_v54 = vld [vmem:[%s18097_s29 + $0x330] sm:$0xff] }
 0xa00   : > { %11238 = vmatpush.msrb.mxu2 %v11101_v41  ;;  %11193 = vmatpush.msra.mxu3 %v11038_v3  ;;  %v10958_v28 = vld [vmem:[#allocation2 + $0x18] sm:$0xff]  ;;  %v11059_v62 = vld [vmem:[%s18097_s29 + $0x228] sm:$0xff]  ;;  %v11076_v9 = vld [vmem:[%s18097_s29 + $0x2b0] sm:$0xff] }
 0xa01   : > { %11199 = vmatpush.msrb.mxu0 %v11068_v0  ;;  %11218 = vmatpush.msrb.mxu1 %v11085_v43  ;;  %v11109_v10 = vld [vmem:[%s18097_s29 + $0x3b8] sm:$0xff]  ;;  %v10956_v25 = vld [vmem:[#allocation2 + $0x30] sm:$0xff]  ;;  %v11091_v7 = vld [vmem:[%s18097_s29 + $0x328] sm:$0xff]  ;;  %v10984_v56 = vadd.f32 %v10968_v53, %v10958_v28 }
 0xa02   : > { %11239 = vmatpush.msrb.mxu2 %v11100_v51  ;;  %11258 = vmatpush.msrb.mxu3 %v11117_v57  ;;  %v11108_v37 = vld [vmem:[%s18097_s29 + $0x3b0] sm:$0xff]  ;;  %v11058_v13 = vld [vmem:[%s18097_s29 + $0x220] sm:$0xff]  ;;  %v11075_v42 = vld [vmem:[%s18097_s29 + $0x2a8] sm:$0xff]  ;;  %v10982_v11 = vadd.f32 %v10966_v59, %v10956_v25  ;;  %v10970_v51 = vperm.slane %v20903_v27, 4  ;;  %v10972_v57 = vperm.slane %v20903_v27, 6 }
 0xa03   : > { %11200 = vmatpush.msrb.mxu0 %v11067_v26  ;;  %11219 = vmatpush.msrb.mxu1 %v11084_v17  ;;  %v10959_v2 = vld [vmem:[#allocation2 + $0x10] sm:$0xff]  ;;  %v11090_v58 = vld [vmem:[%s18097_s29 + $0x320] sm:$0xff]  ;;  %v11107_v47 = vld [vmem:[%s18097_s29 + $0x3a8] sm:$0xff] }
 0xa04   : > { %11240 = vmatpush.msrb.mxu2 %v11099_v48  ;;  %11259 = vmatpush.msrb.mxu3 %v11116_v55  ;;  %v10957_v12 = vld [vmem:[#allocation2] sm:$0xff]  ;;  %v10985_v50 = vadd.f32 %v10969_v38, %v10959_v2  ;;  %v11057_v39 = vld [vmem:[%s18097_s29 + $0x218] sm:$0xff]  ;;  %v11056_v41 = vld [vmem:[%s18097_s29 + $0x210] sm:$0xff] }
 0xa05   : > { %11201 = vmatpush.msrb.mxu0 %v11066_v49  ;;  %11220 = vmatpush.msrb.mxu1 %v11083_v61  ;;  %v11074_v52 = vld [vmem:[%s18097_s29 + $0x2a0] sm:$0xff]  ;;  %v11089_v40 = vld [vmem:[%s18097_s29 + $0x318] sm:$0xff]  ;;  %v10983_v33 = vadd.f32 %v10967_v23, %v10957_v12  ;;  %v11088_v3 = vld [vmem:[%s18097_s29 + $0x310] sm:$0xff] }
 0xa06   : > { %11241 = vmatpush.msrb.mxu2 %v11098_v34  ;;  %11260 = vmatpush.msrb.mxu3 %v11115_v15  ;;  %v11106_v30 = vld [vmem:[%s18097_s29 + $0x3a0] sm:$0xff]  ;;  %v11073_v29 = vld [vmem:[%s18097_s29 + $0x298] sm:$0xff]  ;;  %v11055_v43 = vld [vmem:[%s18097_s29 + $0x208] sm:$0xff]  ;;  %v10971_v34 = vperm.slane %v20903_v27, 5  ;;  %v10973_v15 = vperm.slane %v20903_v27, 7 }
 0xa07   : > { %11202 = vmatpush.msrb.mxu0 %v11065_v4  ;;  %11221 = vmatpush.msrb.mxu1 %v11082_v21  ;;  %v11105_v0 = vld [vmem:[%s18097_s29 + $0x398] sm:$0xff]  ;;  %v11072_v26 = vld [vmem:[%s18097_s29 + $0x290] sm:$0xff]  ;;  %v10960_v17 = vld [vmem:[#allocation2 + $0x8] sm:$0xff] }
 0xa08   : > { %11242 = vmatpush.msrb.mxu2 %v11097_v1  ;;  %11261 = vmatpush.msrb.mxu3 %v11114_v14  ;;  %v10962_v48 = vld [vmem:[#allocation2 + $0x28] sm:$0xff]  ;;  %v11104_v49 = vld [vmem:[%s18097_s29 + $0x390] sm:$0xff]  ;;  %v11054_v61 = vld [vmem:[%s18097_s29 + $0x200] sm:$0xff] }
 0xa09   : > { %11203 = vmatpush.msrb.mxu0 %v11064_v8  ;;  %11222 = vmatpush.msrb.mxu1 %v11081_v36  ;;  %v11087_v55 = vld [vmem:[%s18097_s29 + $0x308] sm:$0xff]  ;;  %v10961_v21 = vld [vmem:[#allocation2 + $0x20] sm:$0xff]  ;;  %v10963_v1 = vld [vmem:[#allocation2 + $0x38] sm:$0xff]  ;;  %v10986_v36 = vadd.f32 %v10970_v51, %v10960_v17 }
 0xa0a   : > { %11243 = vmatpush.msrb.mxu2 %v11096_v5  ;;  %11262 = vmatpush.msrb.mxu3 %v11113_v6  ;;  %v11071_v4 = vld [vmem:[%s18097_s29 + $0x288] sm:$0xff]  ;;  %v11086_v14 = vld [vmem:[%s18097_s29 + $0x300] sm:$0xff]  ;;  %v10988_v5 = vadd.f32 %v10972_v57, %v10962_v48 }
 0xa0b   : > { %11204 = vmatpush.msrb.mxu0 %v11063_v16  ;;  %11223 = vmatpush.msrb.mxu1 %v11080_v22  ;;  %v11103_v8 = vld [vmem:[%s18097_s29 + $0x388] sm:$0xff]  ;;  %v11070_v6 = vld [vmem:[%s18097_s29 + $0x280] sm:$0xff]  ;;  %v10987_v22 = vadd.f32 %v10971_v34, %v10961_v21 }
 0xa0c   : > { %11244 = vmatpush.msrb.mxu2 %v11095_v20  ;;  %11263 = vmatpush.msrb.mxu3 %v11112_v19  ;;  %v11102_v16 = vld [vmem:[%s18097_s29 + $0x380] sm:$0xff]  ;;  %v10989_v20 = vadd.f32 %v10973_v15, %v10963_v1 }
 0xa0d   : > { %11205 = vmatpush.msrb.mxu0 %v11062_v44  ;;  %11224 = vmatpush.msrb.mxu1 %v11079_v45 }
 0xa0e   : > { %11245 = vmatpush.msrb.mxu2 %v11094_v63  ;;  %11264 = vmatpush.msrb.mxu3 %v11111_v18 }
 0xa0f   : > { %11206 = vmatpush.msrb.mxu0 %v11061_v24  ;;  %11225 = vmatpush.msrb.mxu1 %v11078_v46 }
 0xa10   : > { %11246 = vmatpush.msrb.mxu2 %v11093_v31  ;;  %11265 = vmatpush.msrb.mxu3 %v11110_v32 }
 0xa11   : > { %11207 = vmatpush.msrb.mxu0 %v11060_v35  ;;  %11226 = vmatpush.msrb.mxu1 %v11077_v60 }
 0xa12   : > { %11247 = vmatpush.msrb.mxu2 %v11092_v54  ;;  %11266 = vmatpush.msrb.mxu3 %v11109_v10 }
 0xa13   : > { %11208 = vmatpush.msrb.mxu0 %v11059_v62  ;;  %11227 = vmatpush.msrb.mxu1 %v11076_v9 }
 0xa14   : > { %11248 = vmatpush.msrb.mxu2 %v11091_v7  ;;  %11267 = vmatpush.msrb.mxu3 %v11108_v37 }
 0xa15   : > { %11174 = vmatmul.f32.vlgmr.msra.gmra.mxu2 %v10984_v56  ;;  %11209 = vmatpush.msrb.mxu0 %v11058_v13 }
 0xa16   : > { %11228 = vmatpush.msrb.mxu1 %v11075_v42  ;;  %11249 = vmatpush.msrb.mxu2 %v11090_v58 }
 0xa17   : > { %11268 = vmatpush.msrb.mxu3 %v11107_v47  ;;  %11134 = vmatmul.f32.vlgmr.msra.gmra.mxu0 %v10982_v11 }
 0xa18   : > { %11194 = vmatmul.f32.vlgmr.msra.gmra.mxu3 %v10985_v50  ;;  %11210 = vmatpush.msrb.mxu0 %v11057_v39 }
 0xa19   : > { %11229 = vmatpush.msrb.mxu1 %v11074_v52  ;;  %11250 = vmatpush.msrb.mxu2 %v11089_v40 }
 0xa1a   : > { %11269 = vmatpush.msrb.mxu3 %v11106_v30  ;;  %11154 = vmatmul.f32.vlgmr.msra.gmra.mxu1 %v10983_v33 }
 0xa1b   : > { %11211 = vmatpush.msrb.mxu0 %v11056_v41  ;;  %11230 = vmatpush.msrb.mxu1 %v11073_v29 }
 0xa1c   : > { %11251 = vmatpush.msrb.mxu2 %v11088_v3  ;;  %11270 = vmatpush.msrb.mxu3 %v11105_v0 }
 0xa1d   : > { %11212 = vmatpush.msrb.mxu0 %v11055_v43  ;;  %11231 = vmatpush.msrb.mxu1 %v11072_v26 }
 0xa1e   : > { %11252 = vmatpush.msrb.mxu2 %v11087_v55  ;;  %11271 = vmatpush.msrb.mxu3 %v11104_v49 }
 0xa1f   : > { %11213 = vmatpush.msrb.mxu0 %v11054_v61  ;;  %11232 = vmatpush.msrb.mxu1 %v11071_v4 }
 0xa20   : > { %11253 = vmatpush.msrb.mxu2 %v11086_v14  ;;  %11272 = vmatpush.msrb.mxu3 %v11103_v8 }
 0xa21   : > { %11214 = vmatmul.f32.vlgmr.msrb.gmra.mxu0 %v10986_v36  ;;  %11254 = vmatmul.f32.vlgmr.msrb.gmra.mxu2 %v10988_v5 }
 0xa22   : > { %11233 = vmatpush.msrb.mxu1 %v11070_v6  ;;  %11273 = vmatpush.msrb.mxu3 %v11102_v16 }
 0xa23   : > { %11234 = vmatmul.f32.vlgmr.msrb.gmra.mxu1 %v10987_v22  ;;  %11274 = vmatmul.f32.vlgmr.msrb.gmra.mxu3 %v10989_v20 }
 0xa94   : > { %v11135_v19 = vpop.f32.mrf.mxu0 }
 0xa97   : > { %v11155_v44 = vpop.f32.mrf.mxu1 }
 0xa98   : > { %v11156_v45 = vadd.f32 %v11155_v44, %v11135_v19  ;;  %v11175_v27 = vpop.f32.mrf.mxu2 }
 0xa9a   : > { %v11176_v63 = vadd.f32 %v11175_v27, %v11156_v45 }
 0xa9b   : > { %v11195_v18 = vpop.f32.mrf.mxu3 }
 0xa9c   : > { %v11196_v24 = vadd.f32 %v11195_v18, %v11176_v63 }
 0xa9e   : > { %v11215_v46 = vpop.f32.mrf.mxu0 }
 0xa9f   : > { %v11216_v31 = vadd.f32 %v11215_v46, %v11196_v24 }
 0xaa0   : > { %v11235_v32 = vpop.f32.mrf.mxu1 }
 0xaa1   : > { %v11236_v53 = vadd.f32 %v11235_v32, %v11216_v31 }
 0xaa4   : > { %v11255_v35 = vpop.f32.mrf.mxu2 }
 0xaa5   : > { %v11256_v60 = vadd.f32 %v11255_v35, %v11236_v53 }
 0xaa6   : > { %v11275_v28 = vpop.f32.mrf.mxu3 }
 0xaa7   : > { %v11276_v54 = vadd.f32 %v11275_v28, %v11256_v60 }
 0xaa9   : > { %11279 = vst.msk [vmem:[%s18103_s11] sm:$0xff] %vm11278_vm0, %v11276_v54 }
 0xaaa PF: > { %s14_s21 = sadd.s32 1, %s17345_s21   ;;  %s20981_s15 = smov %s17325_s16 }
 0xaab   : > { %p11_p4 = scmp.ge.s32.totalorder %s14_s21, 10   ;;  %s20982_s16 = smov %s17440_s28 }
 0xaac   : > { %s20983_s17 = smov %s17337_s19  ;;  %s20984_s18 = smov %s17341_s20 }
 0xaad   : > { %s20985_s19 = smov %s20988_s22  ;;  %s20986_s20 = smov %s20992_s23 }
 0xaae   :  { %13 = sbr.rel (!%p11_p4) target bundleno = 4 (0x4), region = 138 }

</bundles_post_ra>
